<compile_context>
chip_gen: v5e
topology: v5e:2x2
jax: 0.10.0
libtpu: 0.0.40
codegen_flags: <defaults>
</compile_context>

<pallas_src>
import functools

import jax
import jax.numpy as jnp
import numpy as np
from jax.experimental import pallas as pl
from jax.experimental.pallas import tpu as pltpu

C1, C2, C3, C4 = 128, 128, 256, 512   # trunk channel widths (fixed by module)


def _relu(x):
    return jnp.maximum(x, 0.0)


def _mm(a, w_ref):
    # bf16 operands, f32 accumulation on the MXU.
    return jnp.dot(a.astype(jnp.bfloat16), w_ref[...],
                   preferred_element_type=jnp.float32)


def _conv1_host(pts2d, w1, b1):
    # First (K=3) layer stays on the host in f32: MXU time scales with M and
    # output tiles (not K), so running it in-kernel wastes a full layer of
    # MXU-slot time, and f32 keeps full precision on raw coordinates.
    return jax.nn.relu(
        jnp.dot(pts2d, w1, preferred_element_type=jnp.float32) + b1)


# ----------------------------------------------------------------------------
# Kernel: one grid step == bb batch elements (bb*N trunk rows, bb*A head rows).
# ----------------------------------------------------------------------------
def _pointnet_kernel(num_anchors, reweight, bb, n_pts,
                     h1_ref, attn_ref,
                     w2, b2, w3, b3, w4, b4,
                     wh1, bh1, wh2, bh2, wh3, bh3,
                     out_ref):
    A = num_anchors

    # Shared trunk conv2..conv4 with folded eval-mode BN (ReLU on 2..3).
    # Intermediates carried in bf16 (halves live VMEM); accumulation in f32.
    h = _relu(_mm(h1_ref[...], w2) + b2[...]).astype(jnp.bfloat16)   # (M, 128)
    h = _relu(_mm(h, w3) + b3[...]).astype(jnp.bfloat16)             # (M, 256)
    feat = _mm(h, w4) + b4[...]                                      # (M, 512) f32

    # Per-anchor weighted max-pool over points, vectorized over the batch
    # block; only the tiny static anchor loop remains.
    scale = float(A) if reweight else 1.0
    attn = attn_ref[...] * scale                                     # (M, A) f32
    parts = []
    for a in range(A):
        w_a = attn[:, a:a + 1]                                       # (M, 1)
        weighted = (feat * w_a).reshape(bb, n_pts, C4)               # (bb, N, 512)
        parts.append(jnp.max(weighted, axis=1))                      # (bb, 512)
    pooled = jnp.stack(parts, axis=1).reshape(bb * A, C4)            # (bb*A, 512)

    # Fused m|v head: one chain over bb*A rows.
    g = _relu(_mm(pooled, wh1) + bh1[...]).astype(jnp.bfloat16)      # (bb*A, 512)
    g = _relu(_mm(g, wh2) + bh2[...]).astype(jnp.bfloat16)           # (bb*A, 256)
    mv = _mm(g, wh3) + bh3[...]                                      # (bb*A, 2*zdim)

    # Single dense, lane-aligned store of the whole block.
    out_ref[...] = mv.reshape(bb, A, mv.shape[-1]).astype(out_ref.dtype)


# ----------------------------------------------------------------------------
# Host-side parameter packing: fuse the m/v heads, cast weights to bf16.
# conv1 params are returned separately (applied on the host in f32).
# ----------------------------------------------------------------------------
def split_and_pack_params(flat):
    (w1, b1, w2, b2, w3, b3, w4, b4,
     wm1, bm1, wm2, bm2, wm3, bm3,
     wv1, bv1, wv2, bv2, wv3, bv3) = flat
    f32, bf = jnp.float32, jnp.bfloat16

    # Fused m|v head:
    #   layer1: [wm1 | wv1]          (512, 512)
    #   layer2: blockdiag(wm2, wv2)  (512, 256)
    #   layer3: blockdiag(wm3, wv3)  (256, 2*zdim)
    def blockdiag(wa, wb):
        out = jnp.zeros((wa.shape[0] + wb.shape[0],
                         wa.shape[1] + wb.shape[1]), f32)
        out = out.at[:wa.shape[0], :wa.shape[1]].set(wa)
        return out.at[wa.shape[0]:, wa.shape[1]:].set(wb)

    wh1 = jnp.concatenate([wm1, wv1], axis=1)
    bh1 = jnp.concatenate([bm1, bv1], axis=1)
    wh2 = blockdiag(wm2, wv2)
    bh2 = jnp.concatenate([bm2, bv2], axis=1)
    wh3 = blockdiag(wm3, wv3)
    bh3 = jnp.concatenate([bm3, bv3], axis=1)

    weights = [w2, w3, w4, wh1, wh2, wh3]
    biases = [b2, b3, b4, bh1, bh2, bh3]
    packed = []
    for w, b in zip(weights, biases):
        packed.extend([w.astype(bf), b.astype(f32)])
    return (w1.astype(f32), b1.astype(f32)), tuple(packed)


# ----------------------------------------------------------------------------
# Generation-aware policy and block selection.
# ----------------------------------------------------------------------------
def _device_policy():
    try:
        kind = jax.devices()[0].device_kind.lower()
    except Exception:
        kind = ""
    if "v7" in kind:
        # v7x: 64 MiB physical VMEM and 2 TensorCores -> keep grid >= 2 so the
        # 'parallel' grid axis can shard across both cores.
        return dict(vmem_cap=48 * 2**20, min_grid=2, max_rows=4096)
    # v5e / v6e: 128 MiB VMEM, single TensorCore -> maximize the batch block.
    return dict(vmem_cap=96 * 2**20, min_grid=1, max_rows=8192)


def _step_act_bytes(bb, n, A, zdim):
    m = bb * n
    return (2 * (m * C1 * 2 + m * A * 4)            # double-buffered inputs
            + m * (C2 + C3) * 2                     # bf16 trunk intermediates
            + 2 * m * C4 * 4                        # feat + weighted temp (f32)
            + 2 * bb * A * 2 * zdim * 4             # double-buffered output
            + bb * A * (3 * C4 + 2 * zdim) * 4)     # pooled + head activations


def _select_bb(B, N, A, zdim, max_rows, min_grid, vmem_cap, param_bytes):
    min_grid = min(min_grid, B)
    best = 1
    for cand in range(1, B + 1):
        if B % cand:
            continue
        if B // cand < min_grid:
            continue
        if cand * N > max_rows:
            continue
        if param_bytes + _step_act_bytes(cand, N, A, zdim) > vmem_cap:
            continue
        best = cand
    return best


def pointnet_v2_vae_forward(x, flat_params, *, num_anchors, zdim,
                            reweight_by_anchor=True, max_rows_per_block=None):
    B, N, C = x.shape
    A = num_anchors
    assert C == 3 + A
    assert N % 8 == 0, "number of points must be a multiple of 8"

    policy = _device_policy()
    max_rows = (max_rows_per_block if max_rows_per_block is not None
                else policy["max_rows"])
    max_rows = max(N, max_rows)

    (w1, b1), kparams = split_and_pack_params(flat_params)
    param_bytes = sum(int(np.prod(a.shape)) * a.dtype.itemsize for a in kparams)

    bb = _select_bb(B, N, A, zdim, max_rows, policy["min_grid"],
                    policy["vmem_cap"], param_bytes)
    grid = B // bb

    # Host-side conv1 (+folded BN1 + ReLU) in f32; bf16 activation for the kernel.
    xf = x.astype(jnp.float32)
    pts2d = xf[..., :3].reshape(B * N, 3)
    attn2d = xf[..., 3:].reshape(B * N, A)
    h1 = _conv1_host(pts2d, w1, b1).astype(jnp.bfloat16)       # (B*N, 128)

    def const_spec(arr):
        # Grid-invariant parameter: same block every step (no re-DMA).
        return pl.BlockSpec(arr.shape, lambda i, nd=arr.ndim: (0,) * nd)

    in_specs = [pl.BlockSpec((bb * N, C1), lambda i: (i, 0)),
                pl.BlockSpec((bb * N, A), lambda i: (i, 0))]
    in_specs += [const_spec(a) for a in kparams]
    out_spec = pl.BlockSpec((bb, A, 2 * zdim), lambda i: (i, 0, 0))

    kernel = functools.partial(_pointnet_kernel, A, reweight_by_anchor, bb, N)

    # Tightened VMEM request: params counted once (constant index maps) +
    # peak-liveness activation estimate, floored at the 32 MiB default scope
    # and capped per generation.
    vmem_budget = int(min(policy["vmem_cap"],
                          max(32 * 2**20,
                              param_bytes + 2 * _step_act_bytes(bb, N, A, zdim))))

    # Note: for very large point clouds where even bb=1 exceeds the VMEM cap,
    # an additional N-chunking 'arbitrary' grid axis with a running-max
    # accumulator would keep VMEM flat; not needed at these sizes.
    mv = pl.pallas_call(
        kernel,
        out_shape=jax.ShapeDtypeStruct((B, A, 2 * zdim), jnp.float32),
        grid=(grid,),
        in_specs=in_specs,
        out_specs=out_spec,
        compiler_params=pltpu.CompilerParams(
            dimension_semantics=("parallel",),
            vmem_limit_bytes=vmem_budget),
    )(h1, attn2d, *kparams)

    m = mv[..., :zdim]
    v = mv[..., zdim:]
    return m, v


# ----------------------------------------------------------------------------
# Deterministic synthetic parameters (eval-mode BN folded into conv weights).
# ----------------------------------------------------------------------------
def make_params(key, *, zdim, num_anchors, point_dim=3):
    def linear(k, cin, cout):
        kw, kb = jax.random.split(k)
        w = jax.random.normal(kw, (cin, cout), jnp.float32) / jnp.sqrt(cin)
        b = 0.1 * jax.random.normal(kb, (cout,), jnp.float32)
        return w, b

    def bn_stats(k, c):
        kg, kb, km, kv = jax.random.split(k, 4)
        gamma = 1.0 + 0.1 * jax.random.normal(kg, (c,), jnp.float32)
        beta = 0.1 * jax.random.normal(kb, (c,), jnp.float32)
        rm = 0.1 * jax.random.normal(km, (c,), jnp.float32)
        rv = 0.5 + 0.5 * jnp.abs(jax.random.normal(kv, (c,), jnp.float32))
        return gamma, beta, rm, rv

    def fold_bn(w, b, gamma, beta, rm, rv, eps=1e-5):
        s = gamma / jnp.sqrt(rv + eps)
        return w * s[None, :], (b - rm) * s + beta

    keys = iter(jax.random.split(key, 32))
    flat = []

    def conv_bn(cin, cout):
        w, b = linear(next(keys), cin, cout)
        w, b = fold_bn(w, b, *bn_stats(next(keys), cout))
        flat.extend([w, b.reshape(1, cout)])

    def conv_plain(cin, cout):
        w, b = linear(next(keys), cin, cout)
        flat.extend([w, b.reshape(1, cout)])

    # trunk: conv1..conv4 (each followed by BN in the module)
    conv_bn(point_dim, C1)
    conv_bn(C1, C2)
    conv_bn(C2, C3)
    conv_bn(C3, C4)
    # mlp_m: Conv(512,256)+BN, Conv(256,128)+BN, Conv(128,zdim)
    conv_bn(C4, 256)
    conv_bn(256, 128)
    conv_plain(128, zdim)
    # mlp_v: same structure
    conv_bn(C4, 256)
    conv_bn(256, 128)
    conv_plain(128, zdim)
    return tuple(flat)


# ----------------------------------------------------------------------------
# Pure-JAX reference (unfused layout).  Mirrors the kernel's precision policy:
# conv1 in f32, remaining matmuls with bf16 operands / f32 accumulation.
# ----------------------------------------------------------------------------
def reference_forward(x, flat, *, num_anchors, reweight_by_anchor=True):
    (w1, b1, w2, b2, w3, b3, w4, b4,
     wm1, bm1, wm2, bm2, wm3, bm3,
     wv1, bv1, wv2, bv2, wv3, bv3) = flat
    B, N, _ = x.shape
    pts = x[..., :3].astype(jnp.float32)
    attn = x[..., 3:].astype(jnp.float32)

    def dot(a, w):
        return jnp.einsum('bnc,cd->bnd', a.astype(jnp.bfloat16),
                          w.astype(jnp.bfloat16),
                          preferred_element_type=jnp.float32)

    h = _conv1_host(pts.reshape(B * N, 3), w1, b1).reshape(B, N, C1)
    h = jax.nn.relu(dot(h, w2) + b2)
    h = jax.nn.relu(dot(h, w3) + b3)
    feat = dot(h, w4) + b4                                   # (B, N, 512)

    scale = float(num_anchors) if reweight_by_anchor else 1.0
    weighted = feat[:, :, None, :] * attn[:, :, :, None] * scale  # (B,N,A,512)
    pooled = jnp.max(weighted, axis=1)                       # (B, A, 512)

    def head(p, wa, ba, wb, bb_, wc, bc):
        h_ = jax.nn.relu(dot(p, wa) + ba)
        h_ = jax.nn.relu(dot(h_, wb) + bb_)
        return dot(h_, wc) + bc

    m = head(pooled, wm1, bm1, wm2, bm2, wm3, bm3)
    v = head(pooled, wv1, bv1, wv2, bv2, wv3, bv3)
    return m, v


if __name__ == "__main__":
    B, N, A, ZDIM = 4, 128, 4, 128
    key = jax.random.PRNGKey(0)
    kx, kp = jax.random.split(key)
    x = jax.random.normal(kx, (B, N, 3 + A), jnp.float32)
    params = make_params(kp, zdim=ZDIM, num_anchors=A)

    # max_rows_per_block=256 -> batch block bb=2, grid=(2,): exercises the
    # multi-step pipeline (and both v7x TensorCores) at these small demo shapes.
    m, v = pointnet_v2_vae_forward(x, params, num_anchors=A, zdim=ZDIM,
                                   max_rows_per_block=256)
    jax.block_until_ready((m, v))

    m_ref, v_ref = reference_forward(x, params, num_anchors=A)
    # Tolerance accounts for bf16-operand matmuls (f32 accumulate) and the
    # slightly different accumulation order of the fused kernel layout.
    np.testing.assert_allclose(np.asarray(m), np.asarray(m_ref),
                               rtol=2e-2, atol=2e-2)
    np.testing.assert_allclose(np.asarray(v), np.asarray(v_ref),
                               rtol=2e-2, atol=2e-2)
    print("KERNEL_OK")
</pallas_src>

<mosaic_0001>
module attributes {stable_mosaic.version = 11 : i64} {
  func.func @_pointnet_kernel(%arg0: i32, %arg1: memref<256x128xbf16, #tpu.memory_space<vmem>>, %arg2: memref<256x4xf32, #tpu.memory_space<vmem>>, %arg3: memref<128x128xbf16, #tpu.memory_space<vmem>>, %arg4: memref<1x128xf32, #tpu.memory_space<vmem>>, %arg5: memref<128x256xbf16, #tpu.memory_space<vmem>>, %arg6: memref<1x256xf32, #tpu.memory_space<vmem>>, %arg7: memref<256x512xbf16, #tpu.memory_space<vmem>>, %arg8: memref<1x512xf32, #tpu.memory_space<vmem>>, %arg9: memref<512x512xbf16, #tpu.memory_space<vmem>>, %arg10: memref<1x512xf32, #tpu.memory_space<vmem>>, %arg11: memref<512x256xbf16, #tpu.memory_space<vmem>>, %arg12: memref<1x256xf32, #tpu.memory_space<vmem>>, %arg13: memref<256x256xbf16, #tpu.memory_space<vmem>>, %arg14: memref<1x256xf32, #tpu.memory_space<vmem>>, %arg15: memref<2x4x256xf32, #tpu.memory_space<vmem>>) attributes {dimension_semantics = [#tpu.dimension_semantics<parallel>], iteration_bounds = array<i64: 2>, scalar_prefetch = 0 : i64, scratch_operands = 0 : i64, tpu.core_type = #tpu.core_type<tc>, window_params = [{transform_indices = @transform_0, window_bounds = array<i64: 256, 128>}, {transform_indices = @transform_1, window_bounds = array<i64: 256, 4>}, {pipeline_mode = #tpu.pipeline_mode<synchronous>, transform_indices = @transform_2, window_bounds = array<i64: 128, 128>}, {pipeline_mode = #tpu.pipeline_mode<synchronous>, transform_indices = @transform_3, window_bounds = array<i64: 1, 128>}, {pipeline_mode = #tpu.pipeline_mode<synchronous>, transform_indices = @transform_4, window_bounds = array<i64: 128, 256>}, {pipeline_mode = #tpu.pipeline_mode<synchronous>, transform_indices = @transform_5, window_bounds = array<i64: 1, 256>}, {pipeline_mode = #tpu.pipeline_mode<synchronous>, transform_indices = @transform_6, window_bounds = array<i64: 256, 512>}, {pipeline_mode = #tpu.pipeline_mode<synchronous>, transform_indices = @transform_7, window_bounds = array<i64: 1, 512>}, {pipeline_mode = #tpu.pipeline_mode<synchronous>, transform_indices = @transform_8, window_bounds = array<i64: 512, 512>}, {pipeline_mode = #tpu.pipeline_mode<synchronous>, transform_indices = @transform_9, window_bounds = array<i64: 1, 512>}, {pipeline_mode = #tpu.pipeline_mode<synchronous>, transform_indices = @transform_10, window_bounds = array<i64: 512, 256>}, {pipeline_mode = #tpu.pipeline_mode<synchronous>, transform_indices = @transform_11, window_bounds = array<i64: 1, 256>}, {pipeline_mode = #tpu.pipeline_mode<synchronous>, transform_indices = @transform_12, window_bounds = array<i64: 256, 256>}, {pipeline_mode = #tpu.pipeline_mode<synchronous>, transform_indices = @transform_13, window_bounds = array<i64: 1, 256>}, {transform_indices = @transform_14, window_bounds = array<i64: 2, 4, 256>}]} {
    %c0 = arith.constant 0 : index
    %c0_0 = arith.constant 0 : index
    %0 = vector.load %arg1[%c0, %c0_0] : memref<256x128xbf16, #tpu.memory_space<vmem>>, vector<256x128xbf16>
    %c0_1 = arith.constant 0 : index
    %c0_2 = arith.constant 0 : index
    %1 = vector.load %arg3[%c0_1, %c0_2] : memref<128x128xbf16, #tpu.memory_space<vmem>>, vector<128x128xbf16>
    %cst = arith.constant dense<0.000000e+00> : vector<256x128xf32>
    %2 = tpu.matmul %0, %1, %cst {dimension_numbers = #tpu.dot_dimension_numbers<[1], [0], [0], [1], [0, 0, 1, 1], [], []>} : vector<256x128xbf16>, vector<128x128xbf16>, vector<256x128xf32> -> vector<256x128xf32>
    %c0_3 = arith.constant 0 : index
    %c0_4 = arith.constant 0 : index
    %3 = vector.load %arg4[%c0_3, %c0_4] : memref<1x128xf32, #tpu.memory_space<vmem>>, vector<1x128xf32>
    %4 = vector.broadcast %3 : vector<1x128xf32> to vector<256x128xf32>
    %5 = arith.addf %2, %4 : vector<256x128xf32>
    %cst_5 = arith.constant 0.000000e+00 : f32
    %6 = vector.broadcast %cst_5 : f32 to vector<256x128xf32>
    %7 = arith.maximumf %5, %6 : vector<256x128xf32>
    %8 = arith.truncf %7 : vector<256x128xf32> to vector<256x128xbf16>
    %c0_6 = arith.constant 0 : index
    %c0_7 = arith.constant 0 : index
    %9 = vector.load %arg5[%c0_6, %c0_7] : memref<128x256xbf16, #tpu.memory_space<vmem>>, vector<128x256xbf16>
    %cst_8 = arith.constant dense<0.000000e+00> : vector<256x256xf32>
    %10 = tpu.matmul %8, %9, %cst_8 {dimension_numbers = #tpu.dot_dimension_numbers<[1], [0], [0], [1], [0, 0, 1, 1], [], []>} : vector<256x128xbf16>, vector<128x256xbf16>, vector<256x256xf32> -> vector<256x256xf32>
    %c0_9 = arith.constant 0 : index
    %c0_10 = arith.constant 0 : index
    %11 = vector.load %arg6[%c0_9, %c0_10] : memref<1x256xf32, #tpu.memory_space<vmem>>, vector<1x256xf32>
    %12 = vector.broadcast %11 : vector<1x256xf32> to vector<256x256xf32>
    %13 = arith.addf %10, %12 : vector<256x256xf32>
    %cst_11 = arith.constant 0.000000e+00 : f32
    %14 = vector.broadcast %cst_11 : f32 to vector<256x256xf32>
    %15 = arith.maximumf %13, %14 : vector<256x256xf32>
    %16 = arith.truncf %15 : vector<256x256xf32> to vector<256x256xbf16>
    %c0_12 = arith.constant 0 : index
    %c0_13 = arith.constant 0 : index
    %17 = vector.load %arg7[%c0_12, %c0_13] : memref<256x512xbf16, #tpu.memory_space<vmem>>, vector<256x512xbf16>
    %cst_14 = arith.constant dense<0.000000e+00> : vector<256x512xf32>
    %18 = tpu.matmul %16, %17, %cst_14 {dimension_numbers = #tpu.dot_dimension_numbers<[1], [0], [0], [1], [0, 0, 1, 1], [], []>} : vector<256x256xbf16>, vector<256x512xbf16>, vector<256x512xf32> -> vector<256x512xf32>
    %c0_15 = arith.constant 0 : index
    %c0_16 = arith.constant 0 : index
    %19 = vector.load %arg8[%c0_15, %c0_16] : memref<1x512xf32, #tpu.memory_space<vmem>>, vector<1x512xf32>
    %20 = vector.broadcast %19 : vector<1x512xf32> to vector<256x512xf32>
    %21 = arith.addf %18, %20 : vector<256x512xf32>
    %c0_17 = arith.constant 0 : index
    %c0_18 = arith.constant 0 : index
    %22 = vector.load %arg2[%c0_17, %c0_18] : memref<256x4xf32, #tpu.memory_space<vmem>>, vector<256x4xf32>
    %cst_19 = arith.constant 4.000000e+00 : f32
    %23 = vector.broadcast %cst_19 : f32 to vector<256x4xf32>
    %24 = arith.mulf %22, %23 : vector<256x4xf32>
    %25 = vector.extract_strided_slice %24 {offsets = [0, 0], sizes = [256, 1], strides = [1, 1]} : vector<256x4xf32> to vector<256x1xf32>
    %26 = vector.broadcast %25 : vector<256x1xf32> to vector<256x512xf32>
    %27 = arith.mulf %21, %26 : vector<256x512xf32>
    %28 = vector.shape_cast %27 : vector<256x512xf32> to vector<2x128x512xf32>
    %cst_20 = arith.constant dense<0xFF800000> : vector<2x512xf32>
    %29 = vector.multi_reduction <maximumf>, %28, %cst_20 [1] : vector<2x128x512xf32> to vector<2x512xf32>
    %30 = vector.extract_strided_slice %24 {offsets = [0, 1], sizes = [256, 1], strides = [1, 1]} : vector<256x4xf32> to vector<256x1xf32>
    %31 = vector.broadcast %30 : vector<256x1xf32> to vector<256x512xf32>
    %32 = arith.mulf %21, %31 : vector<256x512xf32>
    %33 = vector.shape_cast %32 : vector<256x512xf32> to vector<2x128x512xf32>
    %cst_21 = arith.constant dense<0xFF800000> : vector<2x512xf32>
    %34 = vector.multi_reduction <maximumf>, %33, %cst_21 [1] : vector<2x128x512xf32> to vector<2x512xf32>
    %35 = vector.extract_strided_slice %24 {offsets = [0, 2], sizes = [256, 1], strides = [1, 1]} : vector<256x4xf32> to vector<256x1xf32>
    %36 = vector.broadcast %35 : vector<256x1xf32> to vector<256x512xf32>
    %37 = arith.mulf %21, %36 : vector<256x512xf32>
    %38 = vector.shape_cast %37 : vector<256x512xf32> to vector<2x128x512xf32>
    %cst_22 = arith.constant dense<0xFF800000> : vector<2x512xf32>
    %39 = vector.multi_reduction <maximumf>, %38, %cst_22 [1] : vector<2x128x512xf32> to vector<2x512xf32>
    %40 = vector.extract_strided_slice %24 {offsets = [0, 3], sizes = [256, 1], strides = [1, 1]} : vector<256x4xf32> to vector<256x1xf32>
    %41 = vector.broadcast %40 : vector<256x1xf32> to vector<256x512xf32>
    %42 = arith.mulf %21, %41 : vector<256x512xf32>
    %43 = vector.shape_cast %42 : vector<256x512xf32> to vector<2x128x512xf32>
    %cst_23 = arith.constant dense<0xFF800000> : vector<2x512xf32>
    %44 = vector.multi_reduction <maximumf>, %43, %cst_23 [1] : vector<2x128x512xf32> to vector<2x512xf32>
    %45 = vector.shape_cast %29 : vector<2x512xf32> to vector<2x1x512xf32>
    %46 = vector.shape_cast %34 : vector<2x512xf32> to vector<2x1x512xf32>
    %47 = vector.shape_cast %39 : vector<2x512xf32> to vector<2x1x512xf32>
    %48 = vector.shape_cast %44 : vector<2x512xf32> to vector<2x1x512xf32>
    %49 = tpu.concatenate %45, %46, %47, %48 in 1 : vector<2x1x512xf32>, vector<2x1x512xf32>, vector<2x1x512xf32>, vector<2x1x512xf32> -> vector<2x4x512xf32>
    %50 = vector.shape_cast %49 : vector<2x4x512xf32> to vector<8x512xf32>
    %51 = arith.truncf %50 : vector<8x512xf32> to vector<8x512xbf16>
    %c0_24 = arith.constant 0 : index
    %c0_25 = arith.constant 0 : index
    %52 = vector.load %arg9[%c0_24, %c0_25] : memref<512x512xbf16, #tpu.memory_space<vmem>>, vector<512x512xbf16>
    %cst_26 = arith.constant dense<0.000000e+00> : vector<8x512xf32>
    %53 = tpu.matmul %51, %52, %cst_26 {dimension_numbers = #tpu.dot_dimension_numbers<[1], [0], [0], [1], [0, 0, 1, 1], [], []>} : vector<8x512xbf16>, vector<512x512xbf16>, vector<8x512xf32> -> vector<8x512xf32>
    %c0_27 = arith.constant 0 : index
    %c0_28 = arith.constant 0 : index
    %54 = vector.load %arg10[%c0_27, %c0_28] : memref<1x512xf32, #tpu.memory_space<vmem>>, vector<1x512xf32>
    %55 = vector.broadcast %54 : vector<1x512xf32> to vector<8x512xf32>
    %56 = arith.addf %53, %55 : vector<8x512xf32>
    %cst_29 = arith.constant 0.000000e+00 : f32
    %57 = vector.broadcast %cst_29 : f32 to vector<8x512xf32>
    %58 = arith.maximumf %56, %57 : vector<8x512xf32>
    %59 = arith.truncf %58 : vector<8x512xf32> to vector<8x512xbf16>
    %c0_30 = arith.constant 0 : index
    %c0_31 = arith.constant 0 : index
    %60 = vector.load %arg11[%c0_30, %c0_31] : memref<512x256xbf16, #tpu.memory_space<vmem>>, vector<512x256xbf16>
    %cst_32 = arith.constant dense<0.000000e+00> : vector<8x256xf32>
    %61 = tpu.matmul %59, %60, %cst_32 {dimension_numbers = #tpu.dot_dimension_numbers<[1], [0], [0], [1], [0, 0, 1, 1], [], []>} : vector<8x512xbf16>, vector<512x256xbf16>, vector<8x256xf32> -> vector<8x256xf32>
    %c0_33 = arith.constant 0 : index
    %c0_34 = arith.constant 0 : index
    %62 = vector.load %arg12[%c0_33, %c0_34] : memref<1x256xf32, #tpu.memory_space<vmem>>, vector<1x256xf32>
    %63 = vector.broadcast %62 : vector<1x256xf32> to vector<8x256xf32>
    %64 = arith.addf %61, %63 : vector<8x256xf32>
    %cst_35 = arith.constant 0.000000e+00 : f32
    %65 = vector.broadcast %cst_35 : f32 to vector<8x256xf32>
    %66 = arith.maximumf %64, %65 : vector<8x256xf32>
    %67 = arith.truncf %66 : vector<8x256xf32> to vector<8x256xbf16>
    %c0_36 = arith.constant 0 : index
    %c0_37 = arith.constant 0 : index
    %68 = vector.load %arg13[%c0_36, %c0_37] : memref<256x256xbf16, #tpu.memory_space<vmem>>, vector<256x256xbf16>
    %cst_38 = arith.constant dense<0.000000e+00> : vector<8x256xf32>
    %69 = tpu.matmul %67, %68, %cst_38 {dimension_numbers = #tpu.dot_dimension_numbers<[1], [0], [0], [1], [0, 0, 1, 1], [], []>} : vector<8x256xbf16>, vector<256x256xbf16>, vector<8x256xf32> -> vector<8x256xf32>
    %c0_39 = arith.constant 0 : index
    %c0_40 = arith.constant 0 : index
    %70 = vector.load %arg14[%c0_39, %c0_40] : memref<1x256xf32, #tpu.memory_space<vmem>>, vector<1x256xf32>
    %71 = vector.broadcast %70 : vector<1x256xf32> to vector<8x256xf32>
    %72 = arith.addf %69, %71 : vector<8x256xf32>
    %73 = vector.shape_cast %72 : vector<8x256xf32> to vector<2x4x256xf32>
    %c0_41 = arith.constant 0 : index
    %c0_42 = arith.constant 0 : index
    %c0_43 = arith.constant 0 : index
    %74 = vector.load %arg15[%c0_41, %c0_42, %c0_43] : memref<2x4x256xf32, #tpu.memory_space<vmem>>, vector<2x4x256xf32>
    tpu.vector_store %arg15[%c0_41, %c0_42, %c0_43], %73 {strides = array<i32>} : memref<2x4x256xf32, #tpu.memory_space<vmem>>, vector<2x4x256xf32>,
    return
  }
  func.func @transform_0(%arg0: i32) -> (i32, i32) {
    %c0_i32 = arith.constant 0 : i32
    %c0_i32_0 = arith.constant 0 : i32
    return %arg0, %c0_i32 : i32, i32
  }
  func.func @transform_1(%arg0: i32) -> (i32, i32) {
    %c0_i32 = arith.constant 0 : i32
    %c0_i32_0 = arith.constant 0 : i32
    return %arg0, %c0_i32 : i32, i32
  }
  func.func @transform_2(%arg0: i32) -> (i32, i32) {
    %c0_i32 = arith.constant 0 : i32
    %c0_i32_0 = arith.constant 0 : i32
    %c0_i32_1 = arith.constant 0 : i32
    return %c0_i32, %c0_i32_0 : i32, i32
  }
  func.func @transform_3(%arg0: i32) -> (i32, i32) {
    %c0_i32 = arith.constant 0 : i32
    %c0_i32_0 = arith.constant 0 : i32
    %c0_i32_1 = arith.constant 0 : i32
    return %c0_i32, %c0_i32_0 : i32, i32
  }
  func.func @transform_4(%arg0: i32) -> (i32, i32) {
    %c0_i32 = arith.constant 0 : i32
    %c0_i32_0 = arith.constant 0 : i32
    %c0_i32_1 = arith.constant 0 : i32
    return %c0_i32, %c0_i32_0 : i32, i32
  }
  func.func @transform_5(%arg0: i32) -> (i32, i32) {
    %c0_i32 = arith.constant 0 : i32
    %c0_i32_0 = arith.constant 0 : i32
    %c0_i32_1 = arith.constant 0 : i32
    return %c0_i32, %c0_i32_0 : i32, i32
  }
  func.func @transform_6(%arg0: i32) -> (i32, i32) {
    %c0_i32 = arith.constant 0 : i32
    %c0_i32_0 = arith.constant 0 : i32
    %c0_i32_1 = arith.constant 0 : i32
    return %c0_i32, %c0_i32_0 : i32, i32
  }
  func.func @transform_7(%arg0: i32) -> (i32, i32) {
    %c0_i32 = arith.constant 0 : i32
    %c0_i32_0 = arith.constant 0 : i32
    %c0_i32_1 = arith.constant 0 : i32
    return %c0_i32, %c0_i32_0 : i32, i32
  }
  func.func @transform_8(%arg0: i32) -> (i32, i32) {
    %c0_i32 = arith.constant 0 : i32
    %c0_i32_0 = arith.constant 0 : i32
    %c0_i32_1 = arith.constant 0 : i32
    return %c0_i32, %c0_i32_0 : i32, i32
  }
  func.func @transform_9(%arg0: i32) -> (i32, i32) {
    %c0_i32 = arith.constant 0 : i32
    %c0_i32_0 = arith.constant 0 : i32
    %c0_i32_1 = arith.constant 0 : i32
    return %c0_i32, %c0_i32_0 : i32, i32
  }
  func.func @transform_10(%arg0: i32) -> (i32, i32) {
    %c0_i32 = arith.constant 0 : i32
    %c0_i32_0 = arith.constant 0 : i32
    %c0_i32_1 = arith.constant 0 : i32
    return %c0_i32, %c0_i32_0 : i32, i32
  }
  func.func @transform_11(%arg0: i32) -> (i32, i32) {
    %c0_i32 = arith.constant 0 : i32
    %c0_i32_0 = arith.constant 0 : i32
    %c0_i32_1 = arith.constant 0 : i32
    return %c0_i32, %c0_i32_0 : i32, i32
  }
  func.func @transform_12(%arg0: i32) -> (i32, i32) {
    %c0_i32 = arith.constant 0 : i32
    %c0_i32_0 = arith.constant 0 : i32
    %c0_i32_1 = arith.constant 0 : i32
    return %c0_i32, %c0_i32_0 : i32, i32
  }
  func.func @transform_13(%arg0: i32) -> (i32, i32) {
    %c0_i32 = arith.constant 0 : i32
    %c0_i32_0 = arith.constant 0 : i32
    %c0_i32_1 = arith.constant 0 : i32
    return %c0_i32, %c0_i32_0 : i32, i32
  }
  func.func @transform_14(%arg0: i32) -> (i32, i32, i32) {
    %c0_i32 = arith.constant 0 : i32
    %c0_i32_0 = arith.constant 0 : i32
    %c0_i32_1 = arith.constant 0 : i32
    return %arg0, %c0_i32, %c0_i32_0 : i32, i32, i32
  }
}

</mosaic_0001>

<bundles_post_ra>
// kernel: tpu_custom_call.1
= control target key start
LH: loop header
LB: loop body
LE: loop exit
PB: predicated region body
PF: predicated region fallthrough
CT: control target
= control target key end

     0   :  { %s11131_s0 = inlined_call_operand.hbm [shape: bf16[512,128], index: 0, kind: input, shape index: {}]   ;;  %s11132_s1 = inlined_call_operand.vmem [shape: f32[512,4], index: 1, kind: input, shape index: {}]   ;;  %s11133_s2 = inlined_call_operand.hbm [shape: bf16[128,128], index: 2, kind: input, shape index: {}]   ;;  %s11134_s3 = inlined_call_operand.vmem [shape: f32[1,128], index: 3, kind: input, shape index: {}]   ;;  %s11135_s4 = inlined_call_operand.hbm [shape: bf16[128,256], index: 4, kind: input, shape index: {}]   ;;  %s11136_s5 = inlined_call_operand.vmem [shape: f32[1,256], index: 5, kind: input, shape index: {}]   ;;  %s11137_s6 = inlined_call_operand.vmem [shape: bf16[256,512], index: 6, kind: input, shape index: {}]   ;;  %s11138_s7 = inlined_call_operand.vmem [shape: f32[1,512], index: 7, kind: input, shape index: {}]   ;;  %s11139_s8 = inlined_call_operand.hbm [shape: bf16[512,512], index: 8, kind: input, shape index: {}]   ;;  %s11140_s9 = inlined_call_operand.vmem [shape: f32[1,512], index: 9, kind: input, shape index: {}]   ;;  %s11141_s10 = inlined_call_operand.hbm [shape: bf16[512,256], index: 10, kind: input, shape index: {}]   ;;  %s11142_s11 = inlined_call_operand.vmem [shape: f32[1,256], index: 11, kind: input, shape index: {}]   ;;  %s11143_s12 = inlined_call_operand.hbm [shape: bf16[256,256], index: 12, kind: input, shape index: {}]   ;;  %s11144_s13 = inlined_call_operand.vmem [shape: f32[1,256], index: 13, kind: input, shape index: {}]   ;;  %s11145_s14 = inlined_call_operand.hbm [shape: f32[4,4,256], index: 14, kind: output, shape index: {}]  }
   0x1   :  { %11426 = sst [smem:[#allocation176_spill]] %s11133_s2 }
   0x2   :  { %11427 = sst [smem:[#allocation177_spill]] %s11135_s4 }
   0x3   :  { %11428 = sst [smem:[#allocation178_spill]] %s11139_s8 }
   0x4   :  { %11429 = sst [smem:[#allocation179_spill]] %s11140_s9 }
   0x5   :  { %11430 = sst [smem:[#allocation180_spill]] %s11141_s10 }
   0x6   :  { %11431 = sst [smem:[#allocation181_spill]] %s11142_s11 }
   0x7   :  { %11432 = sst [smem:[#allocation182_spill]] %s11144_s13 }
   0x8   :  { %11433 = sst [smem:[#allocation183_spill]] %s11145_s14 }
   0x9   :  { %19 = vsyncpa [#allocation3], 0 }
   0xa   :  { %21 = vsyncpa [#allocation3 + $0x1], 0 }
   0xb   :  { %22 = vsyncpa [#allocation6], 0 }
   0xc   :  { %23 = vsyncpa [#allocation9], 0 }
   0xd   :  { %24 = vsyncpa [#allocation12], 0 }
   0xe   :  { %25 = vsyncpa [#allocation4], 0 }
   0xf   :  { %27 = vsyncpa [#allocation4 + $0x1], 0  ;;  %s8392_s29 = smov 0   ;;  %s8394_s30 = smov 0  }
  0x10   :  { %s8396_s15 = smov 0   ;;  %s8398_s16 = smov 0  }
  0x11 LB: > { %s11434_s2 = sld [smem:[#allocation176_spill]]  ;;  %s8416_s20 = sadd.s32 4294967295, %s8298_s16   ;;  %s8298_s16 = sphi %s8398_s16, %s12093_s16   ;;  %s8294_s15 = sphi %s8396_s15, %s12092_s15   ;;  %s8290_s30 = sphi %s8394_s30, %s12091_s30   ;;  %s8286_s29 = sphi %s8392_s29, %s12090_s29  }
  0x12   : > { %p6168_p0 = scmp.ge.s32.totalorder %s8298_s16, 1  ;;  %p54_p1 = scmp.eq.s32.totalorder %s8416_s20, 0 }
  0x13   : > { %p368_p2 = scmp.lt.s32.totalorder %s8298_s16, 3  ;;  %s8300_s22 = smov [#allocation5]  }
  0x14   : > { %s381_s23 = sshll.u32 %s8300_s22, 4  ;;  %s11436_s8 = sld [smem:[#allocation178_spill]]  ;;  %s382_s23 = int_to_ptr.vmem [resolvable:$true] %s381_s23 }
  0x15   : > { %p8421_p3 = pnand %p6168_p0, %p368_p2  ;;  %s8301_s28 = smov [#allocation8]  }
  0x16   : > { %s421_s17 = sshll.u32 %s8301_s28, 4  ;;  %s11148_s18 = smov 64   ;;  %s422_s17 = int_to_ptr.vmem [resolvable:$true] %s421_s17 }
  0x17   : > { %s379_s19 = sshll.u32 %s11434_s2, 4  ;;  %p7861_p4 = pneg %p8421_p3  ;;  %s380_s19 = int_to_ptr.hbm [resolvable:$true] %s379_s19 }
  0x18   : > { %s11149_s22 = smov 4   ;;  %s8304_s24 = smov 256  }
  0x19   : > { %p8433_p6 = pnand %p7861_p4, %p54_p1  ;;  %s8305_s25 = smov 16  }
  0x1a   : > { %s419_s26 = sshll.u32 %s11436_s8, 4  ;;  %s11438_s4 = sld [smem:[#allocation177_spill]]  ;;  %s420_s26 = int_to_ptr.hbm [resolvable:$true] %s419_s26 }
  0x1b   : > { %7864 = dma.hbm_to_vmem [thread:$0]  (!%p8433_p6), %s380_s19, 1024, %s382_s23, [#allocation6], %s11148_s18, %s11148_s18, %s11149_s22  }
  0x1c   : > { %7870 = dma.hbm_to_vmem [thread:$0]  (!%p8433_p6), %s420_s26, 16384, %s422_s17, [#allocation9], %s8304_s24, %s8304_s24, %s8305_s25  }
  0x1d   : > { %s8306_s28 = smov [#allocation7]   ;;  %s11439_s10 = sld [smem:[#allocation180_spill]] }
  0x1e   : > { %s398_s13 = sshll.u32 %s8306_s28, 4  ;;  %s8307_s23 = smov 128   ;;  %s399_s13 = int_to_ptr.vmem [resolvable:$true] %s398_s13 }
  0x1f   : > { %s8308_s18 = smov 8   ;;  %s8309_s2 = smov [#allocation10]  }
  0x20   : > { %s396_s14 = sshll.u32 %s11438_s4, 4  ;;  %s438_s8 = sshll.u32 %s8309_s2, 4  ;;  %s397_s14 = int_to_ptr.hbm [resolvable:$true] %s396_s14  ;;  %s439_s8 = int_to_ptr.vmem [resolvable:$true] %s438_s8 }
  0x21   : > { %7867 = dma.hbm_to_vmem [thread:$0]  (!%p8433_p6), %s397_s14, 2048, %s399_s13, [#allocation6], %s8307_s23, %s8307_s23, %s8308_s18  }
  0x22   : > { %s453_s9 = sshll.u32 %s11143_s12, 4  ;;  %s8310_s11 = smov [#allocation11]   ;;  %s454_s9 = int_to_ptr.hbm [resolvable:$true] %s453_s9 }
  0x23   : > { %s436_s19 = sshll.u32 %s11439_s10, 4  ;;  %s455_s13 = sshll.u32 %s8310_s11, 4  ;;  %s437_s19 = int_to_ptr.hbm [resolvable:$true] %s436_s19  ;;  %s456_s13 = int_to_ptr.vmem [resolvable:$true] %s455_s13 }
  0x24   : > { %7873 = dma.hbm_to_vmem [thread:$0]  (!%p8433_p6), %s437_s19, 8192, %s439_s8, [#allocation9], %s8307_s23, %s8307_s23, %s8308_s18  }
  0x25   : > { %7876 = dma.hbm_to_vmem [thread:$0]  (!%p8433_p6), %s454_s9, 4096, %s456_s13, [#allocation12], %s8307_s23, %s8307_s23, %s8308_s18  }
  0x26   : > { %s6167_s14 = sadd.s32 4294967294, %s8298_s16   ;;  %s8461_s24 = sadd.s32 1, %s8298_s16  }
  0x27   : > { %s40_s25 = sadd.s32 1, %s8294_s15  ;;  %s37_s28 = ssub.s32 %s8298_s16, %s8461_s24 }
  0x28   : > { %p47_p7 = scmp.ne.s32.totalorder %s8294_s15, %s8290_s30  ;;  %p38_p8 = scmp.eq.s32.totalorder %s37_s28, 0 }
  0x29   : > { %p48_p9 = scmp.eq.s32.totalorder %s8298_s16, 0  ;;  %p53_p10 = scmp.ne.s32.totalorder %s8290_s30, %s8286_s29 }
  0x2a   : > { %p355_p11 = scmp.eq.s32.totalorder %s8416_s20, 1  ;;  %p361_p0 = scmp.eq.s32.totalorder %s6167_s14, 1 }
  0x2b   : > { %s8473_s19 = scalar_select %p38_p8, %s8294_s15, %s40_s25  }
  0x2c   : > { %p8477_p12 = por %p54_p1, %p53_p10  ;;  %p8481_p13 = por %p355_p11, %p47_p7 }
  0x2d   : > { %p49_p2 = por %p48_p9, %p47_p7  ;;  %s472_s23 = sand.u32 1, %s8294_s15  }
  0x2e   : > { %p8486_p4 = por %p361_p0, %p53_p10  ;;  %p7890_p6 = scmp.lt.s32.totalorder %s8298_s16, 2 }
  0x2f   : > { %s6175_s8 = sshll.u32 %s472_s23, 7  ;;  %s7506_s26 = sshll.u32 %s8298_s16, 7 }
  0x30   : > { %s481_s11 = scalar_lea.hbm %s11131_s0, %s7506_s26  ;;  %s476_s25 = scalar_lea.vmem [#allocation2], %s6175_s8 }
  0x31   : > { %s482_s13 = sshll.u32 %s481_s11, 4  ;;  %s484_s28 = sshll.u32 %s476_s25, 4  ;;  %s483_s13 = int_to_ptr.hbm [resolvable:$true] %s482_s13  ;;  %s485_s28 = int_to_ptr.vmem [resolvable:$true] %s484_s28 }
  0x32   : > { %p8495_p8 = pnand %p7890_p6, %p49_p2  ;;  %s473_s22 = scalar_lea.sflag [#allocation3], %s472_s23 }
  0x33   : > { %s8190_s4 = sshra.s32 %s483_s13, 4  ;;  %s8197_s8 = scalar_lea.hbm %s11131_s0, 256  ;;  %s8191_s4 = int_to_ptr.hbm [resolvable:$true] %s8190_s4 }
  0x34   : > { %s8192_s10 = scalar_lea.hbm %s8191_s4, 128  ;;  %p8194_p9 = pneg %p8495_p8 }
  0x35   : > { %p8193_p7 = scmp.ne.s32.totalorder %s8191_s4, %s8192_s10  ;;  %p8198_p0 = scmp.lt.s32.totalorder %s8191_s4, %s11131_s0 }
  0x36   : > { %p8199_p2 = scmp.lt.s32.totalorder %s8197_s8, %s8192_s10 }
  0x37   : > { %p8195_p10 = pnand %p8194_p9, %p8193_p7 }
  0x38   : > { %p8200_p6 = por %p8199_p2, %p8198_p0 }
  0x39   : > { %p8196_p11 = pneg %p8195_p10 }
  0x3b   : > { %p8201_p5 = pnand %p8200_p6, %p8196_p11 }
  0x3d   : > { %8204 = shalt.err (!%p8201_p5)
}
  0x3e   : > { %s11444_s23 = smov 4   ;;  %s11445_s25 = smov 64  }
  0x3f   : > { %7880 = dma.hbm_to_vmem [thread:$0]  (!%p8495_p8), %s483_s13, 2048, %s485_s28, %s473_s22, %s11445_s25, %s11445_s25, %s11444_s23  }
  0x40   : > { %505 = sbr.rel (%p8421_p3) target bundleno = 1807 (0x70f), region = 76 }
  0x45   : > { %s8515_s26 = sand.u32 1, %s8290_s30  }
  0x46   : > { %s6179_s4 = sshll.u32 %s8515_s26, 7  ;;  %s508_s10 = scalar_lea.sflag [#allocation3], %s8515_s26 }
  0x47   : > { %s8519_s17 = scalar_lea.vmem [#allocation2], %s6179_s4 }
  0x48   : > { %8265 = dma.done.wait (%p8477_p12), %s508_s10, 2048  }
  0x49   : > { %8267 = vsyncadd (%p8477_p12), %s508_s10, 4294965248 }
  0x4a   : > { %8269 = dma.done.wait (%p54_p1), [#allocation6], 3072  }
  0x4b   : > { %8271 = vsyncadd (%p54_p1), [#allocation6], 4294964224 }
  0x4c   : > { %8273 = dma.done.wait (%p54_p1), [#allocation9], 24576  }
  0x4d   : > { %8275 = vsyncadd (%p54_p1), [#allocation9], 4294942720 }
  0x4e   : > { %8277 = dma.done.wait (%p54_p1), [#allocation12], 4096  }
  0x4f   : > { %8279 = vsyncadd (%p54_p1), [#allocation12], 4294963200  ;;  %s6186_s21 = sshll.u32 %s8416_s20, 5  ;;  %v11154_v0 = vmov 0   ;;  %v7530_v1 = vld [vmem:[#allocation5 + $0x38] sm:$0xff]  ;;  %v7529_v3 = vld [vmem:[#allocation5 + $0x30] sm:$0xff] }
  0x50   : > { %7947 = vset.pattern.permute.xlu1 %v11154_v0  ;;  %p589_p3 = scmp.lt.s32.totalorder %s6186_s21, 63  ;;  %7948 = vset.pattern.permute.xlu2 %v11154_v0  ;;  %v7528_v6 = vld [vmem:[#allocation5 + $0x28] sm:$0xff]  ;;  %v7527_v8 = vld [vmem:[#allocation5 + $0x20] sm:$0xff]  ;;  %v7526_v10 = vld [vmem:[#allocation5 + $0x18] sm:$0xff]  ;;  %v11152_v35 = vmov 1   ;;  %v11150_v41 = vmov 2  }
  0x51   : > { %7946 = vset.pattern.permute.xlu0 %v11154_v0  ;;  %791 = vmatpush.bf16.msra.mxu0 %v7530_v1  ;;  %v7525_v13 = vld [vmem:[#allocation5 + $0x10] sm:$0xff]  ;;  %v7524_v17 = vld [vmem:[#allocation5 + $0x8] sm:$0xff]  ;;  %v7523_v20 = vld [vmem:[#allocation5] sm:$0xff]  ;;  %v11156_v45 = vmov 3   ;;  %vm4202_vm0 = vcmask 1040384   ;;  %vm4211_vm1 = vcmask 1041408  }
  0x52   : > { %s12095_s21 = smov (!%p589_p3, %s6186_s21), 63  ;;  %v7507_v21 = vld [vmem:[%s8519_s17] sm:$0xff]  ;;  %v7508_v30 = vld [vmem:[%s8519_s17 + $0x8] sm:$0xff]  ;;  %v7509_v38 = vld [vmem:[%s8519_s17 + $0x10] sm:$0xff]  ;;  %vm4220_vm2 = vcmask 1042432   ;;  %vm4241_vm3 = vcmask 1043456  }
  0x53   : > { %s6187_s22 = sshll.u32 %s12095_s21, 3  ;;  %v7510_v44 = vld [vmem:[%s8519_s17 + $0x18] sm:$0xff]  ;;  %v7511_v46 = vld [vmem:[%s8519_s17 + $0x20] sm:$0xff]  ;;  %v6342_v47 = vld [vmem:[#allocation7 + $0x70] sm:$0xf]  ;;  %s12053_s11 = sld [smem:[#allocation179_spill]] }
  0x54   : > { %s8544_s28 = scalar_lea.vmem %s11132_s1, %s6187_s22  ;;  %v7546_v48 = vld [vmem:[#allocation7 + $0x74] sm:$0xf0]  ;;  %v7545_v49 = vld [vmem:[#allocation7 + $0x74] sm:$0xf]  ;;  %v6344_v51 = vld [vmem:[#allocation7 + $0x78] sm:$0xf0] }
  0x55   : > { %v2412_v2 = vld [vmem:[%s8544_s28 + $0x10] sm:$0xff]  ;;  %v2413_v5 = vld [vmem:[%s8544_s28 + $0x18] sm:$0xff]  ;;  %792 = vmatpush.bf16.msra.mxu0 %v7529_v3  ;;  %v2414_v12 = vld [vmem:[%s8544_s28 + $0x20] sm:$0xff]  ;;  %v6343_v50 = vor.u32 %v7546_v48, %v6342_v47  ;;  %v6347_v52 = vor.u32 %v7545_v49, %v6344_v51  ;;  %s12086_s10 = sld [smem:[#allocation181_spill]]  ;;  %s6185_s27 = sshll.u32 %s8515_s26, 4 }
  0x56   : > { %v8547_v4 = vmul.f32 4.0, %v2412_v2  ;;  %v8551_v7 = vmul.f32 4.0, %v2413_v5  ;;  %v2417_v9 = vld [vmem:[%s8544_s28 + $0x38] sm:$0xff]  ;;  %v8558_v14 = vmul.f32 4.0, %v2414_v12  ;;  %v2420_v15 = vld [vmem:[%s8544_s28 + $0x50] sm:$0xff]  ;;  %v2415_v16 = vld [vmem:[%s8544_s28 + $0x28] sm:$0xff] }
  0x57   : > { %v8555_v11 = vmul.f32 4.0, %v2417_v9  ;;  %v8564_v18 = vmul.f32 4.0, %v2420_v15  ;;  %v8566_v19 = vmul.f32 4.0, %v2415_v16  ;;  %v2423_v22 = vld [vmem:[%s8544_s28 + $0x68] sm:$0xff]  ;;  %v2418_v24 = vld [vmem:[%s8544_s28 + $0x40] sm:$0xff]  ;;  %v2421_v27 = vld [vmem:[%s8544_s28 + $0x58] sm:$0xff]  ;;  %1030 = vmatpush.bf16.msra.mxu1 %v6343_v50  ;;  %1119 = vmatpush.bf16.msra.mxu2 %v6347_v52 }
  0x58   : > { %2486 = vperm.xlu1 %7947, %v8547_v4   ;;  %2496 = vperm.xlu2 %7948, %v8558_v14   ;;  %v8572_v23 = vmul.f32 4.0, %v2423_v22  ;;  %v8575_v25 = vmul.f32 4.0, %v2418_v24  ;;  %v2426_v26 = vld [vmem:[%s8544_s28 + $0x80] sm:$0xff]  ;;  %v8581_v29 = vmul.f32 4.0, %v2421_v27  ;;  %v2411_v31 = vld [vmem:[%s8544_s28 + $0x8] sm:$0xff]  ;;  %v2424_v33 = vld [vmem:[%s8544_s28 + $0x70] sm:$0xff] }
  0x59   : > { %793 = vmatpush.bf16.msra.mxu0 %v7528_v6  ;;  %v2458_v28 = vmul.f32 4.0, %v2426_v26  ;;  %v8586_v32 = vmul.f32 4.0, %v2411_v31  ;;  %v8589_v34 = vmul.f32 4.0, %v2424_v33  ;;  %v2427_v36 = vld [vmem:[%s8544_s28 + $0x88] sm:$0xff]  ;;  %v2410_v39 = vld [vmem:[%s8544_s28] sm:$0xff]  ;;  %v2428_v42 = vld [vmem:[%s8544_s28 + $0x90] sm:$0xff] }
  0x5a   : > { %v2459_v37 = vmul.f32 4.0, %v2427_v36  ;;  %v8597_v40 = vmul.f32 4.0, %v2410_v39  ;;  %v8603_v43 = vmul.f32 4.0, %v2428_v42  ;;  %v7512_v53 = vld [vmem:[%s8519_s17 + $0x28] sm:$0xff]  ;;  %v6334_v54 = vld [vmem:[#allocation7 + $0x60] sm:$0xf] }
  0x5b   : > { %v7544_v55 = vld [vmem:[#allocation7 + $0x64] sm:$0xf0]  ;;  %v7543_v56 = vld [vmem:[#allocation7 + $0x64] sm:$0xf]  ;;  %v6336_v58 = vld [vmem:[#allocation7 + $0x68] sm:$0xf0] }
  0x5c   : > { %2476 = vperm.xlu0 %7946, %v8597_v40   ;;  %v6335_v57 = vor.u32 %v7544_v55, %v6334_v54  ;;  %v6339_v59 = vor.u32 %v7543_v56, %v6336_v58  ;;  %v6326_v60 = vld [vmem:[#allocation7 + $0x50] sm:$0xf]  ;;  %v7542_v61 = vld [vmem:[#allocation7 + $0x54] sm:$0xf0]  ;;  %v7541_v63 = vld [vmem:[#allocation7 + $0x54] sm:$0xf] }
  0x5d   : > { %794 = vmatpush.bf16.msra.mxu0 %v7527_v8  ;;  %v6327_v62 = vor.u32 %v7542_v61, %v6326_v60  ;;  %v6328_v1 = vld [vmem:[#allocation7 + $0x58] sm:$0xf0]  ;;  %v6318_v3 = vld [vmem:[#allocation7 + $0x40] sm:$0xf]  ;;  %v7540_v5 = vld [vmem:[#allocation7 + $0x44] sm:$0xf0] }
  0x5e   : > { %1031 = vmatpush.bf16.msra.mxu1 %v6335_v57  ;;  %1120 = vmatpush.bf16.msra.mxu2 %v6339_v59  ;;  %v6331_v2 = vor.u32 %v7541_v63, %v6328_v1  ;;  %v2429_v6 = vld [vmem:[%s8544_s28 + $0x98] sm:$0xff]  ;;  %v7539_v8 = vld [vmem:[#allocation7 + $0x44] sm:$0xf]  ;;  %v6320_v9 = vld [vmem:[#allocation7 + $0x48] sm:$0xf0]  ;;  %s12087_s22 = sld [smem:[#allocation182_spill]] }
  0x5f   : > { %v2461_v12 = vmul.f32 4.0, %v2429_v6  ;;  %v6310_v15 = vld [vmem:[#allocation7 + $0x30] sm:$0xf]  ;;  %v7538_v16 = vld [vmem:[#allocation7 + $0x34] sm:$0xf0]  ;;  %v2431_v56 = vld [vmem:[%s8544_s28 + $0xa8] sm:$0xff] }
  0x60   : > { %2491 = vperm.xlu1 %7947, %v8551_v7   ;;  %2501 = vperm.xlu2 %7948, %v8566_v19   ;;  %v7513_v22 = vld [vmem:[%s8519_s17 + $0x30] sm:$0xff]  ;;  %v6302_v26 = vld [vmem:[#allocation7 + $0x20] sm:$0xf]  ;;  %v7536_v27 = vld [vmem:[#allocation7 + $0x24] sm:$0xf0]  ;;  %v8651_v61 = vmul.f32 4.0, %v2431_v56 }
  0x61   : > { %795 = vmatpush.bf16.msra.mxu0 %v7526_v10  ;;  %v6319_v10 = vor.u32 %v7540_v5, %v6318_v3  ;;  %v6304_v31 = vld [vmem:[#allocation7 + $0x28] sm:$0xf0]  ;;  %v6294_v36 = vld [vmem:[#allocation7 + $0x10] sm:$0xf]  ;;  %v6296_v42 = vld [vmem:[#allocation7 + $0x18] sm:$0xf0] }
  0x62   : > { %1032 = vmatpush.bf16.msra.mxu1 %v6327_v62  ;;  %1121 = vmatpush.bf16.msra.mxu2 %v6331_v2  ;;  %v6286_v47 = vld [vmem:[#allocation7] sm:$0xf]  ;;  %v7532_v48 = vld [vmem:[#allocation7 + $0x4] sm:$0xf0]  ;;  %v7531_v49 = vld [vmem:[#allocation7 + $0x4] sm:$0xf] }
  0x63   : > { %v6287_v50 = vor.u32 %v7532_v48, %v6286_v47  ;;  %v6288_v51 = vld [vmem:[#allocation7 + $0x8] sm:$0xf0]  ;;  %v7514_v54 = vld [vmem:[%s8519_s17 + $0x38] sm:$0xff]  ;;  %v7515_v62 = vld [vmem:[%s8519_s17 + $0x40] sm:$0xff]  ;;  %s7836_s13 = sshll.u32 %s8416_s20, 4  ;;  %s12088_s9 = sld [smem:[#allocation183_spill]] }
  0x64   : > { %2481 = vperm.xlu0 %7946, %v8586_v32   ;;  %v2416_v59 = vld [vmem:[%s8544_s28 + $0x30] sm:$0xff]  ;;  %v2419_v3 = vld [vmem:[%s8544_s28 + $0x48] sm:$0xff]  ;;  %v8667_v5 = vld [vmem:[%s11134_s3] ss:$0 sm:$0xff]  ;;  %s586_s23 = scalar_lea.vmem [#allocation13], %s6185_s27  ;;  %s6018_s20 = scalar_lea.sflag [#allocation4], %s8515_s26 }
  0x65   : > { %796 = vmatpush.bf16.msra.mxu0 %v7525_v13  ;;  %v6323_v13 = vor.u32 %v7539_v8, %v6320_v9  ;;  %v8649_v60 = vmul.f32 4.0, %v2416_v59  ;;  %v8669_v6 = vmul.f32 4.0, %v2419_v3  ;;  %s6031_s25 = sshll.u32 %s586_s23, 4  ;;  %s6032_s25 = int_to_ptr.vmem [resolvable:$true] %s6031_s25 }
  0x66   : > { %1033 = vmatpush.bf16.msra.mxu1 %v6319_v10 }
  0x67   : > { %1122 = vmatpush.bf16.msra.mxu2 %v6323_v13  ;;  %v2422_v13 = vld [vmem:[%s8544_s28 + $0x60] sm:$0xff] }
  0x68   : > { %2511 = vperm.xlu1 %7947, %v8555_v11   ;;  %2516 = vperm.xlu2 %7948, %v8575_v25  }
  0x69   : > { %797 = vmatpush.bf16.msra.mxu0 %v7524_v17  ;;  %v7537_v17 = vld [vmem:[#allocation7 + $0x34] sm:$0xf]  ;;  %s8240_s27 = scalar_lea.hbm %s12088_s9, 32 }
  0x6c   : > { %2506 = vperm.xlu0 %7946, %v8649_v60  }
  0x6d   : > { %798 = vmatpush.bf16.msra.mxu0 %v7523_v20  ;;  %v6311_v20 = vor.u32 %v7538_v16, %v6310_v15 }
  0x6f   : > { %1034 = vmatpush.bf16.msra.mxu1 %v6311_v20 }
  0x70   : > { %2526 = vperm.xlu1 %7947, %v8564_v18   ;;  %799 = vmatmul.bf16.vlgmr.msra.gmra.mxu0 %v7507_v21  ;;  %v6312_v21 = vld [vmem:[#allocation7 + $0x38] sm:$0xf0] }
  0x71   : > { %2531 = vperm.xlu2 %7948, %v8581_v29   ;;  %v6315_v24 = vor.u32 %v7537_v17, %v6312_v21  ;;  %v8683_v17 = vmul.f32 4.0, %v2422_v13  ;;  %v7516_v21 = vld [vmem:[%s8519_s17 + $0x48] sm:$0xff] }
  0x73   : > { %1123 = vmatpush.bf16.msra.mxu2 %v6315_v24 }
  0x74   : > { %2521 = vperm.xlu0 %7946, %v8669_v6  }
  0x78   : > { %2541 = vperm.xlu1 %7947, %v8572_v23  }
  0x79   : > { %2546 = vperm.xlu2 %7948, %v8589_v34  }
  0x7c   : > { %2536 = vperm.xlu0 %7946, %v8683_v17  }
  0x80   : > { %2556 = vperm.xlu1 %7947, %v2458_v28   ;;  %804 = vmatmul.bf16.gmra.mxu0 %v7508_v30  ;;  %v7535_v30 = vld [vmem:[#allocation7 + $0x24] sm:$0xf] }
  0x81   : > { %2561 = vperm.xlu2 %7948, %v2459_v37   ;;  %v6307_v33 = vor.u32 %v7535_v30, %v6304_v31  ;;  %v2432_v30 = vld [vmem:[%s8544_s28 + $0xb0] sm:$0xff] }
  0x83   : > { %1124 = vmatpush.bf16.msra.mxu2 %v6307_v33 }
  0x88   : > { %7949 = vset.pattern.permute.xlu1 %v11152_v35 }
  0x89   : > { %2935 = vperm.xlu1 %7949, %v8586_v32   ;;  %7950 = vset.pattern.permute.xlu2 %v11152_v35 }
  0x8a   : > { %2995 = vperm.xlu2 %7950, %v2458_v28  }
  0x90   : > { %809 = vmatmul.bf16.gmra.mxu0 %v7509_v38  ;;  %v7533_v38 = vld [vmem:[#allocation7 + $0x14] sm:$0xf] }
  0x91   : > { %2999 = vperm.xlu1 %7949, %v2459_v37  }
  0x92   : > { %7951 = vset.pattern.permute.xlu2 %v11150_v41 }
  0x93   : > { %3355 = vperm.xlu2 %7951, %v8597_v40  }
  0x99   : > { %7952 = vset.pattern.permute.xlu1 %v11150_v41 }
  0x9a   : > { %3419 = vperm.xlu1 %7952, %v2458_v28  }
  0x9b   : > { %3423 = vperm.xlu2 %7951, %v2459_v37  }
  0xa0   : > { %814 = vmatmul.bf16.gmra.mxu0 %v7510_v44  ;;  %v6299_v44 = vor.u32 %v7533_v38, %v6296_v42  ;;  %v2433_v42 = vld [vmem:[%s8544_s28 + $0xb8] sm:$0xff] }
  0xa1   : > { %v8712_v47 = vmul.f32 4.0, %v2433_v42 }
  0xa2   : > { %7953 = vset.pattern.permute.xlu1 %v11154_v0  ;;  %1125 = vmatpush.bf16.msra.mxu2 %v6299_v44 }
  0xa3   : > { %2566 = vperm.xlu1 %7953, %v8603_v43   ;;  %7954 = vset.pattern.permute.xlu2 %v11152_v35 }
  0xa4   : > { %2939 = vperm.xlu2 %7954, %v8547_v4  }
  0xab   : > { %7955 = vset.pattern.permute.xlu1 %v11156_v45 }
  0xac   : > { %3779 = vperm.xlu1 %7955, %v8597_v40   ;;  %7956 = vset.pattern.permute.xlu2 %v11156_v45 }
  0xad   : > { %3783 = vperm.xlu2 %7956, %v8586_v32  }
  0xb0   : > { %819 = vmatmul.bf16.gmra.mxu0 %v7511_v46  ;;  %v2430_v46 = vld [vmem:[%s8544_s28 + $0xa0] sm:$0xff] }
  0xb1   : > { %v8631_v52 = vmul.f32 4.0, %v2430_v46 }
  0xb2   : > { %v8644_v57 = vpop.permute.xlu2 %2496 }
  0xb3   : > { %11447 = vst [vmem:[#allocation20_spill] sm:$0xff] %v8644_v57 }
  0xb4   : > { %3843 = vperm.xlu1 %7955, %v2458_v28   ;;  %v6303_v28 = vor.u32 %v7536_v27, %v6302_v26  ;;  %v2425_v27 = vld [vmem:[%s8544_s28 + $0x78] sm:$0xff] }
  0xb5   : > { %3847 = vperm.xlu2 %7956, %v2459_v37   ;;  %v7534_v37 = vld [vmem:[#allocation7 + $0x14] sm:$0xf0] }
  0xb6   : > { %1035 = vmatpush.bf16.msra.mxu1 %v6303_v28  ;;  %v6295_v39 = vor.u32 %v7534_v37, %v6294_v36  ;;  %v8696_v28 = vmul.f32 4.0, %v2425_v27  ;;  %v8701_v36 = vmul.f32 4.0, %v2432_v30  ;;  %v6464_v30 = vld [vmem:[%s11137_s6 + $0xf0] sm:$0xf0] }
  0xb8   : > { %2551 = vperm.xlu0 %7946, %v8696_v28  }
  0xba   : > { %1036 = vmatpush.bf16.msra.mxu1 %v6295_v39  ;;  %v8659_v1 = vpop.permute.xlu2 %2501 }
  0xbb   : > { %11449 = vst [vmem:[#allocation22_spill] sm:$0xff] %v8659_v1 }
  0xbc   : > { %7957 = vset.pattern.permute.xlu1 %v11150_v41 }
  0xbd   : > { %3427 = vperm.xlu1 %7957, %v8603_v43   ;;  %7958 = vset.pattern.permute.xlu2 %v11154_v0 }
  0xbe   : > { %2571 = vperm.xlu2 %7958, %v2461_v12   ;;  %1037 = vmatpush.bf16.msra.mxu1 %v6287_v50 }
  0xc0   : > { %824 = vmatmul.bf16.gmra.mxu0 %v7512_v53  ;;  %v6291_v53 = vor.u32 %v7531_v49, %v6288_v51  ;;  %2591 = vperm.xlu0 %7946, %v8712_v47   ;;  %v7517_v49 = vld [vmem:[%s8519_s17 + $0x50] sm:$0xff] }
  0xc2   : > { %1126 = vmatpush.bf16.msra.mxu2 %v6291_v53  ;;  %v8678_v10 = vpop.permute.xlu2 %2516 }
  0xc3   : > { %11451 = vst [vmem:[#allocation24_spill] sm:$0xff] %v8678_v10 }
  0xc5   : > { %7959 = vset.pattern.permute.xlu1 %v11152_v35 }
  0xc6   : > { %2943 = vperm.xlu1 %7959, %v8551_v7   ;;  %7960 = vset.pattern.permute.xlu2 %v11152_v35 }
  0xc7   : > { %3007 = vperm.xlu2 %7960, %v2461_v12  }
  0xca   : > { %v8638_v55 = vpop.permute.xlu1 %2486 }
  0xcb   : > { %11446 = vst [vmem:[#allocation19_spill] sm:$0xff] %v8638_v55  ;;  %v8690_v24 = vpop.permute.xlu2 %2531 }
  0xcc   : > { %11453 = vst [vmem:[#allocation26_spill] sm:$0xff] %v8690_v24 }
  0xce   : > { %7961 = vset.pattern.permute.xlu1 %v11156_v45 }
  0xcf   : > { %3851 = vperm.xlu1 %7961, %v8603_v43   ;;  %7962 = vset.pattern.permute.xlu2 %v11150_v41 }
  0xd0   : > { %829 = vmatmul.bf16.gmra.mxu0 %v7513_v22  ;;  %3367 = vperm.xlu2 %7962, %v8551_v7  }
  0xd2   : > { %v8646_v58 = vpop.permute.xlu1 %2491 }
  0xd3   : > { %11448 = vst [vmem:[#allocation21_spill] sm:$0xff] %v8646_v58  ;;  %v8705_v38 = vpop.permute.xlu2 %2546 }
  0xd4   : > { %11455 = vst [vmem:[#allocation28_spill] sm:$0xff] %v8705_v38 }
  0xd7   : > { %7963 = vset.pattern.permute.xlu1 %v11150_v41 }
  0xd8   : > { %3431 = vperm.xlu1 %7963, %v2461_v12   ;;  %7964 = vset.pattern.permute.xlu2 %v11154_v0 }
  0xd9   : > { %2576 = vperm.xlu2 %7964, %v8631_v52  }
  0xda   : > { %v8661_v2 = vpop.permute.xlu1 %2511 }
  0xdb   : > { %11450 = vst [vmem:[#allocation23_spill] sm:$0xff] %v8661_v2  ;;  %v8717_v51 = vpop.permute.xlu2 %2561 }
  0xdc   : > { %11457 = vst [vmem:[#allocation30_spill] sm:$0xff] %v8717_v51 }
  0xe0   : > { %7965 = vset.pattern.permute.xlu1 %v11152_v35  ;;  %834 = vmatmul.bf16.gmra.mxu0 %v7514_v54  ;;  %v2438_v54 = vld [vmem:[%s8544_s28 + $0xe0] sm:$0xff] }
  0xe1   : > { %3011 = vperm.xlu1 %7965, %v8631_v52   ;;  %7966 = vset.pattern.permute.xlu2 %v11156_v45  ;;  %v8724_v56 = vmul.f32 4.0, %v2438_v54 }
  0xe2   : > { %3791 = vperm.xlu2 %7966, %v8551_v7  }
  0xe3   : > { %2616 = vperm.xlu0 %7946, %v8724_v56  }
  0xe4   : > { %v8731_v3 = vpop.permute.xlu2 %2995 }
  0xe5   : > { %11459 = vst [vmem:[#allocation32_spill] sm:$0xff] %v8731_v3 }
  0xe9   : > { %7967 = vset.pattern.permute.xlu1 %v11156_v45 }
  0xea   : > { %3855 = vperm.xlu1 %7967, %v2461_v12   ;;  %7968 = vset.pattern.permute.xlu2 %v11150_v41  ;;  %v8680_v12 = vpop.permute.xlu1 %2526 }
  0xeb   : > { %3371 = vperm.xlu2 %7968, %v8558_v14   ;;  %11452 = vst [vmem:[#allocation25_spill] sm:$0xff] %v8680_v12  ;;  %8009 = vset.pattern.permute.xlu0 %v11152_v35 }
  0xec   : > { %2931 = vperm.xlu0 %8009, %v8597_v40   ;;  %v7575_v40 = vld [vmem:[%s11137_s6 + $0xe4] sm:$0xf] }
  0xed   : > { %v800_v63 = vpop.f32.mrf.mxu0  ;;  %v8750_v27 = vpop.permute.xlu2 %3355 }
  0xee   : > { %v801_v7 = vadd.f32 %v8667_v5, %v800_v63  ;;  %11462 = vst [vmem:[#allocation35_spill] sm:$0xff] %v8750_v27 }
  0xf0   : > { %839 = vmatmul.bf16.gmra.mxu0 %v7515_v62  ;;  %v880_v15 = vmax.f32 %v801_v7, 0.0 }
  0xf2   : > { %7969 = vset.pattern.permute.xlu1 %v11154_v0  ;;  %v8692_v26 = vpop.permute.xlu1 %2541 }
  0xf3   : > { %2581 = vperm.xlu1 %7969, %v8651_v61   ;;  %7970 = vset.pattern.permute.xlu2 %v11152_v35  ;;  %11454 = vst [vmem:[#allocation27_spill] sm:$0xff] %v8692_v26 }
  0xf4   : > { %2951 = vperm.xlu2 %7970, %v8566_v19   ;;  %3003 = vperm.xlu0 %8009, %v8603_v43  }
  0xf5   : > { %v802_v8 = vpop.f32.mrf.mxu0 }
  0xf6   : > { %v803_v9 = vadd.f32 %v8667_v5, %v802_v8 }
  0xf8   : > { %v881_v16 = vmax.f32 %v803_v9, 0.0 }
  0xfa   : > { %v912_v20 = vpack.c.bf16 %v881_v16, %v880_v15  ;;  %v8707_v39 = vpop.permute.xlu1 %2556  ;;  %v7607_v15 = vld [vmem:[%s11137_s6 + $0x1e4] sm:$0xf]  ;;  %v6592_v16 = vld [vmem:[%s11137_s6 + $0x1f0] sm:$0xf0] }
  0xfb   : > { %7971 = vset.pattern.permute.xlu1 %v11152_v35  ;;  %11456 = vst [vmem:[#allocation29_spill] sm:$0xff] %v8707_v39 }
  0xfc   : > { %3015 = vperm.xlu1 %7971, %v8651_v61   ;;  %1038 = vmatmul.bf16.vlgmr.msra.gmra.mxu1 %v912_v20 }
  0xfd   : > { %1127 = vmatmul.bf16.vlgmr.msra.gmra.mxu2 %v912_v20  ;;  %v805_v22 = vpop.f32.mrf.mxu0  ;;  %7972 = vset.pattern.permute.xlu2 %v11156_v45 }
  0xfe   : > { %v806_v31 = vadd.f32 %v8667_v5, %v805_v22  ;;  %3795 = vperm.xlu2 %7972, %v8558_v14   ;;  %2947 = vperm.xlu0 %8009, %v8558_v14  }
 0x100   : > { %844 = vmatmul.bf16.gmra.mxu0 %v7516_v21  ;;  %v882_v44 = vmax.f32 %v806_v31, 0.0  ;;  %v6595_v21 = vor.u32 %v7607_v15, %v6592_v16  ;;  %v6467_v31 = vor.u32 %v7575_v40, %v6464_v30  ;;  %v7603_v40 = vld [vmem:[%s11137_s6 + $0x1c4] sm:$0xf]  ;;  %v6576_v30 = vld [vmem:[%s11137_s6 + $0x1d0] sm:$0xf0] }
 0x102   : > { %v8719_v53 = vpop.permute.xlu1 %2935  ;;  %1965 = vmatpush.bf16.msrb.mxu2 %v6595_v21  ;;  %1876 = vmatpush.bf16.msrb.mxu1 %v6467_v31  ;;  %v7520_v21 = vld [vmem:[%s8519_s17 + $0x68] sm:$0xff] }
 0x103   : > { %11458 = vst [vmem:[#allocation31_spill] sm:$0xff] %v8719_v53 }
 0x104   : > { %7973 = vset.pattern.permute.xlu1 %v11150_v41 }
 0x105   : > { %3375 = vperm.xlu1 %7973, %v8566_v19   ;;  %v807_v33 = vpop.f32.mrf.mxu0 }
 0x106   : > { %v808_v37 = vadd.f32 %v8667_v5, %v807_v33  ;;  %7974 = vset.pattern.permute.xlu2 %v11150_v41  ;;  %v6590_v33 = vld [vmem:[%s11137_s6 + $0x1e0] sm:$0xf]  ;;  %3019 = vperm.xlu0 %8009, %v8701_v36  }
 0x107   : > { %3439 = vperm.xlu2 %7974, %v8651_v61  }
 0x108   : > { %v883_v46 = vmax.f32 %v808_v37, 0.0  ;;  %v7609_v37 = vld [vmem:[%s11137_s6 + $0x1ec] sm:$0xf0] }
 0x109   : > { %v6591_v42 = vor.u32 %v7609_v37, %v6590_v33  ;;  %v6579_v33 = vor.u32 %v7603_v40, %v6576_v30 }
 0x10a   : > { %v913_v48 = vpack.c.bf16 %v883_v46, %v882_v44  ;;  %v8733_v7 = vpop.permute.xlu1 %2999 }
 0x10b   : > { %11460 = vst [vmem:[#allocation33_spill] sm:$0xff] %v8733_v7  ;;  %1787 = vmatpush.bf16.msrb.mxu0 %v6591_v42  ;;  %1966 = vmatpush.bf16.msrb.mxu2 %v6579_v33 }
 0x10c   : > { %1043 = vmatmul.bf16.gmra.mxu1 %v913_v48 }
 0x10d   : > { %7975 = vset.pattern.permute.xlu1 %v11154_v0  ;;  %1132 = vmatmul.bf16.gmra.mxu2 %v913_v48  ;;  %v810_v50 = vpop.f32.mrf.mxu0 }
 0x10e   : > { %2586 = vperm.xlu1 %7975, %v8701_v36   ;;  %v811_v59 = vadd.f32 %v8667_v5, %v810_v50  ;;  %v8773_v50 = vpop.permute.xlu2 %3423  ;;  %2967 = vperm.xlu0 %8009, %v8669_v6  }
 0x10f   : > { %7976 = vset.pattern.permute.xlu2 %v11152_v35  ;;  %11464 = vst [vmem:[#allocation37_spill] sm:$0xff] %v8773_v50 }
 0x110   : > { %849 = vmatmul.bf16.gmra.mxu0 %v7517_v49  ;;  %v884_v8 = vmax.f32 %v811_v59, 0.0  ;;  %2955 = vperm.xlu2 %7976, %v8649_v60  }
 0x112   : > { %v8748_v22 = vpop.permute.xlu1 %3419 }
 0x113   : > { %11461 = vst [vmem:[#allocation34_spill] sm:$0xff] %v8748_v22 }
 0x115   : > { %v812_v62 = vpop.f32.mrf.mxu0 }
 0x116   : > { %7977 = vset.pattern.permute.xlu1 %v11156_v45  ;;  %v813_v63 = vadd.f32 %v8667_v5, %v812_v62  ;;  %v7519_v62 = vld [vmem:[%s8519_s17 + $0x60] sm:$0xff] }
 0x117   : > { %3799 = vperm.xlu1 %7977, %v8566_v19   ;;  %v7518_v19 = vld [vmem:[%s8519_s17 + $0x58] sm:$0xff] }
 0x118   : > { %v885_v9 = vmax.f32 %v813_v63, 0.0  ;;  %7978 = vset.pattern.permute.xlu2 %v11156_v45 }
 0x119   : > { %3863 = vperm.xlu2 %7978, %v8651_v61  }
 0x11a   : > { %v914_v13 = vpack.c.bf16 %v885_v9, %v884_v8  ;;  %v8771_v49 = vpop.permute.xlu1 %2566  ;;  %v8783_v8 = vpop.permute.xlu2 %2939 }
 0x11b   : > { %11463 = vst [vmem:[#allocation36_spill] sm:$0xff] %v8771_v49 }
 0x11c   : > { %1048 = vmatmul.bf16.gmra.mxu1 %v914_v13  ;;  %11466 = vst [vmem:[#allocation39_spill] sm:$0xff] %v8783_v8 }
 0x11d   : > { %1137 = vmatmul.bf16.gmra.mxu2 %v914_v13  ;;  %v815_v20 = vpop.f32.mrf.mxu0 }
 0x11e   : > { %v816_v44 = vadd.f32 %v8667_v5, %v815_v20 }
 0x11f   : > { %7979 = vset.pattern.permute.xlu1 %v11150_v41 }
 0x120   : > { %3379 = vperm.xlu1 %7979, %v8649_v60   ;;  %854 = vmatmul.bf16.gmra.mxu0 %v7518_v19  ;;  %v886_v61 = vmax.f32 %v816_v44, 0.0  ;;  %v7571_v44 = vld [vmem:[%s11137_s6 + $0xc4] sm:$0xf] }
 0x121   : > { %7980 = vset.pattern.permute.xlu2 %v11150_v41 }
 0x122   : > { %3443 = vperm.xlu2 %7980, %v8701_v36   ;;  %v8781_v43 = vpop.permute.xlu1 %3779 }
 0x123   : > { %11465 = vst [vmem:[#allocation38_spill] sm:$0xff] %v8781_v43 }
 0x125   : > { %v817_v46 = vpop.f32.mrf.mxu0 }
 0x126   : > { %v818_v48 = vadd.f32 %v8667_v5, %v817_v46  ;;  %v6448_v46 = vld [vmem:[%s11137_s6 + $0xd0] sm:$0xf0] }
 0x128   : > { %7981 = vset.pattern.permute.xlu1 %v11152_v35  ;;  %v887_v54 = vmax.f32 %v818_v48, 0.0  ;;  %v2437_v48 = vld [vmem:[%s8544_s28 + $0xd8] sm:$0xff] }
 0x129   : > { %2959 = vperm.xlu1 %7981, %v8555_v11  }
 0x12a   : > { %v915_v59 = vpack.c.bf16 %v887_v54, %v886_v61  ;;  %7982 = vset.pattern.permute.xlu2 %v11152_v35  ;;  %v8792_v14 = vpop.permute.xlu1 %3843  ;;  %v8819_v61 = vmul.f32 4.0, %v2437_v48  ;;  %v6574_v54 = vld [vmem:[%s11137_s6 + $0x1c0] sm:$0xf]  ;;  %v7573_v48 = vld [vmem:[%s11137_s6 + $0xcc] sm:$0xf0] }
 0x12b   : > { %3023 = vperm.xlu2 %7982, %v8712_v47   ;;  %11467 = vst [vmem:[#allocation40_spill] sm:$0xff] %v8792_v14 }
 0x12c   : > { %1053 = vmatmul.bf16.gmra.mxu1 %v915_v59  ;;  %3039 = vperm.xlu0 %8009, %v8819_v61  }
 0x12d   : > { %1142 = vmatmul.bf16.gmra.mxu2 %v915_v59  ;;  %v820_v63 = vpop.f32.mrf.mxu0  ;;  %v7605_v59 = vld [vmem:[%s11137_s6 + $0x1cc] sm:$0xf0] }
 0x12e   : > { %v821_v9 = vadd.f32 %v8667_v5, %v820_v63  ;;  %v6575_v63 = vor.u32 %v7605_v59, %v6574_v54  ;;  %v7521_v54 = vld [vmem:[%s8519_s17 + $0x70] sm:$0xff] }
 0x130   : > { %859 = vmatmul.bf16.gmra.mxu0 %v7519_v62  ;;  %v888_v15 = vmax.f32 %v821_v9, 0.0  ;;  %v2434_v62 = vld [vmem:[%s8544_s28 + $0xc0] sm:$0xff] }
 0x131   : > { %7983 = vset.pattern.permute.xlu1 %v11156_v45  ;;  %1788 = vmatpush.bf16.msrb.mxu0 %v6575_v63 }
 0x132   : > { %3803 = vperm.xlu1 %7983, %v8649_v60   ;;  %v8794_v60 = vpop.permute.xlu2 %3783  ;;  %v8807_v37 = vpop.permute.xlu1 %3427 }
 0x133   : > { %11468 = vst [vmem:[#allocation41_spill] sm:$0xff] %v8794_v60  ;;  %7984 = vset.pattern.permute.xlu2 %v11156_v45 }
 0x134   : > { %3867 = vperm.xlu2 %7984, %v8701_v36   ;;  %11469 = vst [vmem:[#allocation42_spill] sm:$0xff] %v8807_v37  ;;  %v6451_v36 = vor.u32 %v7571_v44, %v6448_v46  ;;  %v6446_v46 = vld [vmem:[%s11137_s6 + $0xc0] sm:$0xf]  ;;  %2987 = vperm.xlu0 %8009, %v8589_v34  }
 0x135   : > { %v822_v13 = vpop.f32.mrf.mxu0 }
 0x136   : > { %v823_v19 = vadd.f32 %v8667_v5, %v822_v13  ;;  %1877 = vmatpush.bf16.msrb.mxu1 %v6451_v36  ;;  %v6447_v36 = vor.u32 %v7573_v48, %v6446_v46  ;;  %v7601_v46 = vld [vmem:[%s11137_s6 + $0x1ac] sm:$0xf0] }
 0x138   : > { %v889_v16 = vmax.f32 %v823_v19, 0.0  ;;  %v8829_v19 = vmul.f32 4.0, %v2434_v62  ;;  %v7569_v62 = vld [vmem:[%s11137_s6 + $0xac] sm:$0xf0] }
 0x13a   : > { %7985 = vset.pattern.permute.xlu1 %v11150_v41  ;;  %v916_v20 = vpack.c.bf16 %v889_v16, %v888_v15  ;;  %v8809_v42 = vpop.permute.xlu2 %3847  ;;  %v6462_v16 = vld [vmem:[%s11137_s6 + $0xe0] sm:$0xf] }
 0x13b   : > { %3447 = vperm.xlu1 %7985, %v8712_v47   ;;  %11470 = vst [vmem:[#allocation43_spill] sm:$0xff] %v8809_v42 }
 0x13c   : > { %1058 = vmatmul.bf16.gmra.mxu1 %v916_v20  ;;  %7986 = vset.pattern.permute.xlu2 %v11154_v0 }
 0x13d   : > { %1147 = vmatmul.bf16.gmra.mxu2 %v916_v20  ;;  %v825_v31 = vpop.f32.mrf.mxu0  ;;  %v7577_v20 = vld [vmem:[%s11137_s6 + $0xec] sm:$0xf0]  ;;  %2596 = vperm.xlu2 %7986, %v8829_v19  }
 0x13e   : > { %v826_v9 = vadd.f32 %v8667_v5, %v825_v31  ;;  %v6463_v30 = vor.u32 %v7577_v20, %v6462_v16  ;;  %v6414_v16 = vld [vmem:[%s11137_s6 + $0x80] sm:$0xf]  ;;  %v7565_v20 = vld [vmem:[%s11137_s6 + $0x8c] sm:$0xf0]  ;;  %8022 = vset.pattern.permute.xlu0 %v11150_v41 }
 0x13f   : > { %3359 = vperm.xlu0 %8022, %v8586_v32  }
 0x140   : > { %864 = vmatmul.bf16.gmra.mxu0 %v7520_v21  ;;  %v8840_v21 = vpop.permute.xlu1 %2943  ;;  %v890_v31 = vmax.f32 %v826_v9, 0.0  ;;  %1698 = vmatpush.bf16.msra.mxu3 %v6463_v30  ;;  %v6415_v30 = vor.u32 %v7565_v20, %v6414_v16 }
 0x141   : > { %11471 = vst [vmem:[#allocation44_spill] sm:$0xff] %v8840_v21 }
 0x142   : > { %v8842_v40 = vpop.permute.xlu2 %2571 }
 0x143   : > { %7987 = vset.pattern.permute.xlu1 %v11152_v35  ;;  %11472 = vst [vmem:[#allocation45_spill] sm:$0xff] %v8842_v40 }
 0x144   : > { %2963 = vperm.xlu1 %7987, %v8575_v25   ;;  %1699 = vmatpush.bf16.msra.mxu3 %v6447_v36 }
 0x145   : > { %v827_v13 = vpop.f32.mrf.mxu0  ;;  %7988 = vset.pattern.permute.xlu2 %v11152_v35 }
 0x146   : > { %v828_v15 = vadd.f32 %v8667_v5, %v827_v13  ;;  %3027 = vperm.xlu2 %7988, %v8829_v19  }
 0x147   : > { %3363 = vperm.xlu0 %8022, %v8547_v4  }
 0x148   : > { %v891_v33 = vmax.f32 %v828_v15, 0.0  ;;  %v8861_v63 = vpop.permute.xlu1 %3851  ;;  %v8866_v15 = vpop.permute.xlu0 %2476 }
 0x149   : > { %11473 = vst [vmem:[#allocation46_spill] sm:$0xff] %v8861_v63 }
 0x14a   : > { %v917_v44 = vpack.c.bf16 %v891_v33, %v890_v31  ;;  %v8863_v9 = vpop.permute.xlu2 %3007  ;;  %11475 = vst [vmem:[#allocation48_spill] sm:$0xff] %v8866_v15  ;;  %v2435_v33 = vld [vmem:[%s8544_s28 + $0xc8] sm:$0xff] }
 0x14b   : > { %11474 = vst [vmem:[#allocation47_spill] sm:$0xff] %v8863_v9 }
 0x14c   : > { %7989 = vset.pattern.permute.xlu1 %v11156_v45  ;;  %1063 = vmatmul.bf16.gmra.mxu1 %v917_v44 }
 0x14d   : > { %3871 = vperm.xlu1 %7989, %v8712_v47   ;;  %1152 = vmatmul.bf16.gmra.mxu2 %v917_v44  ;;  %v830_v59 = vpop.f32.mrf.mxu0  ;;  %v6430_v47 = vld [vmem:[%s11137_s6 + $0xa0] sm:$0xf] }
 0x14e   : > { %v6431_v13 = vor.u32 %v7569_v62, %v6430_v47  ;;  %v831_v31 = vadd.f32 %v8667_v5, %v830_v59  ;;  %v6558_v44 = vld [vmem:[%s11137_s6 + $0x1a0] sm:$0xf]  ;;  %v7561_v47 = vld [vmem:[%s11137_s6 + $0x6c] sm:$0xf0]  ;;  %v8894_v62 = vmul.f32 4.0, %v2435_v33  ;;  %7990 = vset.pattern.permute.xlu2 %v11150_v41 }
 0x14f   : > { %v6559_v36 = vor.u32 %v7601_v46, %v6558_v44  ;;  %v6398_v59 = vld [vmem:[%s11137_s6 + $0x60] sm:$0xf]  ;;  %v7597_v33 = vld [vmem:[%s11137_s6 + $0x18c] sm:$0xf0]  ;;  %3387 = vperm.xlu2 %7990, %v8575_v25   ;;  %3435 = vperm.xlu0 %8022, %v8631_v52  }
 0x150   : > { %869 = vmatmul.bf16.gmra.mxu0 %v7521_v54  ;;  %1700 = vmatpush.bf16.msra.mxu3 %v6431_v13  ;;  %v8896_v13 = vpop.permute.xlu1 %3431  ;;  %v6399_v20 = vor.u32 %v7561_v47, %v6398_v59  ;;  %v8900_v32 = vpop.permute.xlu0 %2481  ;;  %v6542_v46 = vld [vmem:[%s11137_s6 + $0x180] sm:$0xf] }
 0x151   : > { %11476 = vst [vmem:[#allocation49_spill] sm:$0xff] %v8896_v13  ;;  %1789 = vmatpush.bf16.msrb.mxu0 %v6559_v36  ;;  %v7522_v59 = vld [vmem:[%s8519_s17 + $0x78] sm:$0xff]  ;;  %s6030_s17 = scalar_lea.hbm %s12088_s9, %s7836_s13 }
 0x152   : > { %v8898_v16 = vpop.permute.xlu2 %3367  ;;  %11478 = vst [vmem:[#allocation51_spill] sm:$0xff] %v8900_v32  ;;  %s6033_s4 = sshll.u32 %s6030_s17, 4  ;;  %s6034_s4 = int_to_ptr.hbm [resolvable:$true] %s6033_s4 }
 0x153   : > { %11477 = vst [vmem:[#allocation50_spill] sm:$0xff] %v8898_v16 }
 0x154   : > { %1701 = vmatpush.bf16.msra.mxu3 %v6415_v30  ;;  %v892_v30 = vmax.f32 %v831_v31, 0.0  ;;  %v6382_v31 = vld [vmem:[%s11137_s6 + $0x40] sm:$0xf] }
 0x155   : > { %7991 = vset.pattern.permute.xlu1 %v11150_v41  ;;  %v832_v48 = vpop.f32.mrf.mxu0 }
 0x156   : > { %3451 = vperm.xlu1 %7991, %v8829_v19   ;;  %v833_v54 = vadd.f32 %v8667_v5, %v832_v48  ;;  %v6543_v48 = vor.u32 %v7597_v33, %v6542_v46 }
 0x157   : > { %7992 = vset.pattern.permute.xlu2 %v11154_v0  ;;  %v7585_v0 = vld [vmem:[%s11137_s6 + $0x12c] sm:$0xf0]  ;;  %3383 = vperm.xlu0 %8022, %v8555_v11  }
 0x158   : > { %v893_v44 = vmax.f32 %v833_v54, 0.0  ;;  %1702 = vmatpush.bf16.msra.mxu3 %v6399_v20  ;;  %v7557_v54 = vld [vmem:[%s11137_s6 + $0x4c] sm:$0xf0]  ;;  %1790 = vmatpush.bf16.msrb.mxu0 %v6543_v48  ;;  %v7599_v20 = vld [vmem:[%s11137_s6 + $0x1a4] sm:$0xf]  ;;  %v8938_v41 = vpop.permute.xlu1 %3011 }
 0x159   : > { %v6383_v47 = vor.u32 %v7557_v54, %v6382_v31  ;;  %v7593_v48 = vld [vmem:[%s11137_s6 + $0x16c] sm:$0xf0]  ;;  %v6366_v31 = vld [vmem:[%s11137_s6 + $0x20] sm:$0xf]  ;;  %11479 = vst [vmem:[#allocation52_spill] sm:$0xff] %v8938_v41  ;;  %2601 = vperm.xlu2 %7992, %v8894_v62  }
 0x15a   : > { %v918_v36 = vpack.c.bf16 %v893_v44, %v892_v30  ;;  %v6560_v30 = vld [vmem:[%s11137_s6 + $0x1b0] sm:$0xf0]  ;;  %v6526_v44 = vld [vmem:[%s11137_s6 + $0x160] sm:$0xf]  ;;  %v7553_v54 = vld [vmem:[%s11137_s6 + $0x2c] sm:$0xf0] }
 0x15b   : > { %v6563_v33 = vor.u32 %v7599_v20, %v6560_v30  ;;  %v8940_v20 = vpop.permute.xlu2 %2576  ;;  %v8942_v30 = vpop.permute.xlu0 %2506 }
 0x15c   : > { %1068 = vmatmul.bf16.gmra.mxu1 %v918_v36  ;;  %1703 = vmatpush.bf16.msra.mxu3 %v6383_v47  ;;  %11480 = vst [vmem:[#allocation53_spill] sm:$0xff] %v8940_v20  ;;  %v6367_v47 = vor.u32 %v7553_v54, %v6366_v31  ;;  %v6350_v31 = vld [vmem:[%s11137_s6] sm:$0xf]  ;;  %v7549_v54 = vld [vmem:[%s11137_s6 + $0xc] sm:$0xf0] }
 0x15d   : > { %1157 = vmatmul.bf16.gmra.mxu2 %v918_v36  ;;  %v835_v46 = vpop.f32.mrf.mxu0  ;;  %v6527_v36 = vor.u32 %v7593_v48, %v6526_v44  ;;  %11481 = vst [vmem:[#allocation54_spill] sm:$0xff] %v8942_v30  ;;  %v6510_v44 = vld [vmem:[%s11137_s6 + $0x140] sm:$0xf]  ;;  %v7589_v48 = vld [vmem:[%s11137_s6 + $0x14c] sm:$0xf0] }
 0x15e   : > { %7993 = vset.pattern.permute.xlu1 %v11152_v35  ;;  %1967 = vmatpush.bf16.msrb.mxu2 %v6563_v33  ;;  %v6511_v35 = vor.u32 %v7589_v48, %v6510_v44  ;;  %v7567_v33 = vld [vmem:[%s11137_s6 + $0xa4] sm:$0xf]  ;;  %v6351_v44 = vor.u32 %v7549_v54, %v6350_v31  ;;  %v6494_v48 = vld [vmem:[%s11137_s6 + $0x120] sm:$0xf] }
 0x15f   : > { %3031 = vperm.xlu1 %7993, %v8894_v62   ;;  %1791 = vmatpush.bf16.msrb.mxu0 %v6527_v36 }
 0x160   : > { %874 = vmatmul.bf16.gmra.mxu0 %v7522_v59  ;;  %1704 = vmatpush.bf16.msra.mxu3 %v6367_v47  ;;  %v6432_v59 = vld [vmem:[%s11137_s6 + $0xb0] sm:$0xf0]  ;;  %v836_v47 = vadd.f32 %v8667_v5, %v835_v46 }
 0x161   : > { %v6435_v36 = vor.u32 %v7567_v33, %v6432_v59  ;;  %v6495_v59 = vor.u32 %v7585_v0, %v6494_v48  ;;  %v2436_v46 = vld [vmem:[%s8544_s28 + $0xd0] sm:$0xff]  ;;  %3455 = vperm.xlu0 %8022, %v8894_v62  }
 0x162   : > { %v894_v54 = vmax.f32 %v836_v47, 0.0  ;;  %v7581_v0 = vld [vmem:[%s11137_s6 + $0x10c] sm:$0xf0]  ;;  %v8988_v48 = vmul.f32 4.0, %v2436_v46  ;;  %v11486_v47 = vmov 0  }
 0x163   : > { %1878 = vmatpush.bf16.msrb.mxu1 %v6435_v36  ;;  %1792 = vmatpush.bf16.msrb.mxu0 %v6511_v35  ;;  %v8978_v31 = vpop.permute.xlu2 %3791  ;;  %v8980_v20 = vpop.permute.xlu0 %2521  ;;  %v6478_v36 = vld [vmem:[%s11137_s6 + $0x100] sm:$0xf] }
 0x164   : > { %1705 = vmatpush.bf16.msra.mxu3 %v6351_v44  ;;  %11483 = vst [vmem:[#allocation56_spill] sm:$0xff] %v8978_v31  ;;  %v6479_v35 = vor.u32 %v7581_v0, %v6478_v36  ;;  %v11490_v0 = vmov 1  }
 0x165   : > { %v837_v33 = vpop.f32.mrf.mxu0  ;;  %11484 = vst [vmem:[#allocation57_spill] sm:$0xff] %v8980_v20  ;;  %v2439_v20 = vld [vmem:[%s8544_s28 + $0xe8] sm:$0xff] }
 0x167   : > { %7995 = vset.pattern.permute.xlu1 %v11156_v45  ;;  %v838_v45 = vadd.f32 %v8667_v5, %v837_v33  ;;  %1793 = vmatpush.bf16.msrb.mxu0 %v6495_v59  ;;  %v11485_v33 = vmov 3  }
 0x168   : > { %3875 = vperm.xlu1 %7995, %v8829_v19   ;;  %v8976_v19 = vpop.permute.xlu1 %3855  ;;  %7994 = vset.pattern.permute.xlu2 %v11485_v33 }
 0x169   : > { %11482 = vst [vmem:[#allocation55_spill] sm:$0xff] %v8976_v19  ;;  %v895_v41 = vmax.f32 %v838_v45, 0.0  ;;  %3811 = vperm.xlu2 %7994, %v8575_v25   ;;  %3403 = vperm.xlu0 %8022, %v8683_v17  }
 0x16b   : > { %v919_v44 = vpack.c.bf16 %v895_v41, %v894_v54  ;;  %1794 = vmatpush.bf16.msrb.mxu0 %v6479_v35  ;;  %v8997_v59 = vpop.permute.xlu2 %3371  ;;  %v8999_v41 = vpop.permute.xlu0 %2536  ;;  %v11491_v35 = vmov 2  }
 0x16c   : > { %11488 = vst [vmem:[#allocation59_spill] sm:$0xff] %v8997_v59 }
 0x16d   : > { %1073 = vmatmul.bf16.gmra.mxu1 %v919_v44  ;;  %1162 = vmatmul.bf16.gmra.mxu2 %v919_v44  ;;  %v840_v45 = vpop.f32.mrf.mxu0  ;;  %11489 = vst [vmem:[#allocation60_spill] sm:$0xff] %v8999_v41 }
 0x16e   : > { %v841_v46 = vadd.f32 %v8667_v5, %v840_v45 }
 0x170   : > { %7997 = vset.pattern.permute.xlu1 %v11486_v47  ;;  %v8995_v19 = vpop.permute.xlu1 %2581 }
 0x171   : > { %2606 = vperm.xlu1 %7997, %v8988_v48   ;;  %11487 = vst [vmem:[#allocation58_spill] sm:$0xff] %v8995_v19  ;;  %7996 = vset.pattern.permute.xlu2 %v11491_v35  ;;  %v896_v19 = vmax.f32 %v841_v46, 0.0  ;;  %v7595_v46 = vld [vmem:[%s11137_s6 + $0x184] sm:$0xf] }
 0x172   : > { %3391 = vperm.xlu2 %7996, %v8669_v6  }
 0x173   : > { %v9009_v44 = vpop.permute.xlu2 %2951  ;;  %v9012_v45 = vpop.permute.xlu0 %2551 }
 0x174   : > { %11493 = vst [vmem:[#allocation62_spill] sm:$0xff] %v9009_v44 }
 0x175   : > { %v842_v54 = vpop.f32.mrf.mxu0  ;;  %11494 = vst [vmem:[#allocation63_spill] sm:$0xff] %v9012_v45 }
 0x176   : > { %v843_v36 = vadd.f32 %v8667_v5, %v842_v54  ;;  %v944_v54 = vld [vmem:[%s11136_s5] sm:$0x3] }
 0x177   : > { %v9017_v63 = vperm.slane %v944_v54, 0 }
 0x178   : > { %v9007_v25 = vpop.permute.xlu1 %3015  ;;  %v897_v13 = vmax.f32 %v843_v36, 0.0  ;;  %v6544_v36 = vld [vmem:[%s11137_s6 + $0x190] sm:$0xf0] }
 0x179   : > { %7999 = vset.pattern.permute.xlu1 %v11490_v0  ;;  %11492 = vst [vmem:[#allocation61_spill] sm:$0xff] %v9007_v25  ;;  %v1039_v9 = vpop.f32.mrf.mxu1  ;;  %v6547_v37 = vor.u32 %v7595_v46, %v6544_v36  ;;  %v2440_v46 = vld [vmem:[%s8544_s28 + $0xf0] sm:$0xff]  ;;  %v9037_v36 = vperm.slane %v944_v54, 1 }
 0x17a   : > { %3035 = vperm.xlu1 %7999, %v8988_v48   ;;  %v920_v40 = vpack.c.bf16 %v897_v13, %v896_v19  ;;  %7998 = vset.pattern.permute.xlu2 %v11490_v0 }
 0x17b   : > { %1968 = vmatpush.bf16.msrb.mxu2 %v6547_v37  ;;  %v9031_v19 = vpop.permute.xlu2 %3795  ;;  %v9033_v42 = vpop.permute.xlu0 %2591  ;;  %2971 = vperm.xlu2 %7998, %v8564_v18   ;;  %v6416_v37 = vld [vmem:[%s11137_s6 + $0x90] sm:$0xf0] }
 0x17c   : > { %11496 = vst [vmem:[#allocation65_spill] sm:$0xff] %v9031_v19 }
 0x17d   : > { %1078 = vmatmul.bf16.gmra.mxu1 %v920_v40  ;;  %1167 = vmatmul.bf16.gmra.mxu2 %v920_v40  ;;  %v845_v25 = vpop.f32.mrf.mxu0  ;;  %v1040_v40 = vadd.f32 %v1039_v9, %v9017_v63  ;;  %11497 = vst [vmem:[#allocation66_spill] sm:$0xff] %v9033_v42  ;;  %v7563_v9 = vld [vmem:[%s11137_s6 + $0x84] sm:$0xf]  ;;  %v9047_v42 = vmul.f32 4.0, %v2440_v46 }
 0x17e   : > { %v6419_v51 = vor.u32 %v7563_v9, %v6416_v37  ;;  %v846_v22 = vadd.f32 %v8667_v5, %v845_v25 }
 0x17f   : > { %v1208_v14 = vmax.f32 %v1040_v40, 0.0  ;;  %3475 = vperm.xlu0 %8022, %v9047_v42  }
 0x180   : > { %v1128_v49 = vpop.f32.mrf.mxu2  ;;  %v9027_v13 = vpop.permute.xlu1 %3375  ;;  %1879 = vmatpush.bf16.msrb.mxu1 %v6419_v51  ;;  %v898_v9 = vmax.f32 %v846_v22, 0.0 }
 0x181   : > { %11495 = vst [vmem:[#allocation64_spill] sm:$0xff] %v9027_v13  ;;  %v1041_v50 = vpop.f32.mrf.mxu1 }
 0x182   : > { %8001 = vset.pattern.permute.xlu1 %v11491_v35  ;;  %v1042_v7 = vadd.f32 %v1041_v50, %v9017_v63  ;;  %v1129_v50 = vadd.f32 %v1128_v49, %v9037_v36 }
 0x183   : > { %3395 = vperm.xlu1 %8001, %v8564_v18   ;;  %v9060_v51 = vpop.permute.xlu2 %3439  ;;  %8000 = vset.pattern.permute.xlu2 %v11485_v33 }
 0x184   : > { %v1210_v54 = vmax.f32 %v1042_v7, 0.0  ;;  %11500 = vst [vmem:[#allocation69_spill] sm:$0xff] %v9060_v51  ;;  %v9062_v7 = vpop.permute.xlu0 %2616  ;;  %3815 = vperm.xlu2 %8000, %v8669_v6  }
 0x185   : > { %v847_v3 = vpop.f32.mrf.mxu0  ;;  %11501 = vst [vmem:[#allocation70_spill] sm:$0xff] %v9062_v7 }
 0x186   : > { %v9051_v39 = vpack.c.bf16 %v1210_v54, %v1208_v14  ;;  %v848_v45 = vadd.f32 %v8667_v5, %v847_v3  ;;  %v1209_v3 = vmax.f32 %v1129_v50, 0.0 }
 0x187   : > { %8027 = vset.pattern.permute.xlu0 %v11485_v33 }
 0x188   : > { %11498 = vst [vmem:[#allocation67_spill] sm:$0xff] %v9051_v39  ;;  %v1130_v38 = vpop.f32.mrf.mxu2  ;;  %v9055_v26 = vpop.permute.xlu1 %2586  ;;  %v899_v46 = vmax.f32 %v848_v45, 0.0  ;;  %1706 = vmatmul.bf16.vlgmr.msra.gmra.mxu3 %v9051_v39  ;;  %3787 = vperm.xlu0 %8027, %v8547_v4  }
 0x189   : > { %11499 = vst [vmem:[#allocation68_spill] sm:$0xff] %v9055_v26  ;;  %v1131_v40 = vadd.f32 %v1130_v38, %v9037_v36  ;;  %v1044_v49 = vpop.f32.mrf.mxu1 }
 0x18a   : > { %v921_v25 = vpack.c.bf16 %v899_v46, %v898_v9  ;;  %v1045_v54 = vadd.f32 %v1044_v49, %v9017_v63 }
 0x18b   : > { %8003 = vset.pattern.permute.xlu1 %v11486_v47  ;;  %v1211_v14 = vmax.f32 %v1131_v40, 0.0  ;;  %v9075_v50 = vpop.permute.xlu2 %2955 }
 0x18c   : > { %2611 = vperm.xlu1 %8003, %v8819_v61   ;;  %11504 = vst [vmem:[#allocation73_spill] sm:$0xff] %v9075_v50  ;;  %v9077_v9 = vpop.permute.xlu0 %2931  ;;  %8002 = vset.pattern.permute.xlu2 %v11491_v35  ;;  %v1212_v40 = vmax.f32 %v1045_v54, 0.0 }
 0x18d   : > { %v9067_v22 = vpack.c.bf16 %v1211_v14, %v1209_v3  ;;  %1083 = vmatmul.bf16.gmra.mxu1 %v921_v25  ;;  %1172 = vmatmul.bf16.gmra.mxu2 %v921_v25  ;;  %v850_v38 = vpop.f32.mrf.mxu0  ;;  %11505 = vst [vmem:[#allocation74_spill] sm:$0xff] %v9077_v9 }
 0x18e   : > { %v851_v3 = vadd.f32 %v8667_v5, %v850_v38  ;;  %3459 = vperm.xlu2 %8002, %v8988_v48  }
 0x18f   : > { %11502 = vst [vmem:[#allocation71_spill] sm:$0xff] %v9067_v22  ;;  %1795 = vmatmul.bf16.vlgmr.msrb.gmra.mxu0 %v9067_v22 }
 0x190   : > { %v1133_v45 = vpop.f32.mrf.mxu2  ;;  %v9071_v37 = vpop.permute.xlu1 %3799  ;;  %3859 = vperm.xlu0 %8027, %v8631_v52   ;;  %v6528_v52 = vld [vmem:[%s11137_s6 + $0x170] sm:$0xf0] }
 0x191   : > { %11503 = vst [vmem:[#allocation72_spill] sm:$0xff] %v9071_v37  ;;  %v1046_v6 = vpop.f32.mrf.mxu1  ;;  %v1134_v49 = vadd.f32 %v1133_v45, %v9037_v36 }
 0x192   : > { %v1047_v46 = vadd.f32 %v1046_v6, %v9017_v63  ;;  %v900_v6 = vmax.f32 %v851_v3, 0.0 }
 0x193   : > { %v9093_v38 = vpop.permute.xlu2 %3863 }
 0x194   : > { %8005 = vset.pattern.permute.xlu1 %v11485_v33  ;;  %v1214_v14 = vmax.f32 %v1047_v46, 0.0  ;;  %11508 = vst [vmem:[#allocation77_spill] sm:$0xff] %v9093_v38  ;;  %v9095_v54 = vpop.permute.xlu0 %3003  ;;  %v1213_v46 = vmax.f32 %v1134_v49, 0.0 }
 0x195   : > { %3819 = vperm.xlu1 %8005, %v8564_v18   ;;  %v852_v4 = vpop.f32.mrf.mxu0  ;;  %11509 = vst [vmem:[#allocation78_spill] sm:$0xff] %v9095_v54 }
 0x196   : > { %v9086_v25 = vpack.c.bf16 %v1214_v14, %v1212_v40  ;;  %v853_v7 = vadd.f32 %v8667_v5, %v852_v4  ;;  %8004 = vset.pattern.permute.xlu2 %v11490_v0 }
 0x197   : > { %2975 = vperm.xlu2 %8004, %v8581_v29  }
 0x198   : > { %11506 = vst [vmem:[#allocation75_spill] sm:$0xff] %v9086_v25  ;;  %v1135_v26 = vpop.f32.mrf.mxu2  ;;  %v9089_v51 = vpop.permute.xlu1 %3379  ;;  %v901_v18 = vmax.f32 %v853_v7, 0.0  ;;  %1711 = vmatmul.bf16.gmra.mxu3 %v9086_v25  ;;  %3807 = vperm.xlu0 %8027, %v8555_v11  }
 0x199   : > { %11507 = vst [vmem:[#allocation76_spill] sm:$0xff] %v9089_v51  ;;  %v1136_v41 = vadd.f32 %v1135_v26, %v9037_v36  ;;  %v1049_v45 = vpop.f32.mrf.mxu1  ;;  %v7591_v26 = vld [vmem:[%s11137_s6 + $0x164] sm:$0xf] }
 0x19a   : > { %v922_v14 = vpack.c.bf16 %v901_v18, %v900_v6  ;;  %v1050_v6 = vadd.f32 %v1049_v45, %v9017_v63 }
 0x19b   : > { %v1215_v40 = vmax.f32 %v1136_v41, 0.0  ;;  %v6531_v41 = vor.u32 %v7591_v26, %v6528_v52  ;;  %v9114_v18 = vpop.permute.xlu2 %3443  ;;  %v7559_v26 = vld [vmem:[%s11137_s6 + $0x64] sm:$0xf]  ;;  %v6400_v52 = vld [vmem:[%s11137_s6 + $0x70] sm:$0xf0] }
 0x19c   : > { %11512 = vst [vmem:[#allocation81_spill] sm:$0xff] %v9114_v18  ;;  %v6403_v45 = vor.u32 %v7559_v26, %v6400_v52 }
 0x19d   : > { %8007 = vset.pattern.permute.xlu1 %v11491_v35  ;;  %v9100_v3 = vpack.c.bf16 %v1215_v40, %v1213_v46  ;;  %1088 = vmatmul.bf16.gmra.mxu1 %v922_v14  ;;  %v855_v7 = vpop.f32.mrf.mxu0 }
 0x19e   : > { %3399 = vperm.xlu1 %8007, %v8581_v29   ;;  %1177 = vmatmul.bf16.gmra.mxu2 %v922_v14  ;;  %v9118_v14 = vpop.permute.xlu0 %2947  ;;  %v856_v18 = vadd.f32 %v8667_v5, %v855_v7 }
 0x19f   : > { %11510 = vst [vmem:[#allocation79_spill] sm:$0xff] %v9100_v3  ;;  %1800 = vmatmul.bf16.gmra.mxu0 %v9100_v3  ;;  %1969 = vmatpush.bf16.msrb.mxu2 %v6531_v41  ;;  %v1216_v41 = vmax.f32 %v1050_v6, 0.0 }
 0x1a0   : > { %v1138_v4 = vpop.f32.mrf.mxu2  ;;  %v9111_v49 = vpop.permute.xlu1 %2959  ;;  %11513 = vst [vmem:[#allocation82_spill] sm:$0xff] %v9118_v14  ;;  %1880 = vmatpush.bf16.msrb.mxu1 %v6403_v45  ;;  %8006 = vset.pattern.permute.xlu2 %v11485_v33  ;;  %v902_v6 = vmax.f32 %v856_v18, 0.0 }
 0x1a1   : > { %11511 = vst [vmem:[#allocation80_spill] sm:$0xff] %v9111_v49  ;;  %v1051_v46 = vpop.f32.mrf.mxu1  ;;  %v1139_v38 = vadd.f32 %v1138_v4, %v9037_v36  ;;  %3883 = vperm.xlu2 %8006, %v8988_v48   ;;  %3879 = vperm.xlu0 %8027, %v8894_v62  }
 0x1a2   : > { %v1052_v40 = vadd.f32 %v1051_v46, %v9017_v63 }
 0x1a3   : > { %v9139_v52 = vpop.permute.xlu2 %3023  ;;  %v1217_v45 = vmax.f32 %v1139_v38, 0.0 }
 0x1a4   : > { %v1218_v11 = vmax.f32 %v1052_v40, 0.0  ;;  %11516 = vst [vmem:[#allocation85_spill] sm:$0xff] %v9139_v52 }
 0x1a5   : > { %v857_v46 = vpop.f32.mrf.mxu0 }
 0x1a6   : > { %8010 = vset.pattern.permute.xlu1 %v11490_v0  ;;  %v9130_v54 = vpack.c.bf16 %v1218_v11, %v1216_v41  ;;  %v858_v24 = vadd.f32 %v8667_v5, %v857_v46  ;;  %v9144_v48 = vpop.permute.xlu0 %3019 }
 0x1a7   : > { %2979 = vperm.xlu1 %8010, %v8683_v17   ;;  %11518 = vst [vmem:[#allocation87_spill] sm:$0xff] %v9144_v48 }
 0x1a8   : > { %11514 = vst [vmem:[#allocation83_spill] sm:$0xff] %v9130_v54  ;;  %v1140_v12 = vpop.f32.mrf.mxu2  ;;  %v9135_v26 = vpop.permute.xlu1 %3803  ;;  %v903_v7 = vmax.f32 %v858_v24, 0.0  ;;  %1716 = vmatmul.bf16.gmra.mxu3 %v9130_v54 }
 0x1a9   : > { %11515 = vst [vmem:[#allocation84_spill] sm:$0xff] %v9135_v26  ;;  %v1141_v40 = vadd.f32 %v1140_v12, %v9037_v36  ;;  %v1054_v4 = vpop.f32.mrf.mxu1  ;;  %8008 = vset.pattern.permute.xlu2 %v11491_v35  ;;  %3827 = vperm.xlu0 %8027, %v8683_v17  }
 0x1aa   : > { %v923_v11 = vpack.c.bf16 %v903_v7, %v902_v6  ;;  %v1055_v62 = vadd.f32 %v1054_v4, %v9017_v63  ;;  %3463 = vperm.xlu2 %8008, %v8819_v61  }
 0x1ab   : > { %v1219_v41 = vmax.f32 %v1141_v40, 0.0  ;;  %v9154_v38 = vpop.permute.xlu2 %3867 }
 0x1ac   : > { %11520 = vst [vmem:[#allocation89_spill] sm:$0xff] %v9154_v38  ;;  %v1220_v40 = vmax.f32 %v1055_v62, 0.0 }
 0x1ad   : > { %v9142_v46 = vpack.c.bf16 %v1219_v41, %v1217_v45  ;;  %1093 = vmatmul.bf16.gmra.mxu1 %v923_v11  ;;  %v860_v18 = vpop.f32.mrf.mxu0 }
 0x1ae   : > { %1182 = vmatmul.bf16.gmra.mxu2 %v923_v11  ;;  %v861_v45 = vadd.f32 %v8667_v5, %v860_v18 }
 0x1af   : > { %11517 = vst [vmem:[#allocation86_spill] sm:$0xff] %v9142_v46  ;;  %8012 = vset.pattern.permute.xlu1 %v11485_v33  ;;  %1805 = vmatmul.bf16.gmra.mxu0 %v9142_v46 }
 0x1b0   : > { %3823 = vperm.xlu1 %8012, %v8581_v29   ;;  %v1143_v12 = vpop.f32.mrf.mxu2  ;;  %v9150_v24 = vpop.permute.xlu1 %3447  ;;  %v904_v62 = vmax.f32 %v861_v45, 0.0  ;;  %v6512_v45 = vld [vmem:[%s11137_s6 + $0x150] sm:$0xf0] }
 0x1b1   : > { %11519 = vst [vmem:[#allocation88_spill] sm:$0xff] %v9150_v24  ;;  %v1056_v6 = vpop.f32.mrf.mxu1  ;;  %v1144_v11 = vadd.f32 %v1143_v12, %v9037_v36  ;;  %v9164_v24 = vpop.permute.xlu0 %2967  ;;  %3899 = vperm.xlu0 %8027, %v9047_v42  }
 0x1b2   : > { %v1057_v7 = vadd.f32 %v1056_v6, %v9017_v63  ;;  %11522 = vst [vmem:[#allocation91_spill] sm:$0xff] %v9164_v24  ;;  %8011 = vset.pattern.permute.xlu2 %v11490_v0 }
 0x1b3   : > { %v9172_v12 = vpop.permute.xlu2 %2596  ;;  %3043 = vperm.xlu2 %8011, %v8724_v56  }
 0x1b4   : > { %v1222_v29 = vmax.f32 %v1057_v7, 0.0  ;;  %11524 = vst [vmem:[#allocation93_spill] sm:$0xff] %v9172_v12  ;;  %v1221_v7 = vmax.f32 %v1144_v11, 0.0 }
 0x1b5   : > { %v862_v41 = vpop.f32.mrf.mxu0 }
 0x1b6   : > { %v9160_v52 = vpack.c.bf16 %v1222_v29, %v1220_v40  ;;  %v863_v4 = vadd.f32 %v8667_v5, %v862_v41 }
 0x1b8   : > { %11521 = vst [vmem:[#allocation90_spill] sm:$0xff] %v9160_v52  ;;  %8014 = vset.pattern.permute.xlu1 %v11491_v35  ;;  %v1145_v38 = vpop.f32.mrf.mxu2  ;;  %v9167_v17 = vpop.permute.xlu1 %2963  ;;  %v905_v6 = vmax.f32 %v863_v4, 0.0  ;;  %1721 = vmatmul.bf16.gmra.mxu3 %v9160_v52 }
 0x1b9   : > { %3467 = vperm.xlu1 %8014, %v8724_v56   ;;  %11523 = vst [vmem:[#allocation92_spill] sm:$0xff] %v9167_v17  ;;  %v1146_v18 = vadd.f32 %v1145_v38, %v9037_v36  ;;  %v1059_v5 = vpop.f32.mrf.mxu1  ;;  %v7587_v38 = vld [vmem:[%s11137_s6 + $0x144] sm:$0xf] }
 0x1ba   : > { %v924_v29 = vpack.c.bf16 %v905_v6, %v904_v62  ;;  %v6515_v12 = vor.u32 %v7587_v38, %v6512_v45  ;;  %v1060_v62 = vadd.f32 %v1059_v5, %v9017_v63  ;;  %v6384_v5 = vld [vmem:[%s11137_s6 + $0x50] sm:$0xf0]  ;;  %v9206_v45 = vld [vmem:[%s11134_s3] ss:$0 sm:$0xff] }
 0x1bb   : > { %v1223_v40 = vmax.f32 %v1146_v18, 0.0  ;;  %v9190_v6 = vpop.permute.xlu2 %3027  ;;  %8013 = vset.pattern.permute.xlu2 %v11485_v33 }
 0x1bc   : > { %1970 = vmatpush.bf16.msrb.mxu2 %v6515_v12  ;;  %11527 = vst [vmem:[#allocation96_spill] sm:$0xff] %v9190_v6  ;;  %3887 = vperm.xlu2 %8013, %v8819_v61   ;;  %v7555_v12 = vld [vmem:[%s11137_s6 + $0x44] sm:$0xf]  ;;  %v1224_v38 = vmax.f32 %v1060_v62, 0.0 }
 0x1bd   : > { %v9176_v41 = vpack.c.bf16 %v1223_v40, %v1221_v7  ;;  %1098 = vmatmul.bf16.gmra.mxu1 %v924_v29  ;;  %v865_v4 = vpop.f32.mrf.mxu0  ;;  %v9192_v7 = vpop.permute.xlu0 %3039 }
 0x1be   : > { %1187 = vmatmul.bf16.gmra.mxu2 %v924_v29  ;;  %11528 = vst [vmem:[#allocation97_spill] sm:$0xff] %v9192_v7  ;;  %v6387_v29 = vor.u32 %v7555_v12, %v6384_v5  ;;  %v866_v7 = vadd.f32 %v9206_v45, %v865_v4 }
 0x1bf   : > { %11525 = vst [vmem:[#allocation94_spill] sm:$0xff] %v9176_v41  ;;  %1810 = vmatmul.bf16.gmra.mxu0 %v9176_v41 }
 0x1c0   : > { %v1148_v48 = vpop.f32.mrf.mxu2  ;;  %v9186_v11 = vpop.permute.xlu1 %3871  ;;  %1881 = vmatpush.bf16.msrb.mxu1 %v6387_v29  ;;  %v906_v62 = vmax.f32 %v866_v7, 0.0 }
 0x1c1   : > { %8016 = vset.pattern.permute.xlu1 %v11490_v0  ;;  %11526 = vst [vmem:[#allocation95_spill] sm:$0xff] %v9186_v11  ;;  %v1061_v18 = vpop.f32.mrf.mxu1  ;;  %v1149_v61 = vadd.f32 %v1148_v48, %v9037_v36  ;;  %v9222_v48 = vmul.f32 4.0, %v2439_v20 }
 0x1c2   : > { %2983 = vperm.xlu1 %8016, %v8572_v23   ;;  %v1062_v40 = vadd.f32 %v1061_v18, %v9017_v63 }
 0x1c3   : > { %v9219_v4 = vpop.permute.xlu2 %3387 }
 0x1c4   : > { %v1226_v18 = vmax.f32 %v1062_v40, 0.0  ;;  %11531 = vst [vmem:[#allocation100_spill] sm:$0xff] %v9219_v4  ;;  %8015 = vset.pattern.permute.xlu2 %v11486_v47 }
 0x1c5   : > { %v867_v6 = vpop.f32.mrf.mxu0  ;;  %v9225_v7 = vpop.permute.xlu0 %2987  ;;  %2621 = vperm.xlu2 %8015, %v9222_v48  }
 0x1c6   : > { %v9210_v11 = vpack.c.bf16 %v1226_v18, %v1224_v38  ;;  %v868_v24 = vadd.f32 %v9206_v45, %v867_v6  ;;  %v1225_v6 = vmax.f32 %v1149_v61, 0.0  ;;  %11532 = vst [vmem:[#allocation101_spill] sm:$0xff] %v9225_v7 }
 0x1c8   : > { %11529 = vst [vmem:[#allocation98_spill] sm:$0xff] %v9210_v11  ;;  %v1150_v17 = vpop.f32.mrf.mxu2  ;;  %v9214_v12 = vpop.permute.xlu1 %3451  ;;  %v907_v5 = vmax.f32 %v868_v24, 0.0  ;;  %1726 = vmatmul.bf16.gmra.mxu3 %v9210_v11 }
 0x1c9   : > { %11530 = vst [vmem:[#allocation99_spill] sm:$0xff] %v9214_v12  ;;  %v1151_v10 = vadd.f32 %v1150_v17, %v9037_v36  ;;  %v1064_v40 = vpop.f32.mrf.mxu1 }
 0x1ca   : > { %8018 = vset.pattern.permute.xlu1 %v11485_v33  ;;  %v925_v38 = vpack.c.bf16 %v907_v5, %v906_v62  ;;  %v1065_v20 = vadd.f32 %v1064_v40, %v9017_v63  ;;  %v7551_v5 = vld [vmem:[%s11137_s6 + $0x24] sm:$0xf] }
 0x1cb   : > { %3891 = vperm.xlu1 %8018, %v8724_v56   ;;  %v1227_v29 = vmax.f32 %v1151_v10, 0.0  ;;  %v9234_v10 = vpop.permute.xlu2 %2601 }
 0x1cc   : > { %11535 = vst [vmem:[#allocation104_spill] sm:$0xff] %v9234_v10 }
 0x1cd   : > { %v9228_v24 = vpack.c.bf16 %v1227_v29, %v1225_v6  ;;  %1103 = vmatmul.bf16.gmra.mxu1 %v925_v38  ;;  %v870_v17 = vpop.f32.mrf.mxu0  ;;  %v6368_v6 = vld [vmem:[%s11137_s6 + $0x30] sm:$0xf0]  ;;  %8017 = vset.pattern.permute.xlu2 %v11490_v0  ;;  %v7583_v29 = vld [vmem:[%s11137_s6 + $0x124] sm:$0xf]  ;;  %v9254_v4 = vpop.permute.xlu0 %3359 }
 0x1ce   : > { %1192 = vmatmul.bf16.gmra.mxu2 %v925_v38  ;;  %v6371_v40 = vor.u32 %v7551_v5, %v6368_v6  ;;  %v6496_v38 = vld [vmem:[%s11137_s6 + $0x130] sm:$0xf0]  ;;  %3047 = vperm.xlu2 %8017, %v9222_v48   ;;  %11536 = vst [vmem:[#allocation105_spill] sm:$0xff] %v9254_v4 }
 0x1cf   : > { %11533 = vst [vmem:[#allocation102_spill] sm:$0xff] %v9228_v24  ;;  %1815 = vmatmul.bf16.gmra.mxu0 %v9228_v24  ;;  %v6499_v12 = vor.u32 %v7583_v29, %v6496_v38 }
 0x1d0   : > { %v1153_v18 = vpop.f32.mrf.mxu2  ;;  %1882 = vmatpush.bf16.msrb.mxu1 %v6371_v40 }
 0x1d1   : > { %v9231_v56 = vpop.permute.xlu1 %3031  ;;  %v1066_v61 = vpop.f32.mrf.mxu1  ;;  %v1154_v5 = vadd.f32 %v1153_v18, %v9037_v36  ;;  %1971 = vmatpush.bf16.msrb.mxu2 %v6499_v12  ;;  %v6480_v12 = vld [vmem:[%s11137_s6 + $0x110] sm:$0xf0] }
 0x1d2   : > { %11534 = vst [vmem:[#allocation103_spill] sm:$0xff] %v9231_v56  ;;  %v1067_v62 = vadd.f32 %v1066_v61, %v9017_v63  ;;  %v1228_v61 = vmax.f32 %v1065_v20, 0.0  ;;  %v871_v56 = vadd.f32 %v9206_v45, %v870_v17  ;;  %v7547_v20 = vld [vmem:[%s11137_s6 + $0x4] sm:$0xf]  ;;  %v6352_v17 = vld [vmem:[%s11137_s6 + $0x10] sm:$0xf0] }
 0x1d3   : > { %8020 = vset.pattern.permute.xlu1 %v11491_v35  ;;  %v6355_v18 = vor.u32 %v7547_v20, %v6352_v17  ;;  %v1229_v51 = vmax.f32 %v1154_v5, 0.0 }
 0x1d4   : > { %3471 = vperm.xlu1 %8020, %v9222_v48   ;;  %v1230_v10 = vmax.f32 %v1067_v62, 0.0  ;;  %v7579_v62 = vld [vmem:[%s11137_s6 + $0x104] sm:$0xf] }
 0x1d5   : > { %v872_v7 = vpop.f32.mrf.mxu0  ;;  %v6483_v2 = vor.u32 %v7579_v62, %v6480_v12  ;;  %1883 = vmatpush.bf16.msrb.mxu1 %v6355_v18  ;;  %v9285_v5 = vpop.permute.xlu0 %3363 }
 0x1d6   : > { %v9257_v6 = vpack.c.bf16 %v1230_v10, %v1228_v61  ;;  %v873_v49 = vadd.f32 %v9206_v45, %v872_v7  ;;  %v908_v7 = vmax.f32 %v871_v56, 0.0  ;;  %v9276_v61 = vpop.permute.xlu2 %3811  ;;  %8019 = vset.pattern.permute.xlu2 %v11491_v35  ;;  %11541 = vst [vmem:[#allocation110_spill] sm:$0xff] %v9285_v5 }
 0x1d7   : > { %11539 = vst [vmem:[#allocation108_spill] sm:$0xff] %v9276_v61  ;;  %1972 = vmatpush.bf16.msrb.mxu2 %v6483_v2  ;;  %3407 = vperm.xlu2 %8019, %v8572_v23  }
 0x1d8   : > { %11537 = vst [vmem:[#allocation106_spill] sm:$0xff] %v9257_v6  ;;  %v1155_v40 = vpop.f32.mrf.mxu2  ;;  %v909_v10 = vmax.f32 %v873_v49, 0.0  ;;  %1731 = vmatmul.bf16.gmra.mxu3 %v9257_v6 }
 0x1d9   : > { %v1156_v38 = vadd.f32 %v1155_v40, %v9037_v36  ;;  %v1069_v26 = vpop.f32.mrf.mxu1 }
 0x1da   : > { %v9269_v29 = vpop.permute.xlu1 %3875  ;;  %v926_v30 = vpack.c.bf16 %v909_v10, %v908_v7  ;;  %v1070_v17 = vadd.f32 %v1069_v26, %v9017_v63 }
 0x1db   : > { %11538 = vst [vmem:[#allocation107_spill] sm:$0xff] %v9269_v29  ;;  %v1231_v50 = vmax.f32 %v1156_v38, 0.0 }
 0x1dc   : > { %8023 = vset.pattern.permute.xlu1 %v11490_v0 }
 0x1dd   : > { %3051 = vperm.xlu1 %8023, %v9047_v42   ;;  %v9280_v20 = vpack.c.bf16 %v1231_v50, %v1229_v51  ;;  %1108 = vmatmul.bf16.gmra.mxu1 %v926_v30  ;;  %v875_v49 = vpop.f32.mrf.mxu0  ;;  %v1232_v50 = vmax.f32 %v1070_v17, 0.0 }
 0x1de   : > { %1197 = vmatmul.bf16.gmra.mxu2 %v926_v30  ;;  %v9290_v62 = vpop.permute.xlu2 %3391  ;;  %v876_v40 = vadd.f32 %v9206_v45, %v875_v49 }
 0x1df   : > { %11540 = vst [vmem:[#allocation109_spill] sm:$0xff] %v9280_v20  ;;  %1820 = vmatmul.bf16.gmra.mxu0 %v9280_v20  ;;  %8021 = vset.pattern.permute.xlu2 %v11486_v47 }
 0x1e0   : > { %v1158_v56 = vpop.f32.mrf.mxu2  ;;  %11543 = vst [vmem:[#allocation112_spill] sm:$0xff] %v9290_v62  ;;  %2626 = vperm.xlu2 %8021, %v9047_v42  }
 0x1e1   : > { %v1071_v51 = vpop.f32.mrf.mxu1  ;;  %v1159_v7 = vadd.f32 %v1158_v56, %v9037_v36 }
 0x1e2   : > { %v1072_v30 = vadd.f32 %v1071_v51, %v9017_v63  ;;  %v910_v51 = vmax.f32 %v876_v40, 0.0 }
 0x1e3   : > { %v9288_v2 = vpop.permute.xlu1 %2606 }
 0x1e4   : > { %11542 = vst [vmem:[#allocation111_spill] sm:$0xff] %v9288_v2  ;;  %v1234_v18 = vmax.f32 %v1072_v30, 0.0  ;;  %v2441_v2 = vld [vmem:[%s8544_s28 + $0xf8] sm:$0xff] }
 0x1e5   : > { %8025 = vset.pattern.permute.xlu1 %v11485_v33  ;;  %v877_v12 = vpop.f32.mrf.mxu0  ;;  %v9311_v29 = vmul.f32 4.0, %v2441_v2 }
 0x1e6   : > { %3895 = vperm.xlu1 %8025, %v9222_v48   ;;  %v9297_v26 = vpack.c.bf16 %v1234_v18, %v1232_v50  ;;  %v878_v10 = vadd.f32 %v9206_v45, %v877_v12  ;;  %v9305_v48 = vpop.permute.xlu2 %2971  ;;  %v1233_v50 = vmax.f32 %v1159_v7, 0.0  ;;  %v9309_v12 = vpop.permute.xlu0 %3435 }
 0x1e7   : > { %11545 = vst [vmem:[#allocation114_spill] sm:$0xff] %v9305_v48 }
 0x1e8   : > { %11544 = vst [vmem:[#allocation113_spill] sm:$0xff] %v9297_v26  ;;  %v1160_v38 = vpop.f32.mrf.mxu2  ;;  %v911_v17 = vmax.f32 %v878_v10, 0.0  ;;  %1736 = vmatmul.bf16.gmra.mxu3 %v9297_v26  ;;  %8024 = vset.pattern.permute.xlu2 %v11485_v33 }
 0x1e9   : > { %v1161_v49 = vadd.f32 %v1160_v38, %v9037_v36  ;;  %11547 = vst [vmem:[#allocation116_spill] sm:$0xff] %v9309_v12  ;;  %3831 = vperm.xlu2 %8024, %v8572_v23  }
 0x1ea   : > { %v1074_v30 = vpop.f32.mrf.mxu1  ;;  %v927_v45 = vpack.c.bf16 %v911_v17, %v910_v51 }
 0x1eb   : > { %v1235_v18 = vmax.f32 %v1161_v49, 0.0  ;;  %v1075_v40 = vadd.f32 %v1074_v30, %v9017_v63 }
 0x1ec   : > { %v9307_v56 = vpop.permute.xlu1 %3035 }
 0x1ed   : > { %11546 = vst [vmem:[#allocation115_spill] sm:$0xff] %v9307_v56  ;;  %v9313_v62 = vpack.c.bf16 %v1235_v18, %v1233_v50  ;;  %1113 = vmatmul.bf16.gmra.mxu1 %v927_v45  ;;  %v1236_v51 = vmax.f32 %v1075_v40, 0.0  ;;  %v9361_v56 = vld [vmem:[%s11138_s7] sm:$0xf] }
 0x1ee   : > { %1202 = vmatmul.bf16.gmra.mxu2 %v927_v45  ;;  %8028 = vset.pattern.permute.xlu1 %v11486_v47  ;;  %v9321_v7 = vpop.permute.xlu2 %3815  ;;  %v9326_v17 = vpop.permute.xlu0 %3383  ;;  %11559 = vst [vmem:[#allocation128_spill] sm:$0xff] %v9361_v56 }
 0x1ef   : > { %11548 = vst [vmem:[#allocation117_spill] sm:$0xff] %v9313_v62  ;;  %1825 = vmatmul.bf16.gmra.mxu0 %v9313_v62  ;;  %2631 = vperm.xlu1 %8028, %v9311_v29  }
 0x1f0   : > { %v1163_v42 = vpop.f32.mrf.mxu2  ;;  %11549 = vst [vmem:[#allocation118_spill] sm:$0xff] %v9321_v7 }
 0x1f1   : > { %11551 = vst [vmem:[#allocation120_spill] sm:$0xff] %v9326_v17  ;;  %v1164_v49 = vadd.f32 %v1163_v42, %v9037_v36  ;;  %8026 = vset.pattern.permute.xlu2 %v11491_v35 }
 0x1f2   : > { %v1076_v2 = vpop.f32.mrf.mxu1  ;;  %3411 = vperm.xlu2 %8026, %v8589_v34  }
 0x1f3   : > { %v1077_v10 = vadd.f32 %v1076_v2, %v9017_v63  ;;  %v1237_v45 = vmax.f32 %v1164_v49, 0.0 }
 0x1f5   : > { %v9324_v38 = vpop.permute.xlu1 %3395  ;;  %v1238_v47 = vmax.f32 %v1077_v10, 0.0 }
 0x1f6   : > { %11550 = vst [vmem:[#allocation119_spill] sm:$0xff] %v9324_v38  ;;  %v9337_v2 = vpop.permute.xlu2 %3459 }
 0x1f7   : > { %v9329_v50 = vpack.c.bf16 %v1238_v47, %v1236_v51  ;;  %8030 = vset.pattern.permute.xlu1 %v11490_v0  ;;  %11553 = vst [vmem:[#allocation122_spill] sm:$0xff] %v9337_v2  ;;  %v9346_v51 = vpop.permute.xlu0 %3455 }
 0x1f8   : > { %v1165_v30 = vpop.f32.mrf.mxu2  ;;  %3055 = vperm.xlu1 %8030, %v9311_v29   ;;  %11556 = vst [vmem:[#allocation125_spill] sm:$0xff] %v9346_v51 }
 0x1f9   : > { %11552 = vst [vmem:[#allocation121_spill] sm:$0xff] %v9329_v50  ;;  %v1166_v23 = vadd.f32 %v1165_v30, %v9037_v36  ;;  %1741 = vmatmul.bf16.gmra.mxu3 %v9329_v50 }
 0x1fa   : > { %v1079_v18 = vpop.f32.mrf.mxu1  ;;  %8029 = vset.pattern.permute.xlu2 %v11490_v0 }
 0x1fb   : > { %v1239_v40 = vmax.f32 %v1166_v23, 0.0  ;;  %v1080_v49 = vadd.f32 %v1079_v18, %v9017_v63  ;;  %2991 = vperm.xlu2 %8029, %v8696_v28  }
 0x1fd   : > { %v9341_v10 = vpack.c.bf16 %v1239_v40, %v1237_v45  ;;  %1884 = vmatmul.bf16.vlgmr.msrb.gmra.mxu1 %v9051_v39  ;;  %v1240_v45 = vmax.f32 %v1080_v49, 0.0  ;;  %v9369_v49 = vperm.slane %v9361_v56, 0 }
 0x1fe   : > { %v9339_v42 = vpop.permute.xlu1 %2611  ;;  %1973 = vmatmul.bf16.vlgmr.msrb.gmra.mxu2 %v9067_v22  ;;  %v9356_v2 = vpop.permute.xlu2 %2975 }
 0x1ff   : > { %11554 = vst [vmem:[#allocation123_spill] sm:$0xff] %v9339_v42  ;;  %1830 = vmatmul.bf16.gmra.mxu0 %v9341_v10 }
 0x200   : > { %11555 = vst [vmem:[#allocation124_spill] sm:$0xff] %v9341_v10  ;;  %v1168_v47 = vpop.f32.mrf.mxu2  ;;  %8032 = vset.pattern.permute.xlu1 %v11491_v35 }
 0x201   : > { %3415 = vperm.xlu1 %8032, %v8696_v28   ;;  %11558 = vst [vmem:[#allocation127_spill] sm:$0xff] %v9356_v2  ;;  %v1169_v18 = vadd.f32 %v1168_v47, %v9037_v36 }
 0x202   : > { %v1081_v30 = vpop.f32.mrf.mxu1 }
 0x203   : > { %v1082_v23 = vadd.f32 %v1081_v30, %v9017_v63  ;;  %v1241_v22 = vmax.f32 %v1169_v18, 0.0  ;;  %8031 = vset.pattern.permute.xlu2 %v11485_v33 }
 0x204   : > { %3835 = vperm.xlu2 %8031, %v8589_v34  }
 0x205   : > { %v1242_v40 = vmax.f32 %v1082_v23, 0.0  ;;  %v9371_v23 = vpop.permute.xlu0 %3403 }
 0x206   : > { %11561 = vst [vmem:[#allocation130_spill] sm:$0xff] %v9371_v23 }
 0x207   : > { %v9354_v42 = vpop.permute.xlu1 %3819  ;;  %v9364_v51 = vpack.c.bf16 %v1242_v40, %v1240_v45 }
 0x208   : > { %11557 = vst [vmem:[#allocation126_spill] sm:$0xff] %v9354_v42  ;;  %v1170_v0 = vpop.f32.mrf.mxu2 }
 0x209   : > { %11560 = vst [vmem:[#allocation129_spill] sm:$0xff] %v9364_v51  ;;  %v1171_v30 = vadd.f32 %v1170_v0, %v9037_v36  ;;  %1746 = vmatmul.bf16.gmra.mxu3 %v9364_v51  ;;  %8034 = vset.pattern.permute.xlu1 %v11485_v33 }
 0x20a   : > { %v1084_v12 = vpop.f32.mrf.mxu1  ;;  %3839 = vperm.xlu1 %8034, %v8696_v28   ;;  %v9385_v28 = vpop.permute.xlu2 %3883 }
 0x20b   : > { %v1243_v39 = vmax.f32 %v1171_v30, 0.0  ;;  %v1707_v47 = vpop.f32.mrf.mxu3  ;;  %11564 = vst [vmem:[#allocation133_spill] sm:$0xff] %v9385_v28  ;;  %v1085_v30 = vadd.f32 %v1084_v12, %v9017_v63 }
 0x20c   : > { %v1796_v45 = vpop.f32.mrf.mxu0  ;;  %v1708_v0 = vadd.f32 %v1707_v47, %v9369_v49  ;;  %8033 = vset.pattern.permute.xlu2 %v11491_v35 }
 0x20d   : > { %v9377_v40 = vpack.c.bf16 %v1243_v39, %v1241_v22  ;;  %1889 = vmatmul.bf16.gmra.mxu1 %v9086_v25  ;;  %v9389_v39 = vpop.permute.xlu0 %3475  ;;  %3479 = vperm.xlu2 %8033, %v9311_v29  }
 0x20e   : > { %1978 = vmatmul.bf16.gmra.mxu2 %v9100_v3  ;;  %v1797_v56 = vadd.f32 %v1796_v45, %v1708_v0  ;;  %11565 = vst [vmem:[#allocation134_spill] sm:$0xff] %v9389_v39  ;;  %v1244_v3 = vmax.f32 %v1085_v30, 0.0 }
 0x20f   : > { %11562 = vst [vmem:[#allocation131_spill] sm:$0xff] %v9377_v40  ;;  %1835 = vmatmul.bf16.gmra.mxu0 %v9377_v40 }
 0x210   : > { %v9382_v51 = vpop.permute.xlu1 %3399  ;;  %v1173_v18 = vpop.f32.mrf.mxu2  ;;  %v2634_v12 = vmul.f32 %v8866_v15, %v1797_v56  ;;  %v3482_v39 = vmul.f32 %v8750_v27, %v1797_v56 }
 0x211   : > { %11563 = vst [vmem:[#allocation132_spill] sm:$0xff] %v9382_v51  ;;  %v1174_v10 = vadd.f32 %v1173_v18, %v9037_v36 }
 0x212   : > { %v1086_v23 = vpop.f32.mrf.mxu1 }
 0x213   : > { %v1087_v34 = vadd.f32 %v1086_v23, %v9017_v63  ;;  %v1709_v22 = vpop.f32.mrf.mxu3  ;;  %v3058_v23 = vmul.f32 %v9077_v9, %v1797_v56 }
 0x214   : > { %v1798_v47 = vpop.f32.mrf.mxu0  ;;  %v1710_v45 = vadd.f32 %v1709_v22, %v9369_v49 }
 0x215   : > { %v1246_v25 = vmax.f32 %v1087_v34, 0.0  ;;  %8035 = vset.pattern.permute.xlu2 %v11485_v33 }
 0x216   : > { %v1799_v28 = vadd.f32 %v1798_v47, %v1710_v45  ;;  %v3906_v47 = vmul.f32 %v8781_v43, %v1797_v56  ;;  %v9416_v56 = vpop.permute.xlu0 %3787  ;;  %3903 = vperm.xlu2 %8035, %v9311_v29  }
 0x217   : > { %v9394_v0 = vpack.c.bf16 %v1246_v25, %v1244_v3  ;;  %v9407_v3 = vpop.permute.xlu2 %3463  ;;  %11570 = vst [vmem:[#allocation139_spill] sm:$0xff] %v9416_v56 }
 0x218   : > { %v1175_v35 = vpop.f32.mrf.mxu2  ;;  %v2638_v30 = vmul.f32 %v8900_v32, %v1799_v28  ;;  %v3062_v34 = vmul.f32 %v8719_v53, %v1799_v28  ;;  %v3486_v22 = vmul.f32 %v9254_v4, %v1799_v28  ;;  %v3910_v25 = vmul.f32 %v8794_v60, %v1799_v28  ;;  %11568 = vst [vmem:[#allocation137_spill] sm:$0xff] %v9407_v3 }
 0x219   : > { %11566 = vst [vmem:[#allocation135_spill] sm:$0xff] %v9394_v0  ;;  %v9396_v40 = vpop.permute.xlu1 %2979  ;;  %1751 = vmatmul.bf16.gmra.mxu3 %v9394_v0  ;;  %v1176_v45 = vadd.f32 %v1175_v35, %v9037_v36 }
 0x21a   : > { %11567 = vst [vmem:[#allocation136_spill] sm:$0xff] %v9396_v40  ;;  %v1089_v27 = vpop.f32.mrf.mxu1  ;;  %v2762_v9 = vmax.f32 %v2634_v12, %v2638_v30  ;;  %v3186_v18 = vmax.f32 %v3058_v23, %v3062_v34  ;;  %v3610_v15 = vmax.f32 %v3482_v39, %v3486_v22  ;;  %v1245_v40 = vmax.f32 %v1174_v10, 0.0  ;;  %v6470_v22 = vld [vmem:[%s11137_s6 + $0xe8] sm:$0xf] }
 0x21b   : > { %v1247_v32 = vmax.f32 %v1176_v45, 0.0  ;;  %v1712_v50 = vpop.f32.mrf.mxu3  ;;  %v4034_v51 = vmax.f32 %v3906_v47, %v3910_v25  ;;  %v7578_v25 = vld [vmem:[%s11137_s6 + $0xf4] sm:$0xf0]  ;;  %v7608_v47 = vld [vmem:[%s11137_s6 + $0x1ec] sm:$0xf] }
 0x21c   : > { %v1801_v53 = vpop.f32.mrf.mxu0  ;;  %v1713_v4 = vadd.f32 %v1712_v50, %v9369_v49 }
 0x21d   : > { %1894 = vmatmul.bf16.gmra.mxu1 %v9130_v54  ;;  %v9414_v28 = vpack.c.bf16 %v1247_v32, %v1245_v40  ;;  %v1090_v40 = vadd.f32 %v1089_v27, %v9017_v63 }
 0x21e   : > { %1983 = vmatmul.bf16.gmra.mxu2 %v9142_v46  ;;  %v1802_v12 = vadd.f32 %v1801_v53, %v1713_v4 }
 0x21f   : > { %11569 = vst [vmem:[#allocation138_spill] sm:$0xff] %v9414_v28  ;;  %1840 = vmatmul.bf16.gmra.mxu0 %v9414_v28  ;;  %v9428_v34 = vpop.permute.xlu2 %3043 }
 0x220   : > { %v2642_v39 = vmul.f32 %v8638_v55, %v1802_v12  ;;  %v3066_v50 = vmul.f32 %v8783_v8, %v1802_v12  ;;  %v3490_v23 = vmul.f32 %v9285_v5, %v1802_v12  ;;  %v3914_v35 = vmul.f32 %v9416_v56, %v1802_v12  ;;  %11572 = vst [vmem:[#allocation141_spill] sm:$0xff] %v9428_v34 }
 0x221   : > { %v1178_v10 = vpop.f32.mrf.mxu2 }
 0x222   : > { %v9425_v32 = vpop.permute.xlu1 %3823  ;;  %v1091_v30 = vpop.f32.mrf.mxu1  ;;  %v2763_v33 = vmax.f32 %v2762_v9, %v2642_v39  ;;  %v3187_v53 = vmax.f32 %v3186_v18, %v3066_v50  ;;  %v3611_v4 = vmax.f32 %v3610_v15, %v3490_v23  ;;  %v4035_v29 = vmax.f32 %v4034_v51, %v3914_v35  ;;  %v6600_v51 = vld [vmem:[%s11137_s6 + $0x1f8] sm:$0xf0]  ;;  %v7576_v18 = vld [vmem:[%s11137_s6 + $0xec] sm:$0xf] }
 0x223   : > { %11571 = vst [vmem:[#allocation140_spill] sm:$0xff] %v9425_v32  ;;  %v1092_v27 = vadd.f32 %v1091_v30, %v9017_v63  ;;  %v1714_v9 = vpop.f32.mrf.mxu3  ;;  %v6471_v15 = vor.u32 %v7578_v25, %v6470_v22  ;;  %v6603_v39 = vor.u32 %v7608_v47, %v6600_v51  ;;  %v6472_v50 = vld [vmem:[%s11137_s6 + $0xf8] sm:$0xf0]  ;;  %v1248_v23 = vmax.f32 %v1090_v40, 0.0 }
 0x224   : > { %v1803_v45 = vpop.f32.mrf.mxu0  ;;  %v1715_v12 = vadd.f32 %v1714_v9, %v9369_v49  ;;  %v6475_v30 = vor.u32 %v7576_v18, %v6472_v50  ;;  %v1179_v25 = vadd.f32 %v1178_v10, %v9037_v36  ;;  %v7610_v50 = vld [vmem:[%s11137_s6 + $0x1f4] sm:$0xf0] }
 0x225   : > { %v1250_v35 = vmax.f32 %v1092_v27, 0.0  ;;  %2054 = vmatpush.bf16.msrb.mxu3 %v6471_v15  ;;  %2321 = vmatpush.bf16.msra.mxu2 %v6603_v39  ;;  %v6598_v39 = vld [vmem:[%s11137_s6 + $0x1e8] sm:$0xf] }
 0x226   : > { %v1804_v22 = vadd.f32 %v1803_v45, %v1715_v12  ;;  %2232 = vmatpush.bf16.msra.mxu1 %v6475_v30 }
 0x227   : > { %v9451_v34 = vpack.c.bf16 %v1250_v35, %v1248_v23  ;;  %v1249_v23 = vmax.f32 %v1179_v25, 0.0 }
 0x228   : > { %v2646_v46 = vmul.f32 %v8646_v58, %v1804_v22  ;;  %v3070_v47 = vmul.f32 %v8840_v21, %v1804_v22  ;;  %v3494_v9 = vmul.f32 %v8898_v16, %v1804_v22  ;;  %v3918_v51 = vmul.f32 %v8978_v31, %v1804_v22 }
 0x229   : > { %11573 = vst [vmem:[#allocation142_spill] sm:$0xff] %v9451_v34  ;;  %v1180_v3 = vpop.f32.mrf.mxu2  ;;  %1756 = vmatmul.bf16.gmra.mxu3 %v9451_v34  ;;  %v6599_v22 = vor.u32 %v7610_v50, %v6598_v39 }
 0x22a   : > { %v1181_v40 = vadd.f32 %v1180_v3, %v9037_v36  ;;  %v1094_v27 = vpop.f32.mrf.mxu1  ;;  %v2764_v45 = vmax.f32 %v2763_v33, %v2646_v46  ;;  %v3188_v15 = vmax.f32 %v3187_v53, %v3070_v47  ;;  %v3612_v10 = vmax.f32 %v3611_v4, %v3494_v9  ;;  %v9470_v33 = vpop.permute.xlu2 %3887 }
 0x22b   : > { %v4036_v18 = vmax.f32 %v4035_v29, %v3918_v51  ;;  %v9459_v12 = vpop.permute.xlu1 %3467  ;;  %v1717_v3 = vpop.f32.mrf.mxu3  ;;  %11575 = vst [vmem:[#allocation144_spill] sm:$0xff] %v9470_v33  ;;  %2143 = vmatpush.bf16.msra.mxu0 %v6599_v22 }
 0x22c   : > { %11574 = vst [vmem:[#allocation143_spill] sm:$0xff] %v9459_v12  ;;  %v1251_v35 = vmax.f32 %v1181_v40, 0.0  ;;  %v1806_v30 = vpop.f32.mrf.mxu0  ;;  %v1718_v46 = vadd.f32 %v1717_v3, %v9369_v49  ;;  %v1095_v40 = vadd.f32 %v1094_v27, %v9017_v63 }
 0x22d   : > { %1899 = vmatmul.bf16.gmra.mxu1 %v9160_v52 }
 0x22e   : > { %1988 = vmatmul.bf16.gmra.mxu2 %v9176_v41  ;;  %v9472_v53 = vpack.c.bf16 %v1251_v35, %v1249_v23  ;;  %v1807_v4 = vadd.f32 %v1806_v30, %v1718_v46  ;;  %v1252_v41 = vmax.f32 %v1095_v40, 0.0 }
 0x230   : > { %11576 = vst [vmem:[#allocation145_spill] sm:$0xff] %v9472_v53  ;;  %1845 = vmatmul.bf16.gmra.mxu0 %v9472_v53  ;;  %v2650_v25 = vmul.f32 %v8644_v57, %v1807_v4  ;;  %v3074_v47 = vmul.f32 %v9118_v14, %v1807_v4  ;;  %v3498_v9 = vmul.f32 %v8997_v59, %v1807_v4 }
 0x231   : > { %v1183_v29 = vpop.f32.mrf.mxu2  ;;  %v3922_v51 = vmul.f32 %v9031_v19, %v1807_v4 }
 0x232   : > { %v1096_v39 = vpop.f32.mrf.mxu1  ;;  %v2765_v50 = vmax.f32 %v2764_v45, %v2650_v25  ;;  %v3189_v3 = vmax.f32 %v3188_v15, %v3074_v47  ;;  %v3613_v23 = vmax.f32 %v3612_v10, %v3498_v9  ;;  %v9484_v59 = vpop.permute.xlu2 %2621  ;;  %v1184_v27 = vadd.f32 %v1183_v29, %v9037_v36 }
 0x233   : > { %v4037_v35 = vmax.f32 %v4036_v18, %v3922_v51  ;;  %v1097_v30 = vadd.f32 %v1096_v39, %v9017_v63  ;;  %v1719_v22 = vpop.f32.mrf.mxu3  ;;  %11578 = vst [vmem:[#allocation147_spill] sm:$0xff] %v9484_v59  ;;  %v9495_v29 = vpop.permute.xlu0 %3859 }
 0x234   : > { %v1808_v46 = vpop.f32.mrf.mxu0  ;;  %v1720_v12 = vadd.f32 %v1719_v22, %v9369_v49  ;;  %v9482_v33 = vpop.permute.xlu1 %2983  ;;  %11580 = vst [vmem:[#allocation149_spill] sm:$0xff] %v9495_v29 }
 0x235   : > { %11577 = vst [vmem:[#allocation146_spill] sm:$0xff] %v9482_v33  ;;  %v1254_v52 = vmax.f32 %v1097_v30, 0.0 }
 0x236   : > { %v1809_v54 = vadd.f32 %v1808_v46, %v1720_v12 }
 0x237   : > { %v9487_v4 = vpack.c.bf16 %v1254_v52, %v1252_v41  ;;  %v1253_v52 = vmax.f32 %v1184_v27, 0.0 }
 0x238   : > { %v2654_v15 = vmul.f32 %v8659_v1, %v1809_v54  ;;  %v3078_v10 = vmul.f32 %v9009_v44, %v1809_v54  ;;  %v3502_v18 = vmul.f32 %v9027_v13, %v1809_v54  ;;  %v3926_v25 = vmul.f32 %v9071_v37, %v1809_v54 }
 0x239   : > { %11579 = vst [vmem:[#allocation148_spill] sm:$0xff] %v9487_v4  ;;  %v1185_v45 = vpop.f32.mrf.mxu2  ;;  %1761 = vmatmul.bf16.gmra.mxu3 %v9487_v4 }
 0x23a   : > { %v1186_v47 = vadd.f32 %v1185_v45, %v9037_v36  ;;  %v1099_v12 = vpop.f32.mrf.mxu1  ;;  %v2766_v9 = vmax.f32 %v2765_v50, %v2654_v15  ;;  %v3190_v51 = vmax.f32 %v3189_v3, %v3078_v10  ;;  %v3614_v40 = vmax.f32 %v3613_v23, %v3502_v18  ;;  %v11583_v23 = vld [vmem:[#allocation54_spill] sm:$0xff]  ;;  %v11584_v15 = vld [vmem:[#allocation73_spill] sm:$0xff]  ;;  %v11585_v10 = vld [vmem:[#allocation76_spill] sm:$0xff] }
 0x23b   : > { %v1722_v39 = vpop.f32.mrf.mxu3  ;;  %v4038_v22 = vmax.f32 %v4037_v35, %v3926_v25  ;;  %v1100_v50 = vadd.f32 %v1099_v12, %v9017_v63  ;;  %v11586_v25 = vld [vmem:[#allocation84_spill] sm:$0xff] }
 0x23c   : > { %v1255_v41 = vmax.f32 %v1186_v47, 0.0  ;;  %v1811_v30 = vpop.f32.mrf.mxu0  ;;  %v1723_v46 = vadd.f32 %v1722_v39, %v9369_v49  ;;  %v9510_v39 = vpop.permute.xlu2 %3047 }
 0x23d   : > { %1904 = vmatmul.bf16.gmra.mxu1 %v9210_v11  ;;  %v9502_v59 = vpop.permute.xlu1 %3891  ;;  %11587 = vst [vmem:[#allocation152_spill] sm:$0xff] %v9510_v39 }
 0x23e   : > { %1993 = vmatmul.bf16.gmra.mxu2 %v9228_v24  ;;  %v9500_v54 = vpack.c.bf16 %v1255_v41, %v1253_v52  ;;  %v1812_v45 = vadd.f32 %v1811_v30, %v1723_v46  ;;  %11582 = vst [vmem:[#allocation151_spill] sm:$0xff] %v9502_v59  ;;  %v6454_v59 = vld [vmem:[%s11137_s6 + $0xc8] sm:$0xf]  ;;  %v9538_v24 = vpop.permute.xlu0 %3807 }
 0x23f   : > { %11588 = vst [vmem:[#allocation153_spill] sm:$0xff] %v9538_v24 }
 0x240   : > { %11581 = vst [vmem:[#allocation150_spill] sm:$0xff] %v9500_v54  ;;  %1850 = vmatmul.bf16.gmra.mxu0 %v9500_v54  ;;  %v2658_v27 = vmul.f32 %v11583_v23, %v1812_v45  ;;  %v3082_v35 = vmul.f32 %v11584_v15, %v1812_v45  ;;  %v3506_v18 = vmul.f32 %v11585_v10, %v1812_v45  ;;  %v7574_v10 = vld [vmem:[%s11137_s6 + $0xd4] sm:$0xf0]  ;;  %v6456_v23 = vld [vmem:[%s11137_s6 + $0xd8] sm:$0xf0] }
 0x241   : > { %v1188_v3 = vpop.f32.mrf.mxu2  ;;  %v3930_v47 = vmul.f32 %v11586_v25, %v1812_v45  ;;  %v7604_v45 = vld [vmem:[%s11137_s6 + $0x1cc] sm:$0xf] }
 0x242   : > { %v1101_v52 = vpop.f32.mrf.mxu1  ;;  %v9512_v41 = vmax.f32 %v2766_v9, %v2658_v27  ;;  %v9514_v30 = vmax.f32 %v3190_v51, %v3082_v35  ;;  %v9516_v46 = vmax.f32 %v3614_v40, %v3506_v18  ;;  %v6455_v35 = vor.u32 %v7574_v10, %v6454_v59  ;;  %v6584_v40 = vld [vmem:[%s11137_s6 + $0x1d8] sm:$0xf0]  ;;  %v7572_v18 = vld [vmem:[%s11137_s6 + $0xcc] sm:$0xf] }
 0x243   : > { %v1102_v12 = vadd.f32 %v1101_v52, %v9017_v63  ;;  %v1724_v9 = vpop.f32.mrf.mxu3  ;;  %v4039_v51 = vmax.f32 %v4038_v22, %v3930_v47  ;;  %v1256_v52 = vmax.f32 %v1100_v50, 0.0  ;;  %v6587_v15 = vor.u32 %v7604_v45, %v6584_v40  ;;  %v11590_v50 = vld [vmem:[#allocation23_spill] sm:$0xff] }
 0x244   : > { %v1813_v27 = vpop.f32.mrf.mxu0  ;;  %v1725_v25 = vadd.f32 %v1724_v9, %v9369_v49  ;;  %2055 = vmatpush.bf16.msrb.mxu3 %v6455_v35  ;;  %v6459_v59 = vor.u32 %v7572_v18, %v6456_v23  ;;  %v1189_v47 = vadd.f32 %v1188_v3, %v9037_v36  ;;  %v11591_v9 = vld [vmem:[#allocation80_spill] sm:$0xff]  ;;  %v9554_v35 = vpop.permute.xlu2 %3407  ;;  %v6582_v18 = vld [vmem:[%s11137_s6 + $0x1c8] sm:$0xf] }
 0x245   : > { %v1258_v39 = vmax.f32 %v1102_v12, 0.0  ;;  %2322 = vmatpush.bf16.msra.mxu2 %v6587_v15  ;;  %11593 = vst [vmem:[#allocation156_spill] sm:$0xff] %v9554_v35 }
 0x246   : > { %v1814_v10 = vadd.f32 %v1813_v27, %v1725_v25  ;;  %2233 = vmatpush.bf16.msra.mxu1 %v6459_v59  ;;  %v9547_v54 = vpop.permute.xlu1 %3471 }
 0x247   : > { %v9540_v22 = vpack.c.bf16 %v1258_v39, %v1256_v52  ;;  %11592 = vst [vmem:[#allocation155_spill] sm:$0xff] %v9547_v54  ;;  %v1257_v52 = vmax.f32 %v1189_v47, 0.0  ;;  %v6438_v47 = vld [vmem:[%s11137_s6 + $0xa8] sm:$0xf] }
 0x248   : > { %v2662_v12 = vmul.f32 %v11590_v50, %v1814_v10  ;;  %v3086_v45 = vmul.f32 %v11591_v9, %v1814_v10  ;;  %v3510_v40 = vmul.f32 %v9326_v17, %v1814_v10  ;;  %v3934_v29 = vmul.f32 %v9538_v24, %v1814_v10 }
 0x249   : > { %11589 = vst [vmem:[#allocation154_spill] sm:$0xff] %v9540_v22  ;;  %v1190_v11 = vpop.f32.mrf.mxu2  ;;  %1766 = vmatmul.bf16.gmra.mxu3 %v9540_v22 }
 0x24a   : > { %v1191_v23 = vadd.f32 %v1190_v11, %v9037_v36  ;;  %v1104_v25 = vpop.f32.mrf.mxu1  ;;  %v2768_v15 = vmax.f32 %v9512_v41, %v2662_v12  ;;  %v3192_v3 = vmax.f32 %v9514_v30, %v3086_v45  ;;  %v3616_v39 = vmax.f32 %v9516_v46, %v3510_v40  ;;  %v7606_v11 = vld [vmem:[%s11137_s6 + $0x1d4] sm:$0xf0]  ;;  %v11595_v45 = vld [vmem:[#allocation24_spill] sm:$0xff] }
 0x24b   : > { %v4040_v27 = vmax.f32 %v4039_v51, %v3934_v29  ;;  %v1727_v10 = vpop.f32.mrf.mxu3  ;;  %v6583_v41 = vor.u32 %v7606_v11, %v6582_v18  ;;  %v7570_v12 = vld [vmem:[%s11137_s6 + $0xb4] sm:$0xf0]  ;;  %v11597_v11 = vld [vmem:[#allocation100_spill] sm:$0xff] }
 0x24c   : > { %v1259_v59 = vmax.f32 %v1191_v23, 0.0  ;;  %v1816_v54 = vpop.f32.mrf.mxu0  ;;  %v1728_v30 = vadd.f32 %v1727_v10, %v9369_v49  ;;  %v11596_v23 = vld [vmem:[#allocation92_spill] sm:$0xff] }
 0x24d   : > { %1909 = vmatmul.bf16.gmra.mxu1 %v9257_v6  ;;  %2144 = vmatpush.bf16.msra.mxu0 %v6583_v41  ;;  %v6439_v41 = vor.u32 %v7570_v12, %v6438_v47  ;;  %v6566_v12 = vld [vmem:[%s11137_s6 + $0x1a8] sm:$0xf] }
 0x24e   : > { %1998 = vmatmul.bf16.gmra.mxu2 %v9280_v20  ;;  %v9565_v29 = vpack.c.bf16 %v1259_v59, %v1257_v52  ;;  %v1817_v46 = vadd.f32 %v1816_v54, %v1728_v30  ;;  %v1105_v54 = vadd.f32 %v1104_v25, %v9017_v63  ;;  %v6422_v25 = vld [vmem:[%s11137_s6 + $0x88] sm:$0xf] }
 0x24f   : > { %v9587_v9 = vpop.permute.xlu1 %3051  ;;  %2056 = vmatpush.bf16.msrb.mxu3 %v6439_v41  ;;  %v11601_v41 = vld [vmem:[#allocation57_spill] sm:$0xff] }
 0x250   : > { %11594 = vst [vmem:[#allocation157_spill] sm:$0xff] %v9565_v29  ;;  %1855 = vmatmul.bf16.gmra.mxu0 %v9565_v29  ;;  %v2666_v40 = vmul.f32 %v11595_v45, %v1817_v46  ;;  %v3090_v18 = vmul.f32 %v11596_v23, %v1817_v46  ;;  %v3514_v52 = vmul.f32 %v11597_v11, %v1817_v46 }
 0x251   : > { %v1193_v51 = vpop.f32.mrf.mxu2  ;;  %v3938_v59 = vmul.f32 %v9276_v61, %v1817_v46  ;;  %11598 = vst [vmem:[#allocation158_spill] sm:$0xff] %v9587_v9  ;;  %v1260_v46 = vmax.f32 %v1105_v54, 0.0  ;;  %v7562_v54 = vld [vmem:[%s11137_s6 + $0x74] sm:$0xf0] }
 0x252   : > { %v1106_v10 = vpop.f32.mrf.mxu1  ;;  %v9579_v30 = vmax.f32 %v2768_v15, %v2666_v40  ;;  %v9581_v20 = vmax.f32 %v3192_v3, %v3090_v18  ;;  %v9583_v24 = vmax.f32 %v3616_v39, %v3514_v52  ;;  %v7566_v15 = vld [vmem:[%s11137_s6 + $0x94] sm:$0xf0]  ;;  %v9597_v39 = vpop.permute.xlu2 %2626 }
 0x253   : > { %v9585_v17 = vmax.f32 %v4040_v27, %v3938_v59  ;;  %v1107_v23 = vadd.f32 %v1106_v10, %v9017_v63  ;;  %v1729_v45 = vpop.f32.mrf.mxu3  ;;  %11599 = vst [vmem:[#allocation159_spill] sm:$0xff] %v9597_v39  ;;  %v6423_v27 = vor.u32 %v7566_v15, %v6422_v25  ;;  %v7602_v40 = vld [vmem:[%s11137_s6 + $0x1b4] sm:$0xf0]  ;;  %v1194_v59 = vadd.f32 %v1193_v51, %v9037_v36  ;;  %v11602_v15 = vld [vmem:[#allocation91_spill] sm:$0xff] }
 0x254   : > { %v1818_v11 = vpop.f32.mrf.mxu0  ;;  %v1730_v3 = vadd.f32 %v1729_v45, %v9369_v49  ;;  %v6567_v52 = vor.u32 %v7602_v40, %v6566_v12  ;;  %v6550_v12 = vld [vmem:[%s11137_s6 + $0x188] sm:$0xf]  ;;  %v7598_v40 = vld [vmem:[%s11137_s6 + $0x194] sm:$0xf0] }
 0x255   : > { %v1262_v47 = vmax.f32 %v1107_v23, 0.0  ;;  %2057 = vmatpush.bf16.msrb.mxu3 %v6423_v27  ;;  %v6406_v23 = vld [vmem:[%s11137_s6 + $0x68] sm:$0xf] }
 0x256   : > { %v1819_v18 = vadd.f32 %v1818_v11, %v1730_v3  ;;  %v11603_v11 = vld [vmem:[#allocation112_spill] sm:$0xff]  ;;  %2145 = vmatpush.bf16.msra.mxu0 %v6567_v52 }
 0x257   : > { %v9606_v10 = vpack.c.bf16 %v1262_v47, %v1260_v46  ;;  %v6407_v47 = vor.u32 %v7562_v54, %v6406_v23  ;;  %v6551_v54 = vor.u32 %v7598_v40, %v6550_v12 }
 0x258   : > { %v2670_v25 = vmul.f32 %v11601_v41, %v1819_v18  ;;  %v3094_v9 = vmul.f32 %v11602_v15, %v1819_v18  ;;  %v3518_v3 = vmul.f32 %v11603_v11, %v1819_v18  ;;  %v3942_v51 = vmul.f32 %v9321_v7, %v1819_v18  ;;  %v6390_v41 = vld [vmem:[%s11137_s6 + $0x48] sm:$0xf] }
 0x259   : > { %11600 = vst [vmem:[#allocation160_spill] sm:$0xff] %v9606_v10  ;;  %v1195_v45 = vpop.f32.mrf.mxu2  ;;  %1771 = vmatmul.bf16.gmra.mxu3 %v9606_v10 }
 0x25a   : > { %v1196_v46 = vadd.f32 %v1195_v45, %v9037_v36  ;;  %v1109_v27 = vpop.f32.mrf.mxu1  ;;  %v2770_v39 = vmax.f32 %v9579_v30, %v2670_v25  ;;  %v3194_v11 = vmax.f32 %v9581_v20, %v3094_v9  ;;  %v3618_v18 = vmax.f32 %v9583_v24, %v3518_v3  ;;  %2058 = vmatpush.bf16.msrb.mxu3 %v6407_v47  ;;  %v7558_v30 = vld [vmem:[%s11137_s6 + $0x54] sm:$0xf0]  ;;  %v9639_v24 = vpop.permute.xlu1 %3895 }
 0x25b   : > { %v4042_v52 = vmax.f32 %v9585_v17, %v3942_v51  ;;  %v1261_v45 = vmax.f32 %v1194_v59, 0.0  ;;  %v1732_v15 = vpop.f32.mrf.mxu3  ;;  %11604 = vst [vmem:[#allocation161_spill] sm:$0xff] %v9639_v24  ;;  %v6391_v17 = vor.u32 %v7558_v30, %v6390_v41  ;;  %2146 = vmatpush.bf16.msra.mxu0 %v6551_v54  ;;  %v6534_v59 = vld [vmem:[%s11137_s6 + $0x168] sm:$0xf]  ;;  %v7594_v25 = vld [vmem:[%s11137_s6 + $0x174] sm:$0xf0]  ;;  %v1110_v54 = vadd.f32 %v1109_v27, %v9017_v63  ;;  %v9677_v27 = vpop.permute.xlu0 %3879 }
 0x25c   : > { %v1263_v7 = vmax.f32 %v1196_v46, 0.0  ;;  %v1821_v23 = vpop.f32.mrf.mxu0  ;;  %v1733_v20 = vadd.f32 %v1732_v15, %v9369_v49  ;;  %v9649_v15 = vpop.permute.xlu2 %3831  ;;  %v6535_v51 = vor.u32 %v7594_v25, %v6534_v59  ;;  %v7554_v41 = vld [vmem:[%s11137_s6 + $0x34] sm:$0xf0]  ;;  %11608 = vst [vmem:[#allocation164_spill] sm:$0xff] %v9677_v27 }
 0x25d   : > { %1914 = vmatmul.bf16.gmra.mxu1 %v9297_v26  ;;  %11606 = vst [vmem:[#allocation163_spill] sm:$0xff] %v9649_v15  ;;  %v11607_v47 = vld [vmem:[#allocation25_spill] sm:$0xff] }
 0x25e   : > { %2003 = vmatmul.bf16.gmra.mxu2 %v9313_v62  ;;  %v9641_v9 = vpack.c.bf16 %v1263_v7, %v1261_v45  ;;  %v1822_v3 = vadd.f32 %v1821_v23, %v1733_v20  ;;  %2059 = vmatpush.bf16.msrb.mxu3 %v6391_v17  ;;  %v6374_v7 = vld [vmem:[%s11137_s6 + $0x28] sm:$0xf]  ;;  %v7590_v59 = vld [vmem:[%s11137_s6 + $0x154] sm:$0xf0] }
 0x25f   : > { %2147 = vmatpush.bf16.msra.mxu0 %v6535_v51  ;;  %v6375_v20 = vor.u32 %v7554_v41, %v6374_v7  ;;  %v6518_v17 = vld [vmem:[%s11137_s6 + $0x148] sm:$0xf]  ;;  %v7600_v51 = vld [vmem:[%s11137_s6 + $0x1ac] sm:$0xf]  ;;  %v6568_v7 = vld [vmem:[%s11137_s6 + $0x1b8] sm:$0xf0] }
 0x260   : > { %11605 = vst [vmem:[#allocation162_spill] sm:$0xff] %v9641_v9  ;;  %1860 = vmatmul.bf16.gmra.mxu0 %v9641_v9  ;;  %v2674_v12 = vmul.f32 %v11607_v47, %v1822_v3  ;;  %v3098_v40 = vmul.f32 %v9305_v48, %v1822_v3  ;;  %v3522_v45 = vmul.f32 %v9324_v38, %v1822_v3 }
 0x261   : > { %v1198_v46 = vpop.f32.mrf.mxu2  ;;  %v3946_v23 = vmul.f32 %v9354_v42, %v1822_v3 }
 0x262   : > { %v1111_v30 = vpop.f32.mrf.mxu1  ;;  %v9669_v25 = vmax.f32 %v2770_v39, %v2674_v12  ;;  %v9671_v24 = vmax.f32 %v3194_v11, %v3098_v40  ;;  %v9673_v62 = vmax.f32 %v3618_v18, %v3522_v45  ;;  %v6571_v11 = vor.u32 %v7600_v51, %v6568_v7  ;;  %v7568_v18 = vld [vmem:[%s11137_s6 + $0xac] sm:$0xf]  ;;  %2060 = vmatpush.bf16.msrb.mxu3 %v6375_v20  ;;  %v7550_v51 = vld [vmem:[%s11137_s6 + $0x14] sm:$0xf0]  ;;  %v9699_v48 = vpop.permute.xlu1 %2631  ;;  %v6502_v20 = vld [vmem:[%s11137_s6 + $0x128] sm:$0xf] }
 0x263   : > { %v9675_v3 = vmax.f32 %v4042_v52, %v3946_v23  ;;  %v1112_v41 = vadd.f32 %v1111_v30, %v9017_v63  ;;  %v1734_v39 = vpop.f32.mrf.mxu3  ;;  %v6440_v52 = vld [vmem:[%s11137_s6 + $0xb8] sm:$0xf0]  ;;  %v6519_v40 = vor.u32 %v7590_v59, %v6518_v17  ;;  %v6358_v30 = vld [vmem:[%s11137_s6 + $0x8] sm:$0xf]  ;;  %v1264_v7 = vmax.f32 %v1110_v54, 0.0  ;;  %11609 = vst [vmem:[#allocation165_spill] sm:$0xff] %v9699_v48 }
 0x264   : > { %v1823_v12 = vpop.f32.mrf.mxu0  ;;  %v1735_v45 = vadd.f32 %v1734_v39, %v9369_v49  ;;  %v6443_v23 = vor.u32 %v7568_v18, %v6440_v52  ;;  %2323 = vmatpush.bf16.msra.mxu2 %v6571_v11  ;;  %v6359_v42 = vor.u32 %v7550_v51, %v6358_v30  ;;  %v7586_v17 = vld [vmem:[%s11137_s6 + $0x134] sm:$0xf0]  ;;  %v1199_v59 = vadd.f32 %v1198_v46, %v9037_v36  ;;  %v11611_v11 = vld [vmem:[#allocation26_spill] sm:$0xff]  ;;  %v11612_v52 = vld [vmem:[#allocation132_spill] sm:$0xff] }
 0x265   : > { %v1266_v26 = vmax.f32 %v1112_v41, 0.0  ;;  %2148 = vmatpush.bf16.msra.mxu0 %v6519_v40  ;;  %v6503_v41 = vor.u32 %v7586_v17, %v6502_v20 }
 0x266   : > { %v1824_v38 = vadd.f32 %v1823_v12, %v1735_v45  ;;  %2234 = vmatpush.bf16.msra.mxu1 %v6443_v23  ;;  %2061 = vmatpush.bf16.msrb.mxu3 %v6359_v42  ;;  %v9714_v23 = vpop.permute.xlu2 %3411 }
 0x267   : > { %v9708_v39 = vpack.c.bf16 %v1266_v26, %v1264_v7  ;;  %11613 = vst [vmem:[#allocation167_spill] sm:$0xff] %v9714_v23  ;;  %v1265_v7 = vmax.f32 %v1199_v59, 0.0 }
 0x268   : > { %v2678_v12 = vmul.f32 %v11611_v11, %v1824_v38  ;;  %v3102_v18 = vmul.f32 %v9356_v2, %v1824_v38  ;;  %v3526_v40 = vmul.f32 %v11612_v52, %v1824_v38  ;;  %v3950_v45 = vmul.f32 %v9425_v32, %v1824_v38  ;;  %v11614_v52 = vld [vmem:[#allocation121_spill] sm:$0xff] }
 0x269   : > { %11610 = vst [vmem:[#allocation166_spill] sm:$0xff] %v9708_v39  ;;  %v1200_v54 = vpop.f32.mrf.mxu2  ;;  %1776 = vmatmul.bf16.gmra.mxu3 %v9708_v39  ;;  %2149 = vmatpush.bf16.msra.mxu0 %v6503_v41  ;;  %v9727_v41 = vpop.permute.xlu0 %3827 }
 0x26a   : > { %v1201_v30 = vadd.f32 %v1200_v54, %v9037_v36  ;;  %v1114_v46 = vpop.f32.mrf.mxu1  ;;  %v2772_v26 = vmax.f32 %v9669_v25, %v2678_v12  ;;  %v3196_v42 = vmax.f32 %v9671_v24, %v3102_v18  ;;  %v3620_v51 = vmax.f32 %v9673_v62, %v3526_v40  ;;  %v11615_v54 = vld [vmem:[#allocation124_spill] sm:$0xff]  ;;  %11617 = vst [vmem:[#allocation169_spill] sm:$0xff] %v9727_v41  ;;  %v6486_v62 = vld [vmem:[%s11137_s6 + $0x108] sm:$0xf]  ;;  %v7582_v24 = vld [vmem:[%s11137_s6 + $0x114] sm:$0xf0] }
 0x26b   : > { %v1737_v17 = vpop.f32.mrf.mxu3  ;;  %v4044_v38 = vmax.f32 %v9675_v3, %v3950_v45  ;;  %v6487_v3 = vor.u32 %v7582_v24, %v6486_v62  ;;  %v11618_v12 = vld [vmem:[#allocation60_spill] sm:$0xff] }
 0x26c   : > { %v1267_v20 = vmax.f32 %v1201_v30, 0.0  ;;  %v1826_v48 = vpop.f32.mrf.mxu0  ;;  %v1738_v32 = vadd.f32 %v1737_v17, %v9369_v49  ;;  %v11619_v40 = vld [vmem:[#allocation136_spill] sm:$0xff]  ;;  %v11620_v30 = vld [vmem:[#allocation130_spill] sm:$0xff]  ;;  %v9740_v17 = vpop.permute.xlu1 %3055 }
 0x26d   : > { %1919 = vmatmul.bf16.gmra.mxu1 %v11614_v52  ;;  %11621 = vst [vmem:[#allocation170_spill] sm:$0xff] %v9740_v17  ;;  %2150 = vmatpush.bf16.msra.mxu0 %v6487_v3 }
 0x26e   : > { %2008 = vmatmul.bf16.gmra.mxu2 %v11615_v54  ;;  %v9725_v2 = vpack.c.bf16 %v1267_v20, %v1265_v7  ;;  %v1827_v25 = vadd.f32 %v1826_v48, %v1738_v32  ;;  %v1115_v54 = vadd.f32 %v1114_v46, %v9017_v63  ;;  %v9743_v24 = vpop.permute.xlu2 %2991 }
 0x26f   : > { %11622 = vst [vmem:[#allocation171_spill] sm:$0xff] %v9743_v24 }
 0x270   : > { %11616 = vst [vmem:[#allocation168_spill] sm:$0xff] %v9725_v2  ;;  %1865 = vmatmul.bf16.gmra.mxu0 %v9725_v2  ;;  %v2682_v18 = vmul.f32 %v11618_v12, %v1827_v25  ;;  %v3106_v45 = vmul.f32 %v11619_v40, %v1827_v25  ;;  %v3530_v7 = vmul.f32 %v11620_v30, %v1827_v25  ;;  %v1268_v61 = vmax.f32 %v1115_v54, 0.0 }
 0x271   : > { %v1203_v59 = vpop.f32.mrf.mxu2  ;;  %v3954_v20 = vmul.f32 %v9727_v41, %v1827_v25 }
 0x272   : > { %v1116_v52 = vpop.f32.mrf.mxu1  ;;  %v2773_v11 = vmax.f32 %v2772_v26, %v2682_v18  ;;  %v3197_v48 = vmax.f32 %v3196_v42, %v3106_v45  ;;  %v3621_v32 = vmax.f32 %v3620_v51, %v3530_v7  ;;  %v1204_v3 = vadd.f32 %v1203_v59, %v9037_v36  ;;  %v11624_v26 = vld [vmem:[#allocation27_spill] sm:$0xff]  ;;  %v11626_v45 = vld [vmem:[#allocation128_spill] sm:$0xff] }
 0x273   : > { %v4045_v62 = vmax.f32 %v4044_v38, %v3954_v20  ;;  %v1117_v12 = vadd.f32 %v1116_v52, %v9017_v63  ;;  %v1739_v47 = vpop.f32.mrf.mxu3 }
 0x274   : > { %v1828_v40 = vpop.f32.mrf.mxu0  ;;  %v1740_v30 = vadd.f32 %v1739_v47, %v9369_v49  ;;  %v9756_v59 = vpop.permute.xlu1 %3415 }
 0x275   : > { %v1270_v25 = vmax.f32 %v1117_v12, 0.0  ;;  %11625 = vst [vmem:[#allocation173_spill] sm:$0xff] %v9756_v59 }
 0x276   : > { %v1829_v41 = vadd.f32 %v1828_v40, %v1740_v30  ;;  %v9759_v30 = vperm.slane %v11626_v45, 1 }
 0x277   : > { %v9748_v17 = vpack.c.bf16 %v1270_v25, %v1268_v61  ;;  %v1269_v61 = vmax.f32 %v1204_v3, 0.0 }
 0x278   : > { %v2686_v42 = vmul.f32 %v11624_v26, %v1829_v41  ;;  %v3110_v51 = vmul.f32 %v9482_v33, %v1829_v41  ;;  %v3534_v38 = vmul.f32 %v9554_v35, %v1829_v41  ;;  %v3958_v63 = vmul.f32 %v9649_v15, %v1829_v41  ;;  %v11627_v15 = vld [vmem:[#allocation129_spill] sm:$0xff] }
 0x279   : > { %11623 = vst [vmem:[#allocation172_spill] sm:$0xff] %v9748_v17  ;;  %v1205_v46 = vpop.f32.mrf.mxu2  ;;  %1781 = vmatmul.bf16.gmra.mxu3 %v9748_v17 }
 0x27a   : > { %v1206_v52 = vadd.f32 %v1205_v46, %v9037_v36  ;;  %v1885_v47 = vpop.f32.mrf.mxu1  ;;  %v2774_v54 = vmax.f32 %v2773_v11, %v2686_v42  ;;  %v3198_v12 = vmax.f32 %v3197_v48, %v3110_v51  ;;  %v3622_v18 = vmax.f32 %v3621_v32, %v3534_v38  ;;  %v11628_v36 = vld [vmem:[#allocation131_spill] sm:$0xff]  ;;  %v9766_v11 = vpop.permute.xlu2 %3835  ;;  %v11631_v42 = vld [vmem:[#allocation28_spill] sm:$0xff]  ;;  %v11632_v38 = vld [vmem:[#allocation101_spill] sm:$0xff] }
 0x27b   : > { %v4046_v25 = vmax.f32 %v4045_v62, %v3958_v63  ;;  %11630 = vst [vmem:[#allocation174_spill] sm:$0xff] %v9766_v11  ;;  %v1886_v32 = vadd.f32 %v1885_v47, %v9759_v30 }
 0x27c   : > { %v1271_v40 = vmax.f32 %v1206_v52, 0.0  ;;  %v1742_v7 = vpop.f32.mrf.mxu3  ;;  %v1831_v20 = vpop.f32.mrf.mxu0 }
 0x27d   : > { %v1743_v41 = vadd.f32 %v1742_v7, %v9369_v49  ;;  %1924 = vmatmul.bf16.gmra.mxu1 %v11627_v15  ;;  %v9775_v35 = vpop.permute.xlu1 %3839 }
 0x27e   : > { %2013 = vmatmul.bf16.gmra.mxu2 %v11628_v36  ;;  %v9764_v46 = vpack.c.bf16 %v1271_v40, %v1269_v61  ;;  %11633 = vst [vmem:[#allocation175_spill] sm:$0xff] %v9775_v35 }
 0x27f   : > { %v1832_v48 = vadd.f32 %v1831_v20, %v1743_v41 }
 0x280   : > { %11629 = vst [vmem:[#allocation128_spill] sm:$0xff] %v9764_v46  ;;  %1870 = vmatmul.bf16.gmra.mxu0 %v9764_v46 }
 0x281   : > { %v1974_v3 = vpop.f32.mrf.mxu2  ;;  %v2690_v51 = vmul.f32 %v11631_v42, %v1832_v48  ;;  %v3114_v62 = vmul.f32 %v11632_v38, %v1832_v48  ;;  %v3538_v63 = vmul.f32 %v9714_v23, %v1832_v48  ;;  %v3962_v52 = vmul.f32 %v9766_v11, %v1832_v48  ;;  %v7596_v23 = vld [vmem:[%s11137_s6 + $0x18c] sm:$0xf] }
 0x282   : > { %v1975_v45 = vadd.f32 %v1974_v3, %v1886_v32  ;;  %v1887_v7 = vpop.f32.mrf.mxu1  ;;  %v11636_v32 = vld [vmem:[#allocation35_spill] sm:$0xff] }
 0x283   : > { %v2775_v61 = vmax.f32 %v2774_v54, %v2690_v51  ;;  %v3199_v40 = vmax.f32 %v3198_v12, %v3114_v62  ;;  %v3623_v36 = vmax.f32 %v3622_v18, %v3538_v63  ;;  %v4047_v41 = vmax.f32 %v4046_v25, %v3962_v52  ;;  %v6552_v54 = vld [vmem:[%s11137_s6 + $0x198] sm:$0xf0]  ;;  %v7564_v12 = vld [vmem:[%s11137_s6 + $0x8c] sm:$0xf]  ;;  %v11634_v18 = vld [vmem:[#allocation48_spill] sm:$0xff] }
 0x284   : > { %v1744_v15 = vpop.f32.mrf.mxu3  ;;  %v1833_v20 = vpop.f32.mrf.mxu0  ;;  %v1888_v42 = vadd.f32 %v1887_v7, %v9759_v30  ;;  %v11635_v25 = vld [vmem:[#allocation74_spill] sm:$0xff]  ;;  %v9794_v3 = vmul.f32 %v11636_v32, %v1975_v45  ;;  %v6555_v62 = vor.u32 %v7596_v23, %v6552_v54  ;;  %v6424_v63 = vld [vmem:[%s11137_s6 + $0x98] sm:$0xf0]  ;;  %v11637_v52 = vld [vmem:[#allocation63_spill] sm:$0xff] }
 0x285   : > { %v1745_v47 = vadd.f32 %v1744_v15, %v9369_v49  ;;  %v9788_v15 = vmul.f32 %v11634_v18, %v1975_v45  ;;  %v9791_v48 = vmul.f32 %v11635_v25, %v1975_v45  ;;  %v9804_v25 = vmul.f32 %v8781_v43, %v1975_v45  ;;  %v11638_v32 = vld [vmem:[#allocation67_spill] sm:$0xff] }
 0x286   : > { %2324 = vmatpush.bf16.msra.mxu2 %v6555_v62  ;;  %v6427_v23 = vor.u32 %v7564_v12, %v6424_v63 }
 0x287   : > { %v1834_v33 = vadd.f32 %v1833_v20, %v1745_v47 }
 0x288   : > { %2235 = vmatpush.bf16.msra.mxu1 %v6427_v23 }
 0x289   : > { %v1976_v51 = vpop.f32.mrf.mxu2  ;;  %v2694_v7 = vmul.f32 %v11637_v52, %v1834_v33  ;;  %v3118_v20 = vmul.f32 %v9743_v24, %v1834_v33  ;;  %v3542_v47 = vmul.f32 %v9756_v59, %v1834_v33  ;;  %v3966_v18 = vmul.f32 %v9775_v35, %v1834_v33  ;;  %2062 = vmatmul.bf16.vlgmr.msrb.gmra.mxu3 %v11638_v32  ;;  %v11639_v52 = vld [vmem:[#allocation51_spill] sm:$0xff]  ;;  %v11641_v59 = vld [vmem:[#allocation105_spill] sm:$0xff] }
 0x28a   : > { %v1977_v11 = vadd.f32 %v1976_v51, %v1888_v42  ;;  %v1890_v38 = vpop.f32.mrf.mxu1  ;;  %v11640_v24 = vld [vmem:[#allocation31_spill] sm:$0xff] }
 0x28b   : > { %v2776_v54 = vmax.f32 %v2775_v61, %v2694_v7  ;;  %v3200_v26 = vmax.f32 %v3199_v40, %v3118_v20  ;;  %v3624_v46 = vmax.f32 %v3623_v36, %v3542_v47  ;;  %v4048_v17 = vmax.f32 %v4047_v41, %v3966_v18  ;;  %v11642_v47 = vld [vmem:[#allocation71_spill] sm:$0xff] }
 0x28c   : > { %v2639_v2 = vmul.f32 %v11639_v52, %v1977_v11  ;;  %v3063_v39 = vmul.f32 %v11640_v24, %v1977_v11  ;;  %v3487_v27 = vmul.f32 %v11641_v59, %v1977_v11  ;;  %v3911_v33 = vmul.f32 %v8794_v60, %v1977_v11  ;;  %v1747_v45 = vpop.f32.mrf.mxu3  ;;  %v1836_v43 = vpop.f32.mrf.mxu0  ;;  %v11652_v52 = vld [vmem:[#allocation79_spill] sm:$0xff] }
 0x28d   : > { %v2777_v42 = vrot.slane %v2776_v54, 4  ;;  %v3201_v51 = vrot.slane %v3200_v26, 4  ;;  %v3625_v32 = vrot.slane %v3624_v46, 4  ;;  %v4049_v62 = vrot.slane %v4048_v17, 4  ;;  %1929 = vmatmul.bf16.gmra.mxu1 %v9394_v0 }
 0x28e   : > { %2018 = vmatmul.bf16.gmra.mxu2 %v9414_v28  ;;  %v2783_v36 = vmax.f32 %v9788_v15, %v2639_v2  ;;  %v3207_v61 = vmax.f32 %v9791_v48, %v3063_v39  ;;  %v3631_v40 = vmax.f32 %v9794_v3, %v3487_v27  ;;  %v4055_v41 = vmax.f32 %v9804_v25, %v3911_v33 }
 0x28f   : > { %v2778_v11 = vmax.f32 %v2776_v54, %v2777_v42  ;;  %v3202_v12 = vmax.f32 %v3200_v26, %v3201_v51  ;;  %v3626_v18 = vmax.f32 %v3624_v46, %v3625_v32  ;;  %v4050_v63 = vmax.f32 %v4048_v17, %v4049_v62 }
 0x290   : > { %v1891_v7 = vadd.f32 %v1890_v38, %v9759_v30  ;;  %v1748_v20 = vadd.f32 %v1747_v45, %v9369_v49  ;;  %2151 = vmatmul.bf16.vlgmr.msra.gmra.mxu0 %v11642_v47 }
 0x291   : > { %v1979_v23 = vpop.f32.mrf.mxu2  ;;  %v2779_v28 = vrot.slane %v2778_v11, 2  ;;  %v3203_v60 = vrot.slane %v3202_v12, 2  ;;  %v3627_v2 = vrot.slane %v3626_v18, 2  ;;  %v4051_v15 = vrot.slane %v4050_v63, 2 }
 0x292   : > { %v1837_v39 = vadd.f32 %v1836_v43, %v1748_v20  ;;  %v1980_v48 = vadd.f32 %v1979_v23, %v1891_v7  ;;  %v1892_v27 = vpop.f32.mrf.mxu1 }
 0x293   : > { %v2780_v3 = vmax.f32 %v2778_v11, %v2779_v28  ;;  %v3204_v25 = vmax.f32 %v3202_v12, %v3203_v60  ;;  %v3628_v54 = vmax.f32 %v3626_v18, %v3627_v2  ;;  %v4052_v26 = vmax.f32 %v4050_v63, %v4051_v15 }
 0x294   : > { %v1749_v17 = vpop.f32.mrf.mxu3  ;;  %v1838_v46 = vpop.f32.mrf.mxu0  ;;  %v2643_v42 = vmul.f32 %v8638_v55, %v1980_v48  ;;  %v3067_v51 = vmul.f32 %v8783_v8, %v1980_v48  ;;  %v3491_v43 = vmul.f32 %v9285_v5, %v1980_v48  ;;  %v3915_v62 = vmul.f32 %v9416_v56, %v1980_v48  ;;  %v11643_v55 = vld [vmem:[#allocation75_spill] sm:$0xff] }
 0x295   : > { %v2781_v38 = vrot.slane %v2780_v3, 1  ;;  %v3205_v32 = vrot.slane %v3204_v25, 1  ;;  %v3629_v33 = vrot.slane %v3628_v54, 1  ;;  %v4053_v45 = vrot.slane %v4052_v26, 1 }
 0x296   : > { %v2784_v12 = vmax.f32 %v2783_v36, %v2643_v42  ;;  %v3208_v18 = vmax.f32 %v3207_v61, %v3067_v51  ;;  %v3632_v63 = vmax.f32 %v3631_v40, %v3491_v43  ;;  %v4056_v7 = vmax.f32 %v4055_v41, %v3915_v62  ;;  %v11644_v36 = vld [vmem:[#allocation29_spill] sm:$0xff] }
 0x297   : > { %v2782_v28 = vmax.f32 %v2780_v3, %v2781_v38  ;;  %v3206_v60 = vmax.f32 %v3204_v25, %v3205_v32  ;;  %v3630_v11 = vmax.f32 %v3628_v54, %v3629_v33  ;;  %v4054_v23 = vmax.f32 %v4052_v26, %v4053_v45  ;;  %v11645_v25 = vld [vmem:[#allocation32_spill] sm:$0xff]  ;;  %v11646_v26 = vld [vmem:[#allocation34_spill] sm:$0xff]  ;;  %v11649_v51 = vld [vmem:[#allocation33_spill] sm:$0xff] }
 0x298   : > { %v1893_v15 = vadd.f32 %v1892_v27, %v9759_v30  ;;  %v1750_v8 = vadd.f32 %v1749_v17, %v9369_v49  ;;  %v2698_v61 = vmul.f32 %v11644_v36, %v1837_v39  ;;  %v3122_v54 = vmul.f32 %v11645_v25, %v1837_v39  ;;  %v11647_v32 = vld [vmem:[#allocation40_spill] sm:$0xff]  ;;  %v11648_v45 = vld [vmem:[#allocation30_spill] sm:$0xff]  ;;  %v11650_v62 = vld [vmem:[#allocation37_spill] sm:$0xff] }
 0x299   : > { %v1981_v20 = vpop.f32.mrf.mxu2  ;;  %v4203_v2 = vsel %vm4202_vm0, %v2782_v28, %v3206_v60  ;;  %2067 = vmatmul.bf16.gmra.mxu3 %v11643_v55  ;;  %v3546_v38 = vmul.f32 %v11646_v26, %v1837_v39  ;;  %v3970_v27 = vmul.f32 %v11647_v32, %v1837_v39  ;;  %v11651_v28 = vld [vmem:[#allocation43_spill] sm:$0xff] }
 0x29a   : > { %v4212_v5 = vsel %vm4211_vm1, %v4203_v2, %v3630_v11  ;;  %v1895_v48 = vpop.f32.mrf.mxu1  ;;  %v1839_v40 = vadd.f32 %v1838_v46, %v1750_v8  ;;  %v1982_v41 = vadd.f32 %v1981_v20, %v1893_v15 }
 0x29b   : > { %v9830_v3 = vsel %vm4220_vm2, %v4212_v5, %v4054_v23  ;;  %v1896_v17 = vadd.f32 %v1895_v48, %v9759_v30 }
 0x29c   : > { %v1752_v33 = vpop.f32.mrf.mxu3  ;;  %v2702_v42 = vmul.f32 %v11648_v45, %v1839_v40  ;;  %v3126_v43 = vmul.f32 %v11649_v51, %v1839_v40  ;;  %v3550_v5 = vmul.f32 %v11650_v62, %v1839_v40  ;;  %v3974_v60 = vmul.f32 %v11651_v28, %v1839_v40  ;;  %v1841_v11 = vpop.f32.mrf.mxu0 }
 0x29d   : > { %1934 = vmatmul.bf16.gmra.mxu1 %v9451_v34  ;;  %v2647_v8 = vmul.f32 %v8646_v58, %v1982_v41  ;;  %v3071_v46 = vmul.f32 %v8840_v21, %v1982_v41  ;;  %v3495_v39 = vmul.f32 %v8898_v16, %v1982_v41  ;;  %v3919_v20 = vmul.f32 %v8978_v31, %v1982_v41 }
 0x29e   : > { %2023 = vmatmul.bf16.gmra.mxu2 %v9472_v53  ;;  %v2846_v23 = vmax.f32 %v2698_v61, %v2702_v42  ;;  %v3270_v2 = vmax.f32 %v3122_v54, %v3126_v43  ;;  %v3694_v15 = vmax.f32 %v3546_v38, %v3550_v5  ;;  %v4118_v48 = vmax.f32 %v3970_v27, %v3974_v60  ;;  %v11653_v61 = vld [vmem:[#allocation59_spill] sm:$0xff]  ;;  %v11655_v27 = vld [vmem:[#allocation78_spill] sm:$0xff] }
 0x29f   : > { %v2785_v56 = vmax.f32 %v2784_v12, %v2647_v8  ;;  %v3209_v59 = vmax.f32 %v3208_v18, %v3071_v46  ;;  %v3633_v40 = vmax.f32 %v3632_v63, %v3495_v39  ;;  %v4057_v24 = vmax.f32 %v4056_v7, %v3919_v20  ;;  %v11654_v63 = vld [vmem:[#allocation36_spill] sm:$0xff]  ;;  %v11656_v43 = vld [vmem:[#allocation42_spill] sm:$0xff]  ;;  %v7592_v5 = vld [vmem:[%s11137_s6 + $0x16c] sm:$0xf] }
 0x2a0   : > { %2156 = vmatmul.bf16.gmra.mxu0 %v11652_v52  ;;  %v1753_v58 = vadd.f32 %v1752_v33, %v9369_v49  ;;  %v6408_v46 = vld [vmem:[%s11137_s6 + $0x78] sm:$0xf0] }
 0x2a1   : > { %v1984_v34 = vpop.f32.mrf.mxu2 }
 0x2a2   : > { %v1985_v21 = vadd.f32 %v1984_v34, %v1896_v17  ;;  %v1897_v0 = vpop.f32.mrf.mxu1  ;;  %v1842_v16 = vadd.f32 %v1841_v11, %v1753_v58  ;;  %v11657_v34 = vld [vmem:[#allocation46_spill] sm:$0xff] }
 0x2a3   : > { %v1898_v12 = vadd.f32 %v1897_v0, %v9759_v30 }
 0x2a4   : > { %v2651_v41 = vmul.f32 %v8644_v57, %v1985_v21  ;;  %v3075_v53 = vmul.f32 %v9118_v14, %v1985_v21  ;;  %v3499_v54 = vmul.f32 %v11653_v61, %v1985_v21  ;;  %v3923_v38 = vmul.f32 %v9031_v19, %v1985_v21  ;;  %v1754_v18 = vpop.f32.mrf.mxu3  ;;  %v1843_v58 = vpop.f32.mrf.mxu0  ;;  %v6536_v21 = vld [vmem:[%s11137_s6 + $0x178] sm:$0xf0]  ;;  %v11666_v57 = vld [vmem:[#allocation52_spill] sm:$0xff] }
 0x2a5   : > { %v2706_v7 = vmul.f32 %v11654_v63, %v1842_v16  ;;  %v3130_v42 = vmul.f32 %v11655_v27, %v1842_v16  ;;  %v3554_v33 = vmul.f32 %v11656_v43, %v1842_v16  ;;  %v3978_v17 = vmul.f32 %v11657_v34, %v1842_v16  ;;  %v7560_v16 = vld [vmem:[%s11137_s6 + $0x6c] sm:$0xf] }
 0x2a6   : > { %v9864_v60 = vmax.f32 %v2785_v56, %v2651_v41  ;;  %v9866_v0 = vmax.f32 %v3209_v59, %v3075_v53  ;;  %v9868_v11 = vmax.f32 %v3633_v40, %v3499_v54  ;;  %v9870_v8 = vmax.f32 %v4057_v24, %v3923_v38  ;;  %v11658_v54 = vld [vmem:[#allocation83_spill] sm:$0xff] }
 0x2a7   : > { %v2847_v39 = vmax.f32 %v2846_v23, %v2706_v7  ;;  %v3271_v20 = vmax.f32 %v3270_v2, %v3130_v42  ;;  %v3695_v19 = vmax.f32 %v3694_v15, %v3554_v33  ;;  %v4119_v61 = vmax.f32 %v4118_v48, %v3978_v17  ;;  %v11659_v48 = vld [vmem:[#allocation45_spill] sm:$0xff]  ;;  %v11662_v17 = vld [vmem:[#allocation55_spill] sm:$0xff] }
 0x2a8   : > { %v1755_v56 = vadd.f32 %v1754_v18, %v9369_v49  ;;  %v6539_v59 = vor.u32 %v7592_v5, %v6536_v21  ;;  %v6411_v40 = vor.u32 %v7560_v16, %v6408_v46  ;;  %v11660_v18 = vld [vmem:[#allocation47_spill] sm:$0xff]  ;;  %v11661_v42 = vld [vmem:[#allocation49_spill] sm:$0xff] }
 0x2a9   : > { %v1986_v53 = vpop.f32.mrf.mxu2  ;;  %2072 = vmatmul.bf16.gmra.mxu3 %v11658_v54  ;;  %v11665_v46 = vld [vmem:[#allocation53_spill] sm:$0xff] }
 0x2aa   : > { %v1987_v41 = vadd.f32 %v1986_v53, %v1898_v12  ;;  %v1844_v24 = vadd.f32 %v1843_v58, %v1755_v56  ;;  %v9880_v38 = vpop.f32.mrf.mxu1  ;;  %2325 = vmatpush.bf16.msra.mxu2 %v6539_v59  ;;  %2236 = vmatpush.bf16.msra.mxu1 %v6411_v40 }
 0x2ac   : > { %v9883_v14 = vmul.f32 %v8659_v1, %v1987_v41  ;;  %v9886_v23 = vmul.f32 %v9009_v44, %v1987_v41  ;;  %v9889_v2 = vmul.f32 %v9027_v13, %v1987_v41  ;;  %v9892_v15 = vmul.f32 %v9071_v37, %v1987_v41  ;;  %v1757_v56 = vpop.f32.mrf.mxu3  ;;  %v11663_v37 = vld [vmem:[#allocation150_spill] sm:$0xff] }
 0x2ad   : > { %v2710_v12 = vmul.f32 %v11659_v48, %v1844_v24  ;;  %v3134_v7 = vmul.f32 %v11660_v18, %v1844_v24  ;;  %v3558_v33 = vmul.f32 %v11661_v42, %v1844_v24  ;;  %v3982_v58 = vmul.f32 %v11662_v17, %v1844_v24  ;;  %v1846_v53 = vpop.f32.mrf.mxu0  ;;  %1939 = vmatmul.bf16.gmra.mxu1 %v9487_v4  ;;  %v11664_v13 = vld [vmem:[#allocation86_spill] sm:$0xff]  ;;  %v11667_v4 = vld [vmem:[#allocation116_spill] sm:$0xff]  ;;  %v11683_v42 = vld [vmem:[#allocation95_spill] sm:$0xff] }
 0x2ae   : > { %2028 = vmatmul.bf16.gmra.mxu2 %v11663_v37  ;;  %v1758_v5 = vadd.f32 %v1757_v56, %v9369_v49 }
 0x2af   : > { %v2848_v59 = vmax.f32 %v2847_v39, %v2710_v12  ;;  %v3272_v40 = vmax.f32 %v3271_v20, %v3134_v7  ;;  %v3696_v41 = vmax.f32 %v3695_v19, %v3558_v33  ;;  %v4120_v24 = vmax.f32 %v4119_v61, %v3982_v58  ;;  %v11668_v20 = vld [vmem:[#allocation149_spill] sm:$0xff] }
 0x2b0   : > { %2161 = vmatmul.bf16.gmra.mxu0 %v11664_v13  ;;  %v1847_v16 = vadd.f32 %v1846_v53, %v1758_v5  ;;  %v11669_v53 = vld [vmem:[#allocation90_spill] sm:$0xff] }
 0x2b1   : > { %v9910_v21 = vpop.f32.mrf.mxu2 }
 0x2b2   : > { %v9912_v44 = vpop.f32.mrf.mxu1  ;;  %v2714_v1 = vmul.f32 %v11665_v46, %v1847_v16  ;;  %v3138_v31 = vmul.f32 %v11666_v57, %v1847_v16  ;;  %v3562_v39 = vmul.f32 %v11667_v4, %v1847_v16  ;;  %v3986_v19 = vmul.f32 %v11668_v20, %v1847_v16  ;;  %v11670_v57 = vld [vmem:[#allocation58_spill] sm:$0xff]  ;;  %v11671_v4 = vld [vmem:[#allocation61_spill] sm:$0xff] }
 0x2b3   : > { %v11672_v16 = vld [vmem:[#allocation69_spill] sm:$0xff] }
 0x2b4   : > { %v2849_v61 = vmax.f32 %v2848_v59, %v2714_v1  ;;  %v3273_v12 = vmax.f32 %v3272_v40, %v3138_v31  ;;  %v3697_v7 = vmax.f32 %v3696_v41, %v3562_v39  ;;  %v4121_v33 = vmax.f32 %v4120_v24, %v3986_v19  ;;  %v1759_v58 = vpop.f32.mrf.mxu3  ;;  %v11673_v31 = vld [vmem:[#allocation77_spill] sm:$0xff] }
 0x2b5   : > { %v1848_v56 = vpop.f32.mrf.mxu0  ;;  %v1760_v37 = vadd.f32 %v1759_v58, %v9369_v49 }
 0x2b7   : > { %v1849_v5 = vadd.f32 %v1848_v56, %v1760_v37  ;;  %v11674_v56 = vld [vmem:[#allocation94_spill] sm:$0xff] }
 0x2b9   : > { %v9919_v13 = vpop.f32.mrf.mxu2  ;;  %2077 = vmatmul.bf16.gmra.mxu3 %v11669_v53  ;;  %v2718_v54 = vmul.f32 %v11670_v57, %v1849_v5  ;;  %v3142_v17 = vmul.f32 %v11671_v4, %v1849_v5  ;;  %v3566_v1 = vmul.f32 %v11672_v16, %v1849_v5  ;;  %v3990_v59 = vmul.f32 %v11673_v31, %v1849_v5  ;;  %v11675_v5 = vld [vmem:[#allocation68_spill] sm:$0xff] }
 0x2ba   : > { %v9922_v46 = vpop.f32.mrf.mxu1 }
 0x2bb   : > { %v2850_v40 = vmax.f32 %v2849_v61, %v2718_v54  ;;  %v3274_v41 = vmax.f32 %v3273_v12, %v3142_v17  ;;  %v3698_v24 = vmax.f32 %v3697_v7, %v3566_v1  ;;  %v4122_v39 = vmax.f32 %v4121_v33, %v3990_v59  ;;  %v11676_v17 = vld [vmem:[#allocation87_spill] sm:$0xff]  ;;  %v11677_v12 = vld [vmem:[#allocation81_spill] sm:$0xff] }
 0x2bc   : > { %v1762_v19 = vpop.f32.mrf.mxu3  ;;  %v11678_v33 = vld [vmem:[#allocation89_spill] sm:$0xff] }
 0x2bd   : > { %v1851_v58 = vpop.f32.mrf.mxu0  ;;  %1944 = vmatmul.bf16.gmra.mxu1 %v9540_v22  ;;  %v1763_v37 = vadd.f32 %v1762_v19, %v9369_v49 }
 0x2be   : > { %2033 = vmatmul.bf16.gmra.mxu2 %v9565_v29 }
 0x2bf   : > { %v1852_v4 = vadd.f32 %v1851_v58, %v1763_v37  ;;  %v7588_v58 = vld [vmem:[%s11137_s6 + $0x14c] sm:$0xf]  ;;  %v6520_v37 = vld [vmem:[%s11137_s6 + $0x158] sm:$0xf0] }
 0x2c0   : > { %2166 = vmatmul.bf16.gmra.mxu0 %v11674_v56  ;;  %v11682_v56 = vld [vmem:[#allocation88_spill] sm:$0xff] }
 0x2c1   : > { %v9932_v53 = vpop.f32.mrf.mxu2  ;;  %v2722_v54 = vmul.f32 %v11675_v5, %v1852_v4  ;;  %v3146_v61 = vmul.f32 %v11676_v17, %v1852_v4  ;;  %v3570_v7 = vmul.f32 %v11677_v12, %v1852_v4  ;;  %v3994_v1 = vmul.f32 %v11678_v33, %v1852_v4  ;;  %v7556_v12 = vld [vmem:[%s11137_s6 + $0x4c] sm:$0xf]  ;;  %v6392_v4 = vld [vmem:[%s11137_s6 + $0x58] sm:$0xf0] }
 0x2c2   : > { %v9934_v16 = vpop.f32.mrf.mxu1  ;;  %v11681_v17 = vld [vmem:[#allocation85_spill] sm:$0xff] }
 0x2c3   : > { %v2851_v59 = vmax.f32 %v2850_v40, %v2722_v54  ;;  %v3275_v22 = vmax.f32 %v3274_v41, %v3146_v61  ;;  %v3699_v29 = vmax.f32 %v3698_v24, %v3570_v7  ;;  %v4123_v31 = vmax.f32 %v4122_v39, %v3994_v1  ;;  %v11679_v61 = vld [vmem:[#allocation98_spill] sm:$0xff] }
 0x2c4   : > { %v1764_v19 = vpop.f32.mrf.mxu3  ;;  %v6523_v41 = vor.u32 %v7588_v58, %v6520_v37  ;;  %v6395_v24 = vor.u32 %v7556_v12, %v6392_v4  ;;  %v11680_v1 = vld [vmem:[#allocation66_spill] sm:$0xff] }
 0x2c5   : > { %v1853_v57 = vpop.f32.mrf.mxu0  ;;  %v1765_v40 = vadd.f32 %v1764_v19, %v9369_v49 }
 0x2c6   : > { %2326 = vmatpush.bf16.msra.mxu2 %v6523_v41  ;;  %2237 = vmatpush.bf16.msra.mxu1 %v6395_v24  ;;  %v1901_v41 = vadd.f32 %v9880_v38, %v9759_v30  ;;  %v11684_v24 = vld [vmem:[#allocation102_spill] sm:$0xff]  ;;  %v1903_v38 = vadd.f32 %v9912_v44, %v9759_v30 }
 0x2c7   : > { %v1854_v54 = vadd.f32 %v1853_v57, %v1765_v40 }
 0x2c9   : > { %v9953_v39 = vpop.f32.mrf.mxu2  ;;  %2082 = vmatmul.bf16.gmra.mxu3 %v11679_v61  ;;  %v2726_v33 = vmul.f32 %v11680_v1, %v1854_v54  ;;  %v3150_v5 = vmul.f32 %v11681_v17, %v1854_v54  ;;  %v3574_v20 = vmul.f32 %v11682_v56, %v1854_v54  ;;  %v3998_v18 = vmul.f32 %v11683_v42, %v1854_v54  ;;  %v11700_v61 = vld [vmem:[#allocation153_spill] sm:$0xff] }
 0x2ca   : > { %v9956_v7 = vpop.f32.mrf.mxu1 }
 0x2cb   : > { %v2852_v19 = vmax.f32 %v2851_v59, %v2726_v33  ;;  %v3276_v58 = vmax.f32 %v3275_v22, %v3150_v5  ;;  %v3700_v12 = vmax.f32 %v3699_v29, %v3574_v20  ;;  %v4124_v37 = vmax.f32 %v4123_v31, %v3998_v18  ;;  %v11685_v18 = vld [vmem:[#allocation93_spill] sm:$0xff]  ;;  %v11686_v31 = vld [vmem:[#allocation96_spill] sm:$0xff]  ;;  %v11687_v33 = vld [vmem:[#allocation99_spill] sm:$0xff] }
 0x2cc   : > { %v1767_v4 = vpop.f32.mrf.mxu3  ;;  %v1990_v22 = vadd.f32 %v9910_v21, %v1901_v41 }
 0x2cd   : > { %v1856_v57 = vpop.f32.mrf.mxu0  ;;  %1949 = vmatmul.bf16.gmra.mxu1 %v9606_v10  ;;  %v1768_v40 = vadd.f32 %v1767_v4, %v9369_v49 }
 0x2ce   : > { %2038 = vmatmul.bf16.gmra.mxu2 %v9641_v9  ;;  %v11688_v9 = vld [vmem:[#allocation107_spill] sm:$0xff] }
 0x2cf   : > { %v1857_v54 = vadd.f32 %v1856_v57, %v1768_v40 }
 0x2d0   : > { %2171 = vmatmul.bf16.gmra.mxu0 %v11684_v24 }
 0x2d1   : > { %v9968_v56 = vpop.f32.mrf.mxu2  ;;  %v2730_v20 = vmul.f32 %v11685_v18, %v1857_v54  ;;  %v3154_v5 = vmul.f32 %v11686_v31, %v1857_v54  ;;  %v3578_v59 = vmul.f32 %v11687_v33, %v1857_v54  ;;  %v4002_v4 = vmul.f32 %v11688_v9, %v1857_v54  ;;  %v11689_v18 = vld [vmem:[#allocation54_spill] sm:$0xff]  ;;  %v11690_v9 = vld [vmem:[#allocation73_spill] sm:$0xff] }
 0x2d2   : > { %v9971_v29 = vpop.f32.mrf.mxu1  ;;  %v2659_v17 = vmul.f32 %v11689_v18, %v1990_v22  ;;  %v1992_v31 = vadd.f32 %v9919_v13, %v1903_v38  ;;  %v3083_v44 = vmul.f32 %v11690_v9, %v1990_v22  ;;  %v11693_v13 = vmax.f32 %v9864_v60, %v9883_v14  ;;  %v11696_v9 = vld [vmem:[#allocation125_spill] sm:$0xff]  ;;  %v11697_v14 = vld [vmem:[#allocation164_spill] sm:$0xff] }
 0x2d3   : > { %v9979_v10 = vmax.f32 %v2852_v19, %v2730_v20  ;;  %v9981_v42 = vmax.f32 %v3276_v58, %v3154_v5  ;;  %v9983_v57 = vmax.f32 %v3700_v12, %v3578_v59  ;;  %v9985_v21 = vmax.f32 %v4124_v37, %v4002_v4  ;;  %v11691_v19 = vld [vmem:[#allocation76_spill] sm:$0xff]  ;;  %v7552_v37 = vld [vmem:[%s11137_s6 + $0x2c] sm:$0xf]  ;;  %v6376_v59 = vld [vmem:[%s11137_s6 + $0x38] sm:$0xf0] }
 0x2d4   : > { %v1769_v40 = vpop.f32.mrf.mxu3  ;;  %v3507_v20 = vmul.f32 %v11691_v19, %v1990_v22  ;;  %v11692_v58 = vld [vmem:[#allocation84_spill] sm:$0xff]  ;;  %v10004_v4 = vmax.f32 %v11693_v13, %v2659_v17  ;;  %v10007_v38 = vmul.f32 %v11590_v50, %v1992_v31  ;;  %v3935_v48 = vmul.f32 %v11700_v61, %v1992_v31 }
 0x2d5   : > { %v1858_v41 = vpop.f32.mrf.mxu0  ;;  %v1770_v33 = vadd.f32 %v1769_v40, %v9369_v49  ;;  %v3931_v5 = vmul.f32 %v11692_v58, %v1990_v22  ;;  %v1906_v22 = vadd.f32 %v9922_v46, %v9759_v30  ;;  %v6379_v40 = vor.u32 %v7552_v37, %v6376_v59  ;;  %v11695_v58 = vld [vmem:[#allocation103_spill] sm:$0xff]  ;;  %v11698_v17 = vld [vmem:[#allocation80_spill] sm:$0xff]  ;;  %v6504_v59 = vld [vmem:[%s11137_s6 + $0x138] sm:$0xf0] }
 0x2d6   : > { %v3087_v13 = vmul.f32 %v11698_v17, %v1992_v31  ;;  %v11699_v50 = vld [vmem:[#allocation120_spill] sm:$0xff]  ;;  %v7584_v37 = vld [vmem:[%s11137_s6 + $0x12c] sm:$0xf] }
 0x2d7   : > { %v1859_v12 = vadd.f32 %v1858_v41, %v1770_v33  ;;  %v11694_v41 = vld [vmem:[#allocation104_spill] sm:$0xff]  ;;  %v3511_v24 = vmul.f32 %v11699_v50, %v1992_v31  ;;  %v1995_v46 = vadd.f32 %v9932_v53, %v1906_v22  ;;  %2238 = vmatpush.bf16.msra.mxu1 %v6379_v40  ;;  %v11701_v53 = vld [vmem:[#allocation166_spill] sm:$0xff]  ;;  %v7548_v22 = vld [vmem:[%s11137_s6 + $0xc] sm:$0xf] }
 0x2d8   : > { %v6360_v40 = vld [vmem:[%s11137_s6 + $0x18] sm:$0xf0]  ;;  %v11708_v61 = vld [vmem:[#allocation92_spill] sm:$0xff] }
 0x2d9   : > { %v9990_v54 = vpop.f32.mrf.mxu2  ;;  %2087 = vmatmul.bf16.gmra.mxu3 %v9257_v6  ;;  %v2734_v1 = vmul.f32 %v11694_v41, %v1859_v12  ;;  %v3158_v19 = vmul.f32 %v11695_v58, %v1859_v12  ;;  %v3582_v18 = vmul.f32 %v11696_v9, %v1859_v12  ;;  %v4006_v60 = vmul.f32 %v11697_v14, %v1859_v12 }
 0x2da   : > { %v10012_v33 = vpop.f32.mrf.mxu1 }
 0x2db   : > { %v2854_v9 = vmax.f32 %v9979_v10, %v2734_v1  ;;  %v3278_v12 = vmax.f32 %v9981_v42, %v3158_v19  ;;  %v3702_v14 = vmax.f32 %v9983_v57, %v3582_v18  ;;  %v4126_v58 = vmax.f32 %v9985_v21, %v4006_v60  ;;  %v11705_v60 = vld [vmem:[#allocation168_spill] sm:$0xff] }
 0x2dc   : > { %v1772_v31 = vpop.f32.mrf.mxu3  ;;  %v11702_v10 = vmax.f32 %v9866_v0, %v9886_v23  ;;  %v11703_v1 = vmax.f32 %v9868_v11, %v9889_v2  ;;  %v11704_v57 = vmax.f32 %v9870_v8, %v9892_v15  ;;  %v1908_v19 = vadd.f32 %v9934_v16, %v9759_v30  ;;  %v6488_v0 = vld [vmem:[%s11137_s6 + $0x118] sm:$0xf0] }
 0x2dd   : > { %v1861_v41 = vpop.f32.mrf.mxu0  ;;  %1954 = vmatmul.bf16.gmra.mxu1 %v11701_v53  ;;  %v7580_v53 = vld [vmem:[%s11137_s6 + $0x10c] sm:$0xf]  ;;  %v2789_v11 = vmax.f32 %v10004_v4, %v10007_v38  ;;  %v1773_v23 = vadd.f32 %v1772_v31, %v9369_v49  ;;  %v6507_v8 = vor.u32 %v7584_v37, %v6504_v59  ;;  %v6363_v2 = vor.u32 %v7548_v22, %v6360_v40  ;;  %v11709_v38 = vld [vmem:[#allocation100_spill] sm:$0xff] }
 0x2de   : > { %v3212_v42 = vmax.f32 %v11702_v10, %v3083_v44  ;;  %v3636_v18 = vmax.f32 %v11703_v1, %v3507_v20  ;;  %v4060_v21 = vmax.f32 %v11704_v57, %v3931_v5  ;;  %2043 = vmatmul.bf16.gmra.mxu2 %v11705_v60  ;;  %v1997_v20 = vadd.f32 %v9953_v39, %v1908_v19  ;;  %v11706_v5 = vld [vmem:[#allocation109_spill] sm:$0xff]  ;;  %v11707_v1 = vld [vmem:[#allocation24_spill] sm:$0xff]  ;;  %v11711_v39 = vld [vmem:[#allocation111_spill] sm:$0xff] }
 0x2df   : > { %v2667_v57 = vmul.f32 %v11707_v1, %v1995_v46  ;;  %v1862_v60 = vadd.f32 %v1861_v41, %v1773_v23  ;;  %2327 = vmatpush.bf16.msra.mxu2 %v6507_v8  ;;  %2239 = vmatpush.bf16.msra.mxu1 %v6363_v2  ;;  %v6491_v6 = vor.u32 %v7580_v53, %v6488_v0  ;;  %v11710_v37 = vld [vmem:[#allocation108_spill] sm:$0xff]  ;;  %v11712_v22 = vld [vmem:[#allocation115_spill] sm:$0xff]  ;;  %v11714_v41 = vld [vmem:[#allocation133_spill] sm:$0xff] }
 0x2e0   : > { %v3213_v15 = vmax.f32 %v3212_v42, %v3087_v13  ;;  %v3637_v44 = vmax.f32 %v3636_v18, %v3511_v24  ;;  %v4061_v16 = vmax.f32 %v4060_v21, %v3935_v48  ;;  %2176 = vmatmul.bf16.gmra.mxu0 %v11706_v5  ;;  %v3091_v4 = vmul.f32 %v11708_v61, %v1995_v46  ;;  %v11713_v42 = vld [vmem:[#allocation122_spill] sm:$0xff]  ;;  %v11715_v19 = vld [vmem:[#allocation57_spill] sm:$0xff]  ;;  %v11716_v0 = vld [vmem:[#allocation91_spill] sm:$0xff] }
 0x2e1   : > { %v2004_v10 = vpop.f32.mrf.mxu2  ;;  %v3515_v31 = vmul.f32 %v11709_v38, %v1995_v46  ;;  %v3939_v59 = vmul.f32 %v11710_v37, %v1995_v46  ;;  %v1911_v48 = vadd.f32 %v9956_v7, %v9759_v30  ;;  %v2738_v13 = vmul.f32 %v11711_v39, %v1862_v60  ;;  %v11717_v8 = vld [vmem:[#allocation112_spill] sm:$0xff] }
 0x2e2   : > { %v1917_v24 = vpop.f32.mrf.mxu1  ;;  %v3162_v40 = vmul.f32 %v11712_v22, %v1862_v60  ;;  %v3586_v18 = vmul.f32 %v11713_v42, %v1862_v60  ;;  %v4010_v21 = vmul.f32 %v11714_v41, %v1862_v60  ;;  %v2671_v53 = vmul.f32 %v11715_v19, %v1997_v20 }
 0x2e3   : > { %v3095_v23 = vmul.f32 %v11716_v0, %v1997_v20  ;;  %v3519_v2 = vmul.f32 %v11717_v8, %v1997_v20  ;;  %v2000_v46 = vadd.f32 %v9968_v56, %v1911_v48  ;;  %v10076_v37 = vmax.f32 %v2854_v9, %v2738_v13  ;;  %2328 = vmatpush.bf16.msra.mxu2 %v6491_v6  ;;  %v11718_v9 = vld [vmem:[#allocation118_spill] sm:$0xff] }
 0x2e4   : > { %v10078_v7 = vmax.f32 %v3278_v12, %v3162_v40  ;;  %v10080_v38 = vmax.f32 %v3702_v14, %v3586_v18  ;;  %v10082_v39 = vmax.f32 %v4126_v58, %v4010_v21  ;;  %v1774_v22 = vpop.f32.mrf.mxu3  ;;  %v2790_v60 = vmax.f32 %v2789_v11, %v2667_v57  ;;  %v11719_v12 = vld [vmem:[#allocation25_spill] sm:$0xff]  ;;  %v11724_v21 = vld [vmem:[#allocation123_spill] sm:$0xff] }
 0x2e5   : > { %v1863_v42 = vpop.f32.mrf.mxu0  ;;  %v1913_v41 = vadd.f32 %v9971_v29, %v9759_v30  ;;  %v3214_v0 = vmax.f32 %v3213_v15, %v3091_v4  ;;  %v3638_v19 = vmax.f32 %v3637_v44, %v3515_v31  ;;  %v4062_v8 = vmax.f32 %v4061_v16, %v3939_v59  ;;  %v11720_v29 = vld [vmem:[#allocation114_spill] sm:$0xff]  ;;  %v11721_v44 = vld [vmem:[#allocation119_spill] sm:$0xff] }
 0x2e6   : > { %v1775_v56 = vadd.f32 %v1774_v22, %v9369_v49  ;;  %v3943_v48 = vmul.f32 %v11718_v9, %v1997_v20  ;;  %v2675_v13 = vmul.f32 %v11719_v12, %v2000_v46  ;;  %v1916_v58 = vadd.f32 %v10012_v33, %v9759_v30  ;;  %v11722_v4 = vld [vmem:[#allocation126_spill] sm:$0xff]  ;;  %v11723_v20 = vld [vmem:[#allocation113_spill] sm:$0xff] }
 0x2e7   : > { %v2002_v14 = vadd.f32 %v9990_v54, %v1913_v41  ;;  %v2791_v6 = vmax.f32 %v2790_v60, %v2671_v53  ;;  %v3215_v11 = vmax.f32 %v3214_v0, %v3095_v23  ;;  %v3639_v57 = vmax.f32 %v3638_v19, %v3519_v2  ;;  %v11725_v41 = vld [vmem:[#allocation97_spill] sm:$0xff]  ;;  %v11727_v53 = vld [vmem:[#allocation144_spill] sm:$0xff]  ;;  %v11728_v23 = vld [vmem:[#allocation26_spill] sm:$0xff] }
 0x2e8   : > { %v1864_v18 = vadd.f32 %v1863_v42, %v1775_v56  ;;  %v3099_v15 = vmul.f32 %v11720_v29, %v2000_v46  ;;  %v3523_v16 = vmul.f32 %v11721_v44, %v2000_v46  ;;  %v3947_v31 = vmul.f32 %v11722_v4, %v2000_v46  ;;  %v11726_v33 = vld [vmem:[#allocation137_spill] sm:$0xff]  ;;  %v11729_v60 = vld [vmem:[#allocation127_spill] sm:$0xff]  ;;  %v11730_v44 = vld [vmem:[#allocation132_spill] sm:$0xff] }
 0x2e9   : > { %v2006_v40 = vpop.f32.mrf.mxu2  ;;  %v2005_v59 = vadd.f32 %v2004_v10, %v1916_v58  ;;  %2092 = vmatmul.bf16.gmra.mxu3 %v11723_v20  ;;  %v4063_v19 = vmax.f32 %v4062_v8, %v3943_v48  ;;  %v2792_v42 = vmax.f32 %v2791_v6, %v2675_v13  ;;  %v2679_v2 = vmul.f32 %v11728_v23, %v2002_v14  ;;  %v11731_v29 = vld [vmem:[#allocation172_spill] sm:$0xff] }
 0x2ea   : > { %v1920_v22 = vpop.f32.mrf.mxu1  ;;  %v2742_v54 = vmul.f32 %v11724_v21, %v1864_v18  ;;  %v3166_v12 = vmul.f32 %v11725_v41, %v1864_v18  ;;  %v3590_v9 = vmul.f32 %v11726_v33, %v1864_v18  ;;  %v4014_v0 = vmul.f32 %v11727_v53, %v1864_v18  ;;  %v11732_v18 = vld [vmem:[#allocation140_spill] sm:$0xff] }
 0x2eb   : > { %v3103_v56 = vmul.f32 %v11729_v60, %v2002_v14  ;;  %v3527_v46 = vmul.f32 %v11730_v44, %v2002_v14  ;;  %v3216_v33 = vmax.f32 %v3215_v11, %v3099_v15  ;;  %v3951_v8 = vmul.f32 %v11732_v18, %v2002_v14  ;;  %v11733_v48 = vld [vmem:[#allocation60_spill] sm:$0xff]  ;;  %v11736_v15 = vld [vmem:[#allocation117_spill] sm:$0xff] }
 0x2ec   : > { %v2856_v10 = vmax.f32 %v10076_v37, %v2742_v54  ;;  %v3280_v58 = vmax.f32 %v10078_v7, %v3166_v12  ;;  %v3704_v21 = vmax.f32 %v10080_v38, %v3590_v9  ;;  %v1777_v4 = vpop.f32.mrf.mxu3  ;;  %v2683_v13 = vmul.f32 %v11733_v48, %v2005_v59  ;;  %v11734_v60 = vld [vmem:[#allocation128_spill] sm:$0xff] }
 0x2ed   : > { %v1866_v41 = vpop.f32.mrf.mxu0  ;;  %1959 = vmatmul.bf16.gmra.mxu1 %v11731_v29  ;;  %v1918_v6 = vadd.f32 %v1917_v24, %v9759_v30  ;;  %v3640_v44 = vmax.f32 %v3639_v57, %v3523_v16  ;;  %v4064_v23 = vmax.f32 %v4063_v19, %v3947_v31  ;;  %v1778_v37 = vadd.f32 %v1777_v4, %v9369_v49  ;;  %v11735_v9 = vld [vmem:[#allocation136_spill] sm:$0xff]  ;;  %v11737_v24 = vld [vmem:[#allocation130_spill] sm:$0xff]  ;;  %v11738_v31 = vld [vmem:[#allocation169_spill] sm:$0xff] }
 0x2ee   : > { %2048 = vmatmul.bf16.gmra.mxu2 %v11734_v60  ;;  %v4128_v7 = vmax.f32 %v10082_v39, %v4014_v0  ;;  %v2793_v38 = vmax.f32 %v2792_v42, %v2679_v2  ;;  %v3107_v12 = vmul.f32 %v11735_v9, %v2005_v59  ;;  %v1921_v11 = vadd.f32 %v1920_v22, %v9759_v30  ;;  %v11739_v0 = vld [vmem:[#allocation70_spill] sm:$0xff]  ;;  %v11740_v2 = vld [vmem:[#allocation141_spill] sm:$0xff]  ;;  %v11742_v9 = vld [vmem:[#allocation151_spill] sm:$0xff] }
 0x2ef   : > { %v2007_v54 = vadd.f32 %v2006_v40, %v1918_v6  ;;  %v3217_v29 = vmax.f32 %v3216_v33, %v3103_v56  ;;  %v3641_v48 = vmax.f32 %v3640_v44, %v3527_v46  ;;  %v3531_v18 = vmul.f32 %v11737_v24, %v2005_v59  ;;  %v11741_v6 = vld [vmem:[#allocation143_spill] sm:$0xff]  ;;  %v11744_v56 = vld [vmem:[#allocation146_spill] sm:$0xff]  ;;  %v11747_v24 = vld [vmem:[#allocation28_spill] sm:$0xff] }
 0x2f0   : > { %2181 = vmatmul.bf16.gmra.mxu0 %v11736_v15  ;;  %v1867_v60 = vadd.f32 %v1866_v41, %v1778_v37  ;;  %v4065_v57 = vmax.f32 %v4064_v23, %v3951_v8  ;;  %v2794_v16 = vmax.f32 %v2793_v38, %v2683_v13  ;;  %v3955_v4 = vmul.f32 %v11738_v31, %v2005_v59  ;;  %v11743_v33 = vld [vmem:[#allocation27_spill] sm:$0xff]  ;;  %v11745_v41 = vld [vmem:[#allocation156_spill] sm:$0xff] }
 0x2f1   : > { %v2009_v14 = vpop.f32.mrf.mxu2  ;;  %v3218_v15 = vmax.f32 %v3217_v29, %v3107_v12  ;;  %v2687_v44 = vmul.f32 %v11743_v33, %v2007_v54  ;;  %v3111_v46 = vmul.f32 %v11744_v56, %v2007_v54  ;;  %v3535_v23 = vmul.f32 %v11745_v41, %v2007_v54  ;;  %v11748_v29 = vld [vmem:[#allocation101_spill] sm:$0xff]  ;;  %v11749_v33 = vld [vmem:[#allocation167_spill] sm:$0xff] }
 0x2f2   : > { %v2010_v19 = vadd.f32 %v2009_v14, %v1921_v11  ;;  %v1922_v39 = vpop.f32.mrf.mxu1  ;;  %v2746_v42 = vmul.f32 %v11739_v0, %v1867_v60  ;;  %v3170_v40 = vmul.f32 %v11740_v2, %v1867_v60  ;;  %v3594_v22 = vmul.f32 %v11741_v6, %v1867_v60  ;;  %v11746_v14 = vld [vmem:[#allocation163_spill] sm:$0xff] }
 0x2f3   : > { %v4018_v53 = vmul.f32 %v11742_v9, %v1867_v60  ;;  %v3642_v8 = vmax.f32 %v3641_v48, %v3531_v18  ;;  %v3959_v31 = vmul.f32 %v11746_v14, %v2007_v54  ;;  %v4066_v56 = vmax.f32 %v4065_v57, %v3955_v4  ;;  %v11752_v4 = vld [vmem:[#allocation147_spill] sm:$0xff] }
 0x2f4   : > { %v10125_v13 = vmax.f32 %v2856_v10, %v2746_v42  ;;  %v10127_v59 = vmax.f32 %v3280_v58, %v3170_v40  ;;  %v10129_v37 = vmax.f32 %v3704_v21, %v3594_v22  ;;  %v1779_v38 = vpop.f32.mrf.mxu3  ;;  %v2691_v60 = vmul.f32 %v11747_v24, %v2010_v19  ;;  %v11750_v42 = vld [vmem:[#allocation174_spill] sm:$0xff] }
 0x2f5   : > { %v1868_v11 = vpop.f32.mrf.mxu0  ;;  %v3115_v12 = vmul.f32 %v11748_v29, %v2010_v19  ;;  %v3539_v9 = vmul.f32 %v11749_v33, %v2010_v19  ;;  %v1923_v41 = vadd.f32 %v1922_v39, %v9759_v30  ;;  %v1780_v10 = vadd.f32 %v1779_v38, %v9369_v49  ;;  %v11751_v33 = vld [vmem:[#allocation121_spill] sm:$0xff]  ;;  %v11753_v38 = vld [vmem:[#allocation152_spill] sm:$0xff] }
 0x2f6   : > { %v10137_v18 = vmax.f32 %v4128_v7, %v4018_v53  ;;  %v2795_v58 = vmax.f32 %v2794_v16, %v2687_v44  ;;  %v3219_v21 = vmax.f32 %v3218_v15, %v3111_v46  ;;  %v3643_v48 = vmax.f32 %v3642_v8, %v3535_v23  ;;  %v11754_v7 = vld [vmem:[#allocation155_spill] sm:$0xff]  ;;  %v11757_v8 = vld [vmem:[#allocation173_spill] sm:$0xff] }
 0x2f7   : > { %v3963_v40 = vmul.f32 %v11750_v42, %v2010_v19  ;;  %v1869_v54 = vadd.f32 %v1868_v11, %v1780_v10  ;;  %v4067_v24 = vmax.f32 %v4066_v56, %v3959_v31  ;;  %v11755_v15 = vld [vmem:[#allocation63_spill] sm:$0xff] }
 0x2f8   : > { %v2796_v6 = vmax.f32 %v2795_v58, %v2691_v60  ;;  %v3220_v29 = vmax.f32 %v3219_v21, %v3115_v12  ;;  %v3644_v2 = vmax.f32 %v3643_v48, %v3539_v9  ;;  %v11756_v19 = vld [vmem:[#allocation171_spill] sm:$0xff] }
 0x2f9   : > { %v2011_v22 = vpop.f32.mrf.mxu2  ;;  %2097 = vmatmul.bf16.gmra.mxu3 %v11751_v33  ;;  %v2750_v39 = vmul.f32 %v11752_v4, %v1869_v54  ;;  %v3174_v53 = vmul.f32 %v11753_v38, %v1869_v54  ;;  %v3598_v16 = vmul.f32 %v11754_v7, %v1869_v54  ;;  %v4068_v46 = vmax.f32 %v4067_v24, %v3963_v40  ;;  %v11758_v58 = vld [vmem:[#allocation67_spill] sm:$0xff] }
 0x2fa   : > { %v2012_v14 = vadd.f32 %v2011_v22, %v1923_v41  ;;  %v1925_v57 = vpop.f32.mrf.mxu1 }
 0x2fb   : > { %v2858_v9 = vmax.f32 %v10125_v13, %v2750_v39  ;;  %v3282_v56 = vmax.f32 %v10127_v59, %v3174_v53  ;;  %v3706_v11 = vmax.f32 %v10129_v37, %v3598_v16  ;;  %v11759_v13 = vld [vmem:[#allocation161_spill] sm:$0xff]  ;;  %v11760_v16 = vld [vmem:[#allocation124_spill] sm:$0xff] }
 0x2fc   : > { %v2695_v44 = vmul.f32 %v11755_v15, %v2012_v14  ;;  %v3119_v23 = vmul.f32 %v11756_v19, %v2012_v14  ;;  %v3543_v41 = vmul.f32 %v11757_v8, %v2012_v14  ;;  %v3967_v31 = vmul.f32 %v9775_v35, %v2012_v14  ;;  %v1782_v12 = vpop.f32.mrf.mxu3  ;;  %v11764_v8 = vld [vmem:[#allocation158_spill] sm:$0xff] }
 0x2fd   : > { %v1871_v10 = vpop.f32.mrf.mxu0  ;;  %2240 = vmatmul.bf16.vlgmr.msra.gmra.mxu1 %v11758_v58  ;;  %v1783_v40 = vadd.f32 %v1782_v12, %v9369_v49  ;;  %v1926_v14 = vadd.f32 %v1925_v57, %v9759_v30  ;;  %v4022_v39 = vmul.f32 %v11759_v13, %v1869_v54  ;;  %v11763_v12 = vld [vmem:[#allocation159_spill] sm:$0xff] }
 0x2fe   : > { %v2797_v60 = vmax.f32 %v2796_v6, %v2695_v44  ;;  %v3221_v21 = vmax.f32 %v3220_v29, %v3119_v23  ;;  %v3645_v48 = vmax.f32 %v3644_v2, %v3543_v41  ;;  %v4069_v24 = vmax.f32 %v4068_v46, %v3967_v31  ;;  %2329 = vmatmul.bf16.vlgmr.msra.gmra.mxu2 %v11642_v47  ;;  %v10157_v44 = vpop.permute.xlu0 %3899  ;;  %v10159_v46 = vpop.permute.xlu2 %3479 }
 0x2ff   : > { %v1872_v6 = vadd.f32 %v1871_v10, %v1783_v40  ;;  %11761 = vst [vmem:[#allocation71_spill] sm:$0xff] %v10157_v44  ;;  %v4130_v23 = vmax.f32 %v10137_v18, %v4022_v39  ;;  %v11765_v40 = vld [vmem:[#allocation134_spill] sm:$0xff] }
 0x300   : > { %v2798_v22 = vrot.slane %v2797_v60, 4  ;;  %v3222_v59 = vrot.slane %v3221_v21, 4  ;;  %v3646_v53 = vrot.slane %v3645_v48, 4  ;;  %v4070_v37 = vrot.slane %v4069_v24, 4  ;;  %2186 = vmatmul.bf16.gmra.mxu0 %v11760_v16  ;;  %11762 = vst [vmem:[#allocation75_spill] sm:$0xff] %v10159_v46 }
 0x301   : > { %v2014_v29 = vpop.f32.mrf.mxu2  ;;  %v2754_v54 = vmul.f32 %v11763_v12, %v1872_v6  ;;  %v3178_v10 = vmul.f32 %v11764_v8, %v1872_v6  ;;  %v3602_v19 = vmul.f32 %v11765_v40, %v1872_v6  ;;  %v4026_v15 = vmul.f32 %v10157_v44, %v1872_v6 }
 0x302   : > { %v2799_v2 = vmax.f32 %v2797_v60, %v2798_v22  ;;  %v2015_v47 = vadd.f32 %v2014_v29, %v1926_v14  ;;  %v3223_v41 = vmax.f32 %v3221_v21, %v3222_v59  ;;  %v3647_v31 = vmax.f32 %v3645_v48, %v3646_v53  ;;  %v1927_v58 = vpop.f32.mrf.mxu1  ;;  %v10169_v29 = vld [vmem:[%s11138_s7] sm:$0xf] }
 0x303   : > { %v4071_v57 = vmax.f32 %v4069_v24, %v4070_v37  ;;  %v2859_v13 = vmax.f32 %v2858_v9, %v2754_v54  ;;  %v3283_v18 = vmax.f32 %v3282_v56, %v3178_v10  ;;  %v3707_v14 = vmax.f32 %v3706_v11, %v3602_v19  ;;  %v11766_v10 = vld [vmem:[#allocation129_spill] sm:$0xff] }
 0x304   : > { %v2800_v35 = vrot.slane %v2799_v2, 2  ;;  %v3224_v42 = vrot.slane %v3223_v41, 2  ;;  %v3648_v60 = vrot.slane %v3647_v31, 2  ;;  %v4131_v21 = vmax.f32 %v4130_v23, %v4026_v15  ;;  %v1784_v48 = vpop.f32.mrf.mxu3 }
 0x305   : > { %v4072_v22 = vrot.slane %v4071_v57, 2  ;;  %v1873_v24 = vpop.f32.mrf.mxu0  ;;  %v10172_v6 = vperm.slane %v10169_v29, 2  ;;  %v1928_v15 = vadd.f32 %v1927_v58, %v9759_v30  ;;  %v1785_v23 = vadd.f32 %v1784_v48, %v9369_v49 }
 0x306   : > { %v2801_v7 = vmax.f32 %v2799_v2, %v2800_v35  ;;  %v3225_v39 = vmax.f32 %v3223_v41, %v3224_v42  ;;  %v3649_v59 = vmax.f32 %v3647_v31, %v3648_v60  ;;  %v10176_v42 = vmul.f32 %v11644_v36, %v2015_v47 }
 0x307   : > { %v4073_v53 = vmax.f32 %v4071_v57, %v4072_v22  ;;  %v10179_v2 = vmul.f32 %v11645_v25, %v2015_v47  ;;  %v10183_v57 = vmul.f32 %v11646_v26, %v2015_v47  ;;  %v1874_v22 = vadd.f32 %v1873_v24, %v1785_v23 }
 0x308   : > { %v2802_v37 = vrot.slane %v2801_v7, 1  ;;  %v3226_v9 = vrot.slane %v3225_v39, 1  ;;  %v3650_v35 = vrot.slane %v3649_v59, 1 }
 0x309   : > { %v4074_v56 = vrot.slane %v4073_v53, 1  ;;  %v2016_v19 = vpop.f32.mrf.mxu2  ;;  %2102 = vmatmul.bf16.gmra.mxu3 %v11766_v10  ;;  %v3606_v24 = vmul.f32 %v10159_v46, %v1874_v22 }
 0x30a   : > { %v2803_v11 = vmax.f32 %v2801_v7, %v2802_v37  ;;  %v3227_v41 = vmax.f32 %v3225_v39, %v3226_v9  ;;  %v3651_v31 = vmax.f32 %v3649_v59, %v3650_v35  ;;  %v2017_v54 = vadd.f32 %v2016_v19, %v1928_v15  ;;  %v1930_v60 = vpop.f32.mrf.mxu1  ;;  %v10189_v37 = vpop.permute.xlu2 %3903  ;;  %v11768_v35 = vld [vmem:[#allocation165_spill] sm:$0xff] }
 0x30b   : > { %v4075_v58 = vmax.f32 %v4073_v53, %v4074_v56  ;;  %v10187_v7 = vmul.f32 %v11647_v32, %v2015_v47  ;;  %11767 = vst [vmem:[#allocation79_spill] sm:$0xff] %v10189_v37  ;;  %v1931_v25 = vadd.f32 %v1930_v60, %v9759_v30  ;;  %v2758_v53 = vmul.f32 %v11768_v35, %v1874_v22  ;;  %v11769_v56 = vld [vmem:[#allocation170_spill] sm:$0xff] }
 0x30c   : > { %v4204_v49 = vsel %vm4202_vm0, %v2803_v11, %v3227_v41  ;;  %v2703_v48 = vmul.f32 %v11648_v45, %v2017_v54  ;;  %v3127_v39 = vmul.f32 %v11649_v51, %v2017_v54  ;;  %v3551_v59 = vmul.f32 %v11650_v62, %v2017_v54  ;;  %v2063_v15 = vpop.f32.mrf.mxu3 }
 0x30d   : > { %v4213_v9 = vsel %vm4211_vm1, %v4204_v49, %v3651_v31  ;;  %v3182_v47 = vmul.f32 %v11769_v56, %v1874_v22  ;;  %v2152_v19 = vpop.f32.mrf.mxu0  ;;  %2245 = vmatmul.bf16.gmra.mxu1 %v11643_v55  ;;  %v4030_v23 = vmul.f32 %v10189_v37, %v1874_v22  ;;  %v2860_v49 = vmax.f32 %v2859_v13, %v2758_v53  ;;  %v11771_v53 = vld [vmem:[#allocation48_spill] sm:$0xff] }
 0x30e   : > { %v4222_v11 = vsel %vm4220_vm2, %v4213_v9, %v4075_v58  ;;  %v2867_v41 = vmax.f32 %v10176_v42, %v2703_v48  ;;  %v3291_v60 = vmax.f32 %v10179_v2, %v3127_v39  ;;  %2334 = vmatmul.bf16.gmra.mxu2 %v11652_v52  ;;  %v3708_v51 = vmax.f32 %v3707_v14, %v3606_v24  ;;  %v11770_v58 = vld [vmem:[#allocation131_spill] sm:$0xff] }
 0x30f   : > { %v4237_v31 = vrot.slane %v4222_v11, 4  ;;  %v3284_v62 = vmax.f32 %v3283_v18, %v3182_v47  ;;  %v4132_v45 = vmax.f32 %v4131_v21, %v4030_v23  ;;  %v3715_v32 = vmax.f32 %v10183_v57, %v3551_v59  ;;  %v11772_v23 = vld [vmem:[#allocation74_spill] sm:$0xff] }
 0x310   : > { %v3975_v26 = vmul.f32 %v11651_v28, %v2017_v54  ;;  %v2064_v55 = vadd.f32 %v2063_v15, %v10172_v6  ;;  %2191 = vmatmul.bf16.gmra.mxu0 %v11770_v58  ;;  %v2861_v2 = vrot.slane %v2860_v49, 4  ;;  %v3709_v52 = vrot.slane %v3708_v51, 4 }
 0x311   : > { %v2019_v22 = vpop.f32.mrf.mxu2  ;;  %v4242_v42 = vsel %vm4241_vm3, %v9830_v3, %v4237_v31  ;;  %v3285_v48 = vrot.slane %v3284_v62, 4  ;;  %v4133_v13 = vrot.slane %v4132_v45, 4 }
 0x312   : > { %4246 = vst [vmem:[#allocation1] ss:$2 sm:$0xff] %v4242_v42  ;;  %v4139_v18 = vmax.f32 %v10187_v7, %v3975_v26  ;;  %v2153_v14 = vadd.f32 %v2152_v19, %v2064_v55  ;;  %v2020_v21 = vadd.f32 %v2019_v22, %v1931_v25  ;;  %v1932_v57 = vpop.f32.mrf.mxu1  ;;  %v2862_v39 = vmax.f32 %v2860_v49, %v2861_v2 }
 0x313   : > { %v3286_v54 = vmax.f32 %v3284_v62, %v3285_v48  ;;  %v3710_v59 = vmax.f32 %v3708_v51, %v3709_v52  ;;  %v4134_v9 = vmax.f32 %v4132_v45, %v4133_v13  ;;  %v1933_v24 = vadd.f32 %v1932_v57, %v9759_v30 }
 0x314   : > { %v10214_v47 = vmul.f32 %v11771_v53, %v2153_v14  ;;  %v2863_v3 = vrot.slane %v2862_v39, 2  ;;  %v10218_v31 = vmul.f32 %v11772_v23, %v2153_v14  ;;  %v2065_v42 = vpop.f32.mrf.mxu3  ;;  %v2707_v25 = vmul.f32 %v11654_v63, %v2020_v21  ;;  %v11773_v63 = vld [vmem:[#allocation35_spill] sm:$0xff] }
 0x315   : > { %v3287_v15 = vrot.slane %v3286_v54, 2  ;;  %v3711_v11 = vrot.slane %v3710_v59, 2  ;;  %v2154_v26 = vpop.f32.mrf.mxu0  ;;  %v4135_v7 = vrot.slane %v4134_v9, 2  ;;  %v3131_v62 = vmul.f32 %v11655_v27, %v2020_v21 }
 0x316   : > { %v3555_v45 = vmul.f32 %v11656_v43, %v2020_v21  ;;  %v2864_v51 = vmax.f32 %v2862_v39, %v2863_v3  ;;  %v3979_v55 = vmul.f32 %v11657_v34, %v2020_v21  ;;  %v2868_v2 = vmax.f32 %v2867_v41, %v2707_v25  ;;  %v11774_v39 = vld [vmem:[#allocation135_spill] sm:$0xff]  ;;  %v11775_v41 = vld [vmem:[#allocation38_spill] sm:$0xff]  ;;  %v11776_v3 = vld [vmem:[#allocation45_spill] sm:$0xff] }
 0x317   : > { %v3288_v19 = vmax.f32 %v3286_v54, %v3287_v15  ;;  %v3712_v49 = vmax.f32 %v3710_v59, %v3711_v11  ;;  %v4136_v22 = vmax.f32 %v4134_v9, %v4135_v7  ;;  %v3292_v48 = vmax.f32 %v3291_v60, %v3131_v62  ;;  %v11777_v11 = vld [vmem:[#allocation47_spill] sm:$0xff] }
 0x318   : > { %v3716_v52 = vmax.f32 %v3715_v32, %v3555_v45  ;;  %v2865_v57 = vrot.slane %v2864_v51, 1  ;;  %v4140_v23 = vmax.f32 %v4139_v18, %v3979_v55  ;;  %v3484_v58 = vmul.f32 %v11773_v63, %v2153_v14  ;;  %v11779_v45 = vld [vmem:[#allocation55_spill] sm:$0xff] }
 0x319   : > { %v2021_v13 = vpop.f32.mrf.mxu2  ;;  %v3289_v28 = vrot.slane %v3288_v19, 1  ;;  %v3713_v36 = vrot.slane %v3712_v49, 1  ;;  %v4137_v53 = vrot.slane %v4136_v22, 1  ;;  %v2066_v27 = vadd.f32 %v2065_v42, %v10172_v6  ;;  %2107 = vmatmul.bf16.gmra.mxu3 %v11774_v39  ;;  %v11778_v42 = vld [vmem:[#allocation49_spill] sm:$0xff] }
 0x31a   : > { %v2022_v43 = vadd.f32 %v2021_v13, %v1933_v24  ;;  %v1935_v54 = vpop.f32.mrf.mxu1  ;;  %v2866_v59 = vmax.f32 %v2864_v51, %v2865_v57  ;;  %v3908_v60 = vmul.f32 %v11775_v41, %v2153_v14  ;;  %v11847_v41 = vld [vmem:[#allocation160_spill] sm:$0xff] }
 0x31b   : > { %v3290_v21 = vmax.f32 %v3288_v19, %v3289_v28  ;;  %v3714_v9 = vmax.f32 %v3712_v49, %v3713_v36  ;;  %v2155_v32 = vadd.f32 %v2154_v26, %v2066_v27  ;;  %v1936_v18 = vadd.f32 %v1935_v54, %v9759_v30  ;;  %v11780_v28 = vld [vmem:[#allocation83_spill] sm:$0xff]  ;;  %v11783_v49 = vld [vmem:[#allocation105_spill] sm:$0xff]  ;;  %v11784_v54 = vld [vmem:[#allocation86_spill] sm:$0xff] }
 0x31c   : > { %v2711_v15 = vmul.f32 %v11776_v3, %v2022_v43  ;;  %v3135_v7 = vmul.f32 %v11777_v11, %v2022_v43  ;;  %v4138_v25 = vmax.f32 %v4136_v22, %v4137_v53  ;;  %v3559_v24 = vmul.f32 %v11778_v42, %v2022_v43  ;;  %v2068_v13 = vpop.f32.mrf.mxu3  ;;  %v11781_v27 = vld [vmem:[#allocation51_spill] sm:$0xff]  ;;  %v11786_v22 = vld [vmem:[#allocation41_spill] sm:$0xff]  ;;  %v11787_v42 = vld [vmem:[#allocation138_spill] sm:$0xff] }
 0x31d   : > { %v4207_v62 = vsel %vm4202_vm0, %v2866_v59, %v3290_v21  ;;  %v3983_v55 = vmul.f32 %v11779_v45, %v2022_v43  ;;  %v2157_v51 = vpop.f32.mrf.mxu0  ;;  %2250 = vmatmul.bf16.gmra.mxu1 %v11780_v28  ;;  %v2640_v14 = vmul.f32 %v11781_v27, %v2155_v32  ;;  %v11782_v26 = vld [vmem:[#allocation31_spill] sm:$0xff]  ;;  %v3488_v57 = vmul.f32 %v11783_v49, %v2155_v32 }
 0x31e   : > { %v4216_v36 = vsel %vm4211_vm1, %v4207_v62, %v3714_v9  ;;  %v3064_v19 = vmul.f32 %v11782_v26, %v2155_v32  ;;  %2339 = vmatmul.bf16.gmra.mxu2 %v11784_v54  ;;  %v3912_v59 = vmul.f32 %v11786_v22, %v2155_v32  ;;  %v2869_v43 = vmax.f32 %v2868_v2, %v2711_v15  ;;  %v11789_v2 = vld [vmem:[#allocation52_spill] sm:$0xff] }
 0x31f   : > { %v10241_v53 = vsel %vm4220_vm2, %v4216_v36, %v4138_v25  ;;  %v3293_v21 = vmax.f32 %v3292_v48, %v3135_v7  ;;  %v2804_v45 = vmax.f32 %v10214_v47, %v2640_v14  ;;  %v3652_v9 = vmax.f32 %v3484_v58, %v3488_v57  ;;  %v11790_v15 = vld [vmem:[#allocation116_spill] sm:$0xff]  ;;  %v11791_v7 = vld [vmem:[#allocation149_spill] sm:$0xff]  ;;  %v11792_v58 = vld [vmem:[#allocation19_spill] sm:$0xff] }
 0x320   : > { %11785 = vst [vmem:[#allocation109_spill] sm:$0xff] %v10241_v53  ;;  %v3228_v28 = vmax.f32 %v10218_v31, %v3064_v19  ;;  %v3717_v62 = vmax.f32 %v3716_v52, %v3559_v24  ;;  %2196 = vmatmul.bf16.gmra.mxu0 %v11787_v42  ;;  %v4076_v11 = vmax.f32 %v3908_v60, %v3912_v59  ;;  %v11788_v53 = vld [vmem:[#allocation53_spill] sm:$0xff]  ;;  %v11793_v24 = vld [vmem:[#allocation39_spill] sm:$0xff]  ;;  %v11794_v60 = vld [vmem:[#allocation110_spill] sm:$0xff] }
 0x321   : > { %v4141_v3 = vmax.f32 %v4140_v23, %v3983_v55  ;;  %v2069_v34 = vadd.f32 %v2068_v13, %v10172_v6  ;;  %v2024_v54 = vpop.f32.mrf.mxu2  ;;  %v11795_v55 = vld [vmem:[#allocation139_spill] sm:$0xff] }
 0x322   : > { %v2025_v49 = vadd.f32 %v2024_v54, %v1936_v18  ;;  %v1937_v25 = vpop.f32.mrf.mxu1 }
 0x323   : > { %v2158_v36 = vadd.f32 %v2157_v51, %v2069_v34 }
 0x324   : > { %v2715_v32 = vmul.f32 %v11788_v53, %v2025_v49  ;;  %v3139_v48 = vmul.f32 %v11789_v2, %v2025_v49  ;;  %v3563_v47 = vmul.f32 %v11790_v15, %v2025_v49  ;;  %v3987_v31 = vmul.f32 %v11791_v7, %v2025_v49  ;;  %v2070_v19 = vpop.f32.mrf.mxu3 }
 0x325   : > { %v2644_v52 = vmul.f32 %v11792_v58, %v2158_v36  ;;  %v3068_v14 = vmul.f32 %v11793_v24, %v2158_v36  ;;  %v3492_v23 = vmul.f32 %v11794_v60, %v2158_v36  ;;  %v3916_v13 = vmul.f32 %v11795_v55, %v2158_v36  ;;  %v2159_v18 = vpop.f32.mrf.mxu0  ;;  %v11796_v24 = vld [vmem:[#allocation142_spill] sm:$0xff] }
 0x326   : > { %v10256_v57 = vmax.f32 %v2869_v43, %v2715_v32  ;;  %v10258_v34 = vmax.f32 %v3293_v21, %v3139_v48  ;;  %v10260_v51 = vmax.f32 %v3717_v62, %v3563_v47  ;;  %v10262_v59 = vmax.f32 %v4141_v3, %v3987_v31  ;;  %v11797_v21 = vld [vmem:[#allocation21_spill] sm:$0xff]  ;;  %v11798_v32 = vld [vmem:[#allocation44_spill] sm:$0xff]  ;;  %v11799_v48 = vld [vmem:[#allocation50_spill] sm:$0xff] }
 0x327   : > { %v2805_v54 = vmax.f32 %v2804_v45, %v2644_v52  ;;  %v3229_v49 = vmax.f32 %v3228_v28, %v3068_v14  ;;  %v3653_v7 = vmax.f32 %v3652_v9, %v3492_v23  ;;  %v4077_v15 = vmax.f32 %v4076_v11, %v3916_v13  ;;  %v11800_v28 = vld [vmem:[#allocation56_spill] sm:$0xff]  ;;  %v11801_v11 = vld [vmem:[#allocation58_spill] sm:$0xff]  ;;  %v11804_v52 = vld [vmem:[#allocation77_spill] sm:$0xff] }
 0x328   : > { %v1938_v2 = vadd.f32 %v1937_v25, %v9759_v30  ;;  %v2071_v53 = vadd.f32 %v2070_v19, %v10172_v6  ;;  %v11802_v25 = vld [vmem:[#allocation61_spill] sm:$0xff]  ;;  %v11805_v13 = vld [vmem:[#allocation90_spill] sm:$0xff] }
 0x329   : > { %v2026_v60 = vpop.f32.mrf.mxu2  ;;  %2112 = vmatmul.bf16.gmra.mxu3 %v11796_v24 }
 0x32a   : > { %v2160_v36 = vadd.f32 %v2159_v18, %v2071_v53  ;;  %v2027_v55 = vadd.f32 %v2026_v60, %v1938_v2  ;;  %v10267_v43 = vpop.f32.mrf.mxu1  ;;  %v11803_v53 = vld [vmem:[#allocation69_spill] sm:$0xff] }
 0x32c   : > { %v2648_v62 = vmul.f32 %v11797_v21, %v2160_v36  ;;  %v3072_v3 = vmul.f32 %v11798_v32, %v2160_v36  ;;  %v3496_v45 = vmul.f32 %v11799_v48, %v2160_v36  ;;  %v3920_v9 = vmul.f32 %v11800_v28, %v2160_v36  ;;  %v2073_v60 = vpop.f32.mrf.mxu3  ;;  %v11806_v28 = vld [vmem:[#allocation94_spill] sm:$0xff] }
 0x32d   : > { %v10274_v47 = vmul.f32 %v11801_v11, %v2027_v55  ;;  %v10277_v31 = vmul.f32 %v11802_v25, %v2027_v55  ;;  %v10280_v2 = vmul.f32 %v11803_v53, %v2027_v55  ;;  %v10283_v14 = vmul.f32 %v11804_v52, %v2027_v55  ;;  %v2162_v23 = vpop.f32.mrf.mxu0  ;;  %2255 = vmatmul.bf16.gmra.mxu1 %v11805_v13  ;;  %v11811_v25 = vld [vmem:[#allocation65_spill] sm:$0xff] }
 0x32e   : > { %v2806_v19 = vmax.f32 %v2805_v54, %v2648_v62  ;;  %v3230_v18 = vmax.f32 %v3229_v49, %v3072_v3  ;;  %v3654_v48 = vmax.f32 %v3653_v7, %v3496_v45  ;;  %v4078_v36 = vmax.f32 %v4077_v15, %v3920_v9  ;;  %2344 = vmatmul.bf16.gmra.mxu2 %v11806_v28  ;;  %v11807_v54 = vld [vmem:[#allocation145_spill] sm:$0xff]  ;;  %v11808_v62 = vld [vmem:[#allocation20_spill] sm:$0xff]  ;;  %v11809_v45 = vld [vmem:[#allocation82_spill] sm:$0xff] }
 0x32f   : > { %v2074_v13 = vadd.f32 %v2073_v60, %v10172_v6  ;;  %v11810_v9 = vld [vmem:[#allocation59_spill] sm:$0xff] }
 0x330   : > { %2201 = vmatmul.bf16.gmra.mxu0 %v11807_v54 }
 0x331   : > { %v2029_v7 = vpop.f32.mrf.mxu2  ;;  %v2163_v15 = vadd.f32 %v2162_v23, %v2074_v13  ;;  %v11812_v13 = vld [vmem:[#allocation148_spill] sm:$0xff] }
 0x332   : > { %v10297_v49 = vpop.f32.mrf.mxu1 }
 0x333   : > { %v2652_v3 = vmul.f32 %v11808_v62, %v2163_v15  ;;  %v3076_v28 = vmul.f32 %v11809_v45, %v2163_v15  ;;  %v3500_v53 = vmul.f32 %v11810_v9, %v2163_v15  ;;  %v3924_v11 = vmul.f32 %v11811_v25, %v2163_v15  ;;  %v11813_v62 = vld [vmem:[#allocation22_spill] sm:$0xff]  ;;  %v11815_v9 = vld [vmem:[#allocation64_spill] sm:$0xff] }
 0x334   : > { %v2075_v55 = vpop.f32.mrf.mxu3  ;;  %v11814_v45 = vld [vmem:[#allocation62_spill] sm:$0xff]  ;;  %v11816_v15 = vld [vmem:[#allocation72_spill] sm:$0xff] }
 0x335   : > { %v2164_v32 = vpop.f32.mrf.mxu0  ;;  %v2807_v21 = vmax.f32 %v2806_v19, %v2652_v3  ;;  %v3231_v52 = vmax.f32 %v3230_v18, %v3076_v28  ;;  %v3655_v24 = vmax.f32 %v3654_v48, %v3500_v53  ;;  %v4079_v60 = vmax.f32 %v4078_v36, %v3924_v11  ;;  %v11817_v18 = vld [vmem:[#allocation98_spill] sm:$0xff] }
 0x336   : > { %v2076_v54 = vadd.f32 %v2075_v55, %v10172_v6 }
 0x338   : > { %v2165_v23 = vadd.f32 %v2164_v32, %v2076_v54  ;;  %v11818_v32 = vld [vmem:[#allocation102_spill] sm:$0xff] }
 0x339   : > { %v2031_v58 = vpop.f32.mrf.mxu2  ;;  %2117 = vmatmul.bf16.gmra.mxu3 %v11812_v13  ;;  %v11819_v54 = vld [vmem:[#allocation150_spill] sm:$0xff] }
 0x33a   : > { %v1945_v22 = vpop.f32.mrf.mxu1  ;;  %v2656_v26 = vmul.f32 %v11813_v62, %v2165_v23  ;;  %v3080_v27 = vmul.f32 %v11814_v45, %v2165_v23  ;;  %v3504_v42 = vmul.f32 %v11815_v9, %v2165_v23  ;;  %v3928_v25 = vmul.f32 %v11816_v15, %v2165_v23  ;;  %v11820_v9 = vld [vmem:[#allocation54_spill] sm:$0xff]  ;;  %v11821_v15 = vld [vmem:[#allocation73_spill] sm:$0xff]  ;;  %v11822_v62 = vld [vmem:[#allocation76_spill] sm:$0xff] }
 0x33c   : > { %v2078_v39 = vpop.f32.mrf.mxu3  ;;  %v2808_v48 = vmax.f32 %v2807_v21, %v2656_v26  ;;  %v3232_v11 = vmax.f32 %v3231_v52, %v3080_v27  ;;  %v3656_v53 = vmax.f32 %v3655_v24, %v3504_v42  ;;  %v4080_v36 = vmax.f32 %v4079_v60, %v3928_v25  ;;  %v11823_v26 = vld [vmem:[#allocation84_spill] sm:$0xff] }
 0x33d   : > { %v2167_v19 = vpop.f32.mrf.mxu0  ;;  %2260 = vmatmul.bf16.gmra.mxu1 %v11817_v18  ;;  %v2079_v55 = vadd.f32 %v2078_v39, %v10172_v6 }
 0x33e   : > { %2349 = vmatmul.bf16.gmra.mxu2 %v11818_v32 }
 0x33f   : > { %v2168_v28 = vadd.f32 %v2167_v19, %v2079_v55  ;;  %v1941_v19 = vadd.f32 %v10267_v43, %v9759_v30 }
 0x340   : > { %2206 = vmatmul.bf16.gmra.mxu0 %v11819_v54 }
 0x341   : > { %v2034_v3 = vpop.f32.mrf.mxu2  ;;  %v2660_v23 = vmul.f32 %v11820_v9, %v2168_v28  ;;  %v3084_v45 = vmul.f32 %v11821_v15, %v2168_v28  ;;  %v3508_v18 = vmul.f32 %v11822_v62, %v2168_v28  ;;  %v3932_v27 = vmul.f32 %v11823_v26, %v2168_v28  ;;  %v11824_v9 = vld [vmem:[#allocation154_spill] sm:$0xff]  ;;  %v11825_v28 = vld [vmem:[#allocation23_spill] sm:$0xff] }
 0x342   : > { %v10313_v13 = vpop.f32.mrf.mxu1  ;;  %v2030_v62 = vadd.f32 %v2029_v7, %v1941_v19  ;;  %v1943_v19 = vadd.f32 %v10297_v49, %v9759_v30  ;;  %v11832_v49 = vmax.f32 %v10256_v57, %v10274_v47  ;;  %v11837_v57 = vmax.f32 %v10260_v51, %v10280_v2  ;;  %v7637_v51 = vld [vmem:[#allocation8 + $0xcc] sm:$0xf0]  ;;  %v11840_v2 = vld [vmem:[#allocation88_spill] sm:$0xff] }
 0x343   : > { %v2809_v21 = vmax.f32 %v2808_v48, %v2660_v23  ;;  %v3233_v25 = vmax.f32 %v3232_v11, %v3084_v45  ;;  %v3657_v52 = vmax.f32 %v3656_v53, %v3508_v18  ;;  %v4081_v39 = vmax.f32 %v4080_v36, %v3932_v27  ;;  %v11826_v11 = vld [vmem:[#allocation153_spill] sm:$0xff]  ;;  %v11827_v18 = vld [vmem:[#allocation106_spill] sm:$0xff] }
 0x344   : > { %v2080_v42 = vpop.f32.mrf.mxu3 }
 0x345   : > { %v2169_v24 = vpop.f32.mrf.mxu0  ;;  %v2081_v60 = vadd.f32 %v2080_v42, %v10172_v6 }
 0x347   : > { %v2170_v55 = vadd.f32 %v2169_v24, %v2081_v60  ;;  %v11828_v60 = vld [vmem:[#allocation68_spill] sm:$0xff] }
 0x348   : > { %v2723_v7 = vmul.f32 %v11828_v60, %v2030_v62 }
 0x349   : > { %v10322_v32 = vpop.f32.mrf.mxu2  ;;  %2122 = vmatmul.bf16.gmra.mxu3 %v11824_v9  ;;  %v2664_v26 = vmul.f32 %v11825_v28, %v2170_v55  ;;  %v3088_v48 = vmul.f32 %v11698_v17, %v2170_v55  ;;  %v3512_v45 = vmul.f32 %v11699_v50, %v2170_v55  ;;  %v3936_v53 = vmul.f32 %v11826_v11, %v2170_v55  ;;  %v11829_v50 = vld [vmem:[#allocation157_spill] sm:$0xff]  ;;  %v11830_v55 = vld [vmem:[#allocation87_spill] sm:$0xff] }
 0x34a   : > { %v10325_v15 = vpop.f32.mrf.mxu1  ;;  %v3147_v11 = vmul.f32 %v11830_v55, %v2030_v62  ;;  %v11831_v28 = vld [vmem:[#allocation81_spill] sm:$0xff] }
 0x34b   : > { %v2810_v43 = vmax.f32 %v2809_v21, %v2664_v26  ;;  %v3234_v27 = vmax.f32 %v3233_v25, %v3088_v48  ;;  %v3658_v42 = vmax.f32 %v3657_v52, %v3512_v45  ;;  %v4082_v24 = vmax.f32 %v4081_v39, %v3936_v53  ;;  %v7641_v39 = vld [vmem:[#allocation8 + $0xec] sm:$0xf0] }
 0x34c   : > { %v2083_v36 = vpop.f32.mrf.mxu3  ;;  %v3571_v9 = vmul.f32 %v11831_v28, %v2030_v62  ;;  %v1946_v26 = vadd.f32 %v1945_v22, %v9759_v30  ;;  %v2872_v48 = vmax.f32 %v11832_v49, %v2723_v7  ;;  %v11833_v45 = vld [vmem:[#allocation89_spill] sm:$0xff]  ;;  %v11835_v28 = vld [vmem:[#allocation108_spill] sm:$0xff]  ;;  %v11838_v7 = vld [vmem:[#allocation66_spill] sm:$0xff] }
 0x34d   : > { %v2172_v23 = vpop.f32.mrf.mxu0  ;;  %2265 = vmatmul.bf16.gmra.mxu1 %v11827_v18  ;;  %v2084_v17 = vadd.f32 %v2083_v36, %v10172_v6  ;;  %v2032_v18 = vadd.f32 %v2031_v58, %v1943_v19  ;;  %v3995_v53 = vmul.f32 %v11833_v45, %v2030_v62  ;;  %v11834_v19 = vld [vmem:[#allocation100_spill] sm:$0xff] }
 0x34e   : > { %2354 = vmatmul.bf16.gmra.mxu2 %v11706_v5  ;;  %v6718_v5 = vld [vmem:[#allocation8 + $0xe0] sm:$0xf]  ;;  %v2035_v36 = vadd.f32 %v2034_v3, %v1946_v26  ;;  %v3720_v47 = vmax.f32 %v11837_v57, %v3571_v9  ;;  %v11839_v3 = vld [vmem:[#allocation85_spill] sm:$0xff]  ;;  %v6726_v49 = vld [vmem:[#allocation8 + $0xe8] sm:$0xf] }
 0x34f   : > { %v2173_v25 = vadd.f32 %v2172_v23, %v2084_v17  ;;  %v6719_v60 = vor.u32 %v7641_v39, %v6718_v5  ;;  %v11836_v23 = vmax.f32 %v10258_v34, %v10277_v31  ;;  %v2727_v62 = vmul.f32 %v11838_v7, %v2032_v18  ;;  %v6702_v31 = vld [vmem:[#allocation8 + $0xc0] sm:$0xf]  ;;  %v11842_v57 = vld [vmem:[#allocation93_spill] sm:$0xff] }
 0x350   : > { %2211 = vmatmul.bf16.gmra.mxu0 %v11829_v50  ;;  %v3151_v26 = vmul.f32 %v11839_v3, %v2032_v18  ;;  %v3575_v9 = vmul.f32 %v11840_v2, %v2032_v18  ;;  %v11843_v3 = vld [vmem:[#allocation96_spill] sm:$0xff]  ;;  %v11845_v7 = vld [vmem:[#allocation99_spill] sm:$0xff] }
 0x351   : > { %v2039_v21 = vpop.f32.mrf.mxu2  ;;  %v2668_v55 = vmul.f32 %v11707_v1, %v2173_v25  ;;  %v3092_v58 = vmul.f32 %v11708_v61, %v2173_v25  ;;  %v3516_v22 = vmul.f32 %v11834_v19, %v2173_v25  ;;  %v3940_v17 = vmul.f32 %v11835_v28, %v2173_v25  ;;  %5043 = vmatpush.bf16.msra.mxu3 %v6719_v60  ;;  %v7642_v61 = vld [vmem:[#allocation8 + $0xf4] sm:$0xf0] }
 0x352   : > { %v10341_v52 = vpop.f32.mrf.mxu1  ;;  %v3296_v50 = vmax.f32 %v11836_v23, %v3147_v11  ;;  %v11841_v11 = vld [vmem:[#allocation95_spill] sm:$0xff]  ;;  %v2731_v1 = vmul.f32 %v11842_v57, %v2035_v36  ;;  %v1948_v60 = vadd.f32 %v10313_v13, %v9759_v30  ;;  %v2873_v2 = vmax.f32 %v2872_v48, %v2727_v62  ;;  %v11848_v62 = vld [vmem:[#allocation104_spill] sm:$0xff] }
 0x353   : > { %v10359_v19 = vmax.f32 %v2810_v43, %v2668_v55  ;;  %v10361_v25 = vmax.f32 %v3234_v27, %v3092_v58  ;;  %v10363_v28 = vmax.f32 %v3658_v42, %v3516_v22  ;;  %v10365_v34 = vmax.f32 %v4082_v24, %v3940_v17  ;;  %v6710_v58 = vld [vmem:[#allocation8 + $0xc8] sm:$0xf]  ;;  %v7638_v24 = vld [vmem:[#allocation8 + $0xd4] sm:$0xf0]  ;;  %v11846_v13 = vld [vmem:[#allocation107_spill] sm:$0xff] }
 0x354   : > { %v2085_v5 = vpop.f32.mrf.mxu3  ;;  %v3999_v23 = vmul.f32 %v11841_v11, %v2032_v18  ;;  %v3155_v43 = vmul.f32 %v11843_v3, %v2035_v36  ;;  %v6727_v55 = vor.u32 %v7642_v61, %v6726_v49  ;;  %v6703_v42 = vor.u32 %v7637_v51, %v6702_v31  ;;  %v7633_v49 = vld [vmem:[#allocation8 + $0xac] sm:$0xf0] }
 0x355   : > { %v2174_v39 = vpop.f32.mrf.mxu0  ;;  %v2086_v27 = vadd.f32 %v2085_v5, %v10172_v6  ;;  %v11844_v22 = vmax.f32 %v10262_v59, %v10283_v14  ;;  %v3579_v18 = vmul.f32 %v11845_v7, %v2035_v36  ;;  %v2037_v57 = vadd.f32 %v10322_v32, %v1948_v60  ;;  %v6686_v5 = vld [vmem:[#allocation8 + $0xa0] sm:$0xf] }
 0x356   : > { %v3297_v45 = vmax.f32 %v3296_v50, %v3151_v26  ;;  %v4003_v54 = vmul.f32 %v11846_v13, %v2035_v36  ;;  %5147 = vmatpush.bf16.msrb.mxu0 %v6727_v55  ;;  %v3721_v31 = vmax.f32 %v3720_v47, %v3575_v9  ;;  %v1951_v59 = vadd.f32 %v10325_v15, %v9759_v30  ;;  %v6694_v15 = vld [vmem:[#allocation8 + $0xa8] sm:$0xf]  ;;  %v11852_v55 = vld [vmem:[#allocation91_spill] sm:$0xff] }
 0x357   : > { %v4144_v17 = vmax.f32 %v11844_v22, %v3995_v53  ;;  %v2175_v3 = vadd.f32 %v2174_v39, %v2086_v27  ;;  %5044 = vmatpush.bf16.msra.mxu3 %v6703_v42  ;;  %v6711_v14 = vor.u32 %v7638_v24, %v6710_v58  ;;  %v10383_v53 = vmax.f32 %v2873_v2, %v2731_v1  ;;  %v11849_v39 = vld [vmem:[#allocation103_spill] sm:$0xff]  ;;  %v11853_v58 = vld [vmem:[#allocation117_spill] sm:$0xff] }
 0x358   : > { %v10385_v32 = vmax.f32 %v3297_v45, %v3155_v43  ;;  %v6687_v50 = vor.u32 %v7633_v49, %v6686_v5  ;;  %v10387_v36 = vmax.f32 %v3721_v31, %v3579_v18  ;;  %v10390_v26 = vmul.f32 %v11848_v62, %v2037_v57  ;;  %v11850_v45 = vld [vmem:[#allocation125_spill] sm:$0xff]  ;;  %v6670_v24 = vld [vmem:[#allocation8 + $0x80] sm:$0xf]  ;;  %v11855_v18 = vld [vmem:[#allocation112_spill] sm:$0xff] }
 0x359   : > { %v2041_v11 = vpop.f32.mrf.mxu2  ;;  %2127 = vmatmul.bf16.gmra.mxu3 %v11847_v41  ;;  %v4145_v48 = vmax.f32 %v4144_v17, %v3999_v23  ;;  %v10393_v51 = vmul.f32 %v11849_v39, %v2037_v57  ;;  %v2040_v47 = vadd.f32 %v2039_v21, %v1951_v59  ;;  %v7634_v23 = vld [vmem:[#allocation8 + $0xb4] sm:$0xf0]  ;;  %v10399_v2 = vmul.f32 %v11850_v45, %v2037_v57  ;;  %v11851_v43 = vld [vmem:[#allocation57_spill] sm:$0xff]  ;;  %v11854_v21 = vld [vmem:[#allocation164_spill] sm:$0xff] }
 0x35a   : > { %v1955_v61 = vpop.f32.mrf.mxu1  ;;  %v2672_v27 = vmul.f32 %v11851_v43, %v2175_v3  ;;  %v3096_v42 = vmul.f32 %v11852_v55, %v2175_v3  ;;  %v7629_v22 = vld [vmem:[#allocation8 + $0x8c] sm:$0xf0]  ;;  %v10405_v17 = vmul.f32 %v11854_v21, %v2037_v57  ;;  %v11856_v5 = vld [vmem:[#allocation118_spill] sm:$0xff]  ;;  %5148 = vmatpush.bf16.msrb.mxu0 %v6711_v14  ;;  %v6678_v55 = vld [vmem:[#allocation8 + $0x88] sm:$0xf]  ;;  %v2875_v57 = vmax.f32 %v10383_v53, %v10390_v26 }
 0x35b   : > { %v10396_v1 = vmax.f32 %v4145_v48, %v4003_v54  ;;  %v3520_v54 = vmul.f32 %v11855_v18, %v2175_v3  ;;  %v3944_v49 = vmul.f32 %v11856_v5, %v2175_v3  ;;  %v11857_v59 = vld [vmem:[#allocation162_spill] sm:$0xff]  ;;  %5045 = vmatpush.bf16.msra.mxu3 %v6687_v50  ;;  %v6695_v48 = vor.u32 %v7634_v23, %v6694_v15  ;;  %v11858_v21 = vld [vmem:[#allocation111_spill] sm:$0xff]  ;;  %v11865_v62 = vld [vmem:[#allocation133_spill] sm:$0xff] }
 0x35c   : > { %v2088_v9 = vpop.f32.mrf.mxu3  ;;  %v7630_v43 = vld [vmem:[#allocation8 + $0x94] sm:$0xf0]  ;;  %v2739_v18 = vmul.f32 %v11858_v21, %v2040_v47  ;;  %v2812_v14 = vmax.f32 %v10359_v19, %v2672_v27  ;;  %v1956_v50 = vadd.f32 %v1955_v61, %v9759_v30  ;;  %v11861_v19 = vld [vmem:[#allocation119_spill] sm:$0xff] }
 0x35d   : > { %v2177_v60 = vpop.f32.mrf.mxu0  ;;  %2270 = vmatmul.bf16.gmra.mxu1 %v11723_v20  ;;  %v1953_v20 = vadd.f32 %v10341_v52, %v9759_v30  ;;  %v2089_v31 = vadd.f32 %v2088_v9, %v10172_v6  ;;  %v3299_v52 = vmax.f32 %v10385_v32, %v10393_v51  ;;  %v3236_v9 = vmax.f32 %v10361_v25, %v3096_v42  ;;  %v11859_v51 = vld [vmem:[#allocation25_spill] sm:$0xff]  ;;  %v11862_v25 = vld [vmem:[#allocation126_spill] sm:$0xff]  ;;  %v11863_v61 = vld [vmem:[#allocation115_spill] sm:$0xff] }
 0x35e   : > { %2359 = vmatmul.bf16.gmra.mxu2 %v11853_v58  ;;  %v6671_v58 = vor.u32 %v7629_v22, %v6670_v24  ;;  %v6654_v24 = vld [vmem:[#allocation8 + $0x60] sm:$0xf]  ;;  %v7625_v22 = vld [vmem:[#allocation8 + $0x6c] sm:$0xf0]  ;;  %v3660_v5 = vmax.f32 %v10363_v28, %v3520_v54  ;;  %v4084_v53 = vmax.f32 %v10365_v34, %v3944_v49  ;;  %5149 = vmatpush.bf16.msrb.mxu0 %v6695_v48 }
 0x35f   : > { %v2042_v45 = vadd.f32 %v2041_v11, %v1953_v20  ;;  %v2178_v15 = vadd.f32 %v2177_v60, %v2089_v31  ;;  %v6679_v32 = vor.u32 %v7630_v43, %v6678_v55  ;;  %v6655_v26 = vor.u32 %v7625_v22, %v6654_v24  ;;  %v11860_v20 = vld [vmem:[#allocation114_spill] sm:$0xff]  ;;  %v6662_v43 = vld [vmem:[#allocation8 + $0x68] sm:$0xf] }
 0x360   : > { %2216 = vmatmul.bf16.gmra.mxu0 %v11857_v59  ;;  %5046 = vmatpush.bf16.msra.mxu3 %v6671_v58  ;;  %v3163_v60 = vmul.f32 %v11863_v61, %v2040_v47  ;;  %v11864_v31 = vld [vmem:[#allocation122_spill] sm:$0xff]  ;;  %v4011_v28 = vmul.f32 %v11865_v62, %v2040_v47  ;;  %v3723_v58 = vmax.f32 %v10387_v36, %v10399_v2 }
 0x361   : > { %v2044_v3 = vpop.f32.mrf.mxu2  ;;  %v2676_v11 = vmul.f32 %v11859_v51, %v2178_v15  ;;  %v3100_v21 = vmul.f32 %v11860_v20, %v2178_v15  ;;  %v3524_v27 = vmul.f32 %v11861_v19, %v2178_v15  ;;  %v3948_v42 = vmul.f32 %v11862_v25, %v2178_v15  ;;  %v7626_v55 = vld [vmem:[#allocation8 + $0x74] sm:$0xf0]  ;;  %v6638_v20 = vld [vmem:[#allocation8 + $0x40] sm:$0xf] }
 0x362   : > { %v1957_v23 = vpop.f32.mrf.mxu1  ;;  %v3587_v39 = vmul.f32 %v11864_v31, %v2040_v47  ;;  %v2045_v54 = vadd.f32 %v2044_v3, %v1956_v50  ;;  %v4147_v15 = vmax.f32 %v10396_v1, %v10405_v17  ;;  %v11866_v47 = vld [vmem:[#allocation123_spill] sm:$0xff]  ;;  %v11867_v50 = vld [vmem:[#allocation97_spill] sm:$0xff]  ;;  %5150 = vmatpush.bf16.msrb.mxu0 %v6679_v32  ;;  %v2876_v36 = vmax.f32 %v2875_v57, %v2739_v18  ;;  %v11869_v1 = vld [vmem:[#allocation144_spill] sm:$0xff] }
 0x363   : > { %v10430_v48 = vmax.f32 %v2812_v14, %v2676_v11  ;;  %v10432_v24 = vmax.f32 %v3236_v9, %v3100_v21  ;;  %v10434_v22 = vmax.f32 %v3660_v5, %v3524_v27  ;;  %v10436_v19 = vmax.f32 %v4084_v53, %v3948_v42  ;;  %v7621_v14 = vld [vmem:[#allocation8 + $0x4c] sm:$0xf0]  ;;  %v6646_v27 = vld [vmem:[#allocation8 + $0x48] sm:$0xf]  ;;  %v7622_v42 = vld [vmem:[#allocation8 + $0x54] sm:$0xf0] }
 0x364   : > { %v2090_v34 = vpop.f32.mrf.mxu3  ;;  %v2743_v3 = vmul.f32 %v11866_v47, %v2042_v45  ;;  %v3167_v25 = vmul.f32 %v11867_v50, %v2042_v45  ;;  %v11868_v11 = vld [vmem:[#allocation137_spill] sm:$0xff]  ;;  %5047 = vmatpush.bf16.msra.mxu3 %v6655_v26  ;;  %v6663_v9 = vor.u32 %v7626_v55, %v6662_v43  ;;  %v6639_v53 = vor.u32 %v7621_v14, %v6638_v20  ;;  %v11872_v20 = vld [vmem:[#allocation143_spill] sm:$0xff] }
 0x365   : > { %v2179_v49 = vpop.f32.mrf.mxu0  ;;  %v3591_v21 = vmul.f32 %v11868_v11, %v2042_v45  ;;  %v2091_v5 = vadd.f32 %v2090_v34, %v10172_v6  ;;  %v3300_v2 = vmax.f32 %v3299_v52, %v3163_v60  ;;  %v3724_v51 = vmax.f32 %v3723_v58, %v3587_v39  ;;  %v11870_v11 = vld [vmem:[#allocation166_spill] sm:$0xff]  ;;  %v11871_v26 = vld [vmem:[#allocation141_spill] sm:$0xff]  ;;  %v11873_v14 = vld [vmem:[#allocation151_spill] sm:$0xff] }
 0x366   : > { %v4015_v17 = vmul.f32 %v11869_v1, %v2042_v45  ;;  %v4148_v62 = vmax.f32 %v4147_v15, %v4011_v28  ;;  %v2747_v32 = vmul.f32 %v11739_v0, %v2045_v54  ;;  %v1958_v50 = vadd.f32 %v1957_v23, %v9759_v30  ;;  %5151 = vmatpush.bf16.msrb.mxu0 %v6663_v9  ;;  %v6622_v60 = vld [vmem:[#allocation8 + $0x20] sm:$0xf]  ;;  %v11874_v58 = vld [vmem:[#allocation26_spill] sm:$0xff] }
 0x367   : > { %v2180_v31 = vadd.f32 %v2179_v49, %v2091_v5  ;;  %v3171_v43 = vmul.f32 %v11871_v26, %v2045_v54  ;;  %v3595_v55 = vmul.f32 %v11872_v20, %v2045_v54  ;;  %v4019_v18 = vmul.f32 %v11873_v14, %v2045_v54  ;;  %v11875_v49 = vld [vmem:[#allocation127_spill] sm:$0xff]  ;;  %v7617_v20 = vld [vmem:[#allocation8 + $0x2c] sm:$0xf0]  ;;  %v6630_v26 = vld [vmem:[#allocation8 + $0x28] sm:$0xf] }
 0x368   : > { %v6647_v39 = vor.u32 %v7622_v42, %v6646_v27  ;;  %v2877_v57 = vmax.f32 %v2876_v36, %v2743_v3  ;;  %v3301_v45 = vmax.f32 %v3300_v2, %v3167_v25  ;;  %v3725_v52 = vmax.f32 %v3724_v51, %v3591_v21  ;;  %5048 = vmatpush.bf16.msra.mxu3 %v6639_v53  ;;  %v7618_v54 = vld [vmem:[#allocation8 + $0x34] sm:$0xf0]  ;;  %v11876_v3 = vld [vmem:[#allocation132_spill] sm:$0xff]  ;;  %v6606_v2 = vld [vmem:[#allocation8] sm:$0xf] }
 0x369   : > { %v2046_v47 = vpop.f32.mrf.mxu2  ;;  %2132 = vmatmul.bf16.gmra.mxu3 %v11870_v11  ;;  %v4149_v28 = vmax.f32 %v4148_v62, %v4015_v17  ;;  %v2680_v23 = vmul.f32 %v11874_v58, %v2180_v31  ;;  %v3104_v15 = vmul.f32 %v11875_v49, %v2180_v31  ;;  %v3528_v25 = vmul.f32 %v11876_v3, %v2180_v31  ;;  %v11878_v27 = vld [vmem:[#allocation168_spill] sm:$0xff]  ;;  %v7613_v17 = vld [vmem:[#allocation8 + $0xc] sm:$0xf0] }
 0x36a   : > { %v1960_v34 = vpop.f32.mrf.mxu1  ;;  %v2047_v5 = vadd.f32 %v2046_v47, %v1958_v50  ;;  %v10456_v9 = vmax.f32 %v2877_v57, %v2747_v32  ;;  %v10460_v51 = vmax.f32 %v3301_v45, %v3171_v43  ;;  %v10462_v62 = vmax.f32 %v3725_v52, %v3595_v55  ;;  %v11877_v47 = vld [vmem:[#allocation140_spill] sm:$0xff]  ;;  %5152 = vmatpush.bf16.msrb.mxu0 %v6647_v39  ;;  %v7614_v39 = vld [vmem:[#allocation8 + $0x14] sm:$0xf0]  ;;  %v7673_v57 = vld [vmem:[#allocation8 + $0x1ec] sm:$0xf0] }
 0x36b   : > { %v10464_v21 = vmax.f32 %v4149_v28, %v4019_v18  ;;  %v3952_v50 = vmul.f32 %v11877_v47, %v2180_v31  ;;  %v6623_v42 = vor.u32 %v7617_v20, %v6622_v60  ;;  %v6631_v36 = vor.u32 %v7618_v54, %v6630_v26  ;;  %v7640_v60 = vld [vmem:[#allocation8 + $0xec] sm:$0xf]  ;;  %v6728_v28 = vld [vmem:[#allocation8 + $0xf8] sm:$0xf0] }
 0x36c   : > { %v2093_v0 = vpop.f32.mrf.mxu3  ;;  %v2814_v32 = vmax.f32 %v10430_v48, %v2680_v23  ;;  %v3238_v43 = vmax.f32 %v10432_v24, %v3104_v15  ;;  %v2751_v55 = vmul.f32 %v11752_v4, %v2047_v5  ;;  %v3175_v31 = vmul.f32 %v11753_v38, %v2047_v5  ;;  %v11879_v54 = vld [vmem:[#allocation60_spill] sm:$0xff]  ;;  %v11881_v47 = vld [vmem:[#allocation130_spill] sm:$0xff] }
 0x36d   : > { %v2182_v1 = vpop.f32.mrf.mxu0  ;;  %2275 = vmatmul.bf16.gmra.mxu1 %v11751_v33  ;;  %v1961_v33 = vadd.f32 %v1960_v34, %v9759_v30  ;;  %v2094_v53 = vadd.f32 %v2093_v0, %v10172_v6  ;;  %v6846_v34 = vld [vmem:[#allocation8 + $0x1e0] sm:$0xf]  ;;  %v3662_v0 = vmax.f32 %v10434_v22, %v3528_v25  ;;  %5049 = vmatpush.bf16.msra.mxu3 %v6623_v42  ;;  %v11880_v4 = vld [vmem:[#allocation136_spill] sm:$0xff]  ;;  %v11882_v22 = vld [vmem:[#allocation169_spill] sm:$0xff] }
 0x36e   : > { %2364 = vmatmul.bf16.gmra.mxu2 %v11760_v16  ;;  %v6614_v16 = vld [vmem:[#allocation8 + $0x8] sm:$0xf]  ;;  %v6607_v52 = vor.u32 %v7613_v17, %v6606_v2  ;;  %v4086_v48 = vmax.f32 %v10436_v19, %v3952_v50  ;;  %5153 = vmatpush.bf16.msrb.mxu0 %v6631_v36  ;;  %v6847_v23 = vor.u32 %v7673_v57, %v6846_v34  ;;  %v11883_v25 = vld [vmem:[#allocation155_spill] sm:$0xff] }
 0x36f   : > { %v2183_v45 = vadd.f32 %v2182_v1, %v2094_v53  ;;  %v6615_v24 = vor.u32 %v7614_v39, %v6614_v16  ;;  %v6731_v15 = vor.u32 %v7640_v60, %v6728_v28  ;;  %v11884_v53 = vld [vmem:[#allocation161_spill] sm:$0xff]  ;;  %v6830_v17 = vld [vmem:[#allocation8 + $0x1c0] sm:$0xf] }
 0x370   : > { %2221 = vmatmul.bf16.gmra.mxu0 %v11878_v27  ;;  %v4023_v42 = vmul.f32 %v11884_v53, %v2047_v5  ;;  %v7669_v16 = vld [vmem:[#allocation8 + $0x1cc] sm:$0xf0] }
 0x371   : > { %v2049_v18 = vpop.f32.mrf.mxu2  ;;  %v2684_v38 = vmul.f32 %v11879_v54, %v2183_v45  ;;  %v3108_v14 = vmul.f32 %v11880_v4, %v2183_v45  ;;  %v3532_v3 = vmul.f32 %v11881_v47, %v2183_v45  ;;  %v3956_v1 = vmul.f32 %v11882_v22, %v2183_v45  ;;  %5050 = vmatpush.bf16.msra.mxu3 %v6607_v52 }
 0x372   : > { %v2050_v20 = vadd.f32 %v2049_v18, %v1961_v33  ;;  %v1962_v26 = vpop.f32.mrf.mxu1  ;;  %v3599_v33 = vmul.f32 %v11883_v25, %v2047_v5  ;;  %v2879_v45 = vmax.f32 %v10456_v9, %v2751_v55  ;;  %v3303_v5 = vmax.f32 %v10460_v51, %v3175_v31  ;;  %5154 = vmatpush.bf16.msrb.mxu0 %v6615_v24  ;;  %v6814_v31 = vld [vmem:[#allocation8 + $0x1a0] sm:$0xf] }
 0x373   : > { %v10484_v18 = vmax.f32 %v2814_v32, %v2684_v38  ;;  %v10486_v39 = vmax.f32 %v3238_v43, %v3108_v14  ;;  %v10488_v34 = vmax.f32 %v3662_v0, %v3532_v3  ;;  %v10490_v57 = vmax.f32 %v4086_v48, %v3956_v1  ;;  %v7636_v32 = vld [vmem:[#allocation8 + $0xcc] sm:$0xf]  ;;  %v6712_v43 = vld [vmem:[#allocation8 + $0xd8] sm:$0xf0]  ;;  %v7665_v0 = vld [vmem:[#allocation8 + $0x1ac] sm:$0xf0] }
 0x374   : > { %v2755_v2 = vmul.f32 %v11763_v12, %v2050_v20  ;;  %v3179_v19 = vmul.f32 %v11764_v8, %v2050_v20  ;;  %v2095_v50 = vpop.f32.mrf.mxu3  ;;  %v3603_v60 = vmul.f32 %v11765_v40, %v2050_v20  ;;  %v4027_v28 = vmul.f32 %v10157_v44, %v2050_v20  ;;  %v11885_v48 = vld [vmem:[#allocation172_spill] sm:$0xff]  ;;  %v11897_v12 = vld [vmem:[#allocation74_spill] sm:$0xff] }
 0x375   : > { %v2184_v36 = vpop.f32.mrf.mxu0  ;;  %v1963_v8 = vadd.f32 %v1962_v26, %v9759_v30  ;;  %v2096_v38 = vadd.f32 %v2095_v50, %v10172_v6  ;;  %v10499_v14 = vperm.slane %v10169_v29, 3  ;;  %5056 = vmatpush.bf16.msrb.mxu3 %v6847_v23  ;;  %v6831_v3 = vor.u32 %v7669_v16, %v6830_v17  ;;  %v7632_v50 = vld [vmem:[#allocation8 + $0xac] sm:$0xf]  ;;  %v6696_v17 = vld [vmem:[#allocation8 + $0xb8] sm:$0xf0]  ;;  %v11886_v16 = vld [vmem:[#allocation27_spill] sm:$0xff] }
 0x376   : > { %5199 = vmatpush.bf16.msra.mxu0 %v6731_v15  ;;  %v3727_v9 = vmax.f32 %v10462_v62, %v3599_v33  ;;  %v4151_v51 = vmax.f32 %v10464_v21, %v4023_v42  ;;  %v2880_v20 = vmax.f32 %v2879_v45, %v2755_v2  ;;  %v3304_v52 = vmax.f32 %v3303_v5, %v3179_v19  ;;  %v11887_v33 = vld [vmem:[#allocation146_spill] sm:$0xff]  ;;  %v11888_v42 = vld [vmem:[#allocation156_spill] sm:$0xff] }
 0x377   : > { %v2185_v30 = vadd.f32 %v2184_v36, %v2096_v38  ;;  %v6715_v15 = vor.u32 %v7636_v32, %v6712_v43  ;;  %v6815_v1 = vor.u32 %v7665_v0, %v6814_v31  ;;  %v7661_v38 = vld [vmem:[#allocation8 + $0x18c] sm:$0xf0] }
 0x378   : > { %v3728_v24 = vmax.f32 %v3727_v9, %v3603_v60  ;;  %v4152_v23 = vmax.f32 %v4151_v51, %v4027_v28  ;;  %v6798_v28 = vld [vmem:[#allocation8 + $0x180] sm:$0xf] }
 0x379   : > { %v2051_v55 = vpop.f32.mrf.mxu2  ;;  %2137 = vmatmul.bf16.gmra.mxu3 %v11885_v48  ;;  %v2688_v62 = vmul.f32 %v11886_v16, %v2185_v30  ;;  %v3112_v21 = vmul.f32 %v11887_v33, %v2185_v30  ;;  %v3536_v44 = vmul.f32 %v11888_v42, %v2185_v30  ;;  %v11889_v9 = vld [vmem:[#allocation163_spill] sm:$0xff] }
 0x37a   : > { %v2052_v26 = vadd.f32 %v2051_v55, %v1963_v8  ;;  %v2241_v29 = vpop.f32.mrf.mxu1  ;;  %5057 = vmatpush.bf16.msrb.mxu3 %v6831_v3  ;;  %v3960_v3 = vmul.f32 %v11889_v9, %v2185_v30  ;;  %v11890_v51 = vld [vmem:[#allocation131_spill] sm:$0xff]  ;;  %v6699_v55 = vor.u32 %v7632_v50, %v6696_v17  ;;  %5200 = vmatpush.bf16.msra.mxu0 %v6715_v15 }
 0x37b   : > { %v2242_v2 = vadd.f32 %v2241_v29, %v10499_v14  ;;  %v2816_v32 = vmax.f32 %v10484_v18, %v2688_v62  ;;  %v3240_v43 = vmax.f32 %v10486_v39, %v3112_v21  ;;  %v6799_v18 = vor.u32 %v7661_v38, %v6798_v28  ;;  %v11895_v38 = vld [vmem:[#allocation174_spill] sm:$0xff]  ;;  %v11899_v9 = vld [vmem:[#allocation135_spill] sm:$0xff] }
 0x37c   : > { %v2759_v8 = vmul.f32 %v11768_v35, %v2052_v26  ;;  %v3183_v19 = vmul.f32 %v11769_v56, %v2052_v26  ;;  %v3607_v36 = vmul.f32 %v10159_v46, %v2052_v26  ;;  %v4031_v45 = vmul.f32 %v10189_v37, %v2052_v26  ;;  %v2098_v5 = vpop.f32.mrf.mxu3  ;;  %v7628_v26 = vld [vmem:[#allocation8 + $0x8c] sm:$0xf]  ;;  %v6680_v37 = vld [vmem:[#allocation8 + $0x98] sm:$0xf0] }
 0x37d   : > { %v2187_v60 = vpop.f32.mrf.mxu0  ;;  %2280 = vmatmul.bf16.gmra.mxu1 %v11766_v10  ;;  %v3664_v10 = vmax.f32 %v10488_v34, %v3536_v44  ;;  %v2099_v56 = vadd.f32 %v2098_v5, %v10172_v6  ;;  %v11891_v35 = vld [vmem:[#allocation128_spill] sm:$0xff]  ;;  %v6683_v15 = vor.u32 %v7628_v26, %v6680_v37  ;;  %v11894_v5 = vld [vmem:[#allocation167_spill] sm:$0xff] }
 0x37e   : > { %2369 = vmatmul.bf16.gmra.mxu2 %v11890_v51  ;;  %v2881_v31 = vmax.f32 %v2880_v20, %v2759_v8  ;;  %v3305_v0 = vmax.f32 %v3304_v52, %v3183_v19  ;;  %v3729_v29 = vmax.f32 %v3728_v24, %v3607_v36  ;;  %v4153_v46 = vmax.f32 %v4152_v23, %v4031_v45  ;;  %v11892_v19 = vld [vmem:[#allocation28_spill] sm:$0xff] }
 0x37f   : > { %5058 = vmatpush.bf16.msrb.mxu3 %v6815_v1  ;;  %v4088_v20 = vmax.f32 %v10490_v57, %v3960_v3  ;;  %v2188_v52 = vadd.f32 %v2187_v60, %v2099_v56  ;;  %5201 = vmatpush.bf16.msra.mxu0 %v6699_v55  ;;  %v11893_v1 = vld [vmem:[#allocation101_spill] sm:$0xff]  ;;  %v6782_v55 = vld [vmem:[#allocation8 + $0x160] sm:$0xf] }
 0x380   : > { %2226 = vmatmul.bf16.gmra.mxu0 %v11891_v35  ;;  %v2882_v39 = vrot.slane %v2881_v31, 4  ;;  %v3306_v30 = vrot.slane %v3305_v0, 4  ;;  %v3730_v62 = vrot.slane %v3729_v29, 4  ;;  %v4154_v21 = vrot.slane %v4153_v46, 4 }
 0x381   : > { %v2330_v50 = vpop.f32.mrf.mxu2  ;;  %v2692_v36 = vmul.f32 %v11892_v19, %v2188_v52  ;;  %v3116_v45 = vmul.f32 %v11893_v1, %v2188_v52  ;;  %v3540_v28 = vmul.f32 %v11894_v5, %v2188_v52  ;;  %v3964_v51 = vmul.f32 %v11895_v38, %v2188_v52 }
 0x382   : > { %v2331_v24 = vadd.f32 %v2330_v50, %v2242_v2  ;;  %v2243_v23 = vpop.f32.mrf.mxu1  ;;  %v2883_v17 = vmax.f32 %v2881_v31, %v2882_v39  ;;  %v3307_v8 = vmax.f32 %v3305_v0, %v3306_v30  ;;  %v3731_v44 = vmax.f32 %v3729_v29, %v3730_v62  ;;  %v7657_v62 = vld [vmem:[#allocation8 + $0x16c] sm:$0xf0]  ;;  %v6664_v50 = vld [vmem:[#allocation8 + $0x78] sm:$0xf0] }
 0x383   : > { %v4155_v34 = vmax.f32 %v4153_v46, %v4154_v21  ;;  %5059 = vmatpush.bf16.msrb.mxu3 %v6799_v18  ;;  %v2817_v3 = vmax.f32 %v2816_v32, %v2692_v36  ;;  %v3241_v31 = vmax.f32 %v3240_v43, %v3116_v45  ;;  %v3665_v0 = vmax.f32 %v3664_v10, %v3540_v28  ;;  %v7624_v21 = vld [vmem:[#allocation8 + $0x6c] sm:$0xf]  ;;  %v11898_v43 = vld [vmem:[#allocation38_spill] sm:$0xff] }
 0x384   : > { %v2884_v40 = vrot.slane %v2883_v17, 2  ;;  %v3308_v57 = vrot.slane %v3307_v8, 2  ;;  %v3732_v56 = vrot.slane %v3731_v44, 2  ;;  %v2100_v60 = vpop.f32.mrf.mxu3  ;;  %v4089_v46 = vmax.f32 %v4088_v20, %v3964_v51  ;;  %5202 = vmatpush.bf16.msra.mxu0 %v6683_v15  ;;  %v11896_v18 = vld [vmem:[#allocation48_spill] sm:$0xff]  ;;  %v7653_v20 = vld [vmem:[#allocation8 + $0x14c] sm:$0xf0] }
 0x385   : > { %v4156_v2 = vrot.slane %v4155_v34, 2  ;;  %v2189_v37 = vpop.f32.mrf.mxu0  ;;  %v10526_v52 = vmul.f32 %v11896_v18, %v2331_v24  ;;  %v10529_v53 = vmul.f32 %v11897_v12, %v2331_v24  ;;  %v10532_v32 = vmul.f32 %v11773_v63, %v2331_v24  ;;  %v7620_v36 = vld [vmem:[#allocation8 + $0x4c] sm:$0xf]  ;;  %v6648_v63 = vld [vmem:[#allocation8 + $0x58] sm:$0xf0] }
 0x386   : > { %v2885_v29 = vmax.f32 %v2883_v17, %v2884_v40  ;;  %v3309_v26 = vmax.f32 %v3307_v8, %v3308_v57  ;;  %v3733_v39 = vmax.f32 %v3731_v44, %v3732_v56  ;;  %v10535_v10 = vmul.f32 %v11898_v43, %v2331_v24  ;;  %v6766_v40 = vld [vmem:[#allocation8 + $0x140] sm:$0xf] }
 0x387   : > { %v4157_v30 = vmax.f32 %v4155_v34, %v4156_v2  ;;  %v2244_v45 = vadd.f32 %v2243_v23, %v10499_v14  ;;  %v2101_v28 = vadd.f32 %v2100_v60, %v10172_v6  ;;  %v6783_v51 = vor.u32 %v7657_v62, %v6782_v55  ;;  %v6750_v56 = vld [vmem:[#allocation8 + $0x120] sm:$0xf]  ;;  %v7649_v2 = vld [vmem:[#allocation8 + $0x12c] sm:$0xf0] }
 0x388   : > { %v2886_v17 = vrot.slane %v2885_v29, 1  ;;  %v3310_v8 = vrot.slane %v3309_v26, 1  ;;  %v3734_v15 = vrot.slane %v3733_v39, 1  ;;  %v6667_v57 = vor.u32 %v7624_v21, %v6664_v50  ;;  %v11902_v50 = vld [vmem:[#allocation173_spill] sm:$0xff] }
 0x389   : > { %v4158_v44 = vrot.slane %v4157_v30, 1  ;;  %v2332_v34 = vpop.f32.mrf.mxu2  ;;  %v2190_v38 = vadd.f32 %v2189_v37, %v2101_v28  ;;  %5060 = vmatpush.bf16.msrb.mxu3 %v6783_v51  ;;  %v6767_v55 = vor.u32 %v7653_v20, %v6766_v40  ;;  %v6651_v62 = vor.u32 %v7620_v36, %v6648_v63 }
 0x38a   : > { %v2246_v12 = vpop.f32.mrf.mxu1  ;;  %v2887_v24 = vmax.f32 %v2885_v29, %v2886_v17  ;;  %v3311_v18 = vmax.f32 %v3309_v26, %v3310_v8  ;;  %v3735_v43 = vmax.f32 %v3733_v39, %v3734_v15  ;;  %v2333_v5 = vadd.f32 %v2332_v34, %v2244_v45  ;;  %5203 = vmatpush.bf16.msra.mxu0 %v6667_v57  ;;  %v11900_v26 = vld [vmem:[#allocation63_spill] sm:$0xff]  ;;  %v11903_v8 = vld [vmem:[#allocation138_spill] sm:$0xff] }
 0x38b   : > { %v4159_v25 = vmax.f32 %v4157_v30, %v4158_v44  ;;  %v2247_v1 = vadd.f32 %v2246_v12, %v10499_v14  ;;  %v6751_v21 = vor.u32 %v7649_v2, %v6750_v56  ;;  %v2696_v39 = vmul.f32 %v11900_v26, %v2190_v38  ;;  %v11901_v30 = vld [vmem:[#allocation171_spill] sm:$0xff]  ;;  %v11907_v2 = vld [vmem:[#allocation105_spill] sm:$0xff] }
 0x38c   : > { %v4208_v23 = vsel %vm4202_vm0, %v2887_v24, %v3311_v18  ;;  %v2103_v19 = vpop.f32.mrf.mxu3  ;;  %v3120_v37 = vmul.f32 %v11901_v30, %v2190_v38  ;;  %v3544_v17 = vmul.f32 %v11902_v50, %v2190_v38  ;;  %v11904_v44 = vld [vmem:[#allocation175_spill] sm:$0xff]  ;;  %v3489_v24 = vmul.f32 %v11907_v2, %v2333_v5  ;;  %v11908_v18 = vld [vmem:[#allocation109_spill] sm:$0xff] }
 0x38d   : > { %v2192_v60 = vpop.f32.mrf.mxu0  ;;  %2285 = vmatmul.bf16.gmra.mxu1 %v11899_v9  ;;  %v4217_v29 = vsel %vm4211_vm1, %v4208_v23, %v3735_v43  ;;  %v3968_v34 = vmul.f32 %v11904_v44, %v2190_v38  ;;  %v11905_v45 = vld [vmem:[#allocation51_spill] sm:$0xff]  ;;  %v2818_v36 = vmax.f32 %v2817_v3, %v2696_v39  ;;  %5061 = vmatpush.bf16.msrb.mxu3 %v6767_v55  ;;  %v11964_v30 = vld [vmem:[#allocation85_spill] sm:$0xff] }
 0x38e   : > { %2374 = vmatmul.bf16.gmra.mxu2 %v11903_v8  ;;  %v4226_v15 = vsel %vm4220_vm2, %v4217_v29, %v4159_v25  ;;  %v2641_v28 = vmul.f32 %v11905_v45, %v2333_v5  ;;  %v11906_v9 = vld [vmem:[#allocation31_spill] sm:$0xff]  ;;  %v3242_v12 = vmax.f32 %v3241_v31, %v3120_v37  ;;  %v3666_v51 = vmax.f32 %v3665_v0, %v3544_v17  ;;  %v11909_v0 = vld [vmem:[#allocation41_spill] sm:$0xff] }
 0x38f   : > { %v3065_v40 = vmul.f32 %v11906_v9, %v2333_v5  ;;  %v4239_v20 = vrot.slane %v4226_v15, 4  ;;  %5204 = vmatpush.bf16.msra.mxu0 %v6651_v62  ;;  %v4090_v57 = vmax.f32 %v4089_v46, %v3968_v34  ;;  %v2819_v43 = vrot.slane %v2818_v36, 4 }
 0x390   : > { %v2825_v63 = vmax.f32 %v10526_v52, %v2641_v28  ;;  %v3243_v23 = vrot.slane %v3242_v12, 4  ;;  %v3667_v29 = vrot.slane %v3666_v51, 4  ;;  %v3673_v31 = vmax.f32 %v10532_v32, %v3489_v24 }
 0x391   : > { %v3249_v56 = vmax.f32 %v10529_v53, %v3065_v40  ;;  %v2335_v25 = vpop.f32.mrf.mxu2  ;;  %v4244_v38 = vsel %vm4241_vm3, %v11908_v18, %v4239_v20  ;;  %v4091_v3 = vrot.slane %v4090_v57, 4  ;;  %v3913_v46 = vmul.f32 %v11909_v0, %v2333_v5  ;;  %5062 = vmatpush.bf16.msrb.mxu3 %v6751_v21  ;;  %v11910_v20 = vld [vmem:[#allocation19_spill] sm:$0xff]  ;;  %v11911_v5 = vld [vmem:[#allocation29_spill] sm:$0xff] }
 0x392   : > { %v2248_v8 = vpop.f32.mrf.mxu1  ;;  %4248 = vst [vmem:[#allocation1 + $0x1] ss:$2 sm:$0xff] %v4244_v38  ;;  %v2104_v52 = vadd.f32 %v2103_v19, %v10172_v6  ;;  %v2820_v55 = vmax.f32 %v2818_v36, %v2819_v43  ;;  %v3244_v53 = vmax.f32 %v3242_v12, %v3243_v23  ;;  %v3668_v62 = vmax.f32 %v3666_v51, %v3667_v29  ;;  %v11912_v19 = vld [vmem:[#allocation32_spill] sm:$0xff]  ;;  %v11914_v18 = vld [vmem:[#allocation39_spill] sm:$0xff]  ;;  %v11915_v43 = vld [vmem:[#allocation110_spill] sm:$0xff] }
 0x393   : > { %v2336_v39 = vadd.f32 %v2335_v25, %v2247_v1  ;;  %v4092_v37 = vmax.f32 %v4090_v57, %v4091_v3  ;;  %v4097_v17 = vmax.f32 %v10535_v10, %v3913_v46  ;;  %v2249_v1 = vadd.f32 %v2248_v8, %v10499_v14 }
 0x394   : > { %v2193_v15 = vadd.f32 %v2192_v60, %v2104_v52  ;;  %v2105_v34 = vpop.f32.mrf.mxu3  ;;  %v2821_v28 = vrot.slane %v2820_v55, 2  ;;  %v3245_v9 = vrot.slane %v3244_v53, 2  ;;  %v3669_v40 = vrot.slane %v3668_v62, 2  ;;  %v11913_v60 = vld [vmem:[#allocation34_spill] sm:$0xff]  ;;  %v11916_v52 = vld [vmem:[#allocation139_spill] sm:$0xff] }
 0x395   : > { %v2194_v45 = vpop.f32.mrf.mxu0  ;;  %v2645_v32 = vmul.f32 %v11910_v20, %v2336_v39  ;;  %v4093_v2 = vrot.slane %v4092_v37, 2  ;;  %v3069_v38 = vmul.f32 %v11914_v18, %v2336_v39  ;;  %v3493_v23 = vmul.f32 %v11915_v43, %v2336_v39 }
 0x396   : > { %v10562_v24 = vmul.f32 %v11911_v5, %v2193_v15  ;;  %v10565_v36 = vmul.f32 %v11912_v19, %v2193_v15  ;;  %v2822_v21 = vmax.f32 %v2820_v55, %v2821_v28  ;;  %v3246_v12 = vmax.f32 %v3244_v53, %v3245_v9  ;;  %v7616_v55 = vld [vmem:[#allocation8 + $0x2c] sm:$0xf]  ;;  %v6632_v9 = vld [vmem:[#allocation8 + $0x38] sm:$0xf0] }
 0x397   : > { %v3670_v10 = vmax.f32 %v3668_v62, %v3669_v40  ;;  %v10569_v51 = vmul.f32 %v11913_v60, %v2193_v15  ;;  %v4094_v57 = vmax.f32 %v4092_v37, %v4093_v2  ;;  %v10571_v25 = vmax.f32 %v2825_v63, %v2645_v32  ;;  %v11917_v60 = vld [vmem:[#allocation40_spill] sm:$0xff] }
 0x398   : > { %v2823_v3 = vrot.slane %v2822_v21, 1  ;;  %v3247_v0 = vrot.slane %v3246_v12, 1  ;;  %v3917_v20 = vmul.f32 %v11916_v52, %v2336_v39  ;;  %v10576_v62 = vmax.f32 %v3249_v56, %v3069_v38  ;;  %v11918_v56 = vld [vmem:[#allocation142_spill] sm:$0xff] }
 0x399   : > { %v2337_v29 = vpop.f32.mrf.mxu2  ;;  %v3671_v46 = vrot.slane %v3670_v10, 1  ;;  %v4095_v53 = vrot.slane %v4094_v57, 1  ;;  %v10578_v28 = vmax.f32 %v3673_v31, %v3493_v23  ;;  %v2106_v63 = vadd.f32 %v2105_v34, %v10172_v6  ;;  %v4253_v37 = vld.sshfl [vmem:[#allocation1] sm:$0xff pattern:$0x75316420] }
 0x39a   : > { %v2251_v8 = vpop.f32.mrf.mxu1  ;;  %v2824_v40 = vmax.f32 %v2822_v21, %v2823_v3  ;;  %v3248_v32 = vmax.f32 %v3246_v12, %v3247_v0  ;;  %v10581_v18 = vmax.f32 %v4097_v17, %v3917_v20  ;;  %v3972_v19 = vmul.f32 %v11917_v60, %v2193_v15  ;;  %v11920_v21 = vld [vmem:[#allocation145_spill] sm:$0xff]  ;;  %v11925_v3 = vld [vmem:[#allocation43_spill] sm:$0xff] }
 0x39b   : > { %v3672_v2 = vmax.f32 %v3670_v10, %v3671_v46  ;;  %v4096_v43 = vmax.f32 %v4094_v57, %v4095_v53  ;;  %v2195_v39 = vadd.f32 %v2194_v45, %v2106_v63  ;;  %v2338_v52 = vadd.f32 %v2337_v29, %v2249_v1  ;;  %v11921_v10 = vld [vmem:[#allocation30_spill] sm:$0xff]  ;;  %v11922_v15 = vld [vmem:[#allocation33_spill] sm:$0xff]  ;;  %v11927_v53 = vld [vmem:[#allocation44_spill] sm:$0xff] }
 0x39c   : > { %v2108_v5 = vpop.f32.mrf.mxu3  ;;  %v4205_v31 = vsel %vm4202_vm0, %v2824_v40, %v3248_v32  ;;  %v10586_v38 = vpack.c.bf16 %v4253_v37, %v4253_v37  ;;  %v6635_v12 = vor.u32 %v7616_v55, %v6632_v9  ;;  %v11923_v1 = vld [vmem:[#allocation37_spill] sm:$0xff]  ;;  %v6734_v55 = vld [vmem:[#allocation8 + $0x100] sm:$0xf]  ;;  %v11928_v9 = vld [vmem:[#allocation50_spill] sm:$0xff]  ;;  %v2252_v32 = vadd.f32 %v2251_v8, %v10499_v14 }
 0x39d   : > { %v2197_v44 = vpop.f32.mrf.mxu0  ;;  %2290 = vmatmul.bf16.gmra.mxu1 %v11918_v56  ;;  %v2109_v34 = vadd.f32 %v2108_v5, %v10172_v6  ;;  %v4214_v17 = vsel %vm4211_vm1, %v4205_v31, %v3672_v2  ;;  %v2704_v57 = vmul.f32 %v11921_v10, %v2195_v39  ;;  %v3128_v45 = vmul.f32 %v11922_v15, %v2195_v39  ;;  %v11926_v46 = vld [vmem:[#allocation21_spill] sm:$0xff]  ;;  %v6616_v56 = vld [vmem:[#allocation8 + $0x18] sm:$0xf0]  ;;  %v11959_v10 = vld [vmem:[#allocation68_spill] sm:$0xff] }
 0x39e   : > { %11919 = vst [vmem:[#allocation113_spill] sm:$0xff] %v10586_v38  ;;  %2379 = vmatmul.bf16.gmra.mxu2 %v11920_v21  ;;  %v3552_v23 = vmul.f32 %v11923_v1, %v2195_v39  ;;  %v10595_v29 = vsel %vm4220_vm2, %v4214_v17, %v4096_v43  ;;  %v3976_v0 = vmul.f32 %v11925_v3, %v2195_v39  ;;  %v7645_v43 = vld [vmem:[#allocation8 + $0x10c] sm:$0xf0]  ;;  %v7612_v39 = vld [vmem:[#allocation8 + $0xc] sm:$0xf] }
 0x39f   : > { %11924 = vst [vmem:[#allocation121_spill] sm:$0xff] %v10595_v29  ;;  %v2649_v20 = vmul.f32 %v11926_v46, %v2338_v52  ;;  %v3073_v5 = vmul.f32 %v11927_v53, %v2338_v52  ;;  %5051 = vmatmul.bf16.vlgmr.msra.gmra.mxu3 %v10586_v38  ;;  %v2888_v63 = vmax.f32 %v10562_v24, %v2704_v57  ;;  %v11929_v46 = vld [vmem:[#allocation56_spill] sm:$0xff] }
 0x3a0   : > { %v3312_v37 = vmax.f32 %v10565_v36, %v3128_v45  ;;  %v3497_v40 = vmul.f32 %v11928_v9, %v2338_v52  ;;  %5155 = vmatmul.bf16.vlgmr.msrb.gmra.mxu0 %v10586_v38  ;;  %v3736_v31 = vmax.f32 %v10569_v51, %v3552_v23  ;;  %v3921_v24 = vmul.f32 %v11929_v46, %v2338_v52  ;;  %v11930_v51 = vld [vmem:[#allocation36_spill] sm:$0xff]  ;;  %v11933_v52 = vld [vmem:[#allocation46_spill] sm:$0xff] }
 0x3a1   : > { %v2340_v2 = vpop.f32.mrf.mxu2  ;;  %v2827_v21 = vmax.f32 %v10571_v25, %v2649_v20  ;;  %v3251_v17 = vmax.f32 %v10576_v62, %v3073_v5  ;;  %5205 = vmatpush.bf16.msra.mxu0 %v6635_v12  ;;  %v4160_v36 = vmax.f32 %v3972_v19, %v3976_v0  ;;  %v2198_v8 = vadd.f32 %v2197_v44, %v2109_v34  ;;  %v11931_v25 = vld [vmem:[#allocation78_spill] sm:$0xff]  ;;  %v11934_v0 = vld [vmem:[#allocation20_spill] sm:$0xff] }
 0x3a2   : > { %v2253_v57 = vpop.f32.mrf.mxu1  ;;  %v3675_v45 = vmax.f32 %v10578_v28, %v3497_v40  ;;  %v2341_v53 = vadd.f32 %v2340_v2, %v2252_v32  ;;  %v4099_v9 = vmax.f32 %v10581_v18, %v3921_v24  ;;  %v6735_v29 = vor.u32 %v7645_v43, %v6734_v55  ;;  %v11932_v62 = vld [vmem:[#allocation42_spill] sm:$0xff]  ;;  %v11936_v40 = vld [vmem:[#allocation59_spill] sm:$0xff]  ;;  %v11937_v32 = vld [vmem:[#allocation65_spill] sm:$0xff] }
 0x3a3   : > { %v2254_v3 = vadd.f32 %v2253_v57, %v10499_v14  ;;  %v6619_v1 = vor.u32 %v7612_v39, %v6616_v56  ;;  %v2708_v23 = vmul.f32 %v11930_v51, %v2198_v8  ;;  %v3132_v20 = vmul.f32 %v11931_v25, %v2198_v8  ;;  %v11935_v44 = vld [vmem:[#allocation82_spill] sm:$0xff]  ;;  %v11955_v51 = vld [vmem:[#allocation69_spill] sm:$0xff] }
 0x3a4   : > { %v3556_v5 = vmul.f32 %v11932_v62, %v2198_v8  ;;  %v3980_v46 = vmul.f32 %v11933_v52, %v2198_v8  ;;  %v2110_v12 = vpop.f32.mrf.mxu3  ;;  %v2653_v28 = vmul.f32 %v11934_v0, %v2341_v53  ;;  %v3077_v34 = vmul.f32 %v11935_v44, %v2341_v53  ;;  %5063 = vmatpush.bf16.msrb.mxu3 %v6735_v29  ;;  %v4254_v0 = vld.sshfl [vmem:[#allocation1 + $0x8] sm:$0xff pattern:$0x75316420] }
 0x3a5   : > { %v2199_v19 = vpop.f32.mrf.mxu0  ;;  %v3501_v18 = vmul.f32 %v11936_v40, %v2341_v53  ;;  %v3925_v2 = vmul.f32 %v11937_v32, %v2341_v53  ;;  %v2889_v55 = vmax.f32 %v2888_v63, %v2708_v23  ;;  %v3313_v43 = vmax.f32 %v3312_v37, %v3132_v20  ;;  %5206 = vmatpush.bf16.msra.mxu0 %v6619_v1  ;;  %v11939_v37 = vld [vmem:[#allocation22_spill] sm:$0xff]  ;;  %v11943_v23 = vld [vmem:[#allocation45_spill] sm:$0xff]  ;;  %v11947_v32 = vld [vmem:[#allocation148_spill] sm:$0xff] }
 0x3a6   : > { %v3737_v39 = vmax.f32 %v3736_v31, %v3556_v5  ;;  %v4161_v56 = vmax.f32 %v4160_v36, %v3980_v46  ;;  %v10621_v24 = vmax.f32 %v2827_v21, %v2653_v28  ;;  %v10623_v57 = vmax.f32 %v3251_v17, %v3077_v34  ;;  %v11940_v31 = vld [vmem:[#allocation62_spill] sm:$0xff]  ;;  %v11941_v17 = vld [vmem:[#allocation64_spill] sm:$0xff]  ;;  %v11945_v46 = vld [vmem:[#allocation49_spill] sm:$0xff] }
 0x3a7   : > { %v10625_v8 = vmax.f32 %v3675_v45, %v3501_v18  ;;  %v10627_v52 = vmax.f32 %v4099_v9, %v3925_v2  ;;  %v2111_v44 = vadd.f32 %v2110_v12, %v10172_v6  ;;  %v10632_v63 = vpack.c.bf16 %v4254_v0, %v4254_v0  ;;  %v11942_v45 = vld [vmem:[#allocation72_spill] sm:$0xff] }
 0x3a9   : > { %v2342_v40 = vpop.f32.mrf.mxu2  ;;  %v2200_v29 = vadd.f32 %v2199_v19, %v2111_v44  ;;  %11938 = vst [vmem:[#allocation67_spill] sm:$0xff] %v10632_v63  ;;  %v11946_v19 = vld [vmem:[#allocation55_spill] sm:$0xff]  ;;  %v11950_v44 = vld [vmem:[#allocation52_spill] sm:$0xff] }
 0x3aa   : > { %v2343_v62 = vadd.f32 %v2342_v40, %v2254_v3  ;;  %v10630_v53 = vpop.f32.mrf.mxu1  ;;  %v11944_v3 = vld [vmem:[#allocation47_spill] sm:$0xff]  ;;  %v11948_v40 = vld [vmem:[#allocation150_spill] sm:$0xff] }
 0x3ab   : > { %v2712_v20 = vmul.f32 %v11943_v23, %v2200_v29  ;;  %v3136_v5 = vmul.f32 %v11944_v3, %v2200_v29  ;;  %v3560_v12 = vmul.f32 %v11945_v46, %v2200_v29  ;;  %v3984_v28 = vmul.f32 %v11946_v19, %v2200_v29  ;;  %v7674_v3 = vld [vmem:[#allocation8 + $0x1f4] sm:$0xf0] }
 0x3ac   : > { %v10635_v1 = vmul.f32 %v11939_v37, %v2343_v62  ;;  %v10638_v21 = vmul.f32 %v11940_v31, %v2343_v62  ;;  %v10641_v36 = vmul.f32 %v11941_v17, %v2343_v62  ;;  %v10644_v9 = vmul.f32 %v11942_v45, %v2343_v62  ;;  %v2113_v34 = vpop.f32.mrf.mxu3  ;;  %v11949_v62 = vld [vmem:[#allocation53_spill] sm:$0xff] }
 0x3ad   : > { %v2202_v18 = vpop.f32.mrf.mxu0  ;;  %2295 = vmatmul.bf16.gmra.mxu1 %v11947_v32  ;;  %v2890_v37 = vmax.f32 %v2889_v55, %v2712_v20  ;;  %v3314_v29 = vmax.f32 %v3313_v43, %v3136_v5  ;;  %v3738_v31 = vmax.f32 %v3737_v39, %v3560_v12  ;;  %v4162_v17 = vmax.f32 %v4161_v56, %v3984_v28  ;;  %v11952_v43 = vld [vmem:[#allocation149_spill] sm:$0xff] }
 0x3ae   : > { %2384 = vmatmul.bf16.gmra.mxu2 %v11948_v40  ;;  %v2114_v45 = vadd.f32 %v2113_v34, %v10172_v6  ;;  %v11951_v40 = vld [vmem:[#allocation116_spill] sm:$0xff] }
 0x3af   : > { %5064 = vmatmul.bf16.vlgmr.msrb.gmra.mxu3 %v10632_v63 }
 0x3b0   : > { %5207 = vmatmul.bf16.vlgmr.msra.gmra.mxu0 %v10586_v38  ;;  %v2203_v0 = vadd.f32 %v2202_v18, %v2114_v45  ;;  %v6854_v38 = vld [vmem:[#allocation8 + $0x1e8] sm:$0xf] }
 0x3b1   : > { %v10663_v32 = vpop.f32.mrf.mxu2  ;;  %v6855_v45 = vor.u32 %v7674_v3, %v6854_v38  ;;  %v7670_v38 = vld [vmem:[#allocation8 + $0x1d4] sm:$0xf0] }
 0x3b2   : > { %v10665_v2 = vpop.f32.mrf.mxu1  ;;  %v2716_v19 = vmul.f32 %v11949_v62, %v2203_v0  ;;  %v3140_v46 = vmul.f32 %v11950_v44, %v2203_v0  ;;  %v3564_v55 = vmul.f32 %v11951_v40, %v2203_v0  ;;  %v3988_v39 = vmul.f32 %v11952_v43, %v2203_v0  ;;  %v11953_v40 = vld [vmem:[#allocation58_spill] sm:$0xff]  ;;  %v11954_v0 = vld [vmem:[#allocation61_spill] sm:$0xff] }
 0x3b3   : > { %5160 = vmatpush.bf16.msrb.mxu1 %v6855_v45  ;;  %v6822_v45 = vld [vmem:[#allocation8 + $0x1a8] sm:$0xf] }
 0x3b4   : > { %v2115_v56 = vpop.f32.mrf.mxu3  ;;  %v2891_v5 = vmax.f32 %v2890_v37, %v2716_v19  ;;  %v3315_v12 = vmax.f32 %v3314_v29, %v3140_v46  ;;  %v3739_v28 = vmax.f32 %v3738_v31, %v3564_v55  ;;  %v4163_v34 = vmax.f32 %v4162_v17, %v3988_v39  ;;  %v11956_v46 = vld [vmem:[#allocation77_spill] sm:$0xff]  ;;  %v11957_v17 = vld [vmem:[#allocation154_spill] sm:$0xff]  ;;  %v6838_v55 = vld [vmem:[#allocation8 + $0x1c8] sm:$0xf] }
 0x3b5   : > { %v2204_v20 = vpop.f32.mrf.mxu0  ;;  %v2116_v18 = vadd.f32 %v2115_v56, %v10172_v6  ;;  %v6839_v15 = vor.u32 %v7670_v38, %v6838_v55 }
 0x3b7   : > { %v2205_v62 = vadd.f32 %v2204_v20, %v2116_v18  ;;  %v11958_v18 = vld [vmem:[#allocation157_spill] sm:$0xff]  ;;  %5161 = vmatpush.bf16.msrb.mxu1 %v6839_v15 }
 0x3b9   : > { %v10672_v23 = vpop.f32.mrf.mxu2  ;;  %v2720_v44 = vmul.f32 %v11953_v40, %v2205_v62  ;;  %v3144_v43 = vmul.f32 %v11954_v0, %v2205_v62  ;;  %v3568_v19 = vmul.f32 %v11955_v51, %v2205_v62  ;;  %v3992_v37 = vmul.f32 %v11956_v46, %v2205_v62  ;;  %v7666_v40 = vld [vmem:[#allocation8 + $0x1b4] sm:$0xf0] }
 0x3ba   : > { %v10674_v25 = vpop.f32.mrf.mxu1 }
 0x3bb   : > { %v2892_v3 = vmax.f32 %v2891_v5, %v2720_v44  ;;  %v3316_v39 = vmax.f32 %v3315_v12, %v3144_v43  ;;  %v3740_v56 = vmax.f32 %v3739_v28, %v3568_v19  ;;  %v4164_v20 = vmax.f32 %v4163_v34, %v3992_v37  ;;  %v11960_v44 = vld [vmem:[#allocation87_spill] sm:$0xff]  ;;  %v11961_v5 = vld [vmem:[#allocation81_spill] sm:$0xff] }
 0x3bc   : > { %v2118_v29 = vpop.f32.mrf.mxu3  ;;  %v11962_v28 = vld [vmem:[#allocation89_spill] sm:$0xff] }
 0x3bd   : > { %v2207_v31 = vpop.f32.mrf.mxu0  ;;  %2300 = vmatmul.bf16.gmra.mxu1 %v11957_v17  ;;  %v2119_v0 = vadd.f32 %v2118_v29, %v10172_v6  ;;  %v6823_v17 = vor.u32 %v7666_v40, %v6822_v45  ;;  %v7662_v29 = vld [vmem:[#allocation8 + $0x194] sm:$0xf0] }
 0x3be   : > { %2389 = vmatmul.bf16.gmra.mxu2 %v11958_v18  ;;  %v6806_v18 = vld [vmem:[#allocation8 + $0x188] sm:$0xf]  ;;  %v7658_v45 = vld [vmem:[#allocation8 + $0x174] sm:$0xf0] }
 0x3bf   : > { %v2208_v62 = vadd.f32 %v2207_v31, %v2119_v0  ;;  %5162 = vmatpush.bf16.msrb.mxu1 %v6823_v17  ;;  %v6807_v40 = vor.u32 %v7662_v29, %v6806_v18  ;;  %v6790_v31 = vld [vmem:[#allocation8 + $0x168] sm:$0xf] }
 0x3c1   : > { %v10683_v51 = vpop.f32.mrf.mxu2  ;;  %v2724_v60 = vmul.f32 %v11959_v10, %v2208_v62  ;;  %v3148_v43 = vmul.f32 %v11960_v44, %v2208_v62  ;;  %v3572_v12 = vmul.f32 %v11961_v5, %v2208_v62  ;;  %v3996_v34 = vmul.f32 %v11962_v28, %v2208_v62  ;;  %v11963_v28 = vld [vmem:[#allocation66_spill] sm:$0xff] }
 0x3c2   : > { %v10685_v46 = vpop.f32.mrf.mxu1  ;;  %v6791_v62 = vor.u32 %v7658_v45, %v6790_v31  ;;  %v7650_v45 = vld [vmem:[#allocation8 + $0x134] sm:$0xf0] }
 0x3c3   : > { %v2893_v55 = vmax.f32 %v2892_v3, %v2724_v60  ;;  %v3317_v38 = vmax.f32 %v3316_v39, %v3148_v43  ;;  %v3741_v63 = vmax.f32 %v3740_v56, %v3572_v12  ;;  %v4165_v0 = vmax.f32 %v4164_v20, %v3996_v34  ;;  %5163 = vmatpush.bf16.msrb.mxu1 %v6807_v40  ;;  %v11965_v3 = vld [vmem:[#allocation88_spill] sm:$0xff]  ;;  %v11966_v56 = vld [vmem:[#allocation95_spill] sm:$0xff]  ;;  %v7654_v34 = vld [vmem:[#allocation8 + $0x154] sm:$0xf0] }
 0x3c4   : > { %v2120_v19 = vpop.f32.mrf.mxu3  ;;  %v6774_v12 = vld [vmem:[#allocation8 + $0x148] sm:$0xf] }
 0x3c5   : > { %v2209_v37 = vpop.f32.mrf.mxu0  ;;  %v2121_v15 = vadd.f32 %v2120_v19, %v10172_v6  ;;  %v6775_v31 = vor.u32 %v7654_v34, %v6774_v12 }
 0x3c7   : > { %v2210_v44 = vadd.f32 %v2209_v37, %v2121_v15  ;;  %v2257_v15 = vadd.f32 %v10630_v53, %v10499_v14  ;;  %5164 = vmatpush.bf16.msrb.mxu1 %v6791_v62 }
 0x3c9   : > { %v10692_v10 = vpop.f32.mrf.mxu2  ;;  %v2728_v50 = vmul.f32 %v11963_v28, %v2210_v44  ;;  %v3152_v60 = vmul.f32 %v11964_v30, %v2210_v44  ;;  %v3576_v39 = vmul.f32 %v11965_v3, %v2210_v44  ;;  %v4000_v20 = vmul.f32 %v11966_v56, %v2210_v44  ;;  %v6758_v44 = vld [vmem:[#allocation8 + $0x128] sm:$0xf] }
 0x3ca   : > { %v10694_v5 = vpop.f32.mrf.mxu1  ;;  %v2346_v56 = vadd.f32 %v10663_v32, %v2257_v15 }
 0x3cb   : > { %v2894_v19 = vmax.f32 %v2893_v55, %v2728_v50  ;;  %v3318_v37 = vmax.f32 %v3317_v38, %v3152_v60  ;;  %v3742_v18 = vmax.f32 %v3741_v63, %v3576_v39  ;;  %v4166_v29 = vmax.f32 %v4165_v0, %v4000_v20  ;;  %5165 = vmatpush.bf16.msrb.mxu1 %v6775_v31  ;;  %v11967_v55 = vld [vmem:[#allocation93_spill] sm:$0xff]  ;;  %v11968_v38 = vld [vmem:[#allocation96_spill] sm:$0xff]  ;;  %v11969_v39 = vld [vmem:[#allocation54_spill] sm:$0xff] }
 0x3cc   : > { %v2123_v17 = vpop.f32.mrf.mxu3  ;;  %v2259_v63 = vadd.f32 %v10665_v2, %v10499_v14  ;;  %v2661_v32 = vmul.f32 %v11969_v39, %v2346_v56  ;;  %v11970_v20 = vld [vmem:[#allocation73_spill] sm:$0xff]  ;;  %v7646_v31 = vld [vmem:[#allocation8 + $0x114] sm:$0xf0]  ;;  %v6856_v39 = vld [vmem:[#allocation8 + $0x1f8] sm:$0xf0] }
 0x3cd   : > { %v2212_v43 = vpop.f32.mrf.mxu0  ;;  %2305 = vmatmul.bf16.gmra.mxu1 %v11847_v41  ;;  %v2124_v40 = vadd.f32 %v2123_v17, %v10172_v6  ;;  %v3085_v17 = vmul.f32 %v11970_v20, %v2346_v56  ;;  %v2262_v20 = vadd.f32 %v10674_v25, %v10499_v14  ;;  %v11974_v25 = vmax.f32 %v10623_v57, %v10638_v21  ;;  %v11980_v57 = vld [vmem:[#allocation104_spill] sm:$0xff] }
 0x3ce   : > { %2394 = vmatmul.bf16.gmra.mxu2 %v11857_v59  ;;  %v6759_v59 = vor.u32 %v7650_v45, %v6758_v44  ;;  %v2348_v34 = vadd.f32 %v10672_v23, %v2259_v63 }
 0x3cf   : > { %v2213_v3 = vadd.f32 %v2212_v43, %v2124_v40  ;;  %v11971_v43 = vld [vmem:[#allocation76_spill] sm:$0xff] }
 0x3d0   : > { %v3509_v12 = vmul.f32 %v11971_v43, %v2346_v56  ;;  %v6742_v40 = vld [vmem:[#allocation8 + $0x108] sm:$0xf]  ;;  %5166 = vmatpush.bf16.msrb.mxu1 %v6759_v59  ;;  %v3254_v59 = vmax.f32 %v11974_v25, %v3085_v17  ;;  %v11981_v17 = vld [vmem:[#allocation103_spill] sm:$0xff] }
 0x3d1   : > { %v10706_v41 = vpop.f32.mrf.mxu2  ;;  %v2732_v53 = vmul.f32 %v11967_v55, %v2213_v3  ;;  %v3156_v0 = vmul.f32 %v11968_v38, %v2213_v3  ;;  %v3580_v62 = vmul.f32 %v11845_v7, %v2213_v3  ;;  %v4004_v60 = vmul.f32 %v11846_v13, %v2213_v3  ;;  %v7672_v3 = vld [vmem:[#allocation8 + $0x1ec] sm:$0xf]  ;;  %v6840_v55 = vld [vmem:[#allocation8 + $0x1d8] sm:$0xf0] }
 0x3d2   : > { %v10708_v50 = vpop.f32.mrf.mxu1  ;;  %v6743_v63 = vor.u32 %v7646_v31, %v6742_v40  ;;  %v6859_v43 = vor.u32 %v7672_v3, %v6856_v39  ;;  %v7668_v13 = vld [vmem:[#allocation8 + $0x1cc] sm:$0xf] }
 0x3d3   : > { %v10720_v44 = vmax.f32 %v2894_v19, %v2732_v53  ;;  %v10722_v45 = vmax.f32 %v3318_v37, %v3156_v0  ;;  %v10724_v38 = vmax.f32 %v3742_v18, %v3580_v62  ;;  %v10726_v7 = vmax.f32 %v4166_v29, %v4004_v60  ;;  %v11973_v18 = vld [vmem:[#allocation84_spill] sm:$0xff] }
 0x3d4   : > { %v2125_v15 = vpop.f32.mrf.mxu3  ;;  %v11972_v19 = vmax.f32 %v10621_v24, %v10635_v1  ;;  %v3933_v53 = vmul.f32 %v11973_v18, %v2346_v56  ;;  %v2351_v29 = vadd.f32 %v10683_v51, %v2262_v20  ;;  %v11975_v62 = vmax.f32 %v10625_v8, %v10641_v36  ;;  %v11977_v24 = vld [vmem:[#allocation80_spill] sm:$0xff]  ;;  %v11979_v51 = vld [vmem:[#allocation153_spill] sm:$0xff]  ;;  %5167 = vmatpush.bf16.msrb.mxu1 %v6743_v63 }
 0x3d5   : > { %v2214_v2 = vpop.f32.mrf.mxu0  ;;  %v2126_v23 = vadd.f32 %v2125_v15, %v10172_v6  ;;  %v11976_v15 = vld [vmem:[#allocation23_spill] sm:$0xff]  ;;  %v3089_v1 = vmul.f32 %v11977_v24, %v2348_v34  ;;  %v11978_v56 = vld [vmem:[#allocation120_spill] sm:$0xff]  ;;  %v10750_v39 = vmul.f32 %v11979_v51, %v2348_v34  ;;  %v6843_v20 = vor.u32 %v7668_v13, %v6840_v55  ;;  %v11982_v8 = vld [vmem:[#allocation125_spill] sm:$0xff] }
 0x3d6   : > { %v2830_v37 = vmax.f32 %v11972_v19, %v2661_v32  ;;  %v3678_v60 = vmax.f32 %v11975_v62, %v3509_v12  ;;  %v2665_v40 = vmul.f32 %v11976_v15, %v2348_v34  ;;  %v3513_v32 = vmul.f32 %v11978_v56, %v2348_v34  ;;  %v11983_v12 = vld [vmem:[#allocation164_spill] sm:$0xff] }
 0x3d7   : > { %v2215_v31 = vadd.f32 %v2214_v2, %v2126_v23  ;;  %v11984_v2 = vld [vmem:[#allocation24_spill] sm:$0xff]  ;;  %v2264_v34 = vadd.f32 %v10685_v46, %v10499_v14 }
 0x3d8   : > { %5212 = vmatpush.bf16.msra.mxu1 %v6859_v43  ;;  %v2669_v23 = vmul.f32 %v11984_v2, %v2351_v29  ;;  %v11985_v25 = vld [vmem:[#allocation92_spill] sm:$0xff]  ;;  %v6824_v2 = vld [vmem:[#allocation8 + $0x1b8] sm:$0xf0] }
 0x3d9   : > { %v10736_v0 = vpop.f32.mrf.mxu2  ;;  %v2736_v21 = vmul.f32 %v11980_v57, %v2215_v31  ;;  %v3160_v19 = vmul.f32 %v11981_v17, %v2215_v31  ;;  %v3584_v36 = vmul.f32 %v11982_v8, %v2215_v31  ;;  %v4008_v18 = vmul.f32 %v11983_v12, %v2215_v31  ;;  %v11986_v15 = vld [vmem:[#allocation100_spill] sm:$0xff] }
 0x3da   : > { %v10745_v3 = vpop.f32.mrf.mxu1  ;;  %v3093_v62 = vmul.f32 %v11985_v25, %v2351_v29  ;;  %v3517_v24 = vmul.f32 %v11986_v15, %v2351_v29  ;;  %v7664_v51 = vld [vmem:[#allocation8 + $0x1ac] sm:$0xf]  ;;  %v11987_v25 = vmax.f32 %v10627_v52, %v10644_v9  ;;  %v2831_v15 = vmax.f32 %v2830_v37, %v2665_v40 }
 0x3db   : > { %v2896_v55 = vmax.f32 %v10720_v44, %v2736_v21  ;;  %v3320_v56 = vmax.f32 %v10722_v45, %v3160_v19  ;;  %v3744_v31 = vmax.f32 %v10724_v38, %v3584_v36  ;;  %v4168_v43 = vmax.f32 %v10726_v7, %v4008_v18  ;;  %v11988_v21 = vld [vmem:[#allocation108_spill] sm:$0xff] }
 0x3dc   : > { %v2128_v63 = vpop.f32.mrf.mxu3  ;;  %v4102_v46 = vmax.f32 %v11987_v25, %v3933_v53  ;;  %v2353_v12 = vadd.f32 %v10692_v10, %v2264_v34  ;;  %v3255_v44 = vmax.f32 %v3254_v59, %v3089_v1  ;;  %v3679_v45 = vmax.f32 %v3678_v60, %v3513_v32  ;;  %5213 = vmatpush.bf16.msra.mxu1 %v6843_v20  ;;  %v6808_v59 = vld [vmem:[#allocation8 + $0x198] sm:$0xf0]  ;;  %v11989_v60 = vld [vmem:[#allocation57_spill] sm:$0xff]  ;;  %v11990_v32 = vld [vmem:[#allocation91_spill] sm:$0xff] }
 0x3dd   : > { %v2217_v13 = vpop.f32.mrf.mxu0  ;;  %2310 = vmatmul.bf16.gmra.mxu1 %v11870_v11  ;;  %v2267_v11 = vadd.f32 %v10694_v5, %v10499_v14  ;;  %v2129_v38 = vadd.f32 %v2128_v63, %v10172_v6  ;;  %v6827_v7 = vor.u32 %v7664_v51, %v6824_v2  ;;  %v3941_v19 = vmul.f32 %v11988_v21, %v2351_v29  ;;  %v7660_v5 = vld [vmem:[#allocation8 + $0x18c] sm:$0xf]  ;;  %v11992_v63 = vld [vmem:[#allocation111_spill] sm:$0xff]  ;;  %v11993_v51 = vld [vmem:[#allocation122_spill] sm:$0xff] }
 0x3de   : > { %2399 = vmatmul.bf16.gmra.mxu2 %v11878_v27  ;;  %v4103_v27 = vmax.f32 %v4102_v46, %v10750_v39  ;;  %v2832_v9 = vmax.f32 %v2831_v15, %v2669_v23  ;;  %v3256_v37 = vmax.f32 %v3255_v44, %v3093_v62  ;;  %v3680_v53 = vmax.f32 %v3679_v45, %v3517_v24  ;;  %v11991_v18 = vld [vmem:[#allocation112_spill] sm:$0xff]  ;;  %v11994_v62 = vld [vmem:[#allocation133_spill] sm:$0xff]  ;;  %v11997_v15 = vld [vmem:[#allocation114_spill] sm:$0xff] }
 0x3df   : > { %v2356_v36 = vadd.f32 %v10706_v41, %v2267_v11  ;;  %v2218_v10 = vadd.f32 %v2217_v13, %v2129_v38  ;;  %v2673_v1 = vmul.f32 %v11989_v60, %v2353_v12  ;;  %v3097_v20 = vmul.f32 %v11990_v32, %v2353_v12  ;;  %v11995_v13 = vld [vmem:[#allocation118_spill] sm:$0xff]  ;;  %v11996_v25 = vld [vmem:[#allocation25_spill] sm:$0xff]  ;;  %v11998_v32 = vld [vmem:[#allocation119_spill] sm:$0xff] }
 0x3e0   : > { %v3521_v34 = vmul.f32 %v11991_v18, %v2353_v12  ;;  %v6811_v39 = vor.u32 %v7660_v5, %v6808_v59  ;;  %5214 = vmatpush.bf16.msra.mxu1 %v6827_v7  ;;  %v3945_v2 = vmul.f32 %v11995_v13, %v2353_v12  ;;  %v2269_v44 = vadd.f32 %v10708_v50, %v10499_v14  ;;  %v7656_v7 = vld [vmem:[#allocation8 + $0x16c] sm:$0xf] }
 0x3e1   : > { %v2360_v52 = vpop.f32.mrf.mxu2  ;;  %v2740_v29 = vmul.f32 %v11992_v63, %v2218_v10  ;;  %v3164_v41 = vmul.f32 %v11863_v61, %v2218_v10  ;;  %v3588_v23 = vmul.f32 %v11993_v51, %v2218_v10  ;;  %v4012_v24 = vmul.f32 %v11994_v62, %v2218_v10  ;;  %v6792_v10 = vld [vmem:[#allocation8 + $0x178] sm:$0xf0] }
 0x3e2   : > { %v10777_v40 = vpop.f32.mrf.mxu1  ;;  %v2677_v46 = vmul.f32 %v11996_v25, %v2356_v36  ;;  %v3101_v11 = vmul.f32 %v11997_v15, %v2356_v36  ;;  %v4104_v12 = vmax.f32 %v4103_v27, %v3941_v19  ;;  %v3525_v18 = vmul.f32 %v11998_v32, %v2356_v36  ;;  %v11999_v27 = vld [vmem:[#allocation126_spill] sm:$0xff] }
 0x3e3   : > { %v10791_v21 = vmax.f32 %v2896_v55, %v2740_v29  ;;  %v10793_v5 = vmax.f32 %v3320_v56, %v3164_v41  ;;  %v10795_v59 = vmax.f32 %v3744_v31, %v3588_v23  ;;  %v10797_v60 = vmax.f32 %v4168_v43, %v4012_v24 }
 0x3e4   : > { %v2130_v45 = vpop.f32.mrf.mxu3  ;;  %v2358_v13 = vadd.f32 %v10736_v0, %v2269_v44  ;;  %v2272_v50 = vadd.f32 %v10745_v3, %v10499_v14  ;;  %v2833_v25 = vmax.f32 %v2832_v9, %v2673_v1  ;;  %v3257_v15 = vmax.f32 %v3256_v37, %v3097_v20  ;;  %5215 = vmatpush.bf16.msra.mxu1 %v6811_v39  ;;  %v7652_v0 = vld [vmem:[#allocation8 + $0x14c] sm:$0xf]  ;;  %v6776_v44 = vld [vmem:[#allocation8 + $0x158] sm:$0xf0]  ;;  %v12000_v1 = vld [vmem:[#allocation123_spill] sm:$0xff] }
 0x3e5   : > { %v2219_v38 = vpop.f32.mrf.mxu0  ;;  %v2131_v55 = vadd.f32 %v2130_v45, %v10172_v6  ;;  %v6795_v56 = vor.u32 %v7656_v7, %v6792_v10  ;;  %v3681_v31 = vmax.f32 %v3680_v53, %v3521_v34  ;;  %v4105_v29 = vmax.f32 %v4104_v12, %v3945_v2  ;;  %v12001_v53 = vld [vmem:[#allocation97_spill] sm:$0xff]  ;;  %v12003_v2 = vld [vmem:[#allocation144_spill] sm:$0xff] }
 0x3e6   : > { %v2361_v43 = vadd.f32 %v2360_v52, %v2272_v50  ;;  %v2834_v23 = vmax.f32 %v2833_v25, %v2677_v46  ;;  %v3258_v24 = vmax.f32 %v3257_v15, %v3101_v11  ;;  %v3949_v19 = vmul.f32 %v11999_v27, %v2356_v36  ;;  %v12002_v52 = vld [vmem:[#allocation137_spill] sm:$0xff]  ;;  %v12004_v36 = vld [vmem:[#allocation132_spill] sm:$0xff] }
 0x3e7   : > { %v2220_v32 = vadd.f32 %v2219_v38, %v2131_v55  ;;  %v3682_v51 = vmax.f32 %v3681_v31, %v3525_v18  ;;  %v2681_v3 = vmul.f32 %v11874_v58, %v2358_v13  ;;  %v3105_v9 = vmul.f32 %v11875_v49, %v2358_v13  ;;  %v12005_v45 = vld [vmem:[#allocation140_spill] sm:$0xff] }
 0x3e8   : > { %v6779_v37 = vor.u32 %v7652_v0, %v6776_v44  ;;  %5216 = vmatpush.bf16.msra.mxu1 %v6795_v56  ;;  %v3529_v11 = vmul.f32 %v12004_v36, %v2358_v13  ;;  %v3953_v38 = vmul.f32 %v12005_v45, %v2358_v13  ;;  %v2685_v7 = vmul.f32 %v11879_v54, %v2361_v43  ;;  %v7648_v15 = vld [vmem:[#allocation8 + $0x12c] sm:$0xf]  ;;  %v6760_v13 = vld [vmem:[#allocation8 + $0x138] sm:$0xf0] }
 0x3e9   : > { %v2362_v41 = vpop.f32.mrf.mxu2  ;;  %v2744_v20 = vmul.f32 %v12000_v1, %v2220_v32  ;;  %v3168_v34 = vmul.f32 %v12001_v53, %v2220_v32  ;;  %v3592_v39 = vmul.f32 %v12002_v52, %v2220_v32  ;;  %v4016_v46 = vmul.f32 %v12003_v2, %v2220_v32 }
 0x3ea   : > { %v2276_v62 = vpop.f32.mrf.mxu1  ;;  %v3109_v58 = vmul.f32 %v11880_v4, %v2361_v43  ;;  %v4106_v55 = vmax.f32 %v4105_v29, %v3949_v19  ;;  %v3533_v54 = vmul.f32 %v11881_v47, %v2361_v43  ;;  %v3957_v4 = vmul.f32 %v11882_v22, %v2361_v43  ;;  %v7644_v22 = vld [vmem:[#allocation8 + $0x10c] sm:$0xf]  ;;  %v6744_v43 = vld [vmem:[#allocation8 + $0x118] sm:$0xf0] }
 0x3eb   : > { %v2898_v12 = vmax.f32 %v10791_v21, %v2744_v20  ;;  %v3322_v18 = vmax.f32 %v10793_v5, %v3168_v34  ;;  %v3746_v50 = vmax.f32 %v10795_v59, %v3592_v39  ;;  %v4170_v25 = vmax.f32 %v10797_v60, %v4016_v46 }
 0x3ec   : > { %v2133_v10 = vpop.f32.mrf.mxu3  ;;  %v2835_v56 = vmax.f32 %v2834_v23, %v2681_v3  ;;  %v3259_v21 = vmax.f32 %v3258_v24, %v3105_v9  ;;  %5217 = vmatpush.bf16.msra.mxu1 %v6779_v37  ;;  %v6763_v59 = vor.u32 %v7648_v15, %v6760_v13  ;;  %v3683_v31 = vmax.f32 %v3682_v51, %v3529_v11  ;;  %v12006_v3 = vld [vmem:[#allocation70_spill] sm:$0xff]  ;;  %v12007_v37 = vld [vmem:[#allocation141_spill] sm:$0xff]  ;;  %v12008_v51 = vld [vmem:[#allocation143_spill] sm:$0xff] }
 0x3ed   : > { %v2222_v49 = vpop.f32.mrf.mxu0  ;;  %2315 = vmatmul.bf16.gmra.mxu1 %v11885_v48  ;;  %v2274_v48 = vadd.f32 %v10777_v40, %v10499_v14  ;;  %v2134_v5 = vadd.f32 %v2133_v10, %v10172_v6  ;;  %v4107_v60 = vmax.f32 %v4106_v55, %v3953_v38  ;;  %v6747_v24 = vor.u32 %v7644_v22, %v6744_v43  ;;  %v12010_v11 = vld [vmem:[#allocation163_spill] sm:$0xff]  ;;  %v12011_v15 = vld [vmem:[#allocation28_spill] sm:$0xff]  ;;  %v12012_v55 = vld [vmem:[#allocation101_spill] sm:$0xff] }
 0x3ee   : > { %2404 = vmatmul.bf16.gmra.mxu2 %v11891_v35  ;;  %v2277_v35 = vadd.f32 %v2276_v62, %v10499_v14  ;;  %v2836_v29 = vmax.f32 %v2835_v56, %v2685_v7  ;;  %v3260_v19 = vmax.f32 %v3259_v21, %v3109_v58  ;;  %v3684_v44 = vmax.f32 %v3683_v31, %v3533_v54  ;;  %v12015_v22 = vld [vmem:[#allocation147_spill] sm:$0xff] }
 0x3ef   : > { %v2363_v27 = vadd.f32 %v2362_v41, %v2274_v48  ;;  %v2223_v47 = vadd.f32 %v2222_v49, %v2134_v5  ;;  %v4108_v40 = vmax.f32 %v4107_v60, %v3957_v4  ;;  %v12009_v41 = vld [vmem:[#allocation151_spill] sm:$0xff] }
 0x3f0   : > { %5218 = vmatpush.bf16.msra.mxu1 %v6763_v59 }
 0x3f1   : > { %v2365_v32 = vpop.f32.mrf.mxu2  ;;  %v2748_v9 = vmul.f32 %v12006_v3, %v2223_v47  ;;  %v3172_v20 = vmul.f32 %v12007_v37, %v2223_v47  ;;  %v3596_v34 = vmul.f32 %v12008_v51, %v2223_v47  ;;  %v4020_v39 = vmul.f32 %v12009_v41, %v2223_v47 }
 0x3f2   : > { %v2278_v0 = vpop.f32.mrf.mxu1  ;;  %v2366_v23 = vadd.f32 %v2365_v32, %v2277_v35  ;;  %v2689_v62 = vmul.f32 %v11886_v16, %v2363_v27  ;;  %v3113_v46 = vmul.f32 %v11887_v33, %v2363_v27  ;;  %v3537_v36 = vmul.f32 %v11888_v42, %v2363_v27  ;;  %v12013_v16 = vld [vmem:[#allocation167_spill] sm:$0xff]  ;;  %v12014_v33 = vld [vmem:[#allocation174_spill] sm:$0xff] }
 0x3f3   : > { %v3961_v45 = vmul.f32 %v12010_v11, %v2363_v27  ;;  %v10835_v7 = vmax.f32 %v2898_v12, %v2748_v9  ;;  %v10837_v58 = vmax.f32 %v3322_v18, %v3172_v20  ;;  %v10839_v10 = vmax.f32 %v3746_v50, %v3596_v34  ;;  %v12018_v34 = vld [vmem:[#allocation161_spill] sm:$0xff]  ;;  %v12022_v11 = vld [vmem:[#allocation67_spill] sm:$0xff] }
 0x3f4   : > { %v2135_v38 = vpop.f32.mrf.mxu3  ;;  %v10841_v49 = vmax.f32 %v4170_v25, %v4020_v39  ;;  %v2693_v13 = vmul.f32 %v12011_v15, %v2366_v23  ;;  %v3117_v54 = vmul.f32 %v12012_v55, %v2366_v23  ;;  %v3541_v4 = vmul.f32 %v12013_v16, %v2366_v23  ;;  %5219 = vmatpush.bf16.msra.mxu1 %v6747_v24 }
 0x3f5   : > { %v3965_v48 = vmul.f32 %v12014_v33, %v2366_v23  ;;  %v2224_v42 = vpop.f32.mrf.mxu0  ;;  %v2279_v56 = vadd.f32 %v2278_v0, %v10499_v14  ;;  %v2136_v12 = vadd.f32 %v2135_v38, %v10172_v6  ;;  %v2837_v18 = vmax.f32 %v2836_v29, %v2689_v62  ;;  %v12016_v23 = vld [vmem:[#allocation152_spill] sm:$0xff]  ;;  %v12017_v0 = vld [vmem:[#allocation155_spill] sm:$0xff] }
 0x3f6   : > { %v3261_v21 = vmax.f32 %v3260_v19, %v3113_v46  ;;  %v3685_v50 = vmax.f32 %v3684_v44, %v3537_v36  ;;  %v4109_v5 = vmax.f32 %v4108_v40, %v3961_v45  ;;  %v12019_v19 = vld [vmem:[#allocation171_spill] sm:$0xff]  ;;  %v12020_v40 = vld [vmem:[#allocation173_spill] sm:$0xff] }
 0x3f7   : > { %v2225_v59 = vadd.f32 %v2224_v42, %v2136_v12  ;;  %v2838_v27 = vmax.f32 %v2837_v18, %v2693_v13  ;;  %v12021_v62 = vld [vmem:[#allocation175_spill] sm:$0xff] }
 0x3f8   : > { %v3262_v35 = vmax.f32 %v3261_v21, %v3117_v54  ;;  %v3686_v32 = vmax.f32 %v3685_v50, %v3541_v4  ;;  %v4110_v47 = vmax.f32 %v4109_v5, %v3965_v48 }
 0x3f9   : > { %v2367_v25 = vpop.f32.mrf.mxu2  ;;  %v2752_v43 = vmul.f32 %v12015_v22, %v2225_v59  ;;  %v3176_v9 = vmul.f32 %v12016_v23, %v2225_v59  ;;  %v3600_v20 = vmul.f32 %v12017_v0, %v2225_v59  ;;  %v4024_v24 = vmul.f32 %v12018_v34, %v2225_v59  ;;  %v12023_v59 = vld [vmem:[#allocation159_spill] sm:$0xff] }
 0x3fa   : > { %v2368_v31 = vadd.f32 %v2367_v25, %v2279_v56  ;;  %v2281_v60 = vpop.f32.mrf.mxu1 }
 0x3fb   : > { %v2900_v45 = vmax.f32 %v10835_v7, %v2752_v43  ;;  %v3324_v38 = vmax.f32 %v10837_v58, %v3176_v9  ;;  %v3748_v15 = vmax.f32 %v10839_v10, %v3600_v20  ;;  %v4172_v13 = vmax.f32 %v10841_v49, %v4024_v24 }
 0x3fc   : > { %v2697_v29 = vmul.f32 %v11900_v26, %v2368_v31  ;;  %v3121_v44 = vmul.f32 %v12019_v19, %v2368_v31  ;;  %v3545_v39 = vmul.f32 %v12020_v40, %v2368_v31  ;;  %v3969_v46 = vmul.f32 %v12021_v62, %v2368_v31  ;;  %v2138_v36 = vpop.f32.mrf.mxu3 }
 0x3fd   : > { %5168 = vmatmul.bf16.vlgmr.msrb.gmra.mxu1 %v12022_v11  ;;  %v2282_v4 = vadd.f32 %v2281_v60, %v10499_v14  ;;  %v2139_v33 = vadd.f32 %v2138_v36, %v10172_v6  ;;  %v2227_v18 = vpop.f32.mrf.mxu0  ;;  %v12025_v60 = vld [vmem:[#allocation134_spill] sm:$0xff] }
 0x3fe   : > { %v2839_v55 = vmax.f32 %v2838_v27, %v2697_v29  ;;  %v3263_v54 = vmax.f32 %v3262_v35, %v3121_v44  ;;  %v3687_v26 = vmax.f32 %v3686_v32, %v3545_v39  ;;  %v4111_v16 = vmax.f32 %v4110_v47, %v3969_v46  ;;  %v12024_v27 = vld [vmem:[#allocation158_spill] sm:$0xff]  ;;  %v12026_v47 = vld [vmem:[#allocation71_spill] sm:$0xff] }
 0x3ff   : > { %v2228_v21 = vadd.f32 %v2227_v18, %v2139_v33 }
 0x400   : > { %v2840_v48 = vrot.slane %v2839_v55, 4  ;;  %v3264_v42 = vrot.slane %v3263_v54, 4  ;;  %v3688_v56 = vrot.slane %v3687_v26, 4  ;;  %v4112_v12 = vrot.slane %v4111_v16, 4 }
 0x401   : > { %v2370_v7 = vpop.f32.mrf.mxu2  ;;  %v2756_v31 = vmul.f32 %v12023_v59, %v2228_v21  ;;  %v3180_v35 = vmul.f32 %v12024_v27, %v2228_v21  ;;  %v3604_v32 = vmul.f32 %v12025_v60, %v2228_v21  ;;  %v4028_v43 = vmul.f32 %v12026_v47, %v2228_v21  ;;  %v12028_v21 = vld [vmem:[#allocation32_spill] sm:$0xff] }
 0x402   : > { %v2371_v58 = vadd.f32 %v2370_v7, %v2282_v4  ;;  %v2283_v50 = vpop.f32.mrf.mxu1  ;;  %v2841_v10 = vmax.f32 %v2839_v55, %v2840_v48  ;;  %v3265_v5 = vmax.f32 %v3263_v54, %v3264_v42  ;;  %v3689_v49 = vmax.f32 %v3687_v26, %v3688_v56 }
 0x403   : > { %v4113_v25 = vmax.f32 %v4111_v16, %v4112_v12  ;;  %v2901_v19 = vmax.f32 %v2900_v45, %v2756_v31  ;;  %v3325_v44 = vmax.f32 %v3324_v38, %v3180_v35  ;;  %v3749_v40 = vmax.f32 %v3748_v15, %v3604_v32  ;;  %v12027_v15 = vld [vmem:[#allocation29_spill] sm:$0xff] }
 0x404   : > { %v2842_v9 = vrot.slane %v2841_v10, 2  ;;  %v3266_v20 = vrot.slane %v3265_v5, 2  ;;  %v3690_v24 = vrot.slane %v3689_v49, 2  ;;  %v4173_v39 = vmax.f32 %v4172_v13, %v4028_v43  ;;  %v2140_v54 = vpop.f32.mrf.mxu3  ;;  %v12030_v43 = vld [vmem:[#allocation40_spill] sm:$0xff] }
 0x405   : > { %v4114_v29 = vrot.slane %v4113_v25, 2  ;;  %v2284_v42 = vadd.f32 %v2283_v50, %v10499_v14  ;;  %v2141_v56 = vadd.f32 %v2140_v54, %v10172_v6  ;;  %v2701_v13 = vmul.f32 %v12027_v15, %v2371_v58  ;;  %v2229_v7 = vpop.f32.mrf.mxu0  ;;  %v12037_v15 = vld [vmem:[#allocation37_spill] sm:$0xff] }
 0x406   : > { %v2843_v62 = vmax.f32 %v2841_v10, %v2842_v9  ;;  %v3267_v46 = vmax.f32 %v3265_v5, %v3266_v20  ;;  %v3691_v36 = vmax.f32 %v3689_v49, %v3690_v24  ;;  %v3125_v10 = vmul.f32 %v12028_v21, %v2371_v58  ;;  %v12029_v5 = vld [vmem:[#allocation34_spill] sm:$0xff]  ;;  %v12031_v20 = vld [vmem:[#allocation165_spill] sm:$0xff] }
 0x407   : > { %v4115_v55 = vmax.f32 %v4113_v25, %v4114_v29  ;;  %v3549_v49 = vmul.f32 %v12029_v5, %v2371_v58  ;;  %v2230_v25 = vadd.f32 %v2229_v7, %v2141_v56  ;;  %v3973_v50 = vmul.f32 %v12030_v43, %v2371_v58  ;;  %v12032_v29 = vld [vmem:[#allocation170_spill] sm:$0xff]  ;;  %v12038_v5 = vld [vmem:[#allocation121_spill] sm:$0xff] }
 0x408   : > { %v2844_v26 = vrot.slane %v2843_v62, 1  ;;  %v3268_v16 = vrot.slane %v3267_v46, 1  ;;  %v3692_v4 = vrot.slane %v3691_v36, 1 }
 0x409   : > { %v4116_v33 = vrot.slane %v4115_v55, 1  ;;  %v2372_v48 = vpop.f32.mrf.mxu2  ;;  %v2760_v24 = vmul.f32 %v12031_v20, %v2230_v25 }
 0x40a   : > { %v2286_v12 = vpop.f32.mrf.mxu1  ;;  %v2845_v18 = vmax.f32 %v2843_v62, %v2844_v26  ;;  %v3269_v45 = vmax.f32 %v3267_v46, %v3268_v16  ;;  %v3693_v38 = vmax.f32 %v3691_v36, %v3692_v4  ;;  %v2373_v31 = vadd.f32 %v2372_v48, %v2284_v42  ;;  %v12033_v46 = vld [vmem:[#allocation75_spill] sm:$0xff]  ;;  %v12035_v16 = vld [vmem:[#allocation30_spill] sm:$0xff] }
 0x40b   : > { %v4117_v35 = vmax.f32 %v4115_v55, %v4116_v33  ;;  %v2287_v6 = vadd.f32 %v2286_v12, %v10499_v14  ;;  %v3184_v62 = vmul.f32 %v12032_v29, %v2230_v25  ;;  %v3608_v36 = vmul.f32 %v12033_v46, %v2230_v25  ;;  %v12034_v26 = vld [vmem:[#allocation79_spill] sm:$0xff]  ;;  %v12036_v33 = vld [vmem:[#allocation33_spill] sm:$0xff] }
 0x40c   : > { %v4206_v32 = vsel %vm4202_vm0, %v2845_v18, %v3269_v45  ;;  %v4032_v55 = vmul.f32 %v12034_v26, %v2230_v25  ;;  %v2705_v4 = vmul.f32 %v12035_v16, %v2373_v31  ;;  %v3129_v58 = vmul.f32 %v12036_v33, %v2373_v31  ;;  %v12063_v29 = vld [vmem:[#allocation89_spill] sm:$0xff] }
 0x40d   : > { %5220 = vmatmul.bf16.vlgmr.msra.gmra.mxu1 %v12022_v11  ;;  %v4215_v9 = vsel %vm4211_vm1, %v4206_v32, %v3693_v38  ;;  %v2902_v42 = vmax.f32 %v2901_v19, %v2760_v24  ;;  %v3326_v56 = vmax.f32 %v3325_v44, %v3184_v62  ;;  %v3750_v12 = vmax.f32 %v3749_v40, %v3608_v36  ;;  %v12040_v36 = vld [vmem:[#allocation36_spill] sm:$0xff] }
 0x40e   : > { %v4224_v54 = vsel %vm4220_vm2, %v4215_v9, %v4117_v35  ;;  %v4174_v18 = vmax.f32 %v4173_v39, %v4032_v55  ;;  %v2909_v45 = vmax.f32 %v2701_v13, %v2705_v4  ;;  %v3333_v38 = vmax.f32 %v3125_v10, %v3129_v58  ;;  %v12041_v4 = vld [vmem:[#allocation78_spill] sm:$0xff] }
 0x40f   : > { %v4238_v48 = vrot.slane %v4224_v54, 4  ;;  %v3553_v7 = vmul.f32 %v12037_v15, %v2373_v31  ;;  %v2903_v35 = vrot.slane %v2902_v42, 4  ;;  %v3327_v43 = vrot.slane %v3326_v56, 4  ;;  %v12039_v54 = vld [vmem:[#allocation43_spill] sm:$0xff] }
 0x410   : > { %v3751_v25 = vrot.slane %v3750_v12, 4  ;;  %v4175_v16 = vrot.slane %v4174_v18, 4  ;;  %v3977_v19 = vmul.f32 %v12039_v54, %v2373_v31 }
 0x411   : > { %v2375_v21 = vpop.f32.mrf.mxu2  ;;  %v4243_v32 = vsel %vm4241_vm3, %v12038_v5, %v4238_v48  ;;  %v3757_v33 = vmax.f32 %v3549_v49, %v3553_v7  ;;  %v2904_v40 = vmax.f32 %v2902_v42, %v2903_v35  ;;  %v3328_v39 = vmax.f32 %v3326_v56, %v3327_v43 }
 0x412   : > { %v2288_v9 = vpop.f32.mrf.mxu1  ;;  %4250 = vst [vmem:[#allocation1 + $0x10] ss:$2 sm:$0xff] %v4243_v32  ;;  %v2376_v44 = vadd.f32 %v2375_v21, %v2287_v6  ;;  %v3752_v13 = vmax.f32 %v3750_v12, %v3751_v25  ;;  %v4176_v24 = vmax.f32 %v4174_v18, %v4175_v16  ;;  %v4181_v62 = vmax.f32 %v3973_v50, %v3977_v19  ;;  %v12042_v32 = vld [vmem:[#allocation42_spill] sm:$0xff] }
 0x413   : > { %v2289_v10 = vadd.f32 %v2288_v9, %v10499_v14  ;;  %v2905_v48 = vrot.slane %v2904_v40, 2  ;;  %v3329_v15 = vrot.slane %v3328_v39, 2  ;;  %v12043_v6 = vld [vmem:[#allocation46_spill] sm:$0xff] }
 0x414   : > { %v2709_v55 = vmul.f32 %v12040_v36, %v2376_v44  ;;  %v3133_v58 = vmul.f32 %v12041_v4, %v2376_v44  ;;  %v3753_v5 = vrot.slane %v3752_v13, 2  ;;  %v3557_v11 = vmul.f32 %v12042_v32, %v2376_v44 }
 0x415   : > { %v4177_v49 = vrot.slane %v4176_v24, 2  ;;  %v3981_v42 = vmul.f32 %v12043_v6, %v2376_v44  ;;  %v2906_v56 = vmax.f32 %v2904_v40, %v2905_v48  ;;  %v3330_v12 = vmax.f32 %v3328_v39, %v3329_v15  ;;  %v12046_v40 = vld [vmem:[#allocation49_spill] sm:$0xff]  ;;  %v7706_v48 = vld [vmem:[#allocation8 + $0x2f4] sm:$0xf0] }
 0x416   : > { %v2910_v7 = vmax.f32 %v2909_v45, %v2709_v55  ;;  %v3334_v31 = vmax.f32 %v3333_v38, %v3133_v58  ;;  %v3754_v21 = vmax.f32 %v3752_v13, %v3753_v5  ;;  %v3758_v35 = vmax.f32 %v3757_v33, %v3557_v11  ;;  %v12044_v45 = vld [vmem:[#allocation45_spill] sm:$0xff]  ;;  %v12045_v55 = vld [vmem:[#allocation47_spill] sm:$0xff] }
 0x417   : > { %v4178_v18 = vmax.f32 %v4176_v24, %v4177_v49  ;;  %v4182_v50 = vmax.f32 %v4181_v62, %v3981_v42  ;;  %v2907_v25 = vrot.slane %v2906_v56, 1  ;;  %v3331_v9 = vrot.slane %v3330_v12, 1  ;;  %v12047_v13 = vld [vmem:[#allocation55_spill] sm:$0xff] }
 0x418   : > { %v3755_v16 = vrot.slane %v3754_v21, 1 }
 0x419   : > { %v2377_v43 = vpop.f32.mrf.mxu2  ;;  %v4179_v36 = vrot.slane %v4178_v18, 1  ;;  %v2908_v4 = vmax.f32 %v2906_v56, %v2907_v25  ;;  %v3332_v32 = vmax.f32 %v3330_v12, %v3331_v9  ;;  %v12049_v25 = vld [vmem:[#allocation53_spill] sm:$0xff] }
 0x41a   : > { %v2378_v54 = vadd.f32 %v2377_v43, %v2289_v10  ;;  %v2291_v19 = vpop.f32.mrf.mxu1  ;;  %v3756_v26 = vmax.f32 %v3754_v21, %v3755_v16  ;;  %v6982_v10 = vld [vmem:[#allocation8 + $0x2e8] sm:$0xf] }
 0x41b   : > { %v4180_v33 = vmax.f32 %v4178_v18, %v4179_v36  ;;  %v4209_v24 = vsel %vm4202_vm0, %v2908_v4, %v3332_v32  ;;  %v2292_v56 = vadd.f32 %v2291_v19, %v10499_v14  ;;  %v6983_v12 = vor.u32 %v7706_v48, %v6982_v10  ;;  %v12050_v16 = vld [vmem:[#allocation52_spill] sm:$0xff]  ;;  %v12056_v10 = vld [vmem:[#allocation69_spill] sm:$0xff] }
 0x41c   : > { %v2713_v38 = vmul.f32 %v12044_v45, %v2378_v54  ;;  %v3137_v44 = vmul.f32 %v12045_v55, %v2378_v54  ;;  %v3561_v39 = vmul.f32 %v12046_v40, %v2378_v54  ;;  %v3985_v11 = vmul.f32 %v12047_v13, %v2378_v54  ;;  %v12051_v36 = vld [vmem:[#allocation116_spill] sm:$0xff]  ;;  %v10922_v13 = vld [vmem:[%s12053_s11] sm:$0xf] }
 0x41d   : > { %v10899_v58 = vpop.f32.mrf.mxu0  ;;  %v4218_v15 = vsel %vm4211_vm1, %v4209_v24, %v3756_v26  ;;  %5173 = vmatpush.bf16.msrb.mxu2 %v6983_v12  ;;  %v12055_v24 = vld [vmem:[#allocation61_spill] sm:$0xff]  ;;  %v6926_v12 = vld [vmem:[#allocation8 + $0x280] sm:$0xf] }
 0x41e   : > { %v2911_v62 = vmax.f32 %v2910_v7, %v2713_v38  ;;  %v3335_v5 = vmax.f32 %v3334_v31, %v3137_v44  ;;  %v3759_v49 = vmax.f32 %v3758_v35, %v3561_v39  ;;  %v4183_v6 = vmax.f32 %v4182_v50, %v3985_v11  ;;  %v12052_v31 = vld [vmem:[#allocation149_spill] sm:$0xff]  ;;  %v12054_v11 = vld [vmem:[#allocation58_spill] sm:$0xff] }
 0x41f   : > { %v10903_v42 = vsel %vm4220_vm2, %v4218_v15, %v4180_v33  ;;  %v12057_v15 = vld [vmem:[#allocation77_spill] sm:$0xff] }
 0x420   : > { %12048 = vst [vmem:[#allocation124_spill] sm:$0xff] %v10903_v42  ;;  %v7685_v42 = vld [vmem:[#allocation8 + $0x24c] sm:$0xf0] }
 0x421   : > { %v2380_v21 = vpop.f32.mrf.mxu2 }
 0x422   : > { %v2381_v18 = vadd.f32 %v2380_v21, %v2292_v56  ;;  %v2293_v43 = vpop.f32.mrf.mxu1  ;;  %v5052_v7 = vpop.f32.mrf.mxu3  ;;  %v7701_v21 = vld [vmem:[#allocation8 + $0x2cc] sm:$0xf0] }
 0x423   : > { %v2294_v38 = vadd.f32 %v2293_v43, %v10499_v14  ;;  %v7693_v56 = vld [vmem:[#allocation8 + $0x28c] sm:$0xf0] }
 0x424   : > { %v2717_v9 = vmul.f32 %v12049_v25, %v2381_v18  ;;  %v3141_v54 = vmul.f32 %v12050_v16, %v2381_v18  ;;  %v3565_v26 = vmul.f32 %v12051_v36, %v2381_v18  ;;  %v3989_v35 = vmul.f32 %v12052_v31, %v2381_v18 }
 0x425   : > { %v5158_v19 = vpop.f32.mrf.mxu0 }
 0x426   : > { %v10910_v50 = vmax.f32 %v2911_v62, %v2717_v9  ;;  %v10912_v4 = vmax.f32 %v3335_v5, %v3141_v54  ;;  %v10914_v32 = vmax.f32 %v3759_v49, %v3565_v26  ;;  %v10916_v45 = vmax.f32 %v4183_v6, %v3989_v35  ;;  %v6966_v19 = vld [vmem:[#allocation8 + $0x2c8] sm:$0xf] }
 0x427   : > { %v4395_v49 = vperm.slane %v10922_v13, 0 }
 0x429   : > { %v2382_v55 = vpop.f32.mrf.mxu2  ;;  %v5053_v25 = vadd.f32 %v5052_v7, %v4395_v49 }
 0x42a   : > { %v2383_v44 = vadd.f32 %v2382_v55, %v2294_v38  ;;  %v2296_v40 = vpop.f32.mrf.mxu1  ;;  %v5054_v39 = vpop.f32.mrf.mxu3  ;;  %v7702_v38 = vld [vmem:[#allocation8 + $0x2d4] sm:$0xf0] }
 0x42b   : > { %v6967_v55 = vor.u32 %v7702_v38, %v6966_v19  ;;  %v6927_v19 = vor.u32 %v7693_v56, %v6926_v12 }
 0x42c   : > { %v10925_v33 = vmul.f32 %v12054_v11, %v2383_v44  ;;  %v10928_v62 = vmul.f32 %v12055_v24, %v2383_v44  ;;  %v10931_v48 = vmul.f32 %v12056_v10, %v2383_v44  ;;  %v10934_v5 = vmul.f32 %v12057_v15, %v2383_v44  ;;  %v6974_v11 = vld [vmem:[#allocation8 + $0x2e0] sm:$0xf]  ;;  %v7705_v24 = vld [vmem:[#allocation8 + $0x2ec] sm:$0xf0] }
 0x42d   : > { %v10945_v18 = vpop.f32.mrf.mxu0  ;;  %5174 = vmatpush.bf16.msrb.mxu2 %v6967_v55  ;;  %v6958_v10 = vld [vmem:[#allocation8 + $0x2c0] sm:$0xf]  ;;  %v6975_v15 = vor.u32 %v7705_v24, %v6974_v11 }
 0x42e   : > { %12058 = vst [vmem:[#allocation129_spill] sm:$0xff] %v10945_v18  ;;  %v6959_v49 = vor.u32 %v7701_v21, %v6958_v10  ;;  %v6910_v55 = vld [vmem:[#allocation8 + $0x260] sm:$0xf]  ;;  %v7698_v21 = vld [vmem:[#allocation8 + $0x2b4] sm:$0xf0] }
 0x42f   : > { %5069 = vmatpush.bf16.msra.mxu3 %v6975_v15  ;;  %v6894_v11 = vld [vmem:[#allocation8 + $0x240] sm:$0xf]  ;;  %v6950_v15 = vld [vmem:[#allocation8 + $0x2a8] sm:$0xf] }
 0x430   : > { %v6951_v10 = vor.u32 %v7698_v21, %v6950_v15  ;;  %v12062_v21 = vld [vmem:[#allocation81_spill] sm:$0xff] }
 0x431   : > { %v2385_v43 = vpop.f32.mrf.mxu2 }
 0x432   : > { %v2298_v9 = vpop.f32.mrf.mxu1  ;;  %v5065_v16 = vpop.f32.mrf.mxu3  ;;  %5175 = vmatpush.bf16.msrb.mxu2 %v6951_v10 }
 0x433   : > { %v10947_v54 = vadd.f32 %v5065_v16, %v5053_v25  ;;  %5070 = vmatpush.bf16.msra.mxu3 %v6959_v49  ;;  %v6942_v16 = vld [vmem:[#allocation8 + $0x2a0] sm:$0xf]  ;;  %v2297_v49 = vadd.f32 %v2296_v40, %v10499_v14  ;;  %v2299_v12 = vadd.f32 %v2298_v9, %v10499_v14 }
 0x434   : > { %v6878_v9 = vld [vmem:[#allocation8 + $0x220] sm:$0xf] }
 0x435   : > { %12059 = vst [vmem:[#allocation35_spill] sm:$0xff] %v10947_v54  ;;  %v5210_v36 = vpop.f32.mrf.mxu0  ;;  %v7689_v54 = vld [vmem:[#allocation8 + $0x26c] sm:$0xf0]  ;;  %v2386_v56 = vadd.f32 %v2385_v43, %v2297_v49  ;;  %v12064_v49 = vld [vmem:[#allocation88_spill] sm:$0xff] }
 0x436   : > { %v7697_v36 = vld [vmem:[#allocation8 + $0x2ac] sm:$0xf0]  ;;  %v6911_v24 = vor.u32 %v7689_v54, %v6910_v55  ;;  %v12061_v55 = vld [vmem:[#allocation87_spill] sm:$0xff] }
 0x437   : > { %v3149_v46 = vmul.f32 %v12061_v55, %v2386_v56  ;;  %v3573_v40 = vmul.f32 %v12062_v21, %v2386_v56  ;;  %v3997_v20 = vmul.f32 %v12063_v29, %v2386_v56  ;;  %v7694_v55 = vld [vmem:[#allocation8 + $0x294] sm:$0xf0]  ;;  %v12068_v21 = vmax.f32 %v10916_v45, %v10934_v5  ;;  %v7102_v45 = vld [vmem:[#allocation8 + $0x3e0] sm:$0xf] }
 0x438   : > { %v12073_v5 = vld [vmem:[#allocation107_spill] sm:$0xff] }
 0x439   : > { %v2387_v26 = vpop.f32.mrf.mxu2 }
 0x43a   : > { %v2301_v31 = vpop.f32.mrf.mxu1  ;;  %v5067_v35 = vpop.f32.mrf.mxu3 }
 0x43b   : > { %v6943_v35 = vor.u32 %v7697_v36, %v6942_v16  ;;  %v6895_v16 = vor.u32 %v7685_v42, %v6894_v11  ;;  %v2302_v15 = vadd.f32 %v2301_v31, %v10499_v14 }
 0x43d   : > { %5071 = vmatpush.bf16.msra.mxu3 %v6943_v35  ;;  %v2388_v35 = vadd.f32 %v2387_v26, %v2299_v12  ;;  %v7681_v26 = vld [vmem:[#allocation8 + $0x22c] sm:$0xf0] }
 0x43e   : > { %v6879_v31 = vor.u32 %v7681_v26, %v6878_v9  ;;  %v12069_v9 = vld [vmem:[#allocation95_spill] sm:$0xff] }
 0x43f   : > { %v2729_v42 = vmul.f32 %v11963_v28, %v2388_v35  ;;  %v3153_v10 = vmul.f32 %v11964_v30, %v2388_v35  ;;  %v12066_v28 = vmax.f32 %v10912_v4, %v10928_v62  ;;  %v4001_v26 = vmul.f32 %v12069_v9, %v2388_v35  ;;  %v12074_v9 = vld [vmem:[#allocation164_spill] sm:$0xff] }
 0x441   : > { %v2390_v44 = vpop.f32.mrf.mxu2  ;;  %5072 = vmatpush.bf16.msra.mxu3 %v6927_v19  ;;  %v12060_v19 = vld [vmem:[#allocation68_spill] sm:$0xff] }
 0x442   : > { %v2303_v39 = vpop.f32.mrf.mxu1  ;;  %v2725_v54 = vmul.f32 %v12060_v19, %v2386_v56  ;;  %v2391_v11 = vadd.f32 %v2390_v44, %v2302_v15  ;;  %v12065_v19 = vmax.f32 %v10910_v50, %v10925_v33  ;;  %v3338_v44 = vmax.f32 %v12066_v28, %v3149_v46  ;;  %v6934_v56 = vld [vmem:[#allocation8 + $0x288] sm:$0xf] }
 0x443   : > { %v12067_v15 = vmax.f32 %v10914_v32, %v10931_v48  ;;  %v12071_v46 = vld [vmem:[#allocation96_spill] sm:$0xff]  ;;  %v12072_v48 = vld [vmem:[#allocation99_spill] sm:$0xff] }
 0x444   : > { %v2914_v29 = vmax.f32 %v12065_v19, %v2725_v54  ;;  %v12070_v54 = vld [vmem:[#allocation93_spill] sm:$0xff]  ;;  %v3157_v62 = vmul.f32 %v12071_v46, %v2391_v11  ;;  %v3339_v28 = vmax.f32 %v3338_v44, %v3153_v10 }
 0x445   : > { %5073 = vmatpush.bf16.msra.mxu3 %v6911_v24  ;;  %v2304_v24 = vadd.f32 %v2303_v39, %v10499_v14  ;;  %v3762_v30 = vmax.f32 %v12067_v15, %v3573_v40  ;;  %v2733_v4 = vmul.f32 %v12070_v54, %v2391_v11  ;;  %v7677_v19 = vld [vmem:[#allocation8 + $0x20c] sm:$0xf0]  ;;  %v3581_v40 = vmul.f32 %v12072_v48, %v2391_v11 }
 0x446   : > { %v2915_v33 = vmax.f32 %v2914_v29, %v2729_v42  ;;  %v6918_v29 = vld [vmem:[#allocation8 + $0x268] sm:$0xf] }
 0x448   : > { %v2916_v44 = vmax.f32 %v2915_v33, %v2733_v4  ;;  %v7686_v33 = vld [vmem:[#allocation8 + $0x254] sm:$0xf0] }
 0x449   : > { %v2392_v7 = vpop.f32.mrf.mxu2  ;;  %5074 = vmatpush.bf16.msra.mxu3 %v6895_v16  ;;  %v3577_v16 = vmul.f32 %v12064_v49, %v2388_v35  ;;  %v4186_v49 = vmax.f32 %v12068_v21, %v3997_v20  ;;  %v7737_v20 = vld [vmem:[#allocation8 + $0x3ec] sm:$0xf0]  ;;  %v4005_v35 = vmul.f32 %v12073_v5, %v2391_v11  ;;  %v7690_v21 = vld [vmem:[#allocation8 + $0x274] sm:$0xf0] }
 0x44a   : > { %v2306_v25 = vpop.f32.mrf.mxu1  ;;  %v2393_v39 = vadd.f32 %v2392_v7, %v2304_v24  ;;  %v6935_v7 = vor.u32 %v7694_v55, %v6934_v56  ;;  %v6862_v24 = vld [vmem:[#allocation8 + $0x200] sm:$0xf] }
 0x44b   : > { %v2307_v50 = vadd.f32 %v2306_v25, %v10499_v14  ;;  %v3763_v32 = vmax.f32 %v3762_v30, %v3577_v16  ;;  %v6863_v42 = vor.u32 %v7677_v19, %v6862_v24  ;;  %v6919_v16 = vor.u32 %v7690_v21, %v6918_v29  ;;  %v7682_v21 = vld [vmem:[#allocation8 + $0x234] sm:$0xf0] }
 0x44c   : > { %v2737_v25 = vmul.f32 %v11980_v57, %v2393_v39  ;;  %5176 = vmatpush.bf16.msrb.mxu2 %v6935_v7  ;;  %v3161_v56 = vmul.f32 %v11981_v17, %v2393_v39  ;;  %v3585_v55 = vmul.f32 %v11982_v8, %v2393_v39  ;;  %v3340_v30 = vmax.f32 %v3339_v28, %v3157_v62  ;;  %v7086_v7 = vld [vmem:[#allocation8 + $0x3c0] sm:$0xf]  ;;  %v12075_v28 = vld [vmem:[#allocation122_spill] sm:$0xff] }
 0x44d   : > { %5075 = vmatpush.bf16.msra.mxu3 %v6879_v31  ;;  %v7103_v31 = vor.u32 %v7737_v20, %v7102_v45  ;;  %v4009_v11 = vmul.f32 %v12074_v9, %v2393_v39  ;;  %v3764_v57 = vmax.f32 %v3763_v32, %v3581_v40  ;;  %v6902_v39 = vld [vmem:[#allocation8 + $0x248] sm:$0xf] }
 0x44e   : > { %v2917_v4 = vmax.f32 %v2916_v44, %v2737_v25  ;;  %v3341_v62 = vmax.f32 %v3340_v30, %v3161_v56  ;;  %v6903_v40 = vor.u32 %v7686_v33, %v6902_v39  ;;  %v7729_v25 = vld [vmem:[#allocation8 + $0x3ac] sm:$0xf0]  ;;  %v7038_v39 = vld [vmem:[#allocation8 + $0x360] sm:$0xf] }
 0x44f   : > { %v3765_v19 = vmax.f32 %v3764_v57, %v3585_v55  ;;  %v7725_v57 = vld [vmem:[#allocation8 + $0x38c] sm:$0xf0] }
 0x450   : > { %5177 = vmatpush.bf16.msrb.mxu2 %v6919_v16  ;;  %v7721_v33 = vld [vmem:[#allocation8 + $0x36c] sm:$0xf0] }
 0x451   : > { %v2395_v6 = vpop.f32.mrf.mxu2  ;;  %5076 = vmatpush.bf16.msra.mxu3 %v6863_v42 }
 0x452   : > { %v10949_v38 = vpop.f32.mrf.mxu1  ;;  %v2396_v15 = vadd.f32 %v2395_v6, %v2307_v50  ;;  %v4187_v6 = vmax.f32 %v4186_v49, %v4001_v26 }
 0x453   : > { %v2309_v10 = vadd.f32 %v10949_v38, %v10499_v14  ;;  %v7733_v38 = vld [vmem:[#allocation8 + $0x3cc] sm:$0xf0] }
 0x454   : > { %v2741_v54 = vmul.f32 %v11992_v63, %v2396_v15  ;;  %v4188_v24 = vmax.f32 %v4187_v6, %v4005_v35  ;;  %v3165_v49 = vmul.f32 %v11863_v61, %v2396_v15  ;;  %v7087_v26 = vor.u32 %v7733_v38, %v7086_v7  ;;  %v7070_v35 = vld [vmem:[#allocation8 + $0x3a0] sm:$0xf]  ;;  %5178 = vmatpush.bf16.msrb.mxu2 %v6903_v40  ;;  %v7704_v7 = vld [vmem:[#allocation8 + $0x2ec] sm:$0xf]  ;;  %v6984_v38 = vld [vmem:[#allocation8 + $0x2f8] sm:$0xf0] }
 0x455   : > { %5082 = vmatpush.bf16.msrb.mxu3 %v7103_v31  ;;  %v3589_v32 = vmul.f32 %v12075_v28, %v2396_v15  ;;  %v7071_v29 = vor.u32 %v7729_v25, %v7070_v35  ;;  %v6952_v35 = vld [vmem:[#allocation8 + $0x2b8] sm:$0xf0] }
 0x456   : > { %v2918_v45 = vmax.f32 %v2917_v4, %v2741_v54  ;;  %v3342_v42 = vmax.f32 %v3341_v62, %v3165_v49  ;;  %v6870_v54 = vld [vmem:[#allocation8 + $0x208] sm:$0xf] }
 0x459   : > { %v10952_v18 = vpop.f32.mrf.mxu2  ;;  %5083 = vmatpush.bf16.msrb.mxu3 %v7087_v26 }
 0x45a   : > { %v10954_v36 = vpop.f32.mrf.mxu1  ;;  %v2398_v46 = vadd.f32 %v10952_v18, %v2309_v10  ;;  %v4189_v18 = vmax.f32 %v4188_v24, %v4009_v11  ;;  %v3766_v10 = vmax.f32 %v3765_v19, %v3589_v32  ;;  %v7054_v11 = vld [vmem:[#allocation8 + $0x380] sm:$0xf]  ;;  %v6987_v19 = vor.u32 %v7704_v7, %v6984_v38  ;;  %v7688_v7 = vld [vmem:[#allocation8 + $0x26c] sm:$0xf] }
 0x45b   : > { %v2312_v17 = vadd.f32 %v10954_v36, %v10499_v14  ;;  %v12076_v36 = vld [vmem:[#allocation133_spill] sm:$0xff] }
 0x45c   : > { %v4013_v48 = vmul.f32 %v12076_v36, %v2396_v15  ;;  %v2745_v20 = vmul.f32 %v12000_v1, %v2398_v46  ;;  %v3169_v61 = vmul.f32 %v12001_v53, %v2398_v46  ;;  %v4017_v31 = vmul.f32 %v12003_v2, %v2398_v46  ;;  %v6886_v15 = vld [vmem:[#allocation8 + $0x228] sm:$0xf] }
 0x45d   : > { %v6887_v55 = vor.u32 %v7682_v21, %v6886_v15  ;;  %5084 = vmatpush.bf16.msrb.mxu3 %v7071_v29  ;;  %v7039_v36 = vor.u32 %v7721_v33, %v7038_v39  ;;  %v7006_v21 = vld [vmem:[#allocation8 + $0x320] sm:$0xf] }
 0x45e   : > { %v4190_v16 = vmax.f32 %v4189_v18, %v4013_v48  ;;  %v2919_v44 = vmax.f32 %v2918_v45, %v2745_v20  ;;  %v3343_v30 = vmax.f32 %v3342_v42, %v3169_v61 }
 0x45f   : > { %5179 = vmatpush.bf16.msrb.mxu2 %v6887_v55 }
 0x460   : > { %v4191_v24 = vmax.f32 %v4190_v16, %v4017_v31 }
 0x461   : > { %v10964_v43 = vpop.f32.mrf.mxu2 }
 0x462   : > { %v10968_v12 = vpop.f32.mrf.mxu1  ;;  %v2401_v63 = vadd.f32 %v10964_v43, %v2312_v17  ;;  %v3593_v43 = vmul.f32 %v12002_v52, %v2398_v46  ;;  %v7055_v17 = vor.u32 %v7725_v57, %v7054_v11 }
 0x463   : > { %v2314_v5 = vadd.f32 %v10968_v12, %v10499_v14  ;;  %v4397_v12 = vperm.slane %v10922_v13, 2 }
 0x464   : > { %v2749_v56 = vmul.f32 %v12006_v3, %v2401_v63  ;;  %v3173_v52 = vmul.f32 %v12007_v37, %v2401_v63  ;;  %v3767_v3 = vmax.f32 %v3766_v10, %v3593_v43  ;;  %v4021_v46 = vmul.f32 %v12009_v41, %v2401_v63  ;;  %v7700_v41 = vld [vmem:[#allocation8 + $0x2cc] sm:$0xf]  ;;  %5085 = vmatpush.bf16.msrb.mxu3 %v7055_v17  ;;  %v12077_v10 = vld [vmem:[#allocation165_spill] sm:$0xff] }
 0x465   : > { %v7709_v17 = vld [vmem:[#allocation8 + $0x30c] sm:$0xf0] }
 0x466   : > { %v2920_v49 = vmax.f32 %v2919_v44, %v2749_v56  ;;  %v3344_v18 = vmax.f32 %v3343_v30, %v3173_v52  ;;  %v4192_v48 = vmax.f32 %v4191_v24, %v4021_v46  ;;  %v7713_v56 = vld [vmem:[#allocation8 + $0x32c] sm:$0xf0]  ;;  %v12080_v30 = vld [vmem:[#allocation79_spill] sm:$0xff] }
 0x467   : > { %v7007_v11 = vor.u32 %v7713_v56, %v7006_v21  ;;  %v6990_v46 = vld [vmem:[#allocation8 + $0x300] sm:$0xf] }
 0x468   : > { %5086 = vmatpush.bf16.msrb.mxu3 %v7039_v36  ;;  %v6991_v39 = vor.u32 %v7709_v17, %v6990_v46  ;;  %v7627_v17 = vld [vmem:[#allocation8 + $0x84] sm:$0xf] }
 0x469   : > { %v2402_v50 = vpop.f32.mrf.mxu2 }
 0x46a   : > { %v2316_v8 = vpop.f32.mrf.mxu1  ;;  %v2403_v1 = vadd.f32 %v2402_v50, %v2314_v5  ;;  %v3597_v50 = vmul.f32 %v12008_v51, %v2401_v63  ;;  %v6968_v63 = vld [vmem:[#allocation8 + $0x2d8] sm:$0xf0] }
 0x46b   : > { %v2317_v53 = vadd.f32 %v2316_v8, %v10499_v14  ;;  %v7678_v8 = vld [vmem:[#allocation8 + $0x214] sm:$0xf0]  ;;  %v6971_v5 = vor.u32 %v7700_v41, %v6968_v63  ;;  %v7684_v63 = vld [vmem:[#allocation8 + $0x24c] sm:$0xf] }
 0x46c   : > { %v2753_v37 = vmul.f32 %v12015_v22, %v2403_v1  ;;  %v3177_v26 = vmul.f32 %v12016_v23, %v2403_v1  ;;  %v3601_v4 = vmul.f32 %v12017_v0, %v2403_v1  ;;  %v4025_v62 = vmul.f32 %v12018_v34, %v2403_v1  ;;  %v7022_v0 = vld [vmem:[#allocation8 + $0x340] sm:$0xf]  ;;  %v7717_v34 = vld [vmem:[#allocation8 + $0x34c] sm:$0xf0] }
 0x46d   : > { %v6871_v51 = vor.u32 %v7678_v8, %v6870_v54  ;;  %v3768_v22 = vmax.f32 %v3767_v3, %v3597_v50  ;;  %v7023_v15 = vor.u32 %v7717_v34, %v7022_v0 }
 0x46e   : > { %v2921_v45 = vmax.f32 %v2920_v49, %v2753_v37  ;;  %v3345_v20 = vmax.f32 %v3344_v18, %v3177_v26  ;;  %v4193_v42 = vmax.f32 %v4192_v48, %v4025_v62  ;;  %v6920_v26 = vld [vmem:[#allocation8 + $0x278] sm:$0xf0]  ;;  %v4398_v48 = vperm.slane %v10922_v13, 3 }
 0x46f   : > { %5180 = vmatpush.bf16.msrb.mxu2 %v6871_v51  ;;  %v3769_v25 = vmax.f32 %v3768_v22, %v3601_v4  ;;  %5087 = vmatpush.bf16.msrb.mxu3 %v7023_v15  ;;  %v6923_v41 = vor.u32 %v7688_v7, %v6920_v26  ;;  %v6904_v22 = vld [vmem:[#allocation8 + $0x258] sm:$0xf0] }
 0x471   : > { %v2405_v6 = vpop.f32.mrf.mxu2 }
 0x472   : > { %v2406_v2 = vadd.f32 %v2405_v6, %v2317_v53  ;;  %v2318_v9 = vpop.f32.mrf.mxu1  ;;  %v12078_v6 = vld [vmem:[#allocation170_spill] sm:$0xff] }
 0x473   : > { %v2319_v61 = vadd.f32 %v2318_v9, %v10499_v14  ;;  %5225 = vmatpush.bf16.msra.mxu2 %v6987_v19  ;;  %v6936_v9 = vld [vmem:[#allocation8 + $0x298] sm:$0xf0]  ;;  %5088 = vmatpush.bf16.msrb.mxu3 %v7007_v11  ;;  %v7635_v11 = vld [vmem:[#allocation8 + $0xc4] sm:$0xf] }
 0x474   : > { %v2757_v28 = vmul.f32 %v12023_v59, %v2406_v2  ;;  %v3181_v32 = vmul.f32 %v12024_v27, %v2406_v2  ;;  %v3605_v23 = vmul.f32 %v12025_v60, %v2406_v2  ;;  %v4029_v40 = vmul.f32 %v12026_v47, %v2406_v2  ;;  %v7696_v59 = vld [vmem:[#allocation8 + $0x2ac] sm:$0xf] }
 0x475   : > { %v5157_v27 = vadd.f32 %v10899_v58, %v4397_v12  ;;  %v6955_v55 = vor.u32 %v7696_v59, %v6952_v35  ;;  %v12079_v12 = vld [vmem:[#allocation75_spill] sm:$0xff]  ;;  %v7692_v2 = vld [vmem:[#allocation8 + $0x28c] sm:$0xf]  ;;  %v12081_v35 = vld [vmem:[#allocation129_spill] sm:$0xff] }
 0x476   : > { %v2922_v31 = vmax.f32 %v2921_v45, %v2757_v28  ;;  %v3346_v60 = vmax.f32 %v3345_v20, %v3181_v32  ;;  %v3770_v1 = vmax.f32 %v3769_v25, %v3605_v23  ;;  %v4194_v53 = vmax.f32 %v4193_v42, %v4029_v40  ;;  %v7680_v25 = vld [vmem:[#allocation8 + $0x22c] sm:$0xf]  ;;  %v6888_v42 = vld [vmem:[#allocation8 + $0x238] sm:$0xf0] }
 0x477   : > { %5226 = vmatpush.bf16.msra.mxu2 %v6971_v5  ;;  %v6939_v8 = vor.u32 %v7692_v2, %v6936_v9  ;;  %5089 = vmatpush.bf16.msrb.mxu3 %v6991_v39  ;;  %v6907_v45 = vor.u32 %v7684_v63, %v6904_v22  ;;  %v6891_v21 = vor.u32 %v7680_v25, %v6888_v42  ;;  %v7619_v39 = vld [vmem:[#allocation8 + $0x44] sm:$0xf]  ;;  %v6608_v63 = vld [vmem:[#allocation8 + $0x10] sm:$0xf0] }
 0x478   : > { %v7667_v22 = vld [vmem:[#allocation8 + $0x1c4] sm:$0xf]  ;;  %v6768_v42 = vld [vmem:[#allocation8 + $0x150] sm:$0xf0] }
 0x479   : > { %v2407_v43 = vpop.f32.mrf.mxu2  ;;  %v7651_v25 = vld [vmem:[#allocation8 + $0x144] sm:$0xf] }
 0x47a   : > { %v2408_v29 = vadd.f32 %v2407_v43, %v2319_v61  ;;  %v5169_v47 = vpop.f32.mrf.mxu1 }
 0x47b   : > { %v11024_v14 = vadd.f32 %v5169_v47, %v5157_v27  ;;  %5227 = vmatpush.bf16.msra.mxu2 %v6955_v55  ;;  %v5209_v27 = vadd.f32 %v12081_v35, %v4398_v48  ;;  %v6832_v48 = vld [vmem:[#allocation8 + $0x1d0] sm:$0xf0] }
 0x47c   : > { %v2761_v16 = vmul.f32 %v12077_v10, %v2408_v29  ;;  %v3185_v58 = vmul.f32 %v12078_v6, %v2408_v29  ;;  %v3609_v44 = vmul.f32 %v12079_v12, %v2408_v29  ;;  %v4033_v52 = vmul.f32 %v12080_v30, %v2408_v29  ;;  %v12082_v6 = vld [vmem:[#allocation124_spill] sm:$0xff]  ;;  %v6720_v30 = vld [vmem:[#allocation8 + $0xf0] sm:$0xf0] }
 0x47d   : > { %v6784_v35 = vld [vmem:[#allocation8 + $0x170] sm:$0xf0] }
 0x47e   : > { %v2923_v57 = vmax.f32 %v2922_v31, %v2761_v16  ;;  %v3347_v54 = vmax.f32 %v3346_v60, %v3185_v58  ;;  %v3771_v3 = vmax.f32 %v3770_v1, %v3609_v44  ;;  %v4195_v50 = vmax.f32 %v4194_v53, %v4033_v52  ;;  %v7676_v1 = vld [vmem:[#allocation8 + $0x20c] sm:$0xf]  ;;  %v6872_v53 = vld [vmem:[#allocation8 + $0x218] sm:$0xf0]  ;;  %v7639_v44 = vld [vmem:[#allocation8 + $0xe4] sm:$0xf] }
 0x47f   : > { %5228 = vmatpush.bf16.msra.mxu2 %v6939_v8  ;;  %v6875_v16 = vor.u32 %v7676_v1, %v6872_v53  ;;  %v6723_v2 = vor.u32 %v7639_v44, %v6720_v30  ;;  %v6672_v8 = vld [vmem:[#allocation8 + $0x90] sm:$0xf0]  ;;  %v7691_v30 = vld [vmem:[#allocation8 + $0x284] sm:$0xf] }
 0x480   : > { %v2924_v38 = vrot.slane %v2923_v57, 4  ;;  %v3348_v24 = vrot.slane %v3347_v54, 4  ;;  %v3772_v49 = vrot.slane %v3771_v3, 4  ;;  %v4196_v37 = vrot.slane %v4195_v50, 4 }
 0x481   : > { %v6675_v7 = vor.u32 %v7627_v17, %v6672_v8  ;;  %v7679_v17 = vld [vmem:[#allocation8 + $0x224] sm:$0xf]  ;;  %v6880_v8 = vld [vmem:[#allocation8 + $0x230] sm:$0xf0] }
 0x482   : > { %v2925_v33 = vmax.f32 %v2923_v57, %v2924_v38  ;;  %v3349_v4 = vmax.f32 %v3347_v54, %v3348_v24  ;;  %v3773_v62 = vmax.f32 %v3771_v3, %v3772_v49  ;;  %v4197_v51 = vmax.f32 %v4195_v50, %v4196_v37  ;;  %v5171_v19 = vpop.f32.mrf.mxu1  ;;  %v6704_v57 = vld [vmem:[#allocation8 + $0xd0] sm:$0xf0]  ;;  %v7631_v3 = vld [vmem:[#allocation8 + $0xa4] sm:$0xf] }
 0x483   : > { %5229 = vmatpush.bf16.msra.mxu2 %v6923_v41  ;;  %v6707_v54 = vor.u32 %v7635_v11, %v6704_v57  ;;  %v6688_v50 = vld [vmem:[#allocation8 + $0xb0] sm:$0xf0]  ;;  %v7623_v38 = vld [vmem:[#allocation8 + $0x64] sm:$0xf] }
 0x484   : > { %v2926_v18 = vrot.slane %v2925_v33, 2  ;;  %v3350_v28 = vrot.slane %v3349_v4, 2  ;;  %v3774_v32 = vrot.slane %v3773_v62, 2  ;;  %v4198_v36 = vrot.slane %v4197_v51, 2  ;;  %v6656_v24 = vld [vmem:[#allocation8 + $0x70] sm:$0xf0] }
 0x485   : > { %v6691_v46 = vor.u32 %v7631_v3, %v6688_v50  ;;  %v6659_v37 = vor.u32 %v7623_v38, %v6656_v24  ;;  %v7611_v41 = vld [vmem:[#allocation8 + $0x4] sm:$0xf]  ;;  %v6912_v57 = vld [vmem:[#allocation8 + $0x270] sm:$0xf0]  ;;  %v7754_v38 = vld [vmem:[#allocation10 + $0x74] sm:$0xf0] }
 0x486   : > { %v2927_v23 = vmax.f32 %v2925_v33, %v2926_v18  ;;  %v3351_v40 = vmax.f32 %v3349_v4, %v3350_v28  ;;  %v3775_v0 = vmax.f32 %v3773_v62, %v3774_v32  ;;  %v4199_v34 = vmax.f32 %v4197_v51, %v4198_v36  ;;  %v6640_v33 = vld [vmem:[#allocation8 + $0x50] sm:$0xf0]  ;;  %v7615_v62 = vld [vmem:[#allocation8 + $0x24] sm:$0xf] }
 0x487   : > { %5230 = vmatpush.bf16.msra.mxu2 %v6907_v45  ;;  %v6643_v4 = vor.u32 %v7619_v39, %v6640_v33  ;;  %v6624_v51 = vld [vmem:[#allocation8 + $0x30] sm:$0xf0]  ;;  %v7671_v18 = vld [vmem:[#allocation8 + $0x1e4] sm:$0xf]  ;;  %v6611_v32 = vor.u32 %v7611_v41, %v6608_v63  ;;  %v7166_v33 = vld [vmem:[#allocation10 + $0x60] sm:$0xf] }
 0x488   : > { %v2928_v20 = vrot.slane %v2927_v23, 1  ;;  %v3352_v61 = vrot.slane %v3351_v40, 1  ;;  %v3776_v5 = vrot.slane %v3775_v0, 1  ;;  %v4200_v59 = vrot.slane %v4199_v34, 1  ;;  %v6848_v28 = vld [vmem:[#allocation8 + $0x1f0] sm:$0xf0] }
 0x489   : > { %v6627_v19 = vor.u32 %v7615_v62, %v6624_v51  ;;  %v6851_v36 = vor.u32 %v7671_v18, %v6848_v28  ;;  %v7687_v11 = vld [vmem:[#allocation8 + $0x264] sm:$0xf]  ;;  %v6896_v50 = vld [vmem:[#allocation8 + $0x250] sm:$0xf0] }
 0x48a   : > { %v2929_v43 = vmax.f32 %v2927_v23, %v2928_v20  ;;  %v3353_v31 = vmax.f32 %v3351_v40, %v3352_v61  ;;  %v3777_v60 = vmax.f32 %v3775_v0, %v3776_v5  ;;  %v5221_v29 = vpop.f32.mrf.mxu1  ;;  %v4201_v47 = vmax.f32 %v4199_v34, %v4200_v59  ;;  %v7663_v40 = vld [vmem:[#allocation8 + $0x1a4] sm:$0xf]  ;;  %v6816_v0 = vld [vmem:[#allocation8 + $0x1b0] sm:$0xf0] }
 0x48b   : > { %v11032_v13 = vadd.f32 %v5221_v29, %v5209_v27  ;;  %5231 = vmatpush.bf16.msra.mxu2 %v6891_v21  ;;  %v6835_v23 = vor.u32 %v7667_v22, %v6832_v48  ;;  %v12083_v34 = vld [vmem:[#allocation113_spill] sm:$0xff]  ;;  %v6819_v45 = vor.u32 %v7663_v40, %v6816_v0  ;;  %v7659_v20 = vld [vmem:[#allocation8 + $0x184] sm:$0xf]  ;;  %v7150_v0 = vld [vmem:[#allocation10 + $0x40] sm:$0xf] }
 0x48c   : > { %v4210_v15 = vsel %vm4202_vm0, %v2929_v43, %v3353_v31  ;;  %v6800_v61 = vld [vmem:[#allocation8 + $0x190] sm:$0xf0]  ;;  %v7655_v59 = vld [vmem:[#allocation8 + $0x164] sm:$0xf]  ;;  %v6771_v43 = vor.u32 %v7651_v25, %v6768_v42 }
 0x48d   : > { %v4219_v56 = vsel %vm4211_vm1, %v4210_v15, %v3777_v60  ;;  %v6803_v5 = vor.u32 %v7659_v20, %v6800_v61  ;;  %v6787_v27 = vor.u32 %v7655_v59, %v6784_v35  ;;  %v7647_v31 = vld [vmem:[#allocation8 + $0x124] sm:$0xf]  ;;  %v6752_v60 = vld [vmem:[#allocation8 + $0x130] sm:$0xf0]  ;;  %v7142_v59 = vld [vmem:[#allocation10 + $0x30] sm:$0xf] }
 0x48e   : > { %v4228_v55 = vsel %vm4220_vm2, %v4219_v56, %v4201_v47  ;;  %v6755_v29 = vor.u32 %v7647_v31, %v6752_v60  ;;  %v7643_v47 = vld [vmem:[#allocation8 + $0x104] sm:$0xf]  ;;  %v6736_v15 = vld [vmem:[#allocation8 + $0x110] sm:$0xf0]  ;;  %v7746_v35 = vld [vmem:[#allocation10 + $0x34] sm:$0xf0] }
 0x48f   : > { %v4240_v10 = vrot.slane %v4228_v55, 4  ;;  %5232 = vmatpush.bf16.msra.mxu2 %v6875_v16  ;;  %v7703_v21 = vld [vmem:[#allocation8 + $0x2e4] sm:$0xf]  ;;  %v6976_v56 = vld [vmem:[#allocation8 + $0x2f0] sm:$0xf0]  ;;  %v6739_v1 = vor.u32 %v7643_v47, %v6736_v15 }
 0x490   : > { %v6979_v53 = vor.u32 %v7703_v21, %v6976_v56  ;;  %v7699_v55 = vld [vmem:[#allocation8 + $0x2c4] sm:$0xf]  ;;  %v6864_v39 = vld [vmem:[#allocation8 + $0x210] sm:$0xf0]  ;;  %v7134_v31 = vld [vmem:[#allocation10 + $0x20] sm:$0xf] }
 0x491   : > { %v4245_v58 = vsel %vm4241_vm3, %v12082_v6, %v4240_v10  ;;  %v6960_v10 = vld [vmem:[#allocation8 + $0x2d0] sm:$0xf0]  ;;  %v7695_v6 = vld [vmem:[#allocation8 + $0x2a4] sm:$0xf]  ;;  %v7744_v60 = vld [vmem:[#allocation10 + $0x24] sm:$0xf0] }
 0x492   : > { %4252 = vst [vmem:[#allocation1 + $0x11] ss:$2 sm:$0xff] %v4245_v58  ;;  %v5223_v12 = vpop.f32.mrf.mxu1  ;;  %v6963_v16 = vor.u32 %v7699_v55, %v6960_v10  ;;  %v6944_v58 = vld [vmem:[#allocation8 + $0x2b0] sm:$0xf0]  ;;  %v7683_v3 = vld [vmem:[#allocation8 + $0x244] sm:$0xf] }
 0x493   : > { %v12084_v12 = vld [vmem:[#allocation67_spill] sm:$0xff]  ;;  %v6947_v44 = vor.u32 %v7695_v6, %v6944_v58  ;;  %v7104_v51 = vld [vmem:[#allocation8 + $0x3f0] sm:$0xf0]  ;;  %v7126_v21 = vld [vmem:[#allocation10 + $0x10] sm:$0xf] }
 0x494   : > { %v7735_v62 = vld [vmem:[#allocation8 + $0x3e4] sm:$0xf]  ;;  %v7088_v28 = vld [vmem:[#allocation8 + $0x3d0] sm:$0xf0]  ;;  %v7742_v56 = vld [vmem:[#allocation10 + $0x14] sm:$0xf0] }
 0x495   : > { %v7107_v63 = vor.u32 %v7735_v62, %v7104_v51  ;;  %v7731_v18 = vld [vmem:[#allocation8 + $0x3c4] sm:$0xf]  ;;  %v7072_v40 = vld [vmem:[#allocation8 + $0x3b0] sm:$0xf0]  ;;  %v7740_v6 = vld [vmem:[#allocation10 + $0x4] sm:$0xf0] }
 0x496   : > { %v7091_v22 = vor.u32 %v7731_v18, %v7088_v28  ;;  %v7727_v48 = vld [vmem:[#allocation8 + $0x3a4] sm:$0xf]  ;;  %v7024_v15 = vld [vmem:[#allocation8 + $0x350] sm:$0xf0] }
 0x497   : > { %v7075_v20 = vor.u32 %v7727_v48, %v7072_v40  ;;  %v7723_v61 = vld [vmem:[#allocation8 + $0x384] sm:$0xf]  ;;  %v7008_v10 = vld [vmem:[#allocation8 + $0x330] sm:$0xf0]  ;;  %v7722_v48 = vld [vmem:[#allocation8 + $0x374] sm:$0xf0] }
 0x498   : > { %v7719_v42 = vld [vmem:[#allocation8 + $0x364] sm:$0xf]  ;;  %v7745_v28 = vld [vmem:[#allocation10 + $0x34] sm:$0xf] }
 0x499   : > { %v4255_v52 = vld.sshfl [vmem:[#allocation1 + $0x10] sm:$0xff pattern:$0x75316420]  ;;  %v4256_v49 = vld.sshfl [vmem:[#allocation1 + $0x18] sm:$0xff pattern:$0x75316420] }
 0x49a   : > { %v11039_v9 = vpack.c.bf16 %v4255_v52, %v4255_v52  ;;  %v11043_v26 = vpack.c.bf16 %v4256_v49, %v4256_v49  ;;  %v6928_v52 = vld [vmem:[#allocation8 + $0x290] sm:$0xf0]  ;;  %v6883_v49 = vor.u32 %v7679_v17, %v6880_v8  ;;  %v7715_v47 = vld [vmem:[#allocation8 + $0x344] sm:$0xf] }
 0x49b   : > { %v7711_v55 = vld [vmem:[#allocation8 + $0x324] sm:$0xf] }
 0x49c   : > { %5077 = vmatmul.bf16.vlgmr.msra.gmra.mxu3 %v11039_v9  ;;  %5181 = vmatmul.bf16.vlgmr.msrb.gmra.mxu2 %v11039_v9  ;;  %v7747_v51 = vld [vmem:[#allocation10 + $0x44] sm:$0xf] }
 0x49d   : > { %5095 = vmatpush.bf16.msra.mxu3 %v6723_v2  ;;  %v6931_v2 = vor.u32 %v7691_v30, %v6928_v52  ;;  %v7011_v30 = vor.u32 %v7711_v55, %v7008_v10  ;;  %v7707_v52 = vld [vmem:[#allocation8 + $0x304] sm:$0xf]  ;;  %v7112_v55 = vld [vmem:[#allocation8 + $0x3f8] sm:$0xf0] }
 0x49e   : > { %v7743_v40 = vld [vmem:[#allocation10 + $0x24] sm:$0xf] }
 0x4a1   : > { %5096 = vmatpush.bf16.msra.mxu3 %v6707_v54  ;;  %v6915_v54 = vor.u32 %v7687_v11, %v6912_v57  ;;  %v6992_v11 = vld [vmem:[#allocation8 + $0x310] sm:$0xf0]  ;;  %v7751_v57 = vld [vmem:[#allocation10 + $0x64] sm:$0xf] }
 0x4a2   : > { %v6995_v17 = vor.u32 %v7707_v52, %v6992_v11  ;;  %v7728_v11 = vld [vmem:[#allocation8 + $0x3ac] sm:$0xf] }
 0x4a5   : > { %5097 = vmatpush.bf16.msra.mxu3 %v6691_v46  ;;  %v6899_v46 = vor.u32 %v7683_v3, %v6896_v50  ;;  %v7110_v3 = vld [vmem:[#allocation8 + $0x3e8] sm:$0xf]  ;;  %v7738_v50 = vld [vmem:[#allocation8 + $0x3f4] sm:$0xf0] }
 0x4a6   : > { %v7111_v8 = vor.u32 %v7738_v50, %v7110_v3 }
 0x4a9   : > { %5098 = vmatpush.bf16.msra.mxu3 %v6675_v7  ;;  %v7174_v7 = vld [vmem:[#allocation10 + $0x70] sm:$0xf] }
 0x4aa   : > { %v7175_v24 = vor.u32 %v7754_v38, %v7174_v7  ;;  %v7094_v7 = vld [vmem:[#allocation8 + $0x3c8] sm:$0xf]  ;;  %v7734_v38 = vld [vmem:[#allocation8 + $0x3d4] sm:$0xf0] }
 0x4ac   : > { %5090 = vmatmul.bf16.vlgmr.msrb.gmra.mxu3 %v11043_v26  ;;  %5233 = vmatmul.bf16.vlgmr.msra.gmra.mxu2 %v11039_v9 }
 0x4ad   : > { %5099 = vmatpush.bf16.msra.mxu3 %v6659_v37  ;;  %v7675_v37 = vld [vmem:[#allocation8 + $0x204] sm:$0xf]  ;;  %5649 = vmatpush.bf16.msrb.mxu0 %v7175_v24  ;;  %v7095_v24 = vor.u32 %v7734_v38, %v7094_v7 }
 0x4ae   : > { %v6867_v41 = vor.u32 %v7675_v37, %v6864_v39  ;;  %v7730_v37 = vld [vmem:[#allocation8 + $0x3b4] sm:$0xf0]  ;;  %v7749_v39 = vld [vmem:[#allocation10 + $0x54] sm:$0xf] }
 0x4b1   : > { %5100 = vmatpush.bf16.msra.mxu3 %v6643_v4  ;;  %v7752_v4 = vld [vmem:[#allocation10 + $0x64] sm:$0xf0] }
 0x4b5   : > { %5101 = vmatpush.bf16.msra.mxu3 %v6627_v19  ;;  %v7167_v19 = vor.u32 %v7752_v4, %v7166_v33  ;;  %v7160_v33 = vld [vmem:[#allocation10 + $0x58] sm:$0xf0] }
 0x4b6   : > { %v7163_v62 = vor.u32 %v7749_v39, %v7160_v33  ;;  %v7048_v39 = vld [vmem:[#allocation8 + $0x378] sm:$0xf0] }
 0x4b7   : > { %5650 = vmatpush.bf16.msrb.mxu0 %v7167_v19  ;;  %v7152_v19 = vld [vmem:[#allocation10 + $0x48] sm:$0xf0] }
 0x4b8   : > { %v7155_v18 = vor.u32 %v7747_v51, %v7152_v19  ;;  %v7712_v19 = vld [vmem:[#allocation8 + $0x32c] sm:$0xf] }
 0x4b9   : > { %5102 = vmatpush.bf16.msra.mxu3 %v6611_v32  ;;  %v7158_v32 = vld [vmem:[#allocation10 + $0x50] sm:$0xf] }
 0x4bc   : > { %5103 = vmatmul.bf16.vlgmr.msra.gmra.mxu3 %v12083_v34  ;;  %v7748_v34 = vld [vmem:[#allocation10 + $0x44] sm:$0xf0] }
 0x4bd   : > { %5108 = vmatpush.bf16.msrb.mxu3 %v6851_v36  ;;  %v7750_v36 = vld [vmem:[#allocation10 + $0x54] sm:$0xf0] }
 0x4c1   : > { %5109 = vmatpush.bf16.msrb.mxu3 %v6835_v23  ;;  %v7159_v23 = vor.u32 %v7750_v36, %v7158_v32  ;;  %v7144_v32 = vld [vmem:[#allocation10 + $0x38] sm:$0xf0] }
 0x4c3   : > { %5651 = vmatpush.bf16.msrb.mxu0 %v7159_v23  ;;  %v7147_v23 = vor.u32 %v7745_v28, %v7144_v32  ;;  %v7000_v28 = vld [vmem:[#allocation8 + $0x318] sm:$0xf0]  ;;  %v7238_v32 = vld [vmem:[#allocation10 + $0xf0] sm:$0xf] }
 0x4c5   : > { %5110 = vmatpush.bf16.msrb.mxu3 %v6819_v45  ;;  %v7151_v45 = vor.u32 %v7748_v34, %v7150_v0  ;;  %v7136_v0 = vld [vmem:[#allocation10 + $0x28] sm:$0xf0] }
 0x4c7   : > { %5652 = vmatpush.bf16.msrb.mxu0 %v7151_v45  ;;  %v7030_v45 = vld [vmem:[#allocation8 + $0x348] sm:$0xf] }
 0x4c9   : > { %5111 = vmatpush.bf16.msrb.mxu3 %v6803_v5  ;;  %v7056_v5 = vld [vmem:[#allocation8 + $0x390] sm:$0xf0] }
 0x4ca   : > { %v7059_v25 = vor.u32 %v7723_v61, %v7056_v5 }
 0x4cd   : > { %5112 = vmatpush.bf16.msrb.mxu3 %v6787_v27  ;;  %v7143_v27 = vor.u32 %v7746_v35, %v7142_v59  ;;  %v7139_v59 = vor.u32 %v7743_v40, %v7136_v0 }
 0x4cf   : > { %5653 = vmatpush.bf16.msrb.mxu0 %v7143_v27  ;;  %v7741_v27 = vld [vmem:[#allocation10 + $0x14] sm:$0xf] }
 0x4d1   : > { %5113 = vmatpush.bf16.msrb.mxu3 %v6771_v43  ;;  %v7040_v43 = vld [vmem:[#allocation8 + $0x370] sm:$0xf0] }
 0x4d5   : > { %5114 = vmatpush.bf16.msrb.mxu3 %v6755_v29  ;;  %v7135_v29 = vor.u32 %v7744_v60, %v7134_v31  ;;  %v7714_v31 = vld [vmem:[#allocation8 + $0x334] sm:$0xf0] }
 0x4d7   : > { %5654 = vmatpush.bf16.msrb.mxu0 %v7135_v29  ;;  %v7739_v29 = vld [vmem:[#allocation10 + $0x4] sm:$0xf] }
 0x4d9   : > { %5115 = vmatpush.bf16.msrb.mxu3 %v6739_v1  ;;  %v7127_v1 = vor.u32 %v7742_v56, %v7126_v21  ;;  %v7710_v21 = vld [vmem:[#allocation8 + $0x314] sm:$0xf0] }
 0x4db   : > { %5655 = vmatpush.bf16.msrb.mxu0 %v7127_v1 }
 0x4dc   : > { %5116 = vmatmul.bf16.vlgmr.msrb.gmra.mxu3 %v12084_v12  ;;  %v7753_v12 = vld [vmem:[#allocation10 + $0x74] sm:$0xf] }
 0x4dd   : > { %5121 = vmatpush.bf16.msra.mxu3 %v6979_v53  ;;  %v7027_v53 = vor.u32 %v7715_v47, %v7024_v15  ;;  %v6998_v15 = vld [vmem:[#allocation8 + $0x308] sm:$0xf] }
 0x4de   : > { %v6999_v10 = vor.u32 %v7710_v21, %v6998_v15  ;;  %v7786_v15 = vld [vmem:[#allocation10 + $0x174] sm:$0xf0] }
 0x4e1   : > { %5122 = vmatpush.bf16.msra.mxu3 %v6963_v16  ;;  %v7118_v16 = vld [vmem:[#allocation10] sm:$0xf] }
 0x4e2   : > { %v7119_v58 = vor.u32 %v7740_v6, %v7118_v16  ;;  %v7732_v6 = vld [vmem:[#allocation8 + $0x3cc] sm:$0xf] }
 0x4e4   : > { %5656 = vmatpush.bf16.msrb.mxu0 %v7119_v58  ;;  %v7096_v58 = vld [vmem:[#allocation8 + $0x3d8] sm:$0xf0] }
 0x4e5   : > { %5123 = vmatpush.bf16.msra.mxu3 %v6947_v44  ;;  %v7176_v44 = vld [vmem:[#allocation10 + $0x78] sm:$0xf0] }
 0x4e9   : > { %5124 = vmatpush.bf16.msra.mxu3 %v6931_v2  ;;  %v7179_v2 = vor.u32 %v7753_v12, %v7176_v44  ;;  %v12085_v12 = vld [vmem:[#allocation35_spill] sm:$0xff] }
 0x4eb   : > { %5701 = vmatpush.bf16.msra.mxu0 %v7179_v2 }
 0x4ed   : > { %5125 = vmatpush.bf16.msra.mxu3 %v6915_v54  ;;  %v7168_v54 = vld [vmem:[#allocation10 + $0x68] sm:$0xf0] }
 0x4f1   : > { %5126 = vmatpush.bf16.msra.mxu3 %v6899_v46  ;;  %v7171_v46 = vor.u32 %v7751_v57, %v7168_v54  ;;  %v7080_v57 = vld [vmem:[#allocation8 + $0x3b8] sm:$0xf0] }
 0x4f3   : > { %5702 = vmatpush.bf16.msra.mxu0 %v7171_v46  ;;  %v7083_v46 = vor.u32 %v7728_v11, %v7080_v57 }
 0x4f5   : > { %5127 = vmatpush.bf16.msra.mxu3 %v6883_v49  ;;  %v7078_v49 = vld [vmem:[#allocation8 + $0x3a8] sm:$0xf] }
 0x4f6   : > { %v7079_v4 = vor.u32 %v7730_v37, %v7078_v49  ;;  %v7720_v37 = vld [vmem:[#allocation8 + $0x36c] sm:$0xf] }
 0x4f7   : > { %5703 = vmatpush.bf16.msra.mxu0 %v7163_v62  ;;  %v7051_v33 = vor.u32 %v7720_v37, %v7048_v39  ;;  %v7032_v62 = vld [vmem:[#allocation8 + $0x358] sm:$0xf0]  ;;  %v7216_v37 = vld [vmem:[#allocation10 + $0xc8] sm:$0xf0] }
 0x4f9   : > { %5128 = vmatpush.bf16.msra.mxu3 %v6867_v41  ;;  %v7062_v41 = vld [vmem:[#allocation8 + $0x388] sm:$0xf] }
 0x4fb   : > { %5704 = vmatpush.bf16.msra.mxu0 %v7155_v18  ;;  %v7708_v18 = vld [vmem:[#allocation8 + $0x30c] sm:$0xf] }
 0x4fc   : > { %5129 = vmatmul.bf16.vlgmr.msra.gmra.mxu3 %v11039_v9  ;;  %v7043_v9 = vor.u32 %v7719_v42, %v7040_v43  ;;  %v7014_v43 = vld [vmem:[#allocation8 + $0x328] sm:$0xf]  ;;  %v7003_v40 = vor.u32 %v7708_v18, %v7000_v28  ;;  %v7262_v18 = vld [vmem:[#allocation10 + $0x120] sm:$0xf] }
 0x4fd   : > { %5134 = vmatpush.bf16.msrb.mxu3 %v7107_v63  ;;  %v7726_v63 = vld [vmem:[#allocation8 + $0x394] sm:$0xf0]  ;;  %v7015_v47 = vor.u32 %v7714_v31, %v7014_v43 }
 0x4fe   : > { %v7063_v36 = vor.u32 %v7726_v63, %v7062_v41  ;;  %v7016_v41 = vld [vmem:[#allocation8 + $0x338] sm:$0xf0]  ;;  %v7762_v43 = vld [vmem:[#allocation10 + $0xb4] sm:$0xf0] }
 0x4ff   : > { %5705 = vmatpush.bf16.msra.mxu0 %v7147_v23  ;;  %v7019_v63 = vor.u32 %v7712_v19, %v7016_v41  ;;  %v7768_v23 = vld [vmem:[#allocation10 + $0xe4] sm:$0xf0]  ;;  %v7208_v19 = vld [vmem:[#allocation10 + $0xb8] sm:$0xf0] }
 0x501   : > { %5135 = vmatpush.bf16.msrb.mxu3 %v7091_v22  ;;  %v7046_v22 = vld [vmem:[#allocation8 + $0x368] sm:$0xf] }
 0x502   : > { %v7047_v34 = vor.u32 %v7722_v48, %v7046_v22  ;;  %v7230_v22 = vld [vmem:[#allocation10 + $0xe0] sm:$0xf] }
 0x503   : > { %5706 = vmatpush.bf16.msra.mxu0 %v7139_v59  ;;  %v7764_v59 = vld [vmem:[#allocation10 + $0xc4] sm:$0xf0] }
 0x505   : > { %5136 = vmatpush.bf16.msrb.mxu3 %v7075_v20  ;;  %v7718_v20 = vld [vmem:[#allocation8 + $0x354] sm:$0xf0] }
 0x506   : > { %v7031_v42 = vor.u32 %v7718_v20, %v7030_v45  ;;  %v7222_v45 = vld [vmem:[#allocation10 + $0xd0] sm:$0xf]  ;;  %v7766_v20 = vld [vmem:[#allocation10 + $0xd4] sm:$0xf0] }
 0x509   : > { %5137 = vmatpush.bf16.msrb.mxu3 %v7059_v25  ;;  %v7128_v25 = vld [vmem:[#allocation10 + $0x18] sm:$0xf0] }
 0x50a   : > { %v7131_v60 = vor.u32 %v7741_v27, %v7128_v25 }
 0x50c   : > { %5707 = vmatpush.bf16.msra.mxu0 %v7131_v60  ;;  %v7198_v60 = vld [vmem:[#allocation10 + $0xa0] sm:$0xf] }
 0x50d   : > { %5138 = vmatpush.bf16.msrb.mxu3 %v7043_v9  ;;  %v7120_v9 = vld [vmem:[#allocation10 + $0x8] sm:$0xf0] }
 0x511   : > { %5139 = vmatpush.bf16.msrb.mxu3 %v7027_v53  ;;  %v7736_v53 = vld [vmem:[#allocation8 + $0x3ec] sm:$0xf] }
 0x512   : > { %v7115_v16 = vor.u32 %v7736_v53, %v7112_v55  ;;  %v7190_v53 = vld [vmem:[#allocation10 + $0x90] sm:$0xf]  ;;  %v7758_v55 = vld [vmem:[#allocation10 + $0x94] sm:$0xf0] }
 0x515   : > { %5140 = vmatpush.bf16.msrb.mxu3 %v7011_v30  ;;  %v7099_v30 = vor.u32 %v7732_v6, %v7096_v58  ;;  %v7756_v6 = vld [vmem:[#allocation10 + $0x84] sm:$0xf0]  ;;  %v7769_v58 = vld [vmem:[#allocation10 + $0xf4] sm:$0xf] }
 0x519   : > { %5141 = vmatpush.bf16.msrb.mxu3 %v6995_v17  ;;  %v7724_v17 = vld [vmem:[#allocation8 + $0x38c] sm:$0xf] }
 0x51c   : > { %5142 = vmatmul.bf16.vlgmr.msrb.gmra.mxu3 %v11043_v26 }
 0x51d   : > { %5186 = vmatpush.bf16.msra.mxu3 %v7111_v8  ;;  %v7064_v8 = vld [vmem:[#allocation8 + $0x398] sm:$0xf0] }
 0x51e   : > { %v7067_v38 = vor.u32 %v7724_v17, %v7064_v8  ;;  %v7224_v8 = vld [vmem:[#allocation10 + $0xd8] sm:$0xf0] }
 0x51f   : > { %v5078_v61 = vpop.f32.mrf.mxu3  ;;  %v5182_v5 = vpop.f32.mrf.mxu2 }
 0x520   : > { %v11052_v35 = vadd.f32 %v5182_v5, %v11024_v14  ;;  %v7123_v14 = vor.u32 %v7739_v29, %v7120_v9  ;;  %v5079_v44 = vadd.f32 %v5078_v61, %v12085_v12  ;;  %v7214_v61 = vld [vmem:[#allocation10 + $0xc0] sm:$0xf]  ;;  %v7223_v5 = vor.u32 %v7766_v20, %v7222_v45  ;;  %v7760_v29 = vld [vmem:[#allocation10 + $0xa4] sm:$0xf0]  ;;  %v7302_v9 = vld [vmem:[#allocation10 + $0x170] sm:$0xf] }
 0x521   : > { %5187 = vmatpush.bf16.msra.mxu3 %v7095_v24  ;;  %v7215_v25 = vor.u32 %v7764_v59, %v7214_v61  ;;  %v7303_v21 = vor.u32 %v7786_v15, %v7302_v9  ;;  %v7240_v12 = vld [vmem:[#allocation10 + $0xf8] sm:$0xf0]  ;;  %v7254_v45 = vld [vmem:[#allocation10 + $0x110] sm:$0xf]  ;;  %v7774_v20 = vld [vmem:[#allocation10 + $0x114] sm:$0xf0] }
 0x522   : > { %5708 = vmatpush.bf16.msra.mxu0 %v7123_v14  ;;  %v7757_v61 = vld [vmem:[#allocation10 + $0x94] sm:$0xf]  ;;  %v7255_v59 = vor.u32 %v7774_v20, %v7254_v45  ;;  %v7304_v9 = vld [vmem:[#allocation10 + $0x178] sm:$0xf0]  ;;  %v7788_v45 = vld [vmem:[#allocation10 + $0x184] sm:$0xf0] }
 0x523   : > { %5675 = vmatpush.bf16.msrb.mxu2 %v7303_v21  ;;  %v7800_v21 = vld [vmem:[#allocation10 + $0x1e4] sm:$0xf0]  ;;  %v7771_v20 = vld [vmem:[#allocation10 + $0x104] sm:$0xf] }
 0x525   : > { %5188 = vmatpush.bf16.msra.mxu3 %v7079_v4  ;;  %v7716_v4 = vld [vmem:[#allocation8 + $0x34c] sm:$0xf] }
 0x527   : > { %v5080_v56 = vpop.f32.mrf.mxu3  ;;  %v5184_v1 = vpop.f32.mrf.mxu2 }
 0x528   : > { %v7294_v56 = vld [vmem:[#allocation10 + $0x160] sm:$0xf]  ;;  %v7784_v1 = vld [vmem:[#allocation10 + $0x164] sm:$0xf0] }
 0x529   : > { %5189 = vmatpush.bf16.msra.mxu3 %v7063_v36  ;;  %v7770_v36 = vld [vmem:[#allocation10 + $0xf4] sm:$0xf0]  ;;  %v7295_v14 = vor.u32 %v7784_v1, %v7294_v56 }
 0x52a   : > { %v7239_v48 = vor.u32 %v7770_v36, %v7238_v32  ;;  %v7776_v32 = vld [vmem:[#allocation10 + $0x124] sm:$0xf0]  ;;  %v7366_v36 = vld [vmem:[#allocation10 + $0x1f0] sm:$0xf] }
 0x52b   : > { %5676 = vmatpush.bf16.msrb.mxu2 %v7295_v14  ;;  %v7783_v14 = vld [vmem:[#allocation10 + $0x164] sm:$0xf] }
 0x52c   : > { %5662 = vmatpush.bf16.msrb.mxu1 %v7239_v48  ;;  %v7759_v48 = vld [vmem:[#allocation10 + $0xa4] sm:$0xf] }
 0x52d   : > { %5190 = vmatpush.bf16.msra.mxu3 %v7047_v34  ;;  %v7231_v34 = vor.u32 %v7768_v23, %v7230_v22  ;;  %v7802_v22 = vld [vmem:[#allocation10 + $0x1f4] sm:$0xf0]  ;;  %v7200_v23 = vld [vmem:[#allocation10 + $0xa8] sm:$0xf0] }
 0x52f   : > { %v5091_v52 = vpop.f32.mrf.mxu3  ;;  %v5234_v2 = vpop.f32.mrf.mxu2 }
 0x530   : > { %v5092_v54 = vadd.f32 %v5091_v52, %v5079_v44  ;;  %v11057_v3 = vadd.f32 %v5234_v2, %v11032_v13  ;;  %v7035_v13 = vor.u32 %v7716_v4, %v7032_v62  ;;  %5663 = vmatpush.bf16.msrb.mxu1 %v7231_v34  ;;  %v7767_v52 = vld [vmem:[#allocation10 + $0xe4] sm:$0xf]  ;;  %v7232_v2 = vld [vmem:[#allocation10 + $0xe8] sm:$0xf0]  ;;  %v7270_v4 = vld [vmem:[#allocation10 + $0x130] sm:$0xf]  ;;  %v7203_v34 = vor.u32 %v7759_v48, %v7200_v23 }
 0x531   : > { %5191 = vmatpush.bf16.msra.mxu3 %v7031_v42  ;;  %v7206_v42 = vld [vmem:[#allocation10 + $0xb0] sm:$0xf]  ;;  %v7235_v11 = vor.u32 %v7767_v52, %v7232_v2  ;;  %v7778_v62 = vld [vmem:[#allocation10 + $0x134] sm:$0xf0]  ;;  %v7773_v48 = vld [vmem:[#allocation10 + $0x114] sm:$0xf] }
 0x532   : > { %v5251_v50 = vmax.f32 %v5092_v54, 0.0  ;;  %v7207_v31 = vor.u32 %v7762_v43, %v7206_v42  ;;  %v7286_v54 = vld [vmem:[#allocation10 + $0x150] sm:$0xf]  ;;  %v7246_v42 = vld [vmem:[#allocation10 + $0x100] sm:$0xf] }
 0x533   : > { %v7772_v43 = vld [vmem:[#allocation10 + $0x104] sm:$0xf0]  ;;  %v7350_v52 = vld [vmem:[#allocation10 + $0x1d0] sm:$0xf]  ;;  %v7798_v2 = vld [vmem:[#allocation10 + $0x1d4] sm:$0xf0] }
 0x534   : > { %v5255_v7 = vpack.c.bf16 %v5251_v50, %v5251_v50  ;;  %5664 = vmatpush.bf16.msrb.mxu1 %v7223_v5  ;;  %v7782_v50 = vld [vmem:[#allocation10 + $0x154] sm:$0xf0]  ;;  %v7192_v5 = vld [vmem:[#allocation10 + $0x98] sm:$0xf0]  ;;  %v7247_v56 = vor.u32 %v7772_v43, %v7246_v42 }
 0x535   : > { %5192 = vmatpush.bf16.msra.mxu3 %v7015_v47  ;;  %v7287_v17 = vor.u32 %v7782_v50, %v7286_v54  ;;  %v7351_v50 = vor.u32 %v7798_v2, %v7350_v52  ;;  %v7256_v23 = vld [vmem:[#allocation10 + $0x118] sm:$0xf0]  ;;  %v7328_v52 = vld [vmem:[#allocation10 + $0x1a8] sm:$0xf0]  ;;  %v7789_v2 = vld [vmem:[#allocation10 + $0x194] sm:$0xf] }
 0x536   : > { %5657 = vmatmul.bf16.vlgmr.msrb.gmra.mxu0 %v5255_v7 }
 0x537   : > { %v5093_v24 = vpop.f32.mrf.mxu3  ;;  %v5236_v49 = vpop.f32.mrf.mxu2  ;;  %5677 = vmatpush.bf16.msrb.mxu2 %v7287_v17 }
 0x538   : > { %5665 = vmatpush.bf16.msrb.mxu1 %v7215_v25  ;;  %v7763_v49 = vld [vmem:[#allocation10 + $0xc4] sm:$0xf]  ;;  %v7195_v25 = vor.u32 %v7757_v61, %v7192_v5  ;;  %v7248_v61 = vld [vmem:[#allocation10 + $0x108] sm:$0xf0]  ;;  %v7801_v5 = vld [vmem:[#allocation10 + $0x1f4] sm:$0xf] }
 0x539   : > { %5193 = vmatpush.bf16.msra.mxu3 %v6999_v10  ;;  %v7191_v10 = vor.u32 %v7758_v55, %v7190_v53  ;;  %v7251_v42 = vor.u32 %v7771_v20, %v7248_v61  ;;  %v7812_v20 = vld [vmem:[#allocation11 + $0x44] sm:$0xf0]  ;;  %v7811_v61 = vld [vmem:[#allocation11 + $0x44] sm:$0xf] }
 0x53c   : > { %5194 = vmatmul.bf16.vlgmr.msra.gmra.mxu3 %v11043_v26  ;;  %5666 = vmatpush.bf16.msrb.mxu1 %v7207_v31  ;;  %v7755_v31 = vld [vmem:[#allocation10 + $0x84] sm:$0xf] }
 0x53d   : > { %5238 = vmatpush.bf16.msrb.mxu3 %v7115_v16  ;;  %v7182_v16 = vld [vmem:[#allocation10 + $0x80] sm:$0xf] }
 0x53e   : > { %v7183_v44 = vor.u32 %v7756_v6, %v7182_v16 }
 0x53f   : > { %v11059_v51 = vpop.f32.mrf.mxu3 }
 0x541   : > { %5239 = vmatpush.bf16.msrb.mxu3 %v7099_v30  ;;  %v7243_v30 = vor.u32 %v7769_v58, %v7240_v12 }
 0x545   : > { %5240 = vmatpush.bf16.msrb.mxu3 %v7083_v46  ;;  %v7765_v46 = vld [vmem:[#allocation10 + $0xd4] sm:$0xf] }
 0x546   : > { %5709 = vmatmul.bf16.vlgmr.msra.gmra.mxu0 %v5255_v7  ;;  %v7278_v7 = vld [vmem:[#allocation10 + $0x140] sm:$0xf]  ;;  %v7227_v24 = vor.u32 %v7765_v46, %v7224_v8  ;;  %v7288_v46 = vld [vmem:[#allocation10 + $0x158] sm:$0xf0] }
 0x547   : > { %v5106_v0 = vpop.f32.mrf.mxu3  ;;  %v7342_v8 = vld [vmem:[#allocation10 + $0x1c0] sm:$0xf] }
 0x548   : > { %v7263_v0 = vor.u32 %v7776_v32, %v7262_v18  ;;  %v7264_v18 = vld [vmem:[#allocation10 + $0x128] sm:$0xf0] }
 0x549   : > { %5241 = vmatpush.bf16.msrb.mxu3 %v7067_v38  ;;  %v7780_v38 = vld [vmem:[#allocation10 + $0x144] sm:$0xf0] }
 0x54a   : > { %v7279_v39 = vor.u32 %v7780_v38, %v7278_v7  ;;  %v7779_v38 = vld [vmem:[#allocation10 + $0x144] sm:$0xf] }
 0x54c   : > { %5678 = vmatpush.bf16.msrb.mxu2 %v7279_v39  ;;  %v7777_v39 = vld [vmem:[#allocation10 + $0x134] sm:$0xf] }
 0x54d   : > { %5242 = vmatpush.bf16.msrb.mxu3 %v7051_v33  ;;  %v7219_v33 = vor.u32 %v7763_v49, %v7216_v37  ;;  %v7794_v37 = vld [vmem:[#allocation10 + $0x1b4] sm:$0xf0] }
 0x551   : > { %5243 = vmatpush.bf16.msrb.mxu3 %v7035_v13  ;;  %v7761_v13 = vld [vmem:[#allocation10 + $0xb4] sm:$0xf] }
 0x552   : > { %v7211_v28 = vor.u32 %v7761_v13, %v7208_v19  ;;  %v7326_v19 = vld [vmem:[#allocation10 + $0x1a0] sm:$0xf] }
 0x555   : > { %5244 = vmatpush.bf16.msrb.mxu3 %v7019_v63  ;;  %v7271_v63 = vor.u32 %v7778_v62, %v7270_v4 }
 0x557   : > { %5679 = vmatpush.bf16.msrb.mxu2 %v7271_v63  ;;  %v7775_v63 = vld [vmem:[#allocation10 + $0x124] sm:$0xf] }
 0x558   : > { %v7267_v32 = vor.u32 %v7775_v63, %v7264_v18  ;;  %v7816_v63 = vld [vmem:[#allocation11 + $0x64] sm:$0xf0]  ;;  %v7815_v18 = vld [vmem:[#allocation11 + $0x64] sm:$0xf] }
 0x559   : > { %5245 = vmatpush.bf16.msrb.mxu3 %v7003_v40  ;;  %v7367_v40 = vor.u32 %v7802_v22, %v7366_v36  ;;  %v7318_v36 = vld [vmem:[#allocation10 + $0x190] sm:$0xf]  ;;  %v7790_v22 = vld [vmem:[#allocation10 + $0x194] sm:$0xf0] }
 0x55b   : > { %5680 = vmatpush.bf16.msrb.mxu2 %v7263_v0  ;;  %v7259_v0 = vor.u32 %v7773_v48, %v7256_v23  ;;  %v7813_v48 = vld [vmem:[#allocation11 + $0x54] sm:$0xf]  ;;  %v7416_v23 = vld [vmem:[#allocation11 + $0x58] sm:$0xf0] }
 0x55c   : > { %5246 = vmatmul.bf16.vlgmr.msrb.gmra.mxu3 %v11043_v26  ;;  %v7199_v26 = vor.u32 %v7760_v29, %v7198_v60  ;;  %v7184_v60 = vld [vmem:[#allocation10 + $0x88] sm:$0xf0]  ;;  %v7785_v29 = vld [vmem:[#allocation10 + $0x174] sm:$0xf] }
 0x55d   : > { %5688 = vmatpush.bf16.msra.mxu3 %v7367_v40  ;;  %v7187_v53 = vor.u32 %v7755_v31, %v7184_v60  ;;  %v7307_v55 = vor.u32 %v7785_v29, %v7304_v9  ;;  %v7319_v40 = vor.u32 %v7790_v22, %v7318_v36  ;;  %v7799_v31 = vld [vmem:[#allocation10 + $0x1e4] sm:$0xf]  ;;  %v7360_v60 = vld [vmem:[#allocation10 + $0x1e8] sm:$0xf0]  ;;  %v7814_v36 = vld [vmem:[#allocation11 + $0x54] sm:$0xf0] }
 0x55e   : > { %5667 = vmatpush.bf16.msrb.mxu1 %v7199_v26  ;;  %v7358_v26 = vld [vmem:[#allocation10 + $0x1e0] sm:$0xf]  ;;  %v7363_v29 = vor.u32 %v7799_v31, %v7360_v60  ;;  %v7494_v31 = vld [vmem:[#allocation11 + $0xf0] sm:$0xf]  ;;  %v7834_v60 = vld [vmem:[#allocation11 + $0xf4] sm:$0xf0] }
 0x55f   : > { %v11062_v27 = vpop.f32.mrf.mxu3  ;;  %5681 = vmatpush.bf16.msrb.mxu2 %v7255_v59  ;;  %v7359_v1 = vor.u32 %v7800_v21, %v7358_v26  ;;  %v7368_v59 = vld [vmem:[#allocation10 + $0x1f8] sm:$0xf0]  ;;  %v7797_v26 = vld [vmem:[#allocation10 + $0x1d4] sm:$0xf] }
 0x560   : > { %v7371_v43 = vor.u32 %v7801_v5, %v7368_v59  ;;  %v7352_v21 = vld [vmem:[#allocation10 + $0x1d8] sm:$0xf0]  ;;  %v7408_v59 = vld [vmem:[#allocation11 + $0x48] sm:$0xf0] }
 0x561   : > { %5689 = vmatpush.bf16.msra.mxu3 %v7359_v1 }
 0x562   : > { %5668 = vmatpush.bf16.msrb.mxu1 %v7191_v10  ;;  %v7296_v10 = vld [vmem:[#allocation10 + $0x168] sm:$0xf0] }
 0x563   : > { %5682 = vmatpush.bf16.msrb.mxu2 %v7247_v56  ;;  %v7299_v58 = vor.u32 %v7783_v14, %v7296_v10  ;;  %v7795_v56 = vld [vmem:[#allocation10 + $0x1c4] sm:$0xf] }
 0x565   : > { %5690 = vmatpush.bf16.msra.mxu3 %v7351_v50 }
 0x566   : > { %5669 = vmatpush.bf16.msrb.mxu1 %v7183_v44 }
 0x567   : > { %v5119_v47 = vpop.f32.mrf.mxu3  ;;  %5727 = vmatpush.bf16.msra.mxu2 %v7307_v55  ;;  %v7344_v55 = vld [vmem:[#allocation10 + $0x1c8] sm:$0xf0] }
 0x568   : > { %v8039_v47 = vld [vmem:[%s12053_s11] sm:$0xf]  ;;  %v7347_v10 = vor.u32 %v7795_v56, %v7344_v55  ;;  %v7496_v56 = vld [vmem:[#allocation11 + $0xf8] sm:$0xf0] }
 0x569   : > { %v4396_v15 = vperm.slane %v8039_v47, 1 }
 0x56a   : > { %5714 = vmatpush.bf16.msra.mxu1 %v7243_v30 }
 0x56b   : > { %v5105_v16 = vadd.f32 %v11059_v51, %v4396_v15  ;;  %5728 = vmatpush.bf16.msra.mxu2 %v7299_v58  ;;  %v7796_v51 = vld [vmem:[#allocation10 + $0x1c4] sm:$0xf0] }
 0x56d   : > { %v5118_v6 = vadd.f32 %v11062_v27, %v5105_v16  ;;  %v7343_v27 = vor.u32 %v7796_v51, %v7342_v8  ;;  %v7793_v16 = vld [vmem:[#allocation10 + $0x1b4] sm:$0xf] }
 0x56e   : > { %5715 = vmatpush.bf16.msra.mxu1 %v7235_v11  ;;  %v7781_v11 = vld [vmem:[#allocation10 + $0x154] sm:$0xf] }
 0x56f   : > { %v7291_v17 = vor.u32 %v7781_v11, %v7288_v46  ;;  %5691 = vmatpush.bf16.msra.mxu3 %v7343_v27  ;;  %v7320_v11 = vld [vmem:[#allocation10 + $0x198] sm:$0xf0]  ;;  %v7787_v46 = vld [vmem:[#allocation10 + $0x184] sm:$0xf] }
 0x570   : > { %v7323_v50 = vor.u32 %v7789_v2, %v7320_v11  ;;  %v7488_v2 = vld [vmem:[#allocation11 + $0xe8] sm:$0xf0] }
 0x571   : > { %5729 = vmatpush.bf16.msra.mxu2 %v7291_v17  ;;  %v7312_v17 = vld [vmem:[#allocation10 + $0x188] sm:$0xf0] }
 0x572   : > { %5716 = vmatpush.bf16.msra.mxu1 %v7227_v24  ;;  %v7280_v24 = vld [vmem:[#allocation10 + $0x148] sm:$0xf0]  ;;  %v7315_v8 = vor.u32 %v7787_v46, %v7312_v17  ;;  %v7382_v46 = vld [vmem:[#allocation11 + $0x10] sm:$0xf]  ;;  %v7806_v17 = vld [vmem:[#allocation11 + $0x14] sm:$0xf0] }
 0x573   : > { %v7283_v49 = vor.u32 %v7779_v38, %v7280_v24 }
 0x575   : > { %5730 = vmatpush.bf16.msra.mxu2 %v7283_v49 }
 0x576   : > { %5717 = vmatpush.bf16.msra.mxu1 %v7219_v33  ;;  %v7272_v33 = vld [vmem:[#allocation10 + $0x138] sm:$0xf0] }
 0x577   : > { %v7275_v13 = vor.u32 %v7777_v39, %v7272_v33  ;;  %v7818_v39 = vld [vmem:[#allocation11 + $0x74] sm:$0xf0]  ;;  %v7817_v33 = vld [vmem:[#allocation11 + $0x74] sm:$0xf] }
 0x579   : > { %5731 = vmatpush.bf16.msra.mxu2 %v7275_v13 }
 0x57a   : > { %5718 = vmatpush.bf16.msra.mxu1 %v7211_v28 }
 0x57d   : > { %5732 = vmatpush.bf16.msra.mxu2 %v7267_v32  ;;  %v7414_v32 = vld [vmem:[#allocation11 + $0x50] sm:$0xf] }
 0x57e   : > { %5719 = vmatpush.bf16.msra.mxu1 %v7203_v34  ;;  %v7310_v34 = vld [vmem:[#allocation10 + $0x180] sm:$0xf] }
 0x57f   : > { %v11064_v57 = vpop.f32.mrf.mxu3 }
 0x580   : > { %v5131_v12 = vadd.f32 %v11064_v57, %v5118_v6  ;;  %v7334_v57 = vld [vmem:[#allocation10 + $0x1b0] sm:$0xf]  ;;  %v7336_v6 = vld [vmem:[#allocation10 + $0x1b8] sm:$0xf0] }
 0x581   : > { %v7335_v62 = vor.u32 %v7794_v37, %v7334_v57  ;;  %5733 = vmatpush.bf16.msra.mxu2 %v7259_v0  ;;  %v7430_v37 = vld [vmem:[#allocation11 + $0x70] sm:$0xf]  ;;  %v7419_v0 = vor.u32 %v7813_v48, %v7416_v23  ;;  %v7826_v48 = vld [vmem:[#allocation11 + $0xb4] sm:$0xf0] }
 0x582   : > { %5720 = vmatpush.bf16.msra.mxu1 %v7195_v25  ;;  %v7311_v25 = vor.u32 %v7788_v45, %v7310_v34  ;;  %v7406_v45 = vld [vmem:[#allocation11 + $0x40] sm:$0xf] }
 0x583   : > { %5692 = vmatpush.bf16.msra.mxu3 %v7335_v62  ;;  %v7432_v62 = vld [vmem:[#allocation11 + $0x78] sm:$0xf0]  ;;  %v7407_v5 = vor.u32 %v7812_v20, %v7406_v45 }
 0x584   : > { %v7435_v13 = vor.u32 %v7817_v33, %v7432_v62  ;;  %v7374_v33 = vld [vmem:[#allocation11] sm:$0xf]  ;;  %v7804_v62 = vld [vmem:[#allocation11 + $0x4] sm:$0xf0]  ;;  %v7464_v45 = vld [vmem:[#allocation11 + $0xb8] sm:$0xf0] }
 0x585   : > { %5734 = vmatpush.bf16.msra.mxu2 %v7251_v42  ;;  %v7810_v42 = vld [vmem:[#allocation11 + $0x34] sm:$0xf0] }
 0x586   : > { %5721 = vmatpush.bf16.msra.mxu1 %v7187_v53  ;;  %v7355_v53 = vor.u32 %v7797_v26, %v7352_v21  ;;  %v7400_v26 = vld [vmem:[#allocation11 + $0x38] sm:$0xf0]  ;;  %v7833_v21 = vld [vmem:[#allocation11 + $0xf4] sm:$0xf] }
 0x587   : > { %v5132_v41 = vpop.f32.mrf.mxu3  ;;  %v7499_v55 = vor.u32 %v7833_v21, %v7496_v56  ;;  %v7448_v56 = vld [vmem:[#allocation11 + $0x98] sm:$0xf0] }
 0x588   : > { %v7792_v41 = vld [vmem:[#allocation10 + $0x1a4] sm:$0xf0] }
 0x589   : > { %v7327_v28 = vor.u32 %v7792_v41, %v7326_v19  ;;  %v7422_v41 = vld [vmem:[#allocation11 + $0x60] sm:$0xf] }
 0x58b   : > { %5693 = vmatpush.bf16.msra.mxu3 %v7327_v28  ;;  %v7424_v28 = vld [vmem:[#allocation11 + $0x68] sm:$0xf0] }
 0x58c   : > { %v7427_v22 = vor.u32 %v7815_v18, %v7424_v28  ;;  %v7803_v18 = vld [vmem:[#allocation11 + $0x4] sm:$0xf] }
 0x58d   : > { %v7827_v28 = vld [vmem:[#allocation11 + $0xc4] sm:$0xf] }
 0x58f   : > { %5694 = vmatpush.bf16.msra.mxu3 %v7319_v40  ;;  %v7415_v40 = vor.u32 %v7814_v36, %v7414_v32  ;;  %v7472_v36 = vld [vmem:[#allocation11 + $0xc8] sm:$0xf0] }
 0x593   : > { %5695 = vmatpush.bf16.msra.mxu3 %v7311_v25  ;;  %v7398_v25 = vld [vmem:[#allocation11 + $0x30] sm:$0xf] }
 0x597   : > { %5740 = vmatpush.bf16.msrb.mxu3 %v7371_v43  ;;  %v7411_v43 = vor.u32 %v7811_v61, %v7408_v59  ;;  %v7824_v59 = vld [vmem:[#allocation11 + $0xa4] sm:$0xf0] }
 0x59b   : > { %5741 = vmatpush.bf16.msrb.mxu3 %v7363_v29  ;;  %v7809_v29 = vld [vmem:[#allocation11 + $0x34] sm:$0xf] }
 0x59f   : > { %v5143_v44 = vpop.f32.mrf.mxu3  ;;  %5742 = vmatpush.bf16.msrb.mxu3 %v7355_v53  ;;  %v7403_v53 = vor.u32 %v7809_v29, %v7400_v26  ;;  %v5323_v29 = vld [vmem:[%s12086_s10] sm:$0x3]  ;;  %v7821_v26 = vld [vmem:[#allocation11 + $0x94] sm:$0xf]  ;;  %s8234_s10 = sshra.s32 %s6034_s4, 4  ;;  %s8235_s10 = int_to_ptr.hbm [resolvable:$true] %s8234_s10 }
 0x5a0   : > { %v5144_v30 = vadd.f32 %v5143_v44, %v5131_v12  ;;  %v7339_v44 = vor.u32 %v7793_v16, %v7336_v6  ;;  %v7486_v16 = vld [vmem:[#allocation11 + $0xe0] sm:$0xf]  ;;  %s8236_s28 = scalar_lea.hbm %s8235_s10, 16  ;;  %p8241_p8 = scmp.lt.s32.totalorder %s8235_s10, %s12088_s9 }
 0x5a1   : > { %p8237_p1 = scmp.ne.s32.totalorder %s8235_s10, %s8236_s28  ;;  %p8242_p7 = scmp.lt.s32.totalorder %s8240_s27, %s8236_s28 }
 0x5a2   : > { %v5252_v54 = vmax.f32 %v5144_v30, 0.0  ;;  %v7791_v30 = vld [vmem:[#allocation10 + $0x1a4] sm:$0xf] }
 0x5a3   : > { %5743 = vmatpush.bf16.msrb.mxu3 %v7347_v10  ;;  %v7808_v10 = vld [vmem:[#allocation11 + $0x24] sm:$0xf0]  ;;  %p8238_p5 = pnand %p8237_p1, %p8481_p13  ;;  %p8243_p9 = por %p8242_p7, %p8241_p8 }
 0x5a4   : > { %v5256_v7 = vpack.c.bf16 %v5252_v54, %v5252_v54 }
 0x5a5   : > { %p8239_p12 = pneg %p8238_p5 }
 0x5a6   : > { %5670 = vmatmul.bf16.vlgmr.msrb.gmra.mxu1 %v5256_v7 }
 0x5a7   : > { %v5145_v4 = vpop.f32.mrf.mxu3  ;;  %5744 = vmatpush.bf16.msrb.mxu3 %v7339_v44  ;;  %v7392_v44 = vld [vmem:[#allocation11 + $0x28] sm:$0xf0]  ;;  %p8244_p10 = pnand %p8243_p9, %p8239_p12 }
 0x5a8   : > { %v7431_v4 = vor.u32 %v7818_v39, %v7430_v37  ;;  %v7829_v37 = vld [vmem:[#allocation11 + $0xd4] sm:$0xf]  ;;  %v7480_v39 = vld [vmem:[#allocation11 + $0xd8] sm:$0xf0] }
 0x5aa   : > { %5955 = vmatpush.bf16.msrb.mxu0 %v7431_v4  ;;  %v7483_v4 = vor.u32 %v7829_v37, %v7480_v39 }
 0x5b3   : > { %v11072_v47 = vpop.f32.mrf.mxu0 }
 0x5b6   : > { %5722 = vmatmul.bf16.vlgmr.msra.gmra.mxu1 %v5256_v7 }
 0x5bb   : > { %v5660_v12 = vpop.f32.mrf.mxu0 }
 0x5bc   : > { %v7807_v12 = vld [vmem:[#allocation11 + $0x24] sm:$0xf] }
 0x5bf   : > { %v5195_v9 = vpop.f32.mrf.mxu3 }
 0x5c0   : > { %v5196_v15 = vadd.f32 %v5195_v9, %v11052_v35  ;;  %v7331_v35 = vor.u32 %v7791_v30, %v7328_v52  ;;  %v7399_v9 = vor.u32 %v7810_v42, %v7398_v25  ;;  %v7395_v52 = vor.u32 %v7807_v12, %v7392_v44  ;;  %v7823_v25 = vld [vmem:[#allocation11 + $0xa4] sm:$0xf]  ;;  %v7456_v42 = vld [vmem:[#allocation11 + $0xa8] sm:$0xf0] }
 0x5c2   : > { %v5253_v1 = vmax.f32 %v5196_v15, 0.0  ;;  %5745 = vmatpush.bf16.msrb.mxu3 %v7331_v35  ;;  %v7495_v15 = vor.u32 %v7834_v60, %v7494_v31  ;;  %v7831_v35 = vld [vmem:[#allocation11 + $0xe4] sm:$0xf]  ;;  %v7459_v31 = vor.u32 %v7823_v25, %v7456_v42 }
 0x5c3   : > { %v11075_v54 = vpop.f32.mrf.mxu0  ;;  %v7491_v11 = vor.u32 %v7831_v35, %v7488_v2 }
 0x5c4   : > { %v5257_v14 = vpack.c.bf16 %v5253_v1, %v5253_v1  ;;  %5968 = vmatpush.bf16.msrb.mxu1 %v7495_v15  ;;  %v7822_v15 = vld [vmem:[#allocation11 + $0x94] sm:$0xf0] }
 0x5c6   : > { %5683 = vmatmul.bf16.vlgmr.msrb.gmra.mxu2 %v5257_v14  ;;  %5746 = vmatpush.bf16.msrb.mxu3 %v7323_v50 }
 0x5c7   : > { %v5197_v58 = vpop.f32.mrf.mxu3  ;;  %5981 = vmatpush.bf16.msrb.mxu2 %v7435_v13  ;;  %v7470_v13 = vld [vmem:[#allocation11 + $0xc0] sm:$0xf] }
 0x5c8   : > { %v7832_v58 = vld [vmem:[#allocation11 + $0xe4] sm:$0xf0] }
 0x5c9   : > { %v7487_v30 = vor.u32 %v7832_v58, %v7486_v16  ;;  %v7440_v16 = vld [vmem:[#allocation11 + $0x88] sm:$0xf0] }
 0x5ca   : > { %5747 = vmatpush.bf16.msrb.mxu3 %v7315_v8  ;;  %v7478_v8 = vld [vmem:[#allocation11 + $0xd0] sm:$0xf] }
 0x5cb   : > { %v5712_v51 = vpop.f32.mrf.mxu0  ;;  %5982 = vmatpush.bf16.msrb.mxu2 %v7427_v22  ;;  %5969 = vmatpush.bf16.msrb.mxu1 %v7487_v30  ;;  %v7462_v22 = vld [vmem:[#allocation11 + $0xb0] sm:$0xf] }
 0x5cc   : > { %v7383_v51 = vor.u32 %v7806_v17, %v7382_v46  ;;  %v7463_v20 = vor.u32 %v7826_v48, %v7462_v22  ;;  %v5326_v17 = vperm.slane %v5323_v29, 1 }
 0x5cf   : > { %5983 = vmatpush.bf16.msrb.mxu2 %v7419_v0  ;;  %v7825_v0 = vld [vmem:[#allocation11 + $0xb4] sm:$0xf] }
 0x5d0   : > { %v7467_v61 = vor.u32 %v7825_v0, %v7464_v45 }
 0x5d3   : > { %5984 = vmatpush.bf16.msrb.mxu2 %v7411_v43 }
 0x5d6   : > { %5735 = vmatmul.bf16.vlgmr.msra.gmra.mxu2 %v5257_v14  ;;  %v7390_v14 = vld [vmem:[#allocation11 + $0x20] sm:$0xf] }
 0x5d7   : > { %5985 = vmatpush.bf16.msrb.mxu2 %v7403_v53  ;;  %v7391_v6 = vor.u32 %v7808_v10, %v7390_v14  ;;  %v7820_v53 = vld [vmem:[#allocation11 + $0x84] sm:$0xf0]  ;;  %v7451_v14 = vor.u32 %v7821_v26, %v7448_v56  ;;  %v7819_v10 = vld [vmem:[#allocation11 + $0x84] sm:$0xf] }
 0x5d8   : > { %v7443_v58 = vor.u32 %v7819_v10, %v7440_v16 }
 0x5db   : > { %5986 = vmatpush.bf16.msrb.mxu2 %v7395_v52 }
 0x5df   : > { %v5247_v7 = vpop.f32.mrf.mxu3 }
 0x5e0   : > { %v5248_v27 = vadd.f32 %v5247_v7, %v11057_v3  ;;  %v7423_v3 = vor.u32 %v7816_v63, %v7422_v41  ;;  %v7830_v7 = vld [vmem:[#allocation11 + $0xd4] sm:$0xf0]  ;;  %v7375_v41 = vor.u32 %v7804_v62, %v7374_v33 }
 0x5e2   : > { %v5254_v38 = vmax.f32 %v5248_v27, 0.0  ;;  %5956 = vmatpush.bf16.msrb.mxu0 %v7423_v3  ;;  %v7805_v27 = vld [vmem:[#allocation11 + $0x14] sm:$0xf]  ;;  %v7376_v3 = vld [vmem:[#allocation11 + $0x8] sm:$0xf0] }
 0x5e3   : > { %v7379_v32 = vor.u32 %v7803_v18, %v7376_v3 }
 0x5e4   : > { %v5258_v24 = vpack.c.bf16 %v5254_v38, %v5254_v38  ;;  %v7384_v38 = vld [vmem:[#allocation11 + $0x18] sm:$0xf0] }
 0x5e6   : > { %5696 = vmatmul.bf16.vlgmr.msra.gmra.mxu3 %v5258_v24  ;;  %5957 = vmatpush.bf16.msrb.mxu0 %v7415_v40  ;;  %v7475_v40 = vor.u32 %v7827_v28, %v7472_v36 }
 0x5e7   : > { %v5249_v49 = vpop.f32.mrf.mxu3  ;;  %5994 = vmatpush.bf16.msra.mxu3 %v7499_v55  ;;  %v5325_v55 = vperm.slane %v5323_v29, 0 }
 0x5e8   : > { %v7387_v49 = vor.u32 %v7805_v27, %v7384_v38 }
 0x5e9   : > { %v5659_v12 = vadd.f32 %v11072_v47, %v5325_v55 }
 0x5ea   : > { %5958 = vmatpush.bf16.msrb.mxu0 %v7407_v5  ;;  %5987 = vmatpush.bf16.msrb.mxu2 %v7387_v49  ;;  %v7454_v5 = vld [vmem:[#allocation11 + $0xa0] sm:$0xf] }
 0x5eb   : > { %5995 = vmatpush.bf16.msra.mxu3 %v7491_v11  ;;  %v7455_v43 = vor.u32 %v7824_v59, %v7454_v5 }
 0x5ee   : > { %5959 = vmatpush.bf16.msrb.mxu0 %v7399_v9  ;;  %5988 = vmatpush.bf16.msrb.mxu2 %v7379_v32  ;;  %v7446_v9 = vld [vmem:[#allocation11 + $0x90] sm:$0xf] }
 0x5ef   : > { %5996 = vmatpush.bf16.msra.mxu3 %v7483_v4  ;;  %v7447_v21 = vor.u32 %v7822_v15, %v7446_v9 }
 0x5f2   : > { %5960 = vmatpush.bf16.msrb.mxu0 %v7391_v6 }
 0x5f3   : > { %5997 = vmatpush.bf16.msra.mxu3 %v7475_v40 }
 0x5f6   : > { %5748 = vmatmul.bf16.vlgmr.msrb.gmra.mxu3 %v5258_v24  ;;  %v7479_v24 = vor.u32 %v7830_v7, %v7478_v8  ;;  %5961 = vmatpush.bf16.msrb.mxu0 %v7383_v51  ;;  %v5711_v51 = vadd.f32 %v11075_v54, %v5326_v17  ;;  %v5789_v54 = vld [vmem:[%s12087_s22] sm:$0x3] }
 0x5f7   : > { %5998 = vmatpush.bf16.msra.mxu3 %v7467_v61  ;;  %v5791_v62 = vperm.slane %v5789_v54, 0 }
 0x5f8   : > { %5970 = vmatpush.bf16.msrb.mxu1 %v7479_v24 }
 0x5fa   : > { %5962 = vmatpush.bf16.msrb.mxu0 %v7375_v41 }
 0x5fb   : > { %5999 = vmatpush.bf16.msra.mxu3 %v7459_v31 }
 0x5ff   : > { %6000 = vmatpush.bf16.msra.mxu3 %v7451_v14 }
 0x603   : > { %6001 = vmatpush.bf16.msra.mxu3 %v7443_v58 }
 0x623   : > { %v11078_v57 = vpop.f32.mrf.mxu1 }
 0x624   : > { %v5672_v30 = vadd.f32 %v11078_v57, %v5659_v12 }
 0x62b   : > { %v5673_v19 = vpop.f32.mrf.mxu1 }
 0x62c   : > { %v7828_v19 = vld [vmem:[#allocation11 + $0xc4] sm:$0xf0] }
 0x62d   : > { %v7471_v63 = vor.u32 %v7828_v19, %v7470_v13 }
 0x62f   : > { %5971 = vmatpush.bf16.msrb.mxu1 %v7471_v63 }
 0x633   : > { %v11080_v34 = vpop.f32.mrf.mxu1  ;;  %5972 = vmatpush.bf16.msrb.mxu1 %v7463_v20 }
 0x634   : > { %v5724_v7 = vadd.f32 %v11080_v34, %v5711_v51  ;;  %v5792_v34 = vperm.slane %v5789_v54, 1 }
 0x637   : > { %5973 = vmatpush.bf16.msrb.mxu1 %v7455_v43 }
 0x63b   : > { %v5725_v1 = vpop.f32.mrf.mxu1  ;;  %5974 = vmatpush.bf16.msrb.mxu1 %v7447_v21 }
 0x63c   : > { %v7438_v1 = vld [vmem:[#allocation11 + $0x80] sm:$0xf] }
 0x63d   : > { %v7439_v6 = vor.u32 %v7820_v53, %v7438_v1 }
 0x63f   : > { %5975 = vmatpush.bf16.msrb.mxu1 %v7439_v6 }
 0x649   : > { %v11082_v50 = vpop.f32.mrf.mxu2 }
 0x64a   : > { %v5685_v52 = vadd.f32 %v11082_v50, %v5672_v30 }
 0x651   : > { %v5686_v23 = vpop.f32.mrf.mxu2 }
 0x659   : > { %v5736_v60 = vpop.f32.mrf.mxu2 }
 0x65a   : > { %v5737_v47 = vadd.f32 %v5736_v60, %v5724_v7 }
 0x661   : > { %v5738_v44 = vpop.f32.mrf.mxu2 }
 0x669   : > { %v5697_v35 = vpop.f32.mrf.mxu3 }
 0x66a   : > { %v5698_v2 = vadd.f32 %v5697_v35, %v5685_v52 }
 0x66c   : > { %v5753_v11 = vmax.f32 %v5698_v2, 0.0 }
 0x66e   : > { %v5755_v46 = vpack.c.bf16 %v5753_v11, %v5753_v11 }
 0x670   : > { %5963 = vmatmul.bf16.vlgmr.msrb.gmra.mxu0 %v5755_v46  ;;  %5989 = vmatmul.bf16.vlgmr.msrb.gmra.mxu2 %v5755_v46 }
 0x671   : > { %v5699_v8 = vpop.f32.mrf.mxu3 }
 0x679   : > { %v5749_v27 = vpop.f32.mrf.mxu3 }
 0x67a   : > { %v5750_v57 = vadd.f32 %v5749_v27, %v5737_v47 }
 0x67c   : > { %v5754_v38 = vmax.f32 %v5750_v57, 0.0 }
 0x67e   : > { %v5756_v24 = vpack.c.bf16 %v5754_v38, %v5754_v38 }
 0x680   : > { %5976 = vmatmul.bf16.vlgmr.msrb.gmra.mxu1 %v5756_v24  ;;  %6002 = vmatmul.bf16.vlgmr.msra.gmra.mxu3 %v5756_v24 }
 0x681   : > { %v5751_v50 = vpop.f32.mrf.mxu3 }
 0x6ed   : > { %v5964_v49 = vpop.f32.mrf.mxu0 }
 0x6ee   : > { %v5965_v41 = vadd.f32 %v5964_v49, %v5791_v62 }
 0x6f3   : > { %v5990_v37 = vpop.f32.mrf.mxu2 }
 0x6f4   : > { %v5991_v13 = vadd.f32 %v5990_v37, %v5792_v34 }
 0x6f5   : > { %v5966_v39 = vpop.f32.mrf.mxu0 }
 0x6fb   : > { %v5992_v33 = vpop.f32.mrf.mxu2 }
 0x6fd   : > { %v5977_v4 = vpop.f32.mrf.mxu1 }
 0x6fe   : > { %v5978_v3 = vadd.f32 %v5977_v4, %v5965_v41 }
 0x703   : > { %v6003_v19 = vpop.f32.mrf.mxu3 }
 0x704   : > { %v6004_v63 = vadd.f32 %v6003_v19, %v5991_v13 }
 0x705   : > { %v5979_v18 = vpop.f32.mrf.mxu1 }
 0x706   : > { %v6009_v28 = vrot.slane %v6004_v63, 4 }
 0x708   : > { %v6010_v32 = vsel %vm4241_vm3, %v5978_v3, %v6009_v28  ;;  %v6011_v36 = vsel %vm4241_vm3, %v6009_v28, %v5978_v3 }
 0x709   : > { %v6012_v22 = vrot.slane %v6011_v36, 4  ;;  %6015 = vst [vmem:[%s586_s23] sm:$0xff] %v6010_v32 }
 0x70b   : > { %6016 = vst [vmem:[%s586_s23 + $0x8] sm:$0xff] %v6012_v22  ;;  %v6005_v48 = vpop.f32.mrf.mxu3 }
 0x70c   : > { %8247 = shalt.err (!%p8244_p10)
}
 0x70d   : > { %s8315_s26 = smov 128   ;;  %s8316_s8 = smov 8  }
 0x70e   : > { %7859 = dma.vmem_to_hbm [thread:$0]  (%p8481_p13), %s6032_s25, 256, %s6034_s4, %s6018_s20, %s8315_s26, %s8315_s26, %s8316_s8  }
 0x70f PF: > { %s6048_s17 = sand.u32 1, %s8286_s29   ;;  %p12089_p11 = scmp.ge.s32.totalorder %s8298_s16, 2 }
 0x710   : > { %s6049_s23 = scalar_lea.sflag [#allocation4], %s6048_s17 }
 0x711   : > { %p7882_p0 = pnand %p12089_p11, %p8486_p4 }
 0x713   : > { %p7883_p2 = pneg %p7882_p0 }
 0x715   : > { %8281 = dma.done.wait (%p7883_p2), %s6049_s23, 256  }
 0x716   : > { %8283 = vsyncadd (%p7883_p2), %s6049_s23, 4294967040  ;;  %p30_p6 = scmp.ge.s32.totalorder %s8461_s24, 4   ;;  %s12090_s29 = smov %s8290_s30 }
 0x717   : > { %s12091_s30 = smov %s8294_s15  ;;  %s12092_s15 = smov %s8473_s19 }
 0x718   : > { %s12093_s16 = smov %s8461_s24  ;;  %32 = sbr.rel (!%p30_p6) target bundleno = 17 (0x11), region = 147 }
 0x71d   :  { %6055 = vsyncpa [#allocation3], 1 }
 0x71e   :  { %6057 = vsyncpa [#allocation3 + $0x1], 1 }
 0x71f   :  { %6058 = vsyncpa [#allocation6], 1 }
 0x720   :  { %6059 = vsyncpa [#allocation9], 1 }
 0x721   :  { %6060 = vsyncpa [#allocation12], 1 }
 0x722   :  { %6061 = vsyncpa [#allocation4], 1 }
 0x723   :  { %6063 = vsyncpa [#allocation4 + $0x1], 1 }

</bundles_post_ra>
